<compile_context>
chip_gen: v7x
topology: tpu7x:2x2x1
jax: 0.10.0
libtpu: 0.0.40
codegen_flags: <defaults>
</compile_context>

<pallas_src>
import functools

import jax
import jax.numpy as jnp
from jax.experimental import pallas as pl
from jax.experimental.pallas import tpu as pltpu


# ------------------------- fused Encoder kernel (all layers) -------------------------
def _encoder_kernel(x_ref, w_in_ref, conv_w_ref, conv_b_ref, w_dbc_ref,
                    dt_bias_ref, a_ref, d_ref, w_out_ref, gamma_ref, beta_ref,
                    o_ref, act_ref, stage_ref, da_ref, uh_ref,
                    *, apply_norm, eps=1e-5):
    layer = pl.program_id(1)
    n_layers = pl.num_programs(1)
    L, bt, D = act_ref.shape
    K = conv_w_ref.shape[1]
    _, N, Di = a_ref.shape
    M = L * bt

    # ---- layer 0: stage the (bt, L, D) input block as (L, bt, D) f32 resident ----
    @pl.when(layer == 0)
    def _():
        act_ref[...] = jnp.transpose(x_ref[...].astype(jnp.float32), (1, 0, 2))

    x2 = act_ref[...].reshape(M, D)                 # rows ordered (l, b)

    # ---- input projection: batch folded into the matmul M dimension (bf16 MXU) ----
    xz = jnp.dot(x2.astype(jnp.bfloat16), w_in_ref[0],
                 preferred_element_type=jnp.float32)              # (M, 2*Di)
    xp = xz[:, :Di]                                               # SSM branch
    z = xz[:, Di:]                                                # gate branch

    # ---- causal depthwise conv1d: left-zero-padded staging, leading-axis taps ----
    conv_w = conv_w_ref[0]                                        # (K, Di)
    stage_ref[:K - 1] = jnp.zeros((K - 1, bt, Di), jnp.float32)
    stage_ref[K - 1:] = xp.reshape(L, bt, Di)
    xc3 = jnp.zeros((L, bt, Di), jnp.float32)
    for k in range(K):                                            # static K taps
        xc3 = xc3 + stage_ref[k:k + L] * conv_w[k:k + 1, :]
    xc3 = jax.nn.silu(xc3 + conv_b_ref[0])
    xc2 = xc3.reshape(M, Di)
    xc_b = xc2.astype(jnp.bfloat16)

    # ---- fused dt/B/C projection: ONE lane-dense matmul + static lane slices ----
    dbc = jnp.dot(xc_b, w_dbc_ref[0],
                  preferred_element_type=jnp.float32)             # (M, Di+2N)
    dt = jax.nn.softplus(dbc[:, :Di] + dt_bias_ref[0])            # (M, Di)
    bmat = dbc[:, Di:Di + N]                                      # (M, N)
    cmat = dbc[:, Di + N:]                                        # (M, N)
    dt_x = dt * xc2

    # ---- bulk scan coefficients, time-leading layout (L, N*bt, Di) ----
    a = a_ref[0]                                                  # (N, Di)
    dt3 = dt.reshape(L, bt, Di)
    dtx3 = dt_x.reshape(L, bt, Di)
    for n in range(N):                                            # static N
        da_ref[:, n * bt:(n + 1) * bt, :] = jnp.exp(dt3 * a[n:n + 1, :])
        uh_ref[:, n * bt:(n + 1) * bt, :] = (
            dtx3 * bmat[:, n:n + 1].reshape(L, bt, 1))

    # ---- serial selective scan over L: register-carried state, dense slabs ----
    def _scan_step(l, h):
        h = da_ref[l] * h + uh_ref[l]
        uh_ref[l] = h                         # overwrite u with the state history
        return h

    if L <= 32:
        unroll = True
    elif L % 8 == 0:
        unroll = 8
    elif L % 4 == 0:
        unroll = 4
    else:
        unroll = 1
    jax.lax.fori_loop(0, L, _scan_step,
                      jnp.zeros((N * bt, Di), jnp.float32), unroll=unroll)

    # ---- y = D*x + sum_n C[:,n] * h_n ; gate; out-proj; residual ----
    y2 = xc2 * d_ref[0]
    for n in range(N):                                            # static N FMAs
        y2 = y2 + (uh_ref[:, n * bt:(n + 1) * bt, :].reshape(M, Di)
                   * cmat[:, n:n + 1])
    y2 = y2 * jax.nn.silu(z)
    out = jnp.dot(y2.astype(jnp.bfloat16), w_out_ref[0],
                  preferred_element_type=jnp.float32)             # (M, D)
    res = x2 + out
    act_ref[...] = res.reshape(L, bt, D)          # resident for the next layer

    # ---- last layer: optional fused LayerNorm, write back as (bt, L, D) ----
    @pl.when(layer == n_layers - 1)
    def _():
        r = res
        if apply_norm:
            mu = jnp.mean(r, axis=-1, keepdims=True)
            var = jnp.mean(jnp.square(r - mu), axis=-1, keepdims=True)
            r = (r - mu) * jax.lax.rsqrt(var + eps)
            r = r * gamma_ref[...] + beta_ref[...]
        o_ref[...] = jnp.transpose(r.reshape(L, bt, D),
                                   (1, 0, 2)).astype(o_ref.dtype)


# --------------------------------- tiling helpers ---------------------------------
def _choose_batch_tile(B, L, target_rows=256):
    # Aim for >= target_rows rows in the flattened (bt*L, .) matmuls
    # (v6e/v7x MXU is 256 wide); bt must divide B.
    bt = min(B, max(1, -(-target_rows // L)))
    while B % bt:
        bt -= 1
    # Prefer >= 2 batch blocks (v7x has 2 TensorCores) when M stays >= 128.
    if B // bt < 2 and B > 1:
        cand = bt // 2
        while cand > 0 and B % cand:
            cand -= 1
        if cand > 0 and cand * L >= 128:
            bt = cand
    return bt


def _vmem_limit_bytes(bt, L, D, Di, K, N, per_layer_weight_bytes, x_itemsize):
    scratch = 4 * (L * bt * D                      # resident activation
                   + (L + K - 1) * bt * Di         # conv staging
                   + 2 * L * N * bt * Di)          # dA + u/h-history
    io = 2 * 2 * bt * L * D * x_itemsize           # double-buffered in/out blocks
    est = scratch + io + 2 * per_layer_weight_bytes
    # TODO(synk): for production L, chunk the sequence so `est` fits the
    # per-generation budget (64 MiB on v7x) instead of only raising the limit.
    return int(min(64 * 2 ** 20, max(32 * 2 ** 20, 2 * est)))


# ------------------------------ Encoder wrapper ------------------------------
def _prepare_layer(p):
    # Pre-compose the low-rank dt path, fuse dt/B/C into one matrix,
    # precompute A = -exp(a_log), cast MXU operands to bf16.
    w_dt_full = jnp.dot(p["w_xdt"], p["w_dt"])
    w_dbc = jnp.concatenate([w_dt_full, p["w_B"], p["w_C"]], axis=1)
    return {
        "w_in": p["w_in"].astype(jnp.bfloat16),
        "conv_w": p["conv_w"].astype(jnp.float32),
        "conv_b": p["conv_b"].astype(jnp.float32),
        "w_dbc": w_dbc.astype(jnp.bfloat16),
        "dt_bias": p["dt_bias"].astype(jnp.float32),
        "A": (-jnp.exp(p["a_log"])).astype(jnp.float32),
        "d": p["d"].astype(jnp.float32),
        "w_out": p["w_out"].astype(jnp.bfloat16),
    }


def _stack_layer_weights(layer_params):
    prep = [_prepare_layer(p) for p in layer_params]
    return {k: jnp.stack([lp[k] for lp in prep], axis=0) for k in prep[0]}


def encoder_forward(x, layer_params, norm_params=None):
    # Mirrors Encoder.forward: sequentially apply the mamba blocks, then norm.
    n_layers = len(layer_params)
    if n_layers == 0:
        if norm_params is not None:
            return layernorm_apply(x, norm_params["gamma"], norm_params["beta"])
        return x

    B, L, D = x.shape
    w = _stack_layer_weights(layer_params)
    K, Di = w["conv_w"].shape[1], w["conv_w"].shape[2]
    N = w["A"].shape[1]
    bt = _choose_batch_tile(B, L)

    apply_norm = norm_params is not None
    gamma = norm_params["gamma"] if apply_norm else jnp.ones((1, D), jnp.float32)
    beta = norm_params["beta"] if apply_norm else jnp.zeros((1, D), jnp.float32)

    weights = (w["w_in"], w["conv_w"], w["conv_b"], w["w_dbc"], w["dt_bias"],
               w["A"], w["d"], w["w_out"])
    per_layer_w_bytes = sum(int(v.nbytes) for v in weights) // n_layers

    def _layer_weight_spec(arr):
        # Stacked per-layer weight: block = one layer's full matrix, indexed by
        # the layer grid axis (inner, "arbitrary") so the next layer's weights
        # prefetch while the current layer computes.
        return pl.BlockSpec((1,) + arr.shape[1:], lambda i, l: (l, 0, 0))

    kernel = functools.partial(_encoder_kernel, apply_norm=apply_norm)
    return pl.pallas_call(
        kernel,
        out_shape=jax.ShapeDtypeStruct((B, L, D), x.dtype),
        grid_spec=pltpu.PrefetchScalarGridSpec(
            num_scalar_prefetch=0,
            grid=(B // bt, n_layers),                 # layer axis innermost
            in_specs=[pl.BlockSpec((bt, L, D), lambda i, l: (i, 0, 0))]
                     + [_layer_weight_spec(wt) for wt in weights]
                     + [pl.BlockSpec((1, D), lambda i, l: (0, 0)),
                        pl.BlockSpec((1, D), lambda i, l: (0, 0))],
            out_specs=pl.BlockSpec((bt, L, D), lambda i, l: (i, 0, 0)),
            scratch_shapes=[
                pltpu.VMEM((L, bt, D), jnp.float32),            # resident activation
                pltpu.VMEM((L + K - 1, bt, Di), jnp.float32),   # conv staging
                pltpu.VMEM((L, N * bt, Di), jnp.float32),       # dA coefficients
                pltpu.VMEM((L, N * bt, Di), jnp.float32),       # u -> h history
            ],
        ),
        compiler_params=pltpu.CompilerParams(
            dimension_semantics=("parallel", "arbitrary"),
            vmem_limit_bytes=_vmem_limit_bytes(
                bt, L, D, Di, K, N, per_layer_w_bytes, x.dtype.itemsize)),
    )(x, *weights, gamma, beta)


# ------------------------------ LayerNorm kernel ------------------------------
# Only used when the layer list is empty; otherwise the norm is fused above.
def _layernorm_kernel(x_ref, g_ref, b_ref, o_ref):
    Bt, L, D = x_ref.shape
    x = x_ref[...].reshape(Bt * L, D).astype(jnp.float32)
    mu = jnp.mean(x, axis=-1, keepdims=True)
    var = jnp.mean(jnp.square(x - mu), axis=-1, keepdims=True)
    xn = (x - mu) * jax.lax.rsqrt(var + 1e-5)
    o_ref[...] = (xn * g_ref[...] + b_ref[...]).reshape(Bt, L, D).astype(o_ref.dtype)


def layernorm_apply(x, gamma, beta):
    B, L, D = x.shape
    bt = _choose_batch_tile(B, L)
    return pl.pallas_call(
        _layernorm_kernel,
        out_shape=jax.ShapeDtypeStruct((B, L, D), x.dtype),
        grid_spec=pltpu.PrefetchScalarGridSpec(
            num_scalar_prefetch=0,
            grid=(B // bt,),
            in_specs=[pl.BlockSpec((bt, L, D), lambda i: (i, 0, 0)),
                      pl.BlockSpec((1, D), lambda i: (0, 0)),
                      pl.BlockSpec((1, D), lambda i: (0, 0))],
            out_specs=pl.BlockSpec((bt, L, D), lambda i: (i, 0, 0)),
        ),
        compiler_params=pltpu.CompilerParams(dimension_semantics=("parallel",)),
    )(x, gamma, beta)


# ------------------------------- parameter init --------------------------------
def init_mamba_block_params(key, d_model, d_inner, d_state, dt_rank, d_conv):
    ks = jax.random.split(key, 8)

    def rnd(k, shape, scale):
        return scale * jax.random.normal(k, shape, jnp.float32)

    return {
        "w_in": rnd(ks[0], (d_model, 2 * d_inner), 0.05),
        "conv_w": rnd(ks[1], (d_conv, d_inner), 0.2),
        "conv_b": jnp.zeros((1, d_inner), jnp.float32),
        "w_xdt": rnd(ks[2], (d_inner, dt_rank), 0.05),
        "w_dt": rnd(ks[3], (dt_rank, d_inner), 0.1),
        "dt_bias": rnd(ks[4], (1, d_inner), 0.1),
        "w_B": rnd(ks[5], (d_inner, d_state), 0.05),
        "w_C": rnd(ks[6], (d_inner, d_state), 0.05),
        # A stored as (d_state, d_inner); rows broadcast per-state in-kernel.
        "a_log": jnp.log(jnp.broadcast_to(
            jnp.arange(1, d_state + 1, dtype=jnp.float32)[:, None],
            (d_state, d_inner))),
        "d": jnp.ones((1, d_inner), jnp.float32),
        "w_out": rnd(ks[7], (d_inner, d_model), 0.05),
    }


if __name__ == "__main__":
    key = jax.random.PRNGKey(0)
    B, L, D = 2, 8, 128                        # lane-dense d_model
    d_inner, d_state, dt_rank, d_conv = 256, 16, 8, 4
    n_layers = 2

    keys = jax.random.split(key, n_layers + 1)
    x = jax.random.normal(keys[0], (B, L, D), jnp.float32)
    layer_params = [
        init_mamba_block_params(keys[1 + i], D, d_inner, d_state, dt_rank, d_conv)
        for i in range(n_layers)
    ]
    norm_params = {"gamma": jnp.ones((1, D), jnp.float32),
                   "beta": jnp.zeros((1, D), jnp.float32)}

    out = encoder_forward(x, layer_params, norm_params)
    out = jax.block_until_ready(out)
    assert out.shape == (B, L, D)
    assert bool(jnp.all(jnp.isfinite(out)))
    print("KERNEL_OK")
</pallas_src>

<mosaic_0001>
module attributes {stable_mosaic.version = 11 : i64} {
  func.func @_encoder_kernel(%arg0: i32, %arg1: i32, %arg2: memref<2x8x128xf32, #tpu.memory_space<vmem>>, %arg3: memref<1x128x512xbf16, #tpu.memory_space<vmem>>, %arg4: memref<1x4x256xf32, #tpu.memory_space<vmem>>, %arg5: memref<1x1x256xf32, #tpu.memory_space<vmem>>, %arg6: memref<1x256x288xbf16, #tpu.memory_space<vmem>>, %arg7: memref<1x1x256xf32, #tpu.memory_space<vmem>>, %arg8: memref<1x16x256xf32, #tpu.memory_space<vmem>>, %arg9: memref<1x1x256xf32, #tpu.memory_space<vmem>>, %arg10: memref<1x256x128xbf16, #tpu.memory_space<vmem>>, %arg11: memref<1x128xf32, #tpu.memory_space<vmem>>, %arg12: memref<1x128xf32, #tpu.memory_space<vmem>>, %arg13: memref<2x8x128xf32, #tpu.memory_space<vmem>>, %arg14: memref<8x2x128xf32, #tpu.memory_space<vmem>>, %arg15: memref<11x2x256xf32, #tpu.memory_space<vmem>>, %arg16: memref<8x32x256xf32, #tpu.memory_space<vmem>>, %arg17: memref<8x32x256xf32, #tpu.memory_space<vmem>>) attributes {dimension_semantics = [#tpu.dimension_semantics<parallel>, #tpu.dimension_semantics<arbitrary>], iteration_bounds = array<i64: 1, 2>, scalar_prefetch = 0 : i64, scratch_operands = 4 : i64, tpu.core_type = #tpu.core_type<tc>, window_params = [{transform_indices = @transform_0, window_bounds = array<i64: 2, 8, 128>}, {transform_indices = @transform_1, window_bounds = array<i64: 1, 128, 512>}, {transform_indices = @transform_2, window_bounds = array<i64: 1, 4, 256>}, {transform_indices = @transform_3, window_bounds = array<i64: 1, 1, 256>}, {transform_indices = @transform_4, window_bounds = array<i64: 1, 256, 288>}, {transform_indices = @transform_5, window_bounds = array<i64: 1, 1, 256>}, {transform_indices = @transform_6, window_bounds = array<i64: 1, 16, 256>}, {transform_indices = @transform_7, window_bounds = array<i64: 1, 1, 256>}, {transform_indices = @transform_8, window_bounds = array<i64: 1, 256, 128>}, {pipeline_mode = #tpu.pipeline_mode<synchronous>, transform_indices = @transform_9, window_bounds = array<i64: 1, 128>}, {pipeline_mode = #tpu.pipeline_mode<synchronous>, transform_indices = @transform_10, window_bounds = array<i64: 1, 128>}, {transform_indices = @transform_11, window_bounds = array<i64: 2, 8, 128>}]} {
    %c0_i32 = arith.constant 0 : i32
    %0 = arith.cmpi eq, %arg1, %c0_i32 : i32
    %1 = arith.extui %0 : i1 to i32
    %c0_i32_0 = arith.constant 0 : i32
    %2 = arith.cmpi ne, %1, %c0_i32_0 : i32
    scf.if %2 {
      %c0_235 = arith.constant 0 : index
      %c0_236 = arith.constant 0 : index
      %c0_237 = arith.constant 0 : index
      %474 = vector.load %arg2[%c0_235, %c0_236, %c0_237] : memref<2x8x128xf32, #tpu.memory_space<vmem>>, vector<2x8x128xf32>
      %475 = tpu.transpose %474, [1, 0, 2] : vector<2x8x128xf32> -> vector<8x2x128xf32>
      %c0_238 = arith.constant 0 : index
      %c0_239 = arith.constant 0 : index
      %c0_240 = arith.constant 0 : index
      %476 = vector.load %arg14[%c0_238, %c0_239, %c0_240] : memref<8x2x128xf32, #tpu.memory_space<vmem>>, vector<8x2x128xf32>
      tpu.vector_store %arg14[%c0_238, %c0_239, %c0_240], %475 {strides = array<i32>} : memref<8x2x128xf32, #tpu.memory_space<vmem>>, vector<8x2x128xf32>,
    } else {
    }
    %c0 = arith.constant 0 : index
    %c0_1 = arith.constant 0 : index
    %c0_2 = arith.constant 0 : index
    %3 = vector.load %arg14[%c0, %c0_1, %c0_2] : memref<8x2x128xf32, #tpu.memory_space<vmem>>, vector<8x2x128xf32>
    %4 = vector.shape_cast %3 : vector<8x2x128xf32> to vector<16x128xf32>
    %5 = arith.truncf %4 : vector<16x128xf32> to vector<16x128xbf16>
    %c0_3 = arith.constant 0 : index
    %c0_4 = arith.constant 0 : index
    %c0_5 = arith.constant 0 : index
    %6 = vector.load %arg3[%c0_3, %c0_4, %c0_5] : memref<1x128x512xbf16, #tpu.memory_space<vmem>>, vector<1x128x512xbf16>
    %7 = vector.shape_cast %6 : vector<1x128x512xbf16> to vector<128x512xbf16>
    %cst = arith.constant dense<0.000000e+00> : vector<16x512xf32>
    %8 = tpu.matmul %5, %7, %cst {dimension_numbers = #tpu.dot_dimension_numbers<[1], [0], [0], [1], [0, 0, 1, 1], [], []>} : vector<16x128xbf16>, vector<128x512xbf16>, vector<16x512xf32> -> vector<16x512xf32>
    %9 = vector.extract_strided_slice %8 {offsets = [0, 0], sizes = [16, 256], strides = [1, 1]} : vector<16x512xf32> to vector<16x256xf32>
    %10 = vector.extract_strided_slice %8 {offsets = [0, 256], sizes = [16, 256], strides = [1, 1]} : vector<16x512xf32> to vector<16x256xf32>
    %c0_6 = arith.constant 0 : index
    %c0_7 = arith.constant 0 : index
    %c0_8 = arith.constant 0 : index
    %11 = vector.load %arg4[%c0_6, %c0_7, %c0_8] : memref<1x4x256xf32, #tpu.memory_space<vmem>>, vector<1x4x256xf32>
    %12 = vector.shape_cast %11 : vector<1x4x256xf32> to vector<4x256xf32>
    %cst_9 = arith.constant 0.000000e+00 : f32
    %13 = vector.broadcast %cst_9 : f32 to vector<3x2x256xf32>
    %c0_10 = arith.constant 0 : index
    %c0_11 = arith.constant 0 : index
    %c0_12 = arith.constant 0 : index
    %14 = vector.load %arg15[%c0_10, %c0_11, %c0_12] : memref<11x2x256xf32, #tpu.memory_space<vmem>>, vector<3x2x256xf32>
    tpu.vector_store %arg15[%c0_10, %c0_11, %c0_12], %13 {strides = array<i32>} : memref<11x2x256xf32, #tpu.memory_space<vmem>>, vector<3x2x256xf32>,
    %15 = vector.shape_cast %9 : vector<16x256xf32> to vector<8x2x256xf32>
    %c3 = arith.constant 3 : index
    %c0_13 = arith.constant 0 : index
    %c0_14 = arith.constant 0 : index
    %16 = vector.load %arg15[%c3, %c0_13, %c0_14] : memref<11x2x256xf32, #tpu.memory_space<vmem>>, vector<8x2x256xf32>
    tpu.vector_store %arg15[%c3, %c0_13, %c0_14], %15 {strides = array<i32>} : memref<11x2x256xf32, #tpu.memory_space<vmem>>, vector<8x2x256xf32>,
    %cst_15 = arith.constant 0.000000e+00 : f32
    %17 = vector.broadcast %cst_15 : f32 to vector<8x2x256xf32>
    %c0_16 = arith.constant 0 : index
    %c0_17 = arith.constant 0 : index
    %c0_18 = arith.constant 0 : index
    %18 = vector.load %arg15[%c0_16, %c0_17, %c0_18] : memref<11x2x256xf32, #tpu.memory_space<vmem>>, vector<8x2x256xf32>
    %19 = vector.extract_strided_slice %12 {offsets = [0, 0], sizes = [1, 256], strides = [1, 1]} : vector<4x256xf32> to vector<1x256xf32>
    %20 = vector.shape_cast %19 : vector<1x256xf32> to vector<1x1x256xf32>
    %21 = vector.broadcast %20 : vector<1x1x256xf32> to vector<8x2x256xf32>
    %22 = arith.mulf %18, %21 : vector<8x2x256xf32>
    %23 = arith.addf %17, %22 : vector<8x2x256xf32>
    %c1 = arith.constant 1 : index
    %c0_19 = arith.constant 0 : index
    %c0_20 = arith.constant 0 : index
    %24 = vector.load %arg15[%c1, %c0_19, %c0_20] : memref<11x2x256xf32, #tpu.memory_space<vmem>>, vector<8x2x256xf32>
    %25 = vector.extract_strided_slice %12 {offsets = [1, 0], sizes = [1, 256], strides = [1, 1]} : vector<4x256xf32> to vector<1x256xf32>
    %26 = vector.shape_cast %25 : vector<1x256xf32> to vector<1x1x256xf32>
    %27 = vector.broadcast %26 : vector<1x1x256xf32> to vector<8x2x256xf32>
    %28 = arith.mulf %24, %27 : vector<8x2x256xf32>
    %29 = arith.addf %23, %28 : vector<8x2x256xf32>
    %c2 = arith.constant 2 : index
    %c0_21 = arith.constant 0 : index
    %c0_22 = arith.constant 0 : index
    %30 = vector.load %arg15[%c2, %c0_21, %c0_22] : memref<11x2x256xf32, #tpu.memory_space<vmem>>, vector<8x2x256xf32>
    %31 = vector.extract_strided_slice %12 {offsets = [2, 0], sizes = [1, 256], strides = [1, 1]} : vector<4x256xf32> to vector<1x256xf32>
    %32 = vector.shape_cast %31 : vector<1x256xf32> to vector<1x1x256xf32>
    %33 = vector.broadcast %32 : vector<1x1x256xf32> to vector<8x2x256xf32>
    %34 = arith.mulf %30, %33 : vector<8x2x256xf32>
    %35 = arith.addf %29, %34 : vector<8x2x256xf32>
    %c3_23 = arith.constant 3 : index
    %c0_24 = arith.constant 0 : index
    %c0_25 = arith.constant 0 : index
    %36 = vector.load %arg15[%c3_23, %c0_24, %c0_25] : memref<11x2x256xf32, #tpu.memory_space<vmem>>, vector<8x2x256xf32>
    %37 = vector.extract_strided_slice %12 {offsets = [3, 0], sizes = [1, 256], strides = [1, 1]} : vector<4x256xf32> to vector<1x256xf32>
    %38 = vector.shape_cast %37 : vector<1x256xf32> to vector<1x1x256xf32>
    %39 = vector.broadcast %38 : vector<1x1x256xf32> to vector<8x2x256xf32>
    %40 = arith.mulf %36, %39 : vector<8x2x256xf32>
    %41 = arith.addf %35, %40 : vector<8x2x256xf32>
    %c0_26 = arith.constant 0 : index
    %c0_27 = arith.constant 0 : index
    %c0_28 = arith.constant 0 : index
    %42 = vector.load %arg5[%c0_26, %c0_27, %c0_28] : memref<1x1x256xf32, #tpu.memory_space<vmem>>, vector<1x1x256xf32>
    %43 = vector.shape_cast %42 : vector<1x1x256xf32> to vector<1x256xf32>
    %44 = vector.shape_cast %43 : vector<1x256xf32> to vector<1x1x256xf32>
    %45 = vector.broadcast %44 : vector<1x1x256xf32> to vector<8x2x256xf32>
    %46 = arith.addf %41, %45 : vector<8x2x256xf32>
    %47 = arith.negf %46 : vector<8x2x256xf32>
    %48 = math.exp %47 : vector<8x2x256xf32>
    %cst_29 = arith.constant 1.000000e+00 : f32
    %49 = vector.broadcast %cst_29 : f32 to vector<8x2x256xf32>
    %50 = arith.addf %49, %48 : vector<8x2x256xf32>
    %51 = arith.divf %49, %50 : vector<8x2x256xf32>
    %52 = arith.mulf %46, %51 : vector<8x2x256xf32>
    %53 = vector.shape_cast %52 : vector<8x2x256xf32> to vector<16x256xf32>
    %54 = arith.truncf %53 : vector<16x256xf32> to vector<16x256xbf16>
    %c0_30 = arith.constant 0 : index
    %c0_31 = arith.constant 0 : index
    %c0_32 = arith.constant 0 : index
    %55 = vector.load %arg6[%c0_30, %c0_31, %c0_32] : memref<1x256x288xbf16, #tpu.memory_space<vmem>>, vector<1x256x288xbf16>
    %56 = vector.shape_cast %55 : vector<1x256x288xbf16> to vector<256x288xbf16>
    %cst_33 = arith.constant dense<0.000000e+00> : vector<16x288xf32>
    %57 = tpu.matmul %54, %56, %cst_33 {dimension_numbers = #tpu.dot_dimension_numbers<[1], [0], [0], [1], [0, 0, 1, 1], [], []>} : vector<16x256xbf16>, vector<256x288xbf16>, vector<16x288xf32> -> vector<16x288xf32>
    %58 = vector.extract_strided_slice %57 {offsets = [0, 0], sizes = [16, 256], strides = [1, 1]} : vector<16x288xf32> to vector<16x256xf32>
    %c0_34 = arith.constant 0 : index
    %c0_35 = arith.constant 0 : index
    %c0_36 = arith.constant 0 : index
    %59 = vector.load %arg7[%c0_34, %c0_35, %c0_36] : memref<1x1x256xf32, #tpu.memory_space<vmem>>, vector<1x1x256xf32>
    %60 = vector.shape_cast %59 : vector<1x1x256xf32> to vector<1x256xf32>
    %61 = vector.broadcast %60 : vector<1x256xf32> to vector<16x256xf32>
    %62 = arith.addf %58, %61 : vector<16x256xf32>
    %cst_37 = arith.constant 0.000000e+00 : f32
    %63 = vector.broadcast %cst_37 : f32 to vector<16x256xf32>
    %64 = arith.maximumf %62, %63 : vector<16x256xf32>
    %65 = vector.broadcast %cst_37 : f32 to vector<16x256xf32>
    %66 = arith.subf %62, %65 : vector<16x256xf32>
    %67 = arith.cmpf one, %66, %66 : vector<16x256xf32>
    %68 = vector.broadcast %cst_37 : f32 to vector<16x256xf32>
    %69 = arith.addf %62, %68 : vector<16x256xf32>
    %70 = math.absf %66 : vector<16x256xf32>
    %cst_38 = arith.constant 0.000000e+00 : f32
    %71 = vector.broadcast %cst_38 : f32 to vector<16x256xf32>
    %72 = arith.subf %71, %70 : vector<16x256xf32>
    %73 = math.exp %72 : vector<16x256xf32>
    %74 = math.log1p %73 : vector<16x256xf32>
    %75 = arith.addf %64, %74 : vector<16x256xf32>
    %76 = arith.select %67, %69, %75 : vector<16x256xi1>, vector<16x256xf32>
    %77 = vector.extract_strided_slice %57 {offsets = [0, 256], sizes = [16, 16], strides = [1, 1]} : vector<16x288xf32> to vector<16x16xf32>
    %78 = vector.extract_strided_slice %57 {offsets = [0, 272], sizes = [16, 16], strides = [1, 1]} : vector<16x288xf32> to vector<16x16xf32>
    %79 = arith.mulf %76, %53 : vector<16x256xf32>
    %c0_39 = arith.constant 0 : index
    %c0_40 = arith.constant 0 : index
    %c0_41 = arith.constant 0 : index
    %80 = vector.load %arg8[%c0_39, %c0_40, %c0_41] : memref<1x16x256xf32, #tpu.memory_space<vmem>>, vector<1x16x256xf32>
    %81 = vector.shape_cast %80 : vector<1x16x256xf32> to vector<16x256xf32>
    %82 = vector.shape_cast %76 : vector<16x256xf32> to vector<8x2x256xf32>
    %83 = vector.shape_cast %79 : vector<16x256xf32> to vector<8x2x256xf32>
    %84 = vector.extract_strided_slice %81 {offsets = [0, 0], sizes = [1, 256], strides = [1, 1]} : vector<16x256xf32> to vector<1x256xf32>
    %85 = vector.shape_cast %84 : vector<1x256xf32> to vector<1x1x256xf32>
    %86 = vector.broadcast %85 : vector<1x1x256xf32> to vector<8x2x256xf32>
    %87 = arith.mulf %82, %86 : vector<8x2x256xf32>
    %88 = math.exp %87 : vector<8x2x256xf32>
    %c0_42 = arith.constant 0 : index
    %c0_43 = arith.constant 0 : index
    %c0_44 = arith.constant 0 : index
    %89 = vector.load %arg16[%c0_42, %c0_43, %c0_44] : memref<8x32x256xf32, #tpu.memory_space<vmem>>, vector<8x2x256xf32>
    tpu.vector_store %arg16[%c0_42, %c0_43, %c0_44], %88 {strides = array<i32>} : memref<8x32x256xf32, #tpu.memory_space<vmem>>, vector<8x2x256xf32>,
    %90 = vector.extract_strided_slice %77 {offsets = [0, 0], sizes = [16, 1], strides = [1, 1]} : vector<16x16xf32> to vector<16x1xf32>
    %91 = vector.shape_cast %90 : vector<16x1xf32> to vector<8x2x1xf32>
    %92 = vector.broadcast %91 : vector<8x2x1xf32> to vector<8x2x256xf32>
    %93 = arith.mulf %83, %92 : vector<8x2x256xf32>
    %c0_45 = arith.constant 0 : index
    %c0_46 = arith.constant 0 : index
    %c0_47 = arith.constant 0 : index
    %94 = vector.load %arg17[%c0_45, %c0_46, %c0_47] : memref<8x32x256xf32, #tpu.memory_space<vmem>>, vector<8x2x256xf32>
    tpu.vector_store %arg17[%c0_45, %c0_46, %c0_47], %93 {strides = array<i32>} : memref<8x32x256xf32, #tpu.memory_space<vmem>>, vector<8x2x256xf32>,
    %95 = vector.extract_strided_slice %81 {offsets = [1, 0], sizes = [1, 256], strides = [1, 1]} : vector<16x256xf32> to vector<1x256xf32>
    %96 = vector.shape_cast %95 : vector<1x256xf32> to vector<1x1x256xf32>
    %97 = vector.broadcast %96 : vector<1x1x256xf32> to vector<8x2x256xf32>
    %98 = arith.mulf %82, %97 : vector<8x2x256xf32>
    %99 = math.exp %98 : vector<8x2x256xf32>
    %c0_48 = arith.constant 0 : index
    %c2_49 = arith.constant 2 : index
    %c0_50 = arith.constant 0 : index
    %100 = vector.load %arg16[%c0_48, %c2_49, %c0_50] : memref<8x32x256xf32, #tpu.memory_space<vmem>>, vector<8x2x256xf32>
    tpu.vector_store %arg16[%c0_48, %c2_49, %c0_50], %99 {strides = array<i32>} : memref<8x32x256xf32, #tpu.memory_space<vmem>>, vector<8x2x256xf32>,
    %101 = vector.extract_strided_slice %77 {offsets = [0, 1], sizes = [16, 1], strides = [1, 1]} : vector<16x16xf32> to vector<16x1xf32>
    %102 = vector.shape_cast %101 : vector<16x1xf32> to vector<8x2x1xf32>
    %103 = vector.broadcast %102 : vector<8x2x1xf32> to vector<8x2x256xf32>
    %104 = arith.mulf %83, %103 : vector<8x2x256xf32>
    %c0_51 = arith.constant 0 : index
    %c2_52 = arith.constant 2 : index
    %c0_53 = arith.constant 0 : index
    %105 = vector.load %arg17[%c0_51, %c2_52, %c0_53] : memref<8x32x256xf32, #tpu.memory_space<vmem>>, vector<8x2x256xf32>
    tpu.vector_store %arg17[%c0_51, %c2_52, %c0_53], %104 {strides = array<i32>} : memref<8x32x256xf32, #tpu.memory_space<vmem>>, vector<8x2x256xf32>,
    %106 = vector.extract_strided_slice %81 {offsets = [2, 0], sizes = [1, 256], strides = [1, 1]} : vector<16x256xf32> to vector<1x256xf32>
    %107 = vector.shape_cast %106 : vector<1x256xf32> to vector<1x1x256xf32>
    %108 = vector.broadcast %107 : vector<1x1x256xf32> to vector<8x2x256xf32>
    %109 = arith.mulf %82, %108 : vector<8x2x256xf32>
    %110 = math.exp %109 : vector<8x2x256xf32>
    %c0_54 = arith.constant 0 : index
    %c4 = arith.constant 4 : index
    %c0_55 = arith.constant 0 : index
    %111 = vector.load %arg16[%c0_54, %c4, %c0_55] : memref<8x32x256xf32, #tpu.memory_space<vmem>>, vector<8x2x256xf32>
    tpu.vector_store %arg16[%c0_54, %c4, %c0_55], %110 {strides = array<i32>} : memref<8x32x256xf32, #tpu.memory_space<vmem>>, vector<8x2x256xf32>,
    %112 = vector.extract_strided_slice %77 {offsets = [0, 2], sizes = [16, 1], strides = [1, 1]} : vector<16x16xf32> to vector<16x1xf32>
    %113 = vector.shape_cast %112 : vector<16x1xf32> to vector<8x2x1xf32>
    %114 = vector.broadcast %113 : vector<8x2x1xf32> to vector<8x2x256xf32>
    %115 = arith.mulf %83, %114 : vector<8x2x256xf32>
    %c0_56 = arith.constant 0 : index
    %c4_57 = arith.constant 4 : index
    %c0_58 = arith.constant 0 : index
    %116 = vector.load %arg17[%c0_56, %c4_57, %c0_58] : memref<8x32x256xf32, #tpu.memory_space<vmem>>, vector<8x2x256xf32>
    tpu.vector_store %arg17[%c0_56, %c4_57, %c0_58], %115 {strides = array<i32>} : memref<8x32x256xf32, #tpu.memory_space<vmem>>, vector<8x2x256xf32>,
    %117 = vector.extract_strided_slice %81 {offsets = [3, 0], sizes = [1, 256], strides = [1, 1]} : vector<16x256xf32> to vector<1x256xf32>
    %118 = vector.shape_cast %117 : vector<1x256xf32> to vector<1x1x256xf32>
    %119 = vector.broadcast %118 : vector<1x1x256xf32> to vector<8x2x256xf32>
    %120 = arith.mulf %82, %119 : vector<8x2x256xf32>
    %121 = math.exp %120 : vector<8x2x256xf32>
    %c0_59 = arith.constant 0 : index
    %c6 = arith.constant 6 : index
    %c0_60 = arith.constant 0 : index
    %122 = vector.load %arg16[%c0_59, %c6, %c0_60] : memref<8x32x256xf32, #tpu.memory_space<vmem>>, vector<8x2x256xf32>
    tpu.vector_store %arg16[%c0_59, %c6, %c0_60], %121 {strides = array<i32>} : memref<8x32x256xf32, #tpu.memory_space<vmem>>, vector<8x2x256xf32>,
    %123 = vector.extract_strided_slice %77 {offsets = [0, 3], sizes = [16, 1], strides = [1, 1]} : vector<16x16xf32> to vector<16x1xf32>
    %124 = vector.shape_cast %123 : vector<16x1xf32> to vector<8x2x1xf32>
    %125 = vector.broadcast %124 : vector<8x2x1xf32> to vector<8x2x256xf32>
    %126 = arith.mulf %83, %125 : vector<8x2x256xf32>
    %c0_61 = arith.constant 0 : index
    %c6_62 = arith.constant 6 : index
    %c0_63 = arith.constant 0 : index
    %127 = vector.load %arg17[%c0_61, %c6_62, %c0_63] : memref<8x32x256xf32, #tpu.memory_space<vmem>>, vector<8x2x256xf32>
    tpu.vector_store %arg17[%c0_61, %c6_62, %c0_63], %126 {strides = array<i32>} : memref<8x32x256xf32, #tpu.memory_space<vmem>>, vector<8x2x256xf32>,
    %128 = vector.extract_strided_slice %81 {offsets = [4, 0], sizes = [1, 256], strides = [1, 1]} : vector<16x256xf32> to vector<1x256xf32>
    %129 = vector.shape_cast %128 : vector<1x256xf32> to vector<1x1x256xf32>
    %130 = vector.broadcast %129 : vector<1x1x256xf32> to vector<8x2x256xf32>
    %131 = arith.mulf %82, %130 : vector<8x2x256xf32>
    %132 = math.exp %131 : vector<8x2x256xf32>
    %c0_64 = arith.constant 0 : index
    %c8 = arith.constant 8 : index
    %c0_65 = arith.constant 0 : index
    %133 = vector.load %arg16[%c0_64, %c8, %c0_65] : memref<8x32x256xf32, #tpu.memory_space<vmem>>, vector<8x2x256xf32>
    tpu.vector_store %arg16[%c0_64, %c8, %c0_65], %132 {strides = array<i32>} : memref<8x32x256xf32, #tpu.memory_space<vmem>>, vector<8x2x256xf32>,
    %134 = vector.extract_strided_slice %77 {offsets = [0, 4], sizes = [16, 1], strides = [1, 1]} : vector<16x16xf32> to vector<16x1xf32>
    %135 = vector.shape_cast %134 : vector<16x1xf32> to vector<8x2x1xf32>
    %136 = vector.broadcast %135 : vector<8x2x1xf32> to vector<8x2x256xf32>
    %137 = arith.mulf %83, %136 : vector<8x2x256xf32>
    %c0_66 = arith.constant 0 : index
    %c8_67 = arith.constant 8 : index
    %c0_68 = arith.constant 0 : index
    %138 = vector.load %arg17[%c0_66, %c8_67, %c0_68] : memref<8x32x256xf32, #tpu.memory_space<vmem>>, vector<8x2x256xf32>
    tpu.vector_store %arg17[%c0_66, %c8_67, %c0_68], %137 {strides = array<i32>} : memref<8x32x256xf32, #tpu.memory_space<vmem>>, vector<8x2x256xf32>,
    %139 = vector.extract_strided_slice %81 {offsets = [5, 0], sizes = [1, 256], strides = [1, 1]} : vector<16x256xf32> to vector<1x256xf32>
    %140 = vector.shape_cast %139 : vector<1x256xf32> to vector<1x1x256xf32>
    %141 = vector.broadcast %140 : vector<1x1x256xf32> to vector<8x2x256xf32>
    %142 = arith.mulf %82, %141 : vector<8x2x256xf32>
    %143 = math.exp %142 : vector<8x2x256xf32>
    %c0_69 = arith.constant 0 : index
    %c10 = arith.constant 10 : index
    %c0_70 = arith.constant 0 : index
    %144 = vector.load %arg16[%c0_69, %c10, %c0_70] : memref<8x32x256xf32, #tpu.memory_space<vmem>>, vector<8x2x256xf32>
    tpu.vector_store %arg16[%c0_69, %c10, %c0_70], %143 {strides = array<i32>} : memref<8x32x256xf32, #tpu.memory_space<vmem>>, vector<8x2x256xf32>,
    %145 = vector.extract_strided_slice %77 {offsets = [0, 5], sizes = [16, 1], strides = [1, 1]} : vector<16x16xf32> to vector<16x1xf32>
    %146 = vector.shape_cast %145 : vector<16x1xf32> to vector<8x2x1xf32>
    %147 = vector.broadcast %146 : vector<8x2x1xf32> to vector<8x2x256xf32>
    %148 = arith.mulf %83, %147 : vector<8x2x256xf32>
    %c0_71 = arith.constant 0 : index
    %c10_72 = arith.constant 10 : index
    %c0_73 = arith.constant 0 : index
    %149 = vector.load %arg17[%c0_71, %c10_72, %c0_73] : memref<8x32x256xf32, #tpu.memory_space<vmem>>, vector<8x2x256xf32>
    tpu.vector_store %arg17[%c0_71, %c10_72, %c0_73], %148 {strides = array<i32>} : memref<8x32x256xf32, #tpu.memory_space<vmem>>, vector<8x2x256xf32>,
    %150 = vector.extract_strided_slice %81 {offsets = [6, 0], sizes = [1, 256], strides = [1, 1]} : vector<16x256xf32> to vector<1x256xf32>
    %151 = vector.shape_cast %150 : vector<1x256xf32> to vector<1x1x256xf32>
    %152 = vector.broadcast %151 : vector<1x1x256xf32> to vector<8x2x256xf32>
    %153 = arith.mulf %82, %152 : vector<8x2x256xf32>
    %154 = math.exp %153 : vector<8x2x256xf32>
    %c0_74 = arith.constant 0 : index
    %c12 = arith.constant 12 : index
    %c0_75 = arith.constant 0 : index
    %155 = vector.load %arg16[%c0_74, %c12, %c0_75] : memref<8x32x256xf32, #tpu.memory_space<vmem>>, vector<8x2x256xf32>
    tpu.vector_store %arg16[%c0_74, %c12, %c0_75], %154 {strides = array<i32>} : memref<8x32x256xf32, #tpu.memory_space<vmem>>, vector<8x2x256xf32>,
    %156 = vector.extract_strided_slice %77 {offsets = [0, 6], sizes = [16, 1], strides = [1, 1]} : vector<16x16xf32> to vector<16x1xf32>
    %157 = vector.shape_cast %156 : vector<16x1xf32> to vector<8x2x1xf32>
    %158 = vector.broadcast %157 : vector<8x2x1xf32> to vector<8x2x256xf32>
    %159 = arith.mulf %83, %158 : vector<8x2x256xf32>
    %c0_76 = arith.constant 0 : index
    %c12_77 = arith.constant 12 : index
    %c0_78 = arith.constant 0 : index
    %160 = vector.load %arg17[%c0_76, %c12_77, %c0_78] : memref<8x32x256xf32, #tpu.memory_space<vmem>>, vector<8x2x256xf32>
    tpu.vector_store %arg17[%c0_76, %c12_77, %c0_78], %159 {strides = array<i32>} : memref<8x32x256xf32, #tpu.memory_space<vmem>>, vector<8x2x256xf32>,
    %161 = vector.extract_strided_slice %81 {offsets = [7, 0], sizes = [1, 256], strides = [1, 1]} : vector<16x256xf32> to vector<1x256xf32>
    %162 = vector.shape_cast %161 : vector<1x256xf32> to vector<1x1x256xf32>
    %163 = vector.broadcast %162 : vector<1x1x256xf32> to vector<8x2x256xf32>
    %164 = arith.mulf %82, %163 : vector<8x2x256xf32>
    %165 = math.exp %164 : vector<8x2x256xf32>
    %c0_79 = arith.constant 0 : index
    %c14 = arith.constant 14 : index
    %c0_80 = arith.constant 0 : index
    %166 = vector.load %arg16[%c0_79, %c14, %c0_80] : memref<8x32x256xf32, #tpu.memory_space<vmem>>, vector<8x2x256xf32>
    tpu.vector_store %arg16[%c0_79, %c14, %c0_80], %165 {strides = array<i32>} : memref<8x32x256xf32, #tpu.memory_space<vmem>>, vector<8x2x256xf32>,
    %167 = vector.extract_strided_slice %77 {offsets = [0, 7], sizes = [16, 1], strides = [1, 1]} : vector<16x16xf32> to vector<16x1xf32>
    %168 = vector.shape_cast %167 : vector<16x1xf32> to vector<8x2x1xf32>
    %169 = vector.broadcast %168 : vector<8x2x1xf32> to vector<8x2x256xf32>
    %170 = arith.mulf %83, %169 : vector<8x2x256xf32>
    %c0_81 = arith.constant 0 : index
    %c14_82 = arith.constant 14 : index
    %c0_83 = arith.constant 0 : index
    %171 = vector.load %arg17[%c0_81, %c14_82, %c0_83] : memref<8x32x256xf32, #tpu.memory_space<vmem>>, vector<8x2x256xf32>
    tpu.vector_store %arg17[%c0_81, %c14_82, %c0_83], %170 {strides = array<i32>} : memref<8x32x256xf32, #tpu.memory_space<vmem>>, vector<8x2x256xf32>,
    %172 = vector.extract_strided_slice %81 {offsets = [8, 0], sizes = [1, 256], strides = [1, 1]} : vector<16x256xf32> to vector<1x256xf32>
    %173 = vector.shape_cast %172 : vector<1x256xf32> to vector<1x1x256xf32>
    %174 = vector.broadcast %173 : vector<1x1x256xf32> to vector<8x2x256xf32>
    %175 = arith.mulf %82, %174 : vector<8x2x256xf32>
    %176 = math.exp %175 : vector<8x2x256xf32>
    %c0_84 = arith.constant 0 : index
    %c16 = arith.constant 16 : index
    %c0_85 = arith.constant 0 : index
    %177 = vector.load %arg16[%c0_84, %c16, %c0_85] : memref<8x32x256xf32, #tpu.memory_space<vmem>>, vector<8x2x256xf32>
    tpu.vector_store %arg16[%c0_84, %c16, %c0_85], %176 {strides = array<i32>} : memref<8x32x256xf32, #tpu.memory_space<vmem>>, vector<8x2x256xf32>,
    %178 = vector.extract_strided_slice %77 {offsets = [0, 8], sizes = [16, 1], strides = [1, 1]} : vector<16x16xf32> to vector<16x1xf32>
    %179 = vector.shape_cast %178 : vector<16x1xf32> to vector<8x2x1xf32>
    %180 = vector.broadcast %179 : vector<8x2x1xf32> to vector<8x2x256xf32>
    %181 = arith.mulf %83, %180 : vector<8x2x256xf32>
    %c0_86 = arith.constant 0 : index
    %c16_87 = arith.constant 16 : index
    %c0_88 = arith.constant 0 : index
    %182 = vector.load %arg17[%c0_86, %c16_87, %c0_88] : memref<8x32x256xf32, #tpu.memory_space<vmem>>, vector<8x2x256xf32>
    tpu.vector_store %arg17[%c0_86, %c16_87, %c0_88], %181 {strides = array<i32>} : memref<8x32x256xf32, #tpu.memory_space<vmem>>, vector<8x2x256xf32>,
    %183 = vector.extract_strided_slice %81 {offsets = [9, 0], sizes = [1, 256], strides = [1, 1]} : vector<16x256xf32> to vector<1x256xf32>
    %184 = vector.shape_cast %183 : vector<1x256xf32> to vector<1x1x256xf32>
    %185 = vector.broadcast %184 : vector<1x1x256xf32> to vector<8x2x256xf32>
    %186 = arith.mulf %82, %185 : vector<8x2x256xf32>
    %187 = math.exp %186 : vector<8x2x256xf32>
    %c0_89 = arith.constant 0 : index
    %c18 = arith.constant 18 : index
    %c0_90 = arith.constant 0 : index
    %188 = vector.load %arg16[%c0_89, %c18, %c0_90] : memref<8x32x256xf32, #tpu.memory_space<vmem>>, vector<8x2x256xf32>
    tpu.vector_store %arg16[%c0_89, %c18, %c0_90], %187 {strides = array<i32>} : memref<8x32x256xf32, #tpu.memory_space<vmem>>, vector<8x2x256xf32>,
    %189 = vector.extract_strided_slice %77 {offsets = [0, 9], sizes = [16, 1], strides = [1, 1]} : vector<16x16xf32> to vector<16x1xf32>
    %190 = vector.shape_cast %189 : vector<16x1xf32> to vector<8x2x1xf32>
    %191 = vector.broadcast %190 : vector<8x2x1xf32> to vector<8x2x256xf32>
    %192 = arith.mulf %83, %191 : vector<8x2x256xf32>
    %c0_91 = arith.constant 0 : index
    %c18_92 = arith.constant 18 : index
    %c0_93 = arith.constant 0 : index
    %193 = vector.load %arg17[%c0_91, %c18_92, %c0_93] : memref<8x32x256xf32, #tpu.memory_space<vmem>>, vector<8x2x256xf32>
    tpu.vector_store %arg17[%c0_91, %c18_92, %c0_93], %192 {strides = array<i32>} : memref<8x32x256xf32, #tpu.memory_space<vmem>>, vector<8x2x256xf32>,
    %194 = vector.extract_strided_slice %81 {offsets = [10, 0], sizes = [1, 256], strides = [1, 1]} : vector<16x256xf32> to vector<1x256xf32>
    %195 = vector.shape_cast %194 : vector<1x256xf32> to vector<1x1x256xf32>
    %196 = vector.broadcast %195 : vector<1x1x256xf32> to vector<8x2x256xf32>
    %197 = arith.mulf %82, %196 : vector<8x2x256xf32>
    %198 = math.exp %197 : vector<8x2x256xf32>
    %c0_94 = arith.constant 0 : index
    %c20 = arith.constant 20 : index
    %c0_95 = arith.constant 0 : index
    %199 = vector.load %arg16[%c0_94, %c20, %c0_95] : memref<8x32x256xf32, #tpu.memory_space<vmem>>, vector<8x2x256xf32>
    tpu.vector_store %arg16[%c0_94, %c20, %c0_95], %198 {strides = array<i32>} : memref<8x32x256xf32, #tpu.memory_space<vmem>>, vector<8x2x256xf32>,
    %200 = vector.extract_strided_slice %77 {offsets = [0, 10], sizes = [16, 1], strides = [1, 1]} : vector<16x16xf32> to vector<16x1xf32>
    %201 = vector.shape_cast %200 : vector<16x1xf32> to vector<8x2x1xf32>
    %202 = vector.broadcast %201 : vector<8x2x1xf32> to vector<8x2x256xf32>
    %203 = arith.mulf %83, %202 : vector<8x2x256xf32>
    %c0_96 = arith.constant 0 : index
    %c20_97 = arith.constant 20 : index
    %c0_98 = arith.constant 0 : index
    %204 = vector.load %arg17[%c0_96, %c20_97, %c0_98] : memref<8x32x256xf32, #tpu.memory_space<vmem>>, vector<8x2x256xf32>
    tpu.vector_store %arg17[%c0_96, %c20_97, %c0_98], %203 {strides = array<i32>} : memref<8x32x256xf32, #tpu.memory_space<vmem>>, vector<8x2x256xf32>,
    %205 = vector.extract_strided_slice %81 {offsets = [11, 0], sizes = [1, 256], strides = [1, 1]} : vector<16x256xf32> to vector<1x256xf32>
    %206 = vector.shape_cast %205 : vector<1x256xf32> to vector<1x1x256xf32>
    %207 = vector.broadcast %206 : vector<1x1x256xf32> to vector<8x2x256xf32>
    %208 = arith.mulf %82, %207 : vector<8x2x256xf32>
    %209 = math.exp %208 : vector<8x2x256xf32>
    %c0_99 = arith.constant 0 : index
    %c22 = arith.constant 22 : index
    %c0_100 = arith.constant 0 : index
    %210 = vector.load %arg16[%c0_99, %c22, %c0_100] : memref<8x32x256xf32, #tpu.memory_space<vmem>>, vector<8x2x256xf32>
    tpu.vector_store %arg16[%c0_99, %c22, %c0_100], %209 {strides = array<i32>} : memref<8x32x256xf32, #tpu.memory_space<vmem>>, vector<8x2x256xf32>,
    %211 = vector.extract_strided_slice %77 {offsets = [0, 11], sizes = [16, 1], strides = [1, 1]} : vector<16x16xf32> to vector<16x1xf32>
    %212 = vector.shape_cast %211 : vector<16x1xf32> to vector<8x2x1xf32>
    %213 = vector.broadcast %212 : vector<8x2x1xf32> to vector<8x2x256xf32>
    %214 = arith.mulf %83, %213 : vector<8x2x256xf32>
    %c0_101 = arith.constant 0 : index
    %c22_102 = arith.constant 22 : index
    %c0_103 = arith.constant 0 : index
    %215 = vector.load %arg17[%c0_101, %c22_102, %c0_103] : memref<8x32x256xf32, #tpu.memory_space<vmem>>, vector<8x2x256xf32>
    tpu.vector_store %arg17[%c0_101, %c22_102, %c0_103], %214 {strides = array<i32>} : memref<8x32x256xf32, #tpu.memory_space<vmem>>, vector<8x2x256xf32>,
    %216 = vector.extract_strided_slice %81 {offsets = [12, 0], sizes = [1, 256], strides = [1, 1]} : vector<16x256xf32> to vector<1x256xf32>
    %217 = vector.shape_cast %216 : vector<1x256xf32> to vector<1x1x256xf32>
    %218 = vector.broadcast %217 : vector<1x1x256xf32> to vector<8x2x256xf32>
    %219 = arith.mulf %82, %218 : vector<8x2x256xf32>
    %220 = math.exp %219 : vector<8x2x256xf32>
    %c0_104 = arith.constant 0 : index
    %c24 = arith.constant 24 : index
    %c0_105 = arith.constant 0 : index
    %221 = vector.load %arg16[%c0_104, %c24, %c0_105] : memref<8x32x256xf32, #tpu.memory_space<vmem>>, vector<8x2x256xf32>
    tpu.vector_store %arg16[%c0_104, %c24, %c0_105], %220 {strides = array<i32>} : memref<8x32x256xf32, #tpu.memory_space<vmem>>, vector<8x2x256xf32>,
    %222 = vector.extract_strided_slice %77 {offsets = [0, 12], sizes = [16, 1], strides = [1, 1]} : vector<16x16xf32> to vector<16x1xf32>
    %223 = vector.shape_cast %222 : vector<16x1xf32> to vector<8x2x1xf32>
    %224 = vector.broadcast %223 : vector<8x2x1xf32> to vector<8x2x256xf32>
    %225 = arith.mulf %83, %224 : vector<8x2x256xf32>
    %c0_106 = arith.constant 0 : index
    %c24_107 = arith.constant 24 : index
    %c0_108 = arith.constant 0 : index
    %226 = vector.load %arg17[%c0_106, %c24_107, %c0_108] : memref<8x32x256xf32, #tpu.memory_space<vmem>>, vector<8x2x256xf32>
    tpu.vector_store %arg17[%c0_106, %c24_107, %c0_108], %225 {strides = array<i32>} : memref<8x32x256xf32, #tpu.memory_space<vmem>>, vector<8x2x256xf32>,
    %227 = vector.extract_strided_slice %81 {offsets = [13, 0], sizes = [1, 256], strides = [1, 1]} : vector<16x256xf32> to vector<1x256xf32>
    %228 = vector.shape_cast %227 : vector<1x256xf32> to vector<1x1x256xf32>
    %229 = vector.broadcast %228 : vector<1x1x256xf32> to vector<8x2x256xf32>
    %230 = arith.mulf %82, %229 : vector<8x2x256xf32>
    %231 = math.exp %230 : vector<8x2x256xf32>
    %c0_109 = arith.constant 0 : index
    %c26 = arith.constant 26 : index
    %c0_110 = arith.constant 0 : index
    %232 = vector.load %arg16[%c0_109, %c26, %c0_110] : memref<8x32x256xf32, #tpu.memory_space<vmem>>, vector<8x2x256xf32>
    tpu.vector_store %arg16[%c0_109, %c26, %c0_110], %231 {strides = array<i32>} : memref<8x32x256xf32, #tpu.memory_space<vmem>>, vector<8x2x256xf32>,
    %233 = vector.extract_strided_slice %77 {offsets = [0, 13], sizes = [16, 1], strides = [1, 1]} : vector<16x16xf32> to vector<16x1xf32>
    %234 = vector.shape_cast %233 : vector<16x1xf32> to vector<8x2x1xf32>
    %235 = vector.broadcast %234 : vector<8x2x1xf32> to vector<8x2x256xf32>
    %236 = arith.mulf %83, %235 : vector<8x2x256xf32>
    %c0_111 = arith.constant 0 : index
    %c26_112 = arith.constant 26 : index
    %c0_113 = arith.constant 0 : index
    %237 = vector.load %arg17[%c0_111, %c26_112, %c0_113] : memref<8x32x256xf32, #tpu.memory_space<vmem>>, vector<8x2x256xf32>
    tpu.vector_store %arg17[%c0_111, %c26_112, %c0_113], %236 {strides = array<i32>} : memref<8x32x256xf32, #tpu.memory_space<vmem>>, vector<8x2x256xf32>,
    %238 = vector.extract_strided_slice %81 {offsets = [14, 0], sizes = [1, 256], strides = [1, 1]} : vector<16x256xf32> to vector<1x256xf32>
    %239 = vector.shape_cast %238 : vector<1x256xf32> to vector<1x1x256xf32>
    %240 = vector.broadcast %239 : vector<1x1x256xf32> to vector<8x2x256xf32>
    %241 = arith.mulf %82, %240 : vector<8x2x256xf32>
    %242 = math.exp %241 : vector<8x2x256xf32>
    %c0_114 = arith.constant 0 : index
    %c28 = arith.constant 28 : index
    %c0_115 = arith.constant 0 : index
    %243 = vector.load %arg16[%c0_114, %c28, %c0_115] : memref<8x32x256xf32, #tpu.memory_space<vmem>>, vector<8x2x256xf32>
    tpu.vector_store %arg16[%c0_114, %c28, %c0_115], %242 {strides = array<i32>} : memref<8x32x256xf32, #tpu.memory_space<vmem>>, vector<8x2x256xf32>,
    %244 = vector.extract_strided_slice %77 {offsets = [0, 14], sizes = [16, 1], strides = [1, 1]} : vector<16x16xf32> to vector<16x1xf32>
    %245 = vector.shape_cast %244 : vector<16x1xf32> to vector<8x2x1xf32>
    %246 = vector.broadcast %245 : vector<8x2x1xf32> to vector<8x2x256xf32>
    %247 = arith.mulf %83, %246 : vector<8x2x256xf32>
    %c0_116 = arith.constant 0 : index
    %c28_117 = arith.constant 28 : index
    %c0_118 = arith.constant 0 : index
    %248 = vector.load %arg17[%c0_116, %c28_117, %c0_118] : memref<8x32x256xf32, #tpu.memory_space<vmem>>, vector<8x2x256xf32>
    tpu.vector_store %arg17[%c0_116, %c28_117, %c0_118], %247 {strides = array<i32>} : memref<8x32x256xf32, #tpu.memory_space<vmem>>, vector<8x2x256xf32>,
    %249 = vector.extract_strided_slice %81 {offsets = [15, 0], sizes = [1, 256], strides = [1, 1]} : vector<16x256xf32> to vector<1x256xf32>
    %250 = vector.shape_cast %249 : vector<1x256xf32> to vector<1x1x256xf32>
    %251 = vector.broadcast %250 : vector<1x1x256xf32> to vector<8x2x256xf32>
    %252 = arith.mulf %82, %251 : vector<8x2x256xf32>
    %253 = math.exp %252 : vector<8x2x256xf32>
    %c0_119 = arith.constant 0 : index
    %c30 = arith.constant 30 : index
    %c0_120 = arith.constant 0 : index
    %254 = vector.load %arg16[%c0_119, %c30, %c0_120] : memref<8x32x256xf32, #tpu.memory_space<vmem>>, vector<8x2x256xf32>
    tpu.vector_store %arg16[%c0_119, %c30, %c0_120], %253 {strides = array<i32>} : memref<8x32x256xf32, #tpu.memory_space<vmem>>, vector<8x2x256xf32>,
    %255 = vector.extract_strided_slice %77 {offsets = [0, 15], sizes = [16, 1], strides = [1, 1]} : vector<16x16xf32> to vector<16x1xf32>
    %256 = vector.shape_cast %255 : vector<16x1xf32> to vector<8x2x1xf32>
    %257 = vector.broadcast %256 : vector<8x2x1xf32> to vector<8x2x256xf32>
    %258 = arith.mulf %83, %257 : vector<8x2x256xf32>
    %c0_121 = arith.constant 0 : index
    %c30_122 = arith.constant 30 : index
    %c0_123 = arith.constant 0 : index
    %259 = vector.load %arg17[%c0_121, %c30_122, %c0_123] : memref<8x32x256xf32, #tpu.memory_space<vmem>>, vector<8x2x256xf32>
    tpu.vector_store %arg17[%c0_121, %c30_122, %c0_123], %258 {strides = array<i32>} : memref<8x32x256xf32, #tpu.memory_space<vmem>>, vector<8x2x256xf32>,
    %cst_124 = arith.constant 0.000000e+00 : f32
    %260 = vector.broadcast %cst_124 : f32 to vector<32x256xf32>
    %c0_i32_125 = arith.constant 0 : i32
    %261 = arith.index_cast %c0_i32_125 : i32 to index
    %c0_126 = arith.constant 0 : index
    %c0_127 = arith.constant 0 : index
    %262 = vector.load %arg16[%261, %c0_126, %c0_127] : memref<8x32x256xf32, #tpu.memory_space<vmem>>, vector<1x32x256xf32>
    %263 = vector.shape_cast %262 : vector<1x32x256xf32> to vector<32x256xf32>
    %264 = arith.mulf %263, %260 : vector<32x256xf32>
    %265 = arith.index_cast %c0_i32_125 : i32 to index
    %c0_128 = arith.constant 0 : index
    %c0_129 = arith.constant 0 : index
    %266 = vector.load %arg17[%265, %c0_128, %c0_129] : memref<8x32x256xf32, #tpu.memory_space<vmem>>, vector<1x32x256xf32>
    %267 = vector.shape_cast %266 : vector<1x32x256xf32> to vector<32x256xf32>
    %268 = arith.addf %264, %267 : vector<32x256xf32>
    %269 = arith.index_cast %c0_i32_125 : i32 to index
    %c0_130 = arith.constant 0 : index
    %c0_131 = arith.constant 0 : index
    %270 = vector.load %arg17[%269, %c0_130, %c0_131] : memref<8x32x256xf32, #tpu.memory_space<vmem>>, vector<1x32x256xf32>
    %271 = vector.shape_cast %270 : vector<1x32x256xf32> to vector<32x256xf32>
    %272 = vector.shape_cast %268 : vector<32x256xf32> to vector<1x32x256xf32>
    tpu.vector_store %arg17[%269, %c0_130, %c0_131], %272 {strides = array<i32>} : memref<8x32x256xf32, #tpu.memory_space<vmem>>, vector<1x32x256xf32>,
    %c1_i32 = arith.constant 1 : i32
    %273 = arith.index_cast %c1_i32 : i32 to index
    %c0_132 = arith.constant 0 : index
    %c0_133 = arith.constant 0 : index
    %274 = vector.load %arg16[%273, %c0_132, %c0_133] : memref<8x32x256xf32, #tpu.memory_space<vmem>>, vector<1x32x256xf32>
    %275 = vector.shape_cast %274 : vector<1x32x256xf32> to vector<32x256xf32>
    %276 = arith.mulf %275, %268 : vector<32x256xf32>
    %277 = arith.index_cast %c1_i32 : i32 to index
    %c0_134 = arith.constant 0 : index
    %c0_135 = arith.constant 0 : index
    %278 = vector.load %arg17[%277, %c0_134, %c0_135] : memref<8x32x256xf32, #tpu.memory_space<vmem>>, vector<1x32x256xf32>
    %279 = vector.shape_cast %278 : vector<1x32x256xf32> to vector<32x256xf32>
    %280 = arith.addf %276, %279 : vector<32x256xf32>
    %281 = arith.index_cast %c1_i32 : i32 to index
    %c0_136 = arith.constant 0 : index
    %c0_137 = arith.constant 0 : index
    %282 = vector.load %arg17[%281, %c0_136, %c0_137] : memref<8x32x256xf32, #tpu.memory_space<vmem>>, vector<1x32x256xf32>
    %283 = vector.shape_cast %282 : vector<1x32x256xf32> to vector<32x256xf32>
    %284 = vector.shape_cast %280 : vector<32x256xf32> to vector<1x32x256xf32>
    tpu.vector_store %arg17[%281, %c0_136, %c0_137], %284 {strides = array<i32>} : memref<8x32x256xf32, #tpu.memory_space<vmem>>, vector<1x32x256xf32>,
    %c2_i32 = arith.constant 2 : i32
    %285 = arith.index_cast %c2_i32 : i32 to index
    %c0_138 = arith.constant 0 : index
    %c0_139 = arith.constant 0 : index
    %286 = vector.load %arg16[%285, %c0_138, %c0_139] : memref<8x32x256xf32, #tpu.memory_space<vmem>>, vector<1x32x256xf32>
    %287 = vector.shape_cast %286 : vector<1x32x256xf32> to vector<32x256xf32>
    %288 = arith.mulf %287, %280 : vector<32x256xf32>
    %289 = arith.index_cast %c2_i32 : i32 to index
    %c0_140 = arith.constant 0 : index
    %c0_141 = arith.constant 0 : index
    %290 = vector.load %arg17[%289, %c0_140, %c0_141] : memref<8x32x256xf32, #tpu.memory_space<vmem>>, vector<1x32x256xf32>
    %291 = vector.shape_cast %290 : vector<1x32x256xf32> to vector<32x256xf32>
    %292 = arith.addf %288, %291 : vector<32x256xf32>
    %293 = arith.index_cast %c2_i32 : i32 to index
    %c0_142 = arith.constant 0 : index
    %c0_143 = arith.constant 0 : index
    %294 = vector.load %arg17[%293, %c0_142, %c0_143] : memref<8x32x256xf32, #tpu.memory_space<vmem>>, vector<1x32x256xf32>
    %295 = vector.shape_cast %294 : vector<1x32x256xf32> to vector<32x256xf32>
    %296 = vector.shape_cast %292 : vector<32x256xf32> to vector<1x32x256xf32>
    tpu.vector_store %arg17[%293, %c0_142, %c0_143], %296 {strides = array<i32>} : memref<8x32x256xf32, #tpu.memory_space<vmem>>, vector<1x32x256xf32>,
    %c3_i32 = arith.constant 3 : i32
    %297 = arith.index_cast %c3_i32 : i32 to index
    %c0_144 = arith.constant 0 : index
    %c0_145 = arith.constant 0 : index
    %298 = vector.load %arg16[%297, %c0_144, %c0_145] : memref<8x32x256xf32, #tpu.memory_space<vmem>>, vector<1x32x256xf32>
    %299 = vector.shape_cast %298 : vector<1x32x256xf32> to vector<32x256xf32>
    %300 = arith.mulf %299, %292 : vector<32x256xf32>
    %301 = arith.index_cast %c3_i32 : i32 to index
    %c0_146 = arith.constant 0 : index
    %c0_147 = arith.constant 0 : index
    %302 = vector.load %arg17[%301, %c0_146, %c0_147] : memref<8x32x256xf32, #tpu.memory_space<vmem>>, vector<1x32x256xf32>
    %303 = vector.shape_cast %302 : vector<1x32x256xf32> to vector<32x256xf32>
    %304 = arith.addf %300, %303 : vector<32x256xf32>
    %305 = arith.index_cast %c3_i32 : i32 to index
    %c0_148 = arith.constant 0 : index
    %c0_149 = arith.constant 0 : index
    %306 = vector.load %arg17[%305, %c0_148, %c0_149] : memref<8x32x256xf32, #tpu.memory_space<vmem>>, vector<1x32x256xf32>
    %307 = vector.shape_cast %306 : vector<1x32x256xf32> to vector<32x256xf32>
    %308 = vector.shape_cast %304 : vector<32x256xf32> to vector<1x32x256xf32>
    tpu.vector_store %arg17[%305, %c0_148, %c0_149], %308 {strides = array<i32>} : memref<8x32x256xf32, #tpu.memory_space<vmem>>, vector<1x32x256xf32>,
    %c4_i32 = arith.constant 4 : i32
    %309 = arith.index_cast %c4_i32 : i32 to index
    %c0_150 = arith.constant 0 : index
    %c0_151 = arith.constant 0 : index
    %310 = vector.load %arg16[%309, %c0_150, %c0_151] : memref<8x32x256xf32, #tpu.memory_space<vmem>>, vector<1x32x256xf32>
    %311 = vector.shape_cast %310 : vector<1x32x256xf32> to vector<32x256xf32>
    %312 = arith.mulf %311, %304 : vector<32x256xf32>
    %313 = arith.index_cast %c4_i32 : i32 to index
    %c0_152 = arith.constant 0 : index
    %c0_153 = arith.constant 0 : index
    %314 = vector.load %arg17[%313, %c0_152, %c0_153] : memref<8x32x256xf32, #tpu.memory_space<vmem>>, vector<1x32x256xf32>
    %315 = vector.shape_cast %314 : vector<1x32x256xf32> to vector<32x256xf32>
    %316 = arith.addf %312, %315 : vector<32x256xf32>
    %317 = arith.index_cast %c4_i32 : i32 to index
    %c0_154 = arith.constant 0 : index
    %c0_155 = arith.constant 0 : index
    %318 = vector.load %arg17[%317, %c0_154, %c0_155] : memref<8x32x256xf32, #tpu.memory_space<vmem>>, vector<1x32x256xf32>
    %319 = vector.shape_cast %318 : vector<1x32x256xf32> to vector<32x256xf32>
    %320 = vector.shape_cast %316 : vector<32x256xf32> to vector<1x32x256xf32>
    tpu.vector_store %arg17[%317, %c0_154, %c0_155], %320 {strides = array<i32>} : memref<8x32x256xf32, #tpu.memory_space<vmem>>, vector<1x32x256xf32>,
    %c5_i32 = arith.constant 5 : i32
    %321 = arith.index_cast %c5_i32 : i32 to index
    %c0_156 = arith.constant 0 : index
    %c0_157 = arith.constant 0 : index
    %322 = vector.load %arg16[%321, %c0_156, %c0_157] : memref<8x32x256xf32, #tpu.memory_space<vmem>>, vector<1x32x256xf32>
    %323 = vector.shape_cast %322 : vector<1x32x256xf32> to vector<32x256xf32>
    %324 = arith.mulf %323, %316 : vector<32x256xf32>
    %325 = arith.index_cast %c5_i32 : i32 to index
    %c0_158 = arith.constant 0 : index
    %c0_159 = arith.constant 0 : index
    %326 = vector.load %arg17[%325, %c0_158, %c0_159] : memref<8x32x256xf32, #tpu.memory_space<vmem>>, vector<1x32x256xf32>
    %327 = vector.shape_cast %326 : vector<1x32x256xf32> to vector<32x256xf32>
    %328 = arith.addf %324, %327 : vector<32x256xf32>
    %329 = arith.index_cast %c5_i32 : i32 to index
    %c0_160 = arith.constant 0 : index
    %c0_161 = arith.constant 0 : index
    %330 = vector.load %arg17[%329, %c0_160, %c0_161] : memref<8x32x256xf32, #tpu.memory_space<vmem>>, vector<1x32x256xf32>
    %331 = vector.shape_cast %330 : vector<1x32x256xf32> to vector<32x256xf32>
    %332 = vector.shape_cast %328 : vector<32x256xf32> to vector<1x32x256xf32>
    tpu.vector_store %arg17[%329, %c0_160, %c0_161], %332 {strides = array<i32>} : memref<8x32x256xf32, #tpu.memory_space<vmem>>, vector<1x32x256xf32>,
    %c6_i32 = arith.constant 6 : i32
    %333 = arith.index_cast %c6_i32 : i32 to index
    %c0_162 = arith.constant 0 : index
    %c0_163 = arith.constant 0 : index
    %334 = vector.load %arg16[%333, %c0_162, %c0_163] : memref<8x32x256xf32, #tpu.memory_space<vmem>>, vector<1x32x256xf32>
    %335 = vector.shape_cast %334 : vector<1x32x256xf32> to vector<32x256xf32>
    %336 = arith.mulf %335, %328 : vector<32x256xf32>
    %337 = arith.index_cast %c6_i32 : i32 to index
    %c0_164 = arith.constant 0 : index
    %c0_165 = arith.constant 0 : index
    %338 = vector.load %arg17[%337, %c0_164, %c0_165] : memref<8x32x256xf32, #tpu.memory_space<vmem>>, vector<1x32x256xf32>
    %339 = vector.shape_cast %338 : vector<1x32x256xf32> to vector<32x256xf32>
    %340 = arith.addf %336, %339 : vector<32x256xf32>
    %341 = arith.index_cast %c6_i32 : i32 to index
    %c0_166 = arith.constant 0 : index
    %c0_167 = arith.constant 0 : index
    %342 = vector.load %arg17[%341, %c0_166, %c0_167] : memref<8x32x256xf32, #tpu.memory_space<vmem>>, vector<1x32x256xf32>
    %343 = vector.shape_cast %342 : vector<1x32x256xf32> to vector<32x256xf32>
    %344 = vector.shape_cast %340 : vector<32x256xf32> to vector<1x32x256xf32>
    tpu.vector_store %arg17[%341, %c0_166, %c0_167], %344 {strides = array<i32>} : memref<8x32x256xf32, #tpu.memory_space<vmem>>, vector<1x32x256xf32>,
    %c7_i32 = arith.constant 7 : i32
    %345 = arith.index_cast %c7_i32 : i32 to index
    %c0_168 = arith.constant 0 : index
    %c0_169 = arith.constant 0 : index
    %346 = vector.load %arg16[%345, %c0_168, %c0_169] : memref<8x32x256xf32, #tpu.memory_space<vmem>>, vector<1x32x256xf32>
    %347 = vector.shape_cast %346 : vector<1x32x256xf32> to vector<32x256xf32>
    %348 = arith.mulf %347, %340 : vector<32x256xf32>
    %349 = arith.index_cast %c7_i32 : i32 to index
    %c0_170 = arith.constant 0 : index
    %c0_171 = arith.constant 0 : index
    %350 = vector.load %arg17[%349, %c0_170, %c0_171] : memref<8x32x256xf32, #tpu.memory_space<vmem>>, vector<1x32x256xf32>
    %351 = vector.shape_cast %350 : vector<1x32x256xf32> to vector<32x256xf32>
    %352 = arith.addf %348, %351 : vector<32x256xf32>
    %353 = arith.index_cast %c7_i32 : i32 to index
    %c0_172 = arith.constant 0 : index
    %c0_173 = arith.constant 0 : index
    %354 = vector.load %arg17[%353, %c0_172, %c0_173] : memref<8x32x256xf32, #tpu.memory_space<vmem>>, vector<1x32x256xf32>
    %355 = vector.shape_cast %354 : vector<1x32x256xf32> to vector<32x256xf32>
    %356 = vector.shape_cast %352 : vector<32x256xf32> to vector<1x32x256xf32>
    tpu.vector_store %arg17[%353, %c0_172, %c0_173], %356 {strides = array<i32>} : memref<8x32x256xf32, #tpu.memory_space<vmem>>, vector<1x32x256xf32>,
    %c8_i32 = arith.constant 8 : i32
    %c0_174 = arith.constant 0 : index
    %c0_175 = arith.constant 0 : index
    %c0_176 = arith.constant 0 : index
    %357 = vector.load %arg9[%c0_174, %c0_175, %c0_176] : memref<1x1x256xf32, #tpu.memory_space<vmem>>, vector<1x1x256xf32>
    %358 = vector.shape_cast %357 : vector<1x1x256xf32> to vector<1x256xf32>
    %359 = vector.broadcast %358 : vector<1x256xf32> to vector<16x256xf32>
    %360 = arith.mulf %53, %359 : vector<16x256xf32>
    %c0_177 = arith.constant 0 : index
    %c0_178 = arith.constant 0 : index
    %c0_179 = arith.constant 0 : index
    %361 = vector.load %arg17[%c0_177, %c0_178, %c0_179] : memref<8x32x256xf32, #tpu.memory_space<vmem>>, vector<8x2x256xf32>
    %362 = vector.shape_cast %361 : vector<8x2x256xf32> to vector<16x256xf32>
    %363 = vector.extract_strided_slice %78 {offsets = [0, 0], sizes = [16, 1], strides = [1, 1]} : vector<16x16xf32> to vector<16x1xf32>
    %364 = vector.broadcast %363 : vector<16x1xf32> to vector<16x256xf32>
    %365 = arith.mulf %362, %364 : vector<16x256xf32>
    %366 = arith.addf %360, %365 : vector<16x256xf32>
    %c0_180 = arith.constant 0 : index
    %c2_181 = arith.constant 2 : index
    %c0_182 = arith.constant 0 : index
    %367 = vector.load %arg17[%c0_180, %c2_181, %c0_182] : memref<8x32x256xf32, #tpu.memory_space<vmem>>, vector<8x2x256xf32>
    %368 = vector.shape_cast %367 : vector<8x2x256xf32> to vector<16x256xf32>
    %369 = vector.extract_strided_slice %78 {offsets = [0, 1], sizes = [16, 1], strides = [1, 1]} : vector<16x16xf32> to vector<16x1xf32>
    %370 = vector.broadcast %369 : vector<16x1xf32> to vector<16x256xf32>
    %371 = arith.mulf %368, %370 : vector<16x256xf32>
    %372 = arith.addf %366, %371 : vector<16x256xf32>
    %c0_183 = arith.constant 0 : index
    %c4_184 = arith.constant 4 : index
    %c0_185 = arith.constant 0 : index
    %373 = vector.load %arg17[%c0_183, %c4_184, %c0_185] : memref<8x32x256xf32, #tpu.memory_space<vmem>>, vector<8x2x256xf32>
    %374 = vector.shape_cast %373 : vector<8x2x256xf32> to vector<16x256xf32>
    %375 = vector.extract_strided_slice %78 {offsets = [0, 2], sizes = [16, 1], strides = [1, 1]} : vector<16x16xf32> to vector<16x1xf32>
    %376 = vector.broadcast %375 : vector<16x1xf32> to vector<16x256xf32>
    %377 = arith.mulf %374, %376 : vector<16x256xf32>
    %378 = arith.addf %372, %377 : vector<16x256xf32>
    %c0_186 = arith.constant 0 : index
    %c6_187 = arith.constant 6 : index
    %c0_188 = arith.constant 0 : index
    %379 = vector.load %arg17[%c0_186, %c6_187, %c0_188] : memref<8x32x256xf32, #tpu.memory_space<vmem>>, vector<8x2x256xf32>
    %380 = vector.shape_cast %379 : vector<8x2x256xf32> to vector<16x256xf32>
    %381 = vector.extract_strided_slice %78 {offsets = [0, 3], sizes = [16, 1], strides = [1, 1]} : vector<16x16xf32> to vector<16x1xf32>
    %382 = vector.broadcast %381 : vector<16x1xf32> to vector<16x256xf32>
    %383 = arith.mulf %380, %382 : vector<16x256xf32>
    %384 = arith.addf %378, %383 : vector<16x256xf32>
    %c0_189 = arith.constant 0 : index
    %c8_190 = arith.constant 8 : index
    %c0_191 = arith.constant 0 : index
    %385 = vector.load %arg17[%c0_189, %c8_190, %c0_191] : memref<8x32x256xf32, #tpu.memory_space<vmem>>, vector<8x2x256xf32>
    %386 = vector.shape_cast %385 : vector<8x2x256xf32> to vector<16x256xf32>
    %387 = vector.extract_strided_slice %78 {offsets = [0, 4], sizes = [16, 1], strides = [1, 1]} : vector<16x16xf32> to vector<16x1xf32>
    %388 = vector.broadcast %387 : vector<16x1xf32> to vector<16x256xf32>
    %389 = arith.mulf %386, %388 : vector<16x256xf32>
    %390 = arith.addf %384, %389 : vector<16x256xf32>
    %c0_192 = arith.constant 0 : index
    %c10_193 = arith.constant 10 : index
    %c0_194 = arith.constant 0 : index
    %391 = vector.load %arg17[%c0_192, %c10_193, %c0_194] : memref<8x32x256xf32, #tpu.memory_space<vmem>>, vector<8x2x256xf32>
    %392 = vector.shape_cast %391 : vector<8x2x256xf32> to vector<16x256xf32>
    %393 = vector.extract_strided_slice %78 {offsets = [0, 5], sizes = [16, 1], strides = [1, 1]} : vector<16x16xf32> to vector<16x1xf32>
    %394 = vector.broadcast %393 : vector<16x1xf32> to vector<16x256xf32>
    %395 = arith.mulf %392, %394 : vector<16x256xf32>
    %396 = arith.addf %390, %395 : vector<16x256xf32>
    %c0_195 = arith.constant 0 : index
    %c12_196 = arith.constant 12 : index
    %c0_197 = arith.constant 0 : index
    %397 = vector.load %arg17[%c0_195, %c12_196, %c0_197] : memref<8x32x256xf32, #tpu.memory_space<vmem>>, vector<8x2x256xf32>
    %398 = vector.shape_cast %397 : vector<8x2x256xf32> to vector<16x256xf32>
    %399 = vector.extract_strided_slice %78 {offsets = [0, 6], sizes = [16, 1], strides = [1, 1]} : vector<16x16xf32> to vector<16x1xf32>
    %400 = vector.broadcast %399 : vector<16x1xf32> to vector<16x256xf32>
    %401 = arith.mulf %398, %400 : vector<16x256xf32>
    %402 = arith.addf %396, %401 : vector<16x256xf32>
    %c0_198 = arith.constant 0 : index
    %c14_199 = arith.constant 14 : index
    %c0_200 = arith.constant 0 : index
    %403 = vector.load %arg17[%c0_198, %c14_199, %c0_200] : memref<8x32x256xf32, #tpu.memory_space<vmem>>, vector<8x2x256xf32>
    %404 = vector.shape_cast %403 : vector<8x2x256xf32> to vector<16x256xf32>
    %405 = vector.extract_strided_slice %78 {offsets = [0, 7], sizes = [16, 1], strides = [1, 1]} : vector<16x16xf32> to vector<16x1xf32>
    %406 = vector.broadcast %405 : vector<16x1xf32> to vector<16x256xf32>
    %407 = arith.mulf %404, %406 : vector<16x256xf32>
    %408 = arith.addf %402, %407 : vector<16x256xf32>
    %c0_201 = arith.constant 0 : index
    %c16_202 = arith.constant 16 : index
    %c0_203 = arith.constant 0 : index
    %409 = vector.load %arg17[%c0_201, %c16_202, %c0_203] : memref<8x32x256xf32, #tpu.memory_space<vmem>>, vector<8x2x256xf32>
    %410 = vector.shape_cast %409 : vector<8x2x256xf32> to vector<16x256xf32>
    %411 = vector.extract_strided_slice %78 {offsets = [0, 8], sizes = [16, 1], strides = [1, 1]} : vector<16x16xf32> to vector<16x1xf32>
    %412 = vector.broadcast %411 : vector<16x1xf32> to vector<16x256xf32>
    %413 = arith.mulf %410, %412 : vector<16x256xf32>
    %414 = arith.addf %408, %413 : vector<16x256xf32>
    %c0_204 = arith.constant 0 : index
    %c18_205 = arith.constant 18 : index
    %c0_206 = arith.constant 0 : index
    %415 = vector.load %arg17[%c0_204, %c18_205, %c0_206] : memref<8x32x256xf32, #tpu.memory_space<vmem>>, vector<8x2x256xf32>
    %416 = vector.shape_cast %415 : vector<8x2x256xf32> to vector<16x256xf32>
    %417 = vector.extract_strided_slice %78 {offsets = [0, 9], sizes = [16, 1], strides = [1, 1]} : vector<16x16xf32> to vector<16x1xf32>
    %418 = vector.broadcast %417 : vector<16x1xf32> to vector<16x256xf32>
    %419 = arith.mulf %416, %418 : vector<16x256xf32>
    %420 = arith.addf %414, %419 : vector<16x256xf32>
    %c0_207 = arith.constant 0 : index
    %c20_208 = arith.constant 20 : index
    %c0_209 = arith.constant 0 : index
    %421 = vector.load %arg17[%c0_207, %c20_208, %c0_209] : memref<8x32x256xf32, #tpu.memory_space<vmem>>, vector<8x2x256xf32>
    %422 = vector.shape_cast %421 : vector<8x2x256xf32> to vector<16x256xf32>
    %423 = vector.extract_strided_slice %78 {offsets = [0, 10], sizes = [16, 1], strides = [1, 1]} : vector<16x16xf32> to vector<16x1xf32>
    %424 = vector.broadcast %423 : vector<16x1xf32> to vector<16x256xf32>
    %425 = arith.mulf %422, %424 : vector<16x256xf32>
    %426 = arith.addf %420, %425 : vector<16x256xf32>
    %c0_210 = arith.constant 0 : index
    %c22_211 = arith.constant 22 : index
    %c0_212 = arith.constant 0 : index
    %427 = vector.load %arg17[%c0_210, %c22_211, %c0_212] : memref<8x32x256xf32, #tpu.memory_space<vmem>>, vector<8x2x256xf32>
    %428 = vector.shape_cast %427 : vector<8x2x256xf32> to vector<16x256xf32>
    %429 = vector.extract_strided_slice %78 {offsets = [0, 11], sizes = [16, 1], strides = [1, 1]} : vector<16x16xf32> to vector<16x1xf32>
    %430 = vector.broadcast %429 : vector<16x1xf32> to vector<16x256xf32>
    %431 = arith.mulf %428, %430 : vector<16x256xf32>
    %432 = arith.addf %426, %431 : vector<16x256xf32>
    %c0_213 = arith.constant 0 : index
    %c24_214 = arith.constant 24 : index
    %c0_215 = arith.constant 0 : index
    %433 = vector.load %arg17[%c0_213, %c24_214, %c0_215] : memref<8x32x256xf32, #tpu.memory_space<vmem>>, vector<8x2x256xf32>
    %434 = vector.shape_cast %433 : vector<8x2x256xf32> to vector<16x256xf32>
    %435 = vector.extract_strided_slice %78 {offsets = [0, 12], sizes = [16, 1], strides = [1, 1]} : vector<16x16xf32> to vector<16x1xf32>
    %436 = vector.broadcast %435 : vector<16x1xf32> to vector<16x256xf32>
    %437 = arith.mulf %434, %436 : vector<16x256xf32>
    %438 = arith.addf %432, %437 : vector<16x256xf32>
    %c0_216 = arith.constant 0 : index
    %c26_217 = arith.constant 26 : index
    %c0_218 = arith.constant 0 : index
    %439 = vector.load %arg17[%c0_216, %c26_217, %c0_218] : memref<8x32x256xf32, #tpu.memory_space<vmem>>, vector<8x2x256xf32>
    %440 = vector.shape_cast %439 : vector<8x2x256xf32> to vector<16x256xf32>
    %441 = vector.extract_strided_slice %78 {offsets = [0, 13], sizes = [16, 1], strides = [1, 1]} : vector<16x16xf32> to vector<16x1xf32>
    %442 = vector.broadcast %441 : vector<16x1xf32> to vector<16x256xf32>
    %443 = arith.mulf %440, %442 : vector<16x256xf32>
    %444 = arith.addf %438, %443 : vector<16x256xf32>
    %c0_219 = arith.constant 0 : index
    %c28_220 = arith.constant 28 : index
    %c0_221 = arith.constant 0 : index
    %445 = vector.load %arg17[%c0_219, %c28_220, %c0_221] : memref<8x32x256xf32, #tpu.memory_space<vmem>>, vector<8x2x256xf32>
    %446 = vector.shape_cast %445 : vector<8x2x256xf32> to vector<16x256xf32>
    %447 = vector.extract_strided_slice %78 {offsets = [0, 14], sizes = [16, 1], strides = [1, 1]} : vector<16x16xf32> to vector<16x1xf32>
    %448 = vector.broadcast %447 : vector<16x1xf32> to vector<16x256xf32>
    %449 = arith.mulf %446, %448 : vector<16x256xf32>
    %450 = arith.addf %444, %449 : vector<16x256xf32>
    %c0_222 = arith.constant 0 : index
    %c30_223 = arith.constant 30 : index
    %c0_224 = arith.constant 0 : index
    %451 = vector.load %arg17[%c0_222, %c30_223, %c0_224] : memref<8x32x256xf32, #tpu.memory_space<vmem>>, vector<8x2x256xf32>
    %452 = vector.shape_cast %451 : vector<8x2x256xf32> to vector<16x256xf32>
    %453 = vector.extract_strided_slice %78 {offsets = [0, 15], sizes = [16, 1], strides = [1, 1]} : vector<16x16xf32> to vector<16x1xf32>
    %454 = vector.broadcast %453 : vector<16x1xf32> to vector<16x256xf32>
    %455 = arith.mulf %452, %454 : vector<16x256xf32>
    %456 = arith.addf %450, %455 : vector<16x256xf32>
    %457 = arith.negf %10 : vector<16x256xf32>
    %458 = math.exp %457 : vector<16x256xf32>
    %cst_225 = arith.constant 1.000000e+00 : f32
    %459 = vector.broadcast %cst_225 : f32 to vector<16x256xf32>
    %460 = arith.addf %459, %458 : vector<16x256xf32>
    %461 = arith.divf %459, %460 : vector<16x256xf32>
    %462 = arith.mulf %10, %461 : vector<16x256xf32>
    %463 = arith.mulf %456, %462 : vector<16x256xf32>
    %464 = arith.truncf %463 : vector<16x256xf32> to vector<16x256xbf16>
    %c0_226 = arith.constant 0 : index
    %c0_227 = arith.constant 0 : index
    %c0_228 = arith.constant 0 : index
    %465 = vector.load %arg10[%c0_226, %c0_227, %c0_228] : memref<1x256x128xbf16, #tpu.memory_space<vmem>>, vector<1x256x128xbf16>
    %466 = vector.shape_cast %465 : vector<1x256x128xbf16> to vector<256x128xbf16>
    %cst_229 = arith.constant dense<0.000000e+00> : vector<16x128xf32>
    %467 = tpu.matmul %464, %466, %cst_229 {dimension_numbers = #tpu.dot_dimension_numbers<[1], [0], [0], [1], [0, 0, 1, 1], [], []>} : vector<16x256xbf16>, vector<256x128xbf16>, vector<16x128xf32> -> vector<16x128xf32>
    %468 = arith.addf %4, %467 : vector<16x128xf32>
    %469 = vector.shape_cast %468 : vector<16x128xf32> to vector<8x2x128xf32>
    %c0_230 = arith.constant 0 : index
    %c0_231 = arith.constant 0 : index
    %c0_232 = arith.constant 0 : index
    %470 = vector.load %arg14[%c0_230, %c0_231, %c0_232] : memref<8x2x128xf32, #tpu.memory_space<vmem>>, vector<8x2x128xf32>
    tpu.vector_store %arg14[%c0_230, %c0_231, %c0_232], %469 {strides = array<i32>} : memref<8x2x128xf32, #tpu.memory_space<vmem>>, vector<8x2x128xf32>,
    %c1_i32_233 = arith.constant 1 : i32
    %471 = arith.cmpi eq, %arg1, %c1_i32_233 : i32
    %472 = arith.extui %471 : i1 to i32
    %c0_i32_234 = arith.constant 0 : i32
    %473 = arith.cmpi ne, %472, %c0_i32_234 : i32
    scf.if %473 {
      %cst_235 = arith.constant dense<0.000000e+00> : vector<16xf32>
      %474 = vector.multi_reduction <add>, %468, %cst_235 [1] : vector<16x128xf32> to vector<16xf32>
      %475 = vector.shape_cast %474 : vector<16xf32> to vector<16x1xf32>
      %cst_236 = arith.constant 1.280000e+02 : f32
      %476 = vector.broadcast %cst_236 : f32 to vector<16x1xf32>
      %477 = arith.divf %475, %476 : vector<16x1xf32>
      %478 = vector.broadcast %477 : vector<16x1xf32> to vector<16x128xf32>
      %479 = arith.subf %468, %478 : vector<16x128xf32>
      %480 = arith.mulf %479, %479 : vector<16x128xf32>
      %cst_237 = arith.constant dense<0.000000e+00> : vector<16xf32>
      %481 = vector.multi_reduction <add>, %480, %cst_237 [1] : vector<16x128xf32> to vector<16xf32>
      %482 = vector.shape_cast %481 : vector<16xf32> to vector<16x1xf32>
      %cst_238 = arith.constant 1.280000e+02 : f32
      %483 = vector.broadcast %cst_238 : f32 to vector<16x1xf32>
      %484 = arith.divf %482, %483 : vector<16x1xf32>
      %485 = vector.broadcast %477 : vector<16x1xf32> to vector<16x128xf32>
      %486 = arith.subf %468, %485 : vector<16x128xf32>
      %cst_239 = arith.constant 9.99999974E-6 : f32
      %487 = vector.broadcast %cst_239 : f32 to vector<16x1xf32>
      %488 = arith.addf %484, %487 : vector<16x1xf32>
      %489 = math.rsqrt %488 : vector<16x1xf32>
      %490 = vector.broadcast %489 : vector<16x1xf32> to vector<16x128xf32>
      %491 = arith.mulf %486, %490 : vector<16x128xf32>
      %c0_240 = arith.constant 0 : index
      %c0_241 = arith.constant 0 : index
      %492 = vector.load %arg11[%c0_240, %c0_241] : memref<1x128xf32, #tpu.memory_space<vmem>>, vector<1x128xf32>
      %493 = vector.broadcast %492 : vector<1x128xf32> to vector<16x128xf32>
      %494 = arith.mulf %491, %493 : vector<16x128xf32>
      %c0_242 = arith.constant 0 : index
      %c0_243 = arith.constant 0 : index
      %495 = vector.load %arg12[%c0_242, %c0_243] : memref<1x128xf32, #tpu.memory_space<vmem>>, vector<1x128xf32>
      %496 = vector.broadcast %495 : vector<1x128xf32> to vector<16x128xf32>
      %497 = arith.addf %494, %496 : vector<16x128xf32>
      %498 = vector.shape_cast %497 : vector<16x128xf32> to vector<8x2x128xf32>
      %499 = tpu.transpose %498, [1, 0, 2] : vector<8x2x128xf32> -> vector<2x8x128xf32>
      %c0_244 = arith.constant 0 : index
      %c0_245 = arith.constant 0 : index
      %c0_246 = arith.constant 0 : index
      %500 = vector.load %arg13[%c0_244, %c0_245, %c0_246] : memref<2x8x128xf32, #tpu.memory_space<vmem>>, vector<2x8x128xf32>
      tpu.vector_store %arg13[%c0_244, %c0_245, %c0_246], %499 {strides = array<i32>} : memref<2x8x128xf32, #tpu.memory_space<vmem>>, vector<2x8x128xf32>,
    } else {
    }
    return
  }
  func.func @transform_0(%arg0: i32, %arg1: i32) -> (i32, i32, i32) {
    %c0_i32 = arith.constant 0 : i32
    %c0_i32_0 = arith.constant 0 : i32
    %c0_i32_1 = arith.constant 0 : i32
    return %arg0, %c0_i32, %c0_i32_0 : i32, i32, i32
  }
  func.func @transform_1(%arg0: i32, %arg1: i32) -> (i32, i32, i32) {
    %c0_i32 = arith.constant 0 : i32
    %c0_i32_0 = arith.constant 0 : i32
    %c0_i32_1 = arith.constant 0 : i32
    return %arg1, %c0_i32, %c0_i32_0 : i32, i32, i32
  }
  func.func @transform_2(%arg0: i32, %arg1: i32) -> (i32, i32, i32) {
    %c0_i32 = arith.constant 0 : i32
    %c0_i32_0 = arith.constant 0 : i32
    %c0_i32_1 = arith.constant 0 : i32
    return %arg1, %c0_i32, %c0_i32_0 : i32, i32, i32
  }
  func.func @transform_3(%arg0: i32, %arg1: i32) -> (i32, i32, i32) {
    %c0_i32 = arith.constant 0 : i32
    %c0_i32_0 = arith.constant 0 : i32
    %c0_i32_1 = arith.constant 0 : i32
    return %arg1, %c0_i32, %c0_i32_0 : i32, i32, i32
  }
  func.func @transform_4(%arg0: i32, %arg1: i32) -> (i32, i32, i32) {
    %c0_i32 = arith.constant 0 : i32
    %c0_i32_0 = arith.constant 0 : i32
    %c0_i32_1 = arith.constant 0 : i32
    return %arg1, %c0_i32, %c0_i32_0 : i32, i32, i32
  }
  func.func @transform_5(%arg0: i32, %arg1: i32) -> (i32, i32, i32) {
    %c0_i32 = arith.constant 0 : i32
    %c0_i32_0 = arith.constant 0 : i32
    %c0_i32_1 = arith.constant 0 : i32
    return %arg1, %c0_i32, %c0_i32_0 : i32, i32, i32
  }
  func.func @transform_6(%arg0: i32, %arg1: i32) -> (i32, i32, i32) {
    %c0_i32 = arith.constant 0 : i32
    %c0_i32_0 = arith.constant 0 : i32
    %c0_i32_1 = arith.constant 0 : i32
    return %arg1, %c0_i32, %c0_i32_0 : i32, i32, i32
  }
  func.func @transform_7(%arg0: i32, %arg1: i32) -> (i32, i32, i32) {
    %c0_i32 = arith.constant 0 : i32
    %c0_i32_0 = arith.constant 0 : i32
    %c0_i32_1 = arith.constant 0 : i32
    return %arg1, %c0_i32, %c0_i32_0 : i32, i32, i32
  }
  func.func @transform_8(%arg0: i32, %arg1: i32) -> (i32, i32, i32) {
    %c0_i32 = arith.constant 0 : i32
    %c0_i32_0 = arith.constant 0 : i32
    %c0_i32_1 = arith.constant 0 : i32
    return %arg1, %c0_i32, %c0_i32_0 : i32, i32, i32
  }
  func.func @transform_9(%arg0: i32, %arg1: i32) -> (i32, i32) {
    %c0_i32 = arith.constant 0 : i32
    %c0_i32_0 = arith.constant 0 : i32
    %c0_i32_1 = arith.constant 0 : i32
    return %c0_i32, %c0_i32_0 : i32, i32
  }
  func.func @transform_10(%arg0: i32, %arg1: i32) -> (i32, i32) {
    %c0_i32 = arith.constant 0 : i32
    %c0_i32_0 = arith.constant 0 : i32
    %c0_i32_1 = arith.constant 0 : i32
    return %c0_i32, %c0_i32_0 : i32, i32
  }
  func.func @transform_11(%arg0: i32, %arg1: i32) -> (i32, i32, i32) {
    %c0_i32 = arith.constant 0 : i32
    %c0_i32_0 = arith.constant 0 : i32
    %c0_i32_1 = arith.constant 0 : i32
    return %arg0, %c0_i32, %c0_i32_0 : i32, i32, i32
  }
}

</mosaic_0001>

<bundles_post_ra>
// kernel: tpu_custom_call.1
= control target key start
LH: loop header
LB: loop body
LE: loop exit
PB: predicated region body
PF: predicated region fallthrough
CT: control target
= control target key end

     0   :  { %s16658_s0 = inlined_call_operand.vmem [shape: f32[2,8,128], index: 0, kind: input, shape index: {}]   ;;  %s16659_s1 = inlined_call_operand.vmem [shape: bf16[2,128,512], index: 1, kind: input, shape index: {}]   ;;  %s16660_s2 = inlined_call_operand.vmem [shape: f32[2,4,256], index: 2, kind: input, shape index: {}]   ;;  %s16661_s3 = inlined_call_operand.vmem [shape: f32[2,1,256], index: 3, kind: input, shape index: {}]   ;;  %s16662_s4 = inlined_call_operand.vmem [shape: bf16[2,256,288], index: 4, kind: input, shape index: {}]   ;;  %s16663_s5 = inlined_call_operand.vmem [shape: f32[2,1,256], index: 5, kind: input, shape index: {}]   ;;  %s16664_s6 = inlined_call_operand.vmem [shape: f32[2,16,256], index: 6, kind: input, shape index: {}]   ;;  %s16665_s7 = inlined_call_operand.vmem [shape: f32[2,1,256], index: 7, kind: input, shape index: {}]   ;;  %s16666_s8 = inlined_call_operand.vmem [shape: bf16[2,256,128], index: 8, kind: input, shape index: {}]   ;;  %s16667_s9 = inlined_call_operand.vmem [shape: f32[1,128], index: 9, kind: input, shape index: {}]   ;;  %s16668_s10 = inlined_call_operand.vmem [shape: f32[1,128], index: 10, kind: input, shape index: {}]   ;;  %s16669_s11 = inlined_call_operand.hbm [shape: f32[2,8,128], index: 11, kind: output, shape index: {}]  }
   0x1   :  { %16801 = sst [smem:[#allocation55_spill]] %s16659_s1 }
   0x2   :  { %16802 = sst [smem:[#allocation56_spill]] %s16660_s2 }
   0x3   :  { %16803 = sst [smem:[#allocation57_spill]] %s16669_s11 }
   0x4   :  { %16 = vsyncpa [#allocation7], 0  ;;  %s13525_s17 = smov 0   ;;  %s13527_s18 = smov 0  }
   0x5   :  { %s13529_s19 = smov 0  }
   0x6 LB: > { %16804 = sst [smem:[#allocation9_spill]] %s13414_s18  ;;  %s31_s21 = sadd.s32 1, %s13414_s18  ;;  %s13418_s19 = sphi %s13529_s19, %s22_s19   ;;  %s13414_s18 = sphi %s13527_s18, %s17110_s18   ;;  %s13410_s17 = sphi %s13525_s17, %s17109_s17  }
   0x7   : > { %16805 = sst [smem:[#allocation10_spill]] %s13418_s19  ;;  %p32_p0 = scmp.ge.s32.totalorder %s31_s21, 2 }
   0x8   : > { %p12100_p1 = scmp.ge.s32.totalorder %s13418_s19, 1  ;;  %p428_p2 = scmp.lt.s32.totalorder %s13418_s19, 3 }
   0x9   : > { %s17112_s21 = smov (%p32_p0, %s31_s21), 0 }
   0xa   : > { %16806 = sst [smem:[#allocation11_spill]] %s17112_s21  ;;  %p429_p3 = pnand %p12100_p1, %p428_p2 }
   0xc   : > { %432 = sbr.rel (%p429_p3) target bundleno = 1833 (0x729), region = 64 }
  0x13   : > { %p506_p4 = scmp.lt.s32.totalorder %s13410_s17, 1  ;;  %s16807_s1 = sld [smem:[#allocation55_spill]] }
  0x14   : > { %s16808_s2 = sld [smem:[#allocation56_spill]]  ;;  %p12113_p5 = scmp.ne.s32.totalorder %s13410_s17, 0 }
  0x15   : > { %s507_s22 = scalar_select %p506_p4, %s13410_s17, 1 }
  0x16   : > { %v549_v0 = vld [vmem:[%s16658_s0] sm:$0xff] (!%p12113_p5)  ;;  %v550_v1 = vld [vmem:[%s16658_s0 + $0x8] sm:$0xff] (!%p12113_p5)  ;;  %v555_v2 = vlaneseq (!%p12113_p5)  ;;  %v13420_v3 = vmov (!%p12113_p5), 1983009808   ;;  %v13421_v6 = vmov (!%p12113_p5), 1934713408  }
  0x17   : > { %s12495_s23 = sshll.u32 %s507_s22, 8  ;;  %s12496_s24 = sshll.u32 %s507_s22, 3  ;;  %v553_v4 = vunpack.c.l.s4 (!%p12113_p5), %v13420_v3  ;;  %v584_v7 = vunpack.c.l.s4 (!%p12113_p5), %v13421_v6  ;;  %v13422_v9 = vmov (!%p12113_p5), 0.0  }
  0x18   : > { %s13558_s12 = sshll.u32 %s507_s22, 1  ;;  %s12543_s13 = smul.u32 384, %s507_s22  ;;  %v556_v5 = vshrl.u32 (!%p12113_p5), %v555_v2, 7  ;;  %v551_v10 = vcombine.high (!%p12113_p5), %v549_v0, %v13422_v9  ;;  %v566_v11 = vcombine.high (!%p12113_p5), %v550_v1, %v13422_v9 }
  0x19   : > { %s13551_s27 = scalar_lea.vmem %s16807_s1, %s12495_s23  ;;  %s528_s23 = scalar_lea.vmem %s16663_s5, %s13558_s12  ;;  %v554_v8 = vunpack.c.0.s8 (!%p12113_p5), %v553_v4  ;;  %v585_v12 = vunpack.c.0.s8 (!%p12113_p5), %v584_v7 }
  0x1a   : > { %s13556_s30 = scalar_lea.vmem %s16808_s2, %s12496_s24  ;;  %s13571_s28 = scalar_lea.vmem %s16662_s4, %s12543_s13 }
  0x1b   : > { %s12497_s24 = sshll.u32 %s507_s22, 5  ;;  %s537_s14 = scalar_lea.vmem %s16665_s7, %s13558_s12  ;;  %v557_v13 = vsub.s32 (!%p12113_p5), %v554_v8, %v556_v5  ;;  %v588_v14 = vsub.s32 (!%p12113_p5), %v585_v12, %v556_v5 }
  0x1c   : > { %s13576_s2 = scalar_lea.vmem %s16664_s6, %s12497_s24  ;;  %s12498_s15 = sshll.u32 %s507_s22, 7 }
  0x1d   : > { %s13585_s20 = scalar_lea.vmem %s16666_s8, %s12498_s15  ;;  %548 = sbr.rel (%p12113_p5) target bundleno = 39 (0x27), region = 68  ;;  %v558_v15 = vrot.slane (!%p12113_p5), %v549_v0, %v557_v13  ;;  %v573_v16 = vrot.slane (!%p12113_p5), %v550_v1, %v557_v13  ;;  %v565_v17 = vrot.slane (!%p12113_p5), %v551_v10, %v557_v13  ;;  %v580_v18 = vrot.slane (!%p12113_p5), %v566_v11, %v557_v13 }
  0x1f   : > { %v581_v19 = vcombine.low (!%p12113_p5), %v558_v15, %v573_v16  ;;  %v582_v20 = vcombine.high (!%p12113_p5), %v558_v15, %v573_v16  ;;  %v597_v21 = vcombine.low (!%p12113_p5), %v565_v17, %v580_v18  ;;  %v598_v22 = vcombine.high (!%p12113_p5), %v565_v17, %v580_v18 }
  0x21   : > { %12114 = vst.sshfl [vmem:[#allocation2] sm:$0x11 pattern:$0x73516240] (!%p12113_p5), %v581_v19  ;;  %v589_v23 = vrot.slane (!%p12113_p5), %v581_v19, %v588_v14  ;;  %v596_v24 = vrot.slane (!%p12113_p5), %v582_v20, %v588_v14  ;;  %v605_v25 = vrot.slane (!%p12113_p5), %v597_v21, %v588_v14  ;;  %v612_v26 = vrot.slane (!%p12113_p5), %v598_v22, %v588_v14 }
  0x22   : > { %12115 = vst.sshfl [vmem:[#allocation2 + $0x4] sm:$0x11 pattern:$0x73516240] (!%p12113_p5), %v582_v20 }
  0x23   : > { %12116 = vst.sshfl [vmem:[#allocation2 + $0x8] sm:$0x11 pattern:$0x73516240] (!%p12113_p5), %v597_v21  ;;  %v613_v27 = vcombine.high (!%p12113_p5), %v589_v23, %v13422_v9  ;;  %v614_v28 = vcombine.high (!%p12113_p5), %v596_v24, %v13422_v9  ;;  %v615_v29 = vcombine.high (!%p12113_p5), %v605_v25, %v13422_v9  ;;  %v616_v30 = vcombine.high (!%p12113_p5), %v612_v26, %v13422_v9 }
  0x24   : > { %12117 = vst.sshfl [vmem:[#allocation2 + $0xc] sm:$0x11 pattern:$0x73516240] %v598_v22 }
  0x25   : > { %618 = vst [vmem:[#allocation2 + $0x2] sm:$0x3] %v613_v27  ;;  %620 = vst [vmem:[#allocation2 + $0x6] sm:$0x3] %v614_v28 }
  0x26   : > { %622 = vst [vmem:[#allocation2 + $0xa] sm:$0x3] %v615_v29  ;;  %624 = vst [vmem:[#allocation2 + $0xe] sm:$0x3] %v616_v30 }
  0x27 PF: > { %v12758_v31 = vld [vmem:[%s13551_s27 + $0x4] ss:$16 sps:$4 sm:$0xff]   ;;  %v12760_v32 = vld [vmem:[%s13551_s27] ss:$16 sps:$4 sm:$0xff]   ;;  %v16678_v33 = vmov 0   ;;  %v646_v41 = vlaneseq  ;;  %v13425_v27 = vmov 0.0   ;;  %s16812_s19 = scalar_lea.vmem %s16661_s3, %s13558_s12 }
  0x28   : > { %902 = vmatprep.mubr.bf16.mxu0 %v16678_v33  ;;  %945 = vmatprep.mubr.bf16.mxu1 %v16678_v33  ;;  %v12761_v34 = vld [vmem:[%s13551_s27 + $0x24] ss:$16 sps:$4 sm:$0xff]   ;;  %v12763_v35 = vld [vmem:[%s13551_s27 + $0x20] ss:$16 sps:$4 sm:$0xff]   ;;  %v13424_v39 = vmov 1983009808  }
  0x29   : > { %870 = vmatprep.subr.bf16.mxu0 %v12758_v31  ;;  %v12764_v36 = vld [vmem:[%s13551_s27 + $0x44] ss:$16 sps:$4 sm:$0xff]   ;;  %v12766_v37 = vld [vmem:[%s13551_s27 + $0x40] ss:$16 sps:$4 sm:$0xff]   ;;  %v644_v40 = vunpack.c.l.s4 %v13424_v39  ;;  %v13606_v53 = vshrl.u32 %v646_v41, 7  ;;  %p12486_p6 = scmp.ne.s32.totalorder %s13410_s17, 1 }
  0x2a   : > { %871 = vmatpush1.bf16.msra.mxu0 %v12760_v32  ;;  %v12767_v38 = vld [vmem:[%s13551_s27 + $0x64] ss:$16 sps:$4 sm:$0xff]   ;;  %v12769_v42 = vld [vmem:[%s13551_s27 + $0x60] ss:$16 sps:$4 sm:$0xff]   ;;  %v12782_v54 = vld [vmem:[%s13551_s27 + $0xc] ss:$16 sps:$4 sm:$0xff]  }
  0x2b   : > { %872 = vmatprep.subr.bf16.mxu0 %v12761_v34  ;;  %v12770_v43 = vld [vmem:[%s13551_s27 + $0x84] ss:$16 sps:$4 sm:$0xff]   ;;  %v12772_v44 = vld [vmem:[%s13551_s27 + $0x80] ss:$16 sps:$4 sm:$0xff]   ;;  %v645_v52 = vunpack.c.0.s8 %v644_v40  ;;  %16809 = vst [vmem:[#allocation12_spill] sm:$0xff] %v13606_v53  ;;  %913 = vmatprep.subr.bf16.mxu1 %v12782_v54 }
  0x2c   : > { %v625_v45 = vld [vmem:[#allocation2] sm:$0x3]  ;;  %v626_v46 = vld [vmem:[#allocation2 + $0x2] sm:$0x3]  ;;  %v627_v47 = vld [vmem:[#allocation2 + $0x4] sm:$0x3] }
  0x2d   : > { %v628_v48 = vld [vmem:[#allocation2 + $0x6] sm:$0x3]  ;;  %v629_v49 = vld [vmem:[#allocation2 + $0x8] sm:$0x3]  ;;  %v630_v50 = vld [vmem:[#allocation2 + $0xa] sm:$0x3]  ;;  %v13613_v59 = vsub.s32 %v645_v52, %v13606_v53  ;;  %v641_v61 = vcombine.low %v625_v45, %v626_v46 }
  0x2e   : > { %873 = vmatpush1.bf16.msra.mxu0 %v12763_v35  ;;  %v631_v51 = vld [vmem:[#allocation2 + $0xc] sm:$0x3]  ;;  %v12784_v55 = vld [vmem:[%s13551_s27 + $0x8] ss:$16 sps:$4 sm:$0xff]   ;;  %v632_v56 = vld [vmem:[#allocation2 + $0xe] sm:$0x3]  ;;  %v642_v62 = vcombine.low %v627_v47, %v628_v48  ;;  %v658_v63 = vcombine.low %v629_v49, %v630_v50 }
  0x2f   : > { %874 = vmatprep.subr.bf16.mxu0 %v12764_v36  ;;  %v12785_v57 = vld [vmem:[%s13551_s27 + $0x2c] ss:$16 sps:$4 sm:$0xff]   ;;  %v12773_v58 = vld [vmem:[%s13551_s27 + $0xa4] ss:$16 sps:$4 sm:$0xff]   ;;  %914 = vmatpush1.bf16.msra.mxu1 %v12784_v55  ;;  %v12787_v60 = vld [vmem:[%s13551_s27 + $0x28] ss:$16 sps:$4 sm:$0xff]   ;;  %v659_v0 = vcombine.low %v631_v51, %v632_v56  ;;  %v649_v7 = vrot.slane %v641_v61, %v13613_v59 }
  0x30   : > { %915 = vmatprep.subr.bf16.mxu1 %v12785_v57  ;;  %v12788_v1 = vld [vmem:[%s13551_s27 + $0x4c] ss:$16 sps:$4 sm:$0xff]   ;;  %v12775_v2 = vld [vmem:[%s13551_s27 + $0xa0] ss:$16 sps:$4 sm:$0xff]   ;;  %v12776_v3 = vld [vmem:[%s13551_s27 + $0xc4] ss:$16 sps:$4 sm:$0xff]   ;;  %v656_v8 = vrot.slane %v642_v62, %v13613_v59  ;;  %v666_v9 = vrot.slane %v658_v63, %v13613_v59 }
  0x31   : > { %v12778_v4 = vld [vmem:[%s13551_s27 + $0xc0] ss:$16 sps:$4 sm:$0xff]   ;;  %v12790_v5 = vld [vmem:[%s13551_s27 + $0x48] ss:$16 sps:$4 sm:$0xff]   ;;  %v12779_v6 = vld [vmem:[%s13551_s27 + $0xe4] ss:$16 sps:$4 sm:$0xff]   ;;  %v673_v10 = vrot.slane %v659_v0, %v13613_v59 }
  0x32   : > { %875 = vmatpush1.bf16.msra.mxu0 %v12766_v37  ;;  %v12791_v11 = vld [vmem:[%s13551_s27 + $0x6c] ss:$16 sps:$4 sm:$0xff]   ;;  %v12793_v12 = vld [vmem:[%s13551_s27 + $0x68] ss:$16 sps:$4 sm:$0xff]   ;;  %v12781_v14 = vld [vmem:[%s13551_s27 + $0xe0] ss:$16 sps:$4 sm:$0xff]   ;;  %v657_v15 = vcombine.low %v649_v7, %v656_v8 }
  0x33   : > { %876 = vmatprep.subr.bf16.mxu0 %v12767_v38  ;;  %916 = vmatpush1.bf16.msra.mxu1 %v12787_v60  ;;  %v12794_v13 = vld [vmem:[%s13551_s27 + $0x8c] ss:$16 sps:$4 sm:$0xff]   ;;  %v674_v16 = vcombine.low %v666_v9, %v673_v10  ;;  %v12796_v17 = vld [vmem:[%s13551_s27 + $0x88] ss:$16 sps:$4 sm:$0xff]   ;;  %v12807_v24 = vld [vmem:[%s13571_s28 + $0x4] ss:$12 sps:$4 sm:$0xff]  }
  0x34   : > { %917 = vmatprep.subr.bf16.mxu1 %v12788_v1  ;;  %v12797_v18 = vld [vmem:[%s13551_s27 + $0xac] ss:$16 sps:$4 sm:$0xff]   ;;  %v12799_v20 = vld [vmem:[%s13551_s27 + $0xa8] ss:$16 sps:$4 sm:$0xff]   ;;  %957 = vst [vmem:[#allocation3] sm:$0xf] %v13425_v27 }
  0x35   : > { %v677_v19 = vpack.c.bf16 %v674_v16, %v657_v15  ;;  %v12800_v21 = vld [vmem:[%s13551_s27 + $0xcc] ss:$16 sps:$4 sm:$0xff]   ;;  %v12802_v22 = vld [vmem:[%s13551_s27 + $0xc8] ss:$16 sps:$4 sm:$0xff]   ;;  %958 = vst [vmem:[#allocation3 + $0x4] sm:$0xf] %v13425_v27 }
  0x36   : > { %877 = vmatpush1.bf16.msra.mxu0 %v12769_v42  ;;  %v12803_v23 = vld [vmem:[%s13551_s27 + $0xec] ss:$16 sps:$4 sm:$0xff]   ;;  %v12808_v26 = vld [vmem:[%s13551_s27 + $0xe8] ss:$16 sps:$4 sm:$0xff]   ;;  %959 = vst [vmem:[#allocation3 + $0x8] sm:$0xf] %v13425_v27 }
  0x37   : > { %878 = vmatprep.subr.bf16.mxu0 %v12770_v43  ;;  %918 = vmatpush1.bf16.msra.mxu1 %v12790_v5  ;;  %v12805_v25 = vld [vmem:[%s13571_s28] ss:$12 sps:$4 sm:$0xff]   ;;  %v12811_v28 = vld [vmem:[%s13571_s28 + $0x1c] ss:$12 sps:$4 sm:$0xff]   ;;  %v12809_v29 = vld [vmem:[%s13571_s28 + $0x18] ss:$12 sps:$4 sm:$0xff]  }
  0x38   : > { %919 = vmatprep.subr.bf16.mxu1 %v12791_v11  ;;  %v12814_v30 = vld [vmem:[%s13571_s28 + $0x34] ss:$12 sps:$4 sm:$0xff]   ;;  %v12812_v31 = vld [vmem:[%s13571_s28 + $0x30] ss:$12 sps:$4 sm:$0xff]   ;;  %v12817_v34 = vld [vmem:[%s13571_s28 + $0x4c] ss:$12 sps:$4 sm:$0xff]  }
  0x39   : > { %v12815_v32 = vld [vmem:[%s13571_s28 + $0x48] ss:$12 sps:$4 sm:$0xff]   ;;  %v12820_v35 = vld [vmem:[%s13571_s28 + $0x64] ss:$12 sps:$4 sm:$0xff]   ;;  %v12818_v36 = vld [vmem:[%s13571_s28 + $0x60] ss:$12 sps:$4 sm:$0xff]  }
  0x3a   : > { %879 = vmatpush1.bf16.msra.mxu0 %v12772_v44  ;;  %v12833_v37 = vld [vmem:[%s13571_s28 + $0xc8] ss:$12 sps:$4 sm:$0xff]   ;;  %v12838_v40 = vld [vmem:[%s13571_s28 + $0xe0] ss:$12 sps:$4 sm:$0xff]   ;;  %v12821_v42 = vld [vmem:[%s13571_s28 + $0x78] ss:$12 sps:$4 sm:$0xff]  }
  0x3b   : > { %880 = vmatprep.subr.bf16.mxu0 %v12773_v58  ;;  %920 = vmatpush1.bf16.msra.mxu1 %v12793_v12  ;;  %v12834_v38 = vld [vmem:[%s13571_s28 + $0x8] ss:$12 sps:$4 sm:$0xff]   ;;  %v12839_v41 = vld [vmem:[%s13571_s28 + $0x20] ss:$12 sps:$4 sm:$0xff]   ;;  %v12843_v43 = vld [vmem:[%s13571_s28 + $0xf8] ss:$12 sps:$4 sm:$0xff]  }
  0x3c   : > { %921 = vmatprep.subr.bf16.mxu1 %v12794_v13  ;;  %v12823_v39 = vld [vmem:[%s13571_s28 + $0x7c] ss:$12 sps:$4 sm:$0xff]   ;;  %v12826_v44 = vld [vmem:[%s13571_s28 + $0x94] ss:$12 sps:$4 sm:$0xff]   ;;  %v12844_v45 = vld [vmem:[%s13571_s28 + $0x38] ss:$12 sps:$4 sm:$0xff]  }
  0x3d   : > { %v12824_v46 = vld [vmem:[%s13571_s28 + $0x90] ss:$12 sps:$4 sm:$0xff]   ;;  %v12829_v48 = vld [vmem:[%s13571_s28 + $0xac] ss:$12 sps:$4 sm:$0xff]   ;;  %v12827_v50 = vld [vmem:[%s13571_s28 + $0xa8] ss:$12 sps:$4 sm:$0xff]  }
  0x3e   : > { %881 = vmatpush1.bf16.msra.mxu0 %v12775_v2  ;;  %v12848_v47 = vld [vmem:[%s13571_s28 + $0x110] ss:$12 sps:$4 sm:$0xff]   ;;  %v12853_v51 = vld [vmem:[%s13571_s28 + $0x128] ss:$12 sps:$4 sm:$0xff]   ;;  %v12830_v55 = vld [vmem:[%s13571_s28 + $0xc0] ss:$12 sps:$4 sm:$0xff]  }
  0x3f   : > { %882 = vmatprep.subr.bf16.mxu0 %v12776_v3  ;;  %922 = vmatpush1.bf16.msra.mxu1 %v12796_v17  ;;  %v12849_v49 = vld [vmem:[%s13571_s28 + $0x50] ss:$12 sps:$4 sm:$0xff]   ;;  %v12854_v54 = vld [vmem:[%s13571_s28 + $0x68] ss:$12 sps:$4 sm:$0xff]   ;;  %v12858_v56 = vld [vmem:[%s13571_s28 + $0x140] ss:$12 sps:$4 sm:$0xff]  }
  0x40   : > { %923 = vmatprep.subr.bf16.mxu1 %v12797_v18  ;;  %v12832_v52 = vld [vmem:[%s13571_s28 + $0xc4] ss:$12 sps:$4 sm:$0xff]   ;;  %v12837_v57 = vld [vmem:[%s13571_s28 + $0xdc] ss:$12 sps:$4 sm:$0xff]   ;;  %v12859_v58 = vld [vmem:[%s13571_s28 + $0x80] ss:$12 sps:$4 sm:$0xff]  }
  0x41   : > { %v12835_v60 = vld [vmem:[%s13571_s28 + $0xd8] ss:$12 sps:$4 sm:$0xff]   ;;  %v12842_v62 = vld [vmem:[%s13571_s28 + $0xf4] ss:$12 sps:$4 sm:$0xff]   ;;  %v12840_v0 = vld [vmem:[%s13571_s28 + $0xf0] ss:$12 sps:$4 sm:$0xff]  }
  0x42   : > { %883 = vmatpush1.bf16.msra.mxu0 %v12778_v4  ;;  %v12863_v61 = vld [vmem:[%s13571_s28 + $0x158] ss:$12 sps:$4 sm:$0xff]   ;;  %v12868_v1 = vld [vmem:[%s13571_s28 + $0x170] ss:$12 sps:$4 sm:$0xff]   ;;  %v12845_v4 = vld [vmem:[%s13571_s28 + $0x108] ss:$12 sps:$4 sm:$0xff]  }
  0x43   : > { %884 = vmatprep.subr.bf16.mxu0 %v12779_v6  ;;  %924 = vmatpush1.bf16.msra.mxu1 %v12799_v20  ;;  %v12864_v63 = vld [vmem:[%s13571_s28 + $0x98] ss:$12 sps:$4 sm:$0xff]   ;;  %v12869_v3 = vld [vmem:[%s13571_s28 + $0xb0] ss:$12 sps:$4 sm:$0xff]   ;;  %v12850_v6 = vld [vmem:[%s13571_s28 + $0x120] ss:$12 sps:$4 sm:$0xff]  }
  0x44   : > { %925 = vmatprep.subr.bf16.mxu1 %v12800_v21  ;;  %v12847_v2 = vld [vmem:[%s13571_s28 + $0x10c] ss:$12 sps:$4 sm:$0xff]   ;;  %v12852_v5 = vld [vmem:[%s13571_s28 + $0x124] ss:$12 sps:$4 sm:$0xff]   ;;  %v12857_v7 = vld [vmem:[%s13571_s28 + $0x13c] ss:$12 sps:$4 sm:$0xff]  }
  0x45   : > { %v12855_v8 = vld [vmem:[%s13571_s28 + $0x138] ss:$12 sps:$4 sm:$0xff]   ;;  %v12862_v9 = vld [vmem:[%s13571_s28 + $0x154] ss:$12 sps:$4 sm:$0xff]   ;;  %v12860_v10 = vld [vmem:[%s13571_s28 + $0x150] ss:$12 sps:$4 sm:$0xff]  }
  0x46   : > { %885 = vmatpush1.bf16.msra.mxu0 %v12781_v14  ;;  %v12867_v11 = vld [vmem:[%s13571_s28 + $0x16c] ss:$12 sps:$4 sm:$0xff]   ;;  %v12865_v12 = vld [vmem:[%s13571_s28 + $0x168] ss:$12 sps:$4 sm:$0xff]   ;;  %v13686_v13 = vsub.s32 0, %v13606_v53  ;;  %v13689_v14 = vsub.s32 4, %v13606_v53 }
  0x47   : > { %926 = vmatpush1.bf16.msra.mxu1 %v12802_v22  ;;  %1685 = vmatprep.subr.bf16.mxu0 %v12807_v24  ;;  %v956_v15 = vld [vmem:[%s13556_s30] sm:$0xff]  ;;  %v13693_v16 = vsub.s32 1, %v13606_v53  ;;  %v13696_v17 = vsub.s32 5, %v13606_v53  ;;  %v13703_v22 = vsub.s32 2, %v13606_v53 }
  0x48   : > { %927 = vmatprep.subr.bf16.mxu1 %v12803_v23  ;;  %16810 = vst [vmem:[#allocation13_spill] sm:$0xff] %v13686_v13  ;;  %v1029_v18 = vrot.slane %v956_v15, %v13686_v13  ;;  %v13706_v23 = vsub.s32 6, %v13606_v53 }
  0x49   : > { %903 = vmatmul.mubr.bf16.vlgmr.msra.gmra.mrb[0].mxu0 %v677_v19  ;;  %16811 = vst [vmem:[#allocation14_spill] sm:$0xff] %v13693_v16  ;;  %v1083_v20 = vrot.slane %v956_v15, %v13693_v16  ;;  %v1087_v21 = vrot.slane %v956_v15, %v13696_v17 }
  0x4a   : > { %1686 = vmatpush1.bf16.msra.mxu0 %v12805_v25  ;;  %v1039_v24 = vrot.slane %v1029_v18, %v13686_v13 }
  0x4b   : > { %928 = vmatpush1.bf16.msra.mxu1 %v12808_v26  ;;  %1687 = vmatprep.subr.bf16.mxu0 %v12811_v28  ;;  %v1093_v26 = vrot.slane %v1083_v20, %v13693_v16  ;;  %v1097_v27 = vrot.slane %v1087_v21, %v13693_v16  ;;  %v1137_v28 = vrot.slane %v956_v15, %v13703_v22 }
  0x4c   : > { %12499 = vmatprep.subr.bf16.mxu1 %v12833_v37 }
  0x4e   : > { %946 = vmatmul.mubr.bf16.vlgmr.msra.gmra.mrb[0].mxu1 %v677_v19  ;;  %1688 = vmatpush1.bf16.msra.mxu0 %v12809_v29  ;;  %v1033_v19 = vrot.slane %v956_v15, %v13689_v14  ;;  %v1141_v29 = vrot.slane %v956_v15, %v13706_v23 }
  0x4f   : > { %1689 = vmatprep.subr.bf16.mxu0 %v12814_v30  ;;  %12500 = vmatpush3.bf16.msra.mxu1 %v12834_v38  ;;  %v1017_v38 = vld [vmem:[#allocation3] sm:$0xf] }
  0x50   : > { %12501 = vmatprep.subr.bf16.mxu1 %v12838_v40  ;;  %v1043_v25 = vrot.slane %v1033_v19, %v13686_v13 }
  0x52   : > { %1690 = vmatpush1.bf16.msra.mxu0 %v12812_v31  ;;  %v1046_v30 = vcombine.low %v1039_v24, %v1043_v25  ;;  %v1100_v31 = vcombine.low %v1093_v26, %v1097_v27 }
  0x53   : > { %1691 = vmatprep.subr.bf16.mxu0 %v12817_v34  ;;  %12502 = vmatpush3.bf16.msra.mxu1 %v12839_v41  ;;  %v1151_v34 = vrot.slane %v1141_v29, %v13703_v22  ;;  %v1072_v41 = vld [vmem:[#allocation3 + $0x4] sm:$0xf] }
  0x54   : > { %12503 = vmatprep.subr.bf16.mxu1 %v12843_v43  ;;  %v13723_v37 = vrot.slane %v1046_v30, %v13613_v59 }
  0x56   : > { %1692 = vmatpush1.bf16.msra.mxu0 %v12815_v32  ;;  %v1147_v32 = vrot.slane %v1137_v28, %v13703_v22 }
  0x57   : > { %1693 = vmatprep.subr.bf16.mxu0 %v12820_v35  ;;  %12504 = vmatpush3.bf16.msra.mxu1 %v12844_v45  ;;  %v13717_v35 = vsub.s32 3, %v13606_v53  ;;  %v1232_v45 = vld [vmem:[%s16812_s19] sm:$0x3] }
  0x58   : > { %12505 = vmatprep.subr.bf16.mxu1 %v12848_v47  ;;  %v1154_v40 = vcombine.low %v1147_v32, %v1151_v34  ;;  %v1055_v47 = vmul.f32 %v13723_v37, %v1017_v38 }
  0x5a   : > { %1694 = vmatpush1.bf16.msra.mxu0 %v12818_v36  ;;  %v13720_v36 = vsub.s32 7, %v13606_v53 }
  0x5b   : > { %1695 = vmatprep.subr.bf16.mxu0 %v12823_v39  ;;  %12506 = vmatpush3.bf16.msra.mxu1 %v12849_v49  ;;  %v13726_v39 = vrot.slane %v1100_v31, %v13613_v59 }
  0x5c   : > { %12507 = vmatprep.subr.bf16.mxu1 %v12853_v51  ;;  %v1194_v43 = vrot.slane %v956_v15, %v13720_v36 }
  0x5d   : > { %v1109_v51 = vmul.f32 %v13726_v39, %v1072_v41 }
  0x5e   : > { %1696 = vmatpush1.bf16.msra.mxu0 %v12821_v42  ;;  %v1190_v42 = vrot.slane %v956_v15, %v13717_v35 }
  0x5f   : > { %1697 = vmatprep.subr.bf16.mxu0 %v12826_v44  ;;  %12508 = vmatpush3.bf16.msra.mxu1 %v12854_v54 }
  0x60   : > { %12509 = vmatprep.subr.bf16.mxu1 %v12858_v56  ;;  %v1204_v56 = vrot.slane %v1194_v43, %v13717_v35 }
  0x62   : > { %1698 = vmatpush1.bf16.msra.mxu0 %v12824_v46 }
  0x63   : > { %1699 = vmatprep.subr.bf16.mxu0 %v12829_v48  ;;  %12510 = vmatpush3.bf16.msra.mxu1 %v12859_v58  ;;  %v1241_v58 = vrot.slane %v1232_v45, %v13693_v16 }
  0x64   : > { %12511 = vmatprep.subr.bf16.mxu1 %v12863_v61 }
  0x66   : > { %1700 = vmatpush1.bf16.msra.mxu0 %v12827_v50 }
  0x67   : > { %1701 = vmatprep.subr.bf16.mxu0 %v12832_v52  ;;  %12512 = vmatpush3.bf16.msra.mxu1 %v12864_v63  ;;  %v13738_v52 = vrot.slane %v1154_v40, %v13613_v59 }
  0x68   : > { %12513 = vmatprep.subr.bf16.mxu1 %v12868_v1  ;;  %v1073_v1 = vld [vmem:[#allocation3 + $0x8] sm:$0xf] }
  0x6a   : > { %1702 = vmatpush1.bf16.msra.mxu0 %v12830_v55  ;;  %v1200_v55 = vrot.slane %v1190_v42, %v13717_v35 }
  0x6b   : > { %1703 = vmatprep.subr.bf16.mxu0 %v12837_v57  ;;  %12514 = vmatpush3.bf16.msra.mxu1 %v12869_v3  ;;  %v1237_v57 = vrot.slane %v1232_v45, %v13686_v13 }
  0x6d   : > { %v1242_v19 = vcombine.low %v1237_v57, %v1241_v58 }
  0x6e   : > { %1704 = vmatpush1.bf16.msra.mxu0 %v12835_v60 }
  0x6f   : > { %1705 = vmatprep.subr.bf16.mxu0 %v12842_v62  ;;  %v13757_v34 = vrot.slane %v1242_v19, %v13613_v59 }
  0x72   : > { %1706 = vmatpush1.bf16.msra.mxu0 %v12840_v0  ;;  %v1018_v0 = vld [vmem:[#allocation3 + $0x4] sm:$0xf] }
  0x73   : > { %1707 = vmatprep.subr.bf16.mxu0 %v12847_v2  ;;  %v1126_v2 = vld [vmem:[#allocation3 + $0x8] sm:$0xf] }
  0x74   : > { %v1163_v18 = vmul.f32 %v13738_v52, %v1126_v2 }
  0x76   : > { %1708 = vmatpush1.bf16.msra.mxu0 %v12845_v4 }
  0x77   : > { %1709 = vmatprep.subr.bf16.mxu0 %v12852_v5 }
  0x7a   : > { %1710 = vmatpush1.bf16.msra.mxu0 %v12850_v6 }
  0x7b   : > { %1711 = vmatprep.subr.bf16.mxu0 %v12857_v7  ;;  %v1019_v7 = vld [vmem:[#allocation3 + $0x8] sm:$0xf] }
  0x7c   : > { %v1057_v20 = vmul.f32 %v13723_v37, %v1019_v7 }
  0x7e   : > { %1712 = vmatpush1.bf16.msra.mxu0 %v12855_v8  ;;  %v1056_v8 = vmul.f32 %v13723_v37, %v1018_v0 }
  0x7f   : > { %1713 = vmatprep.subr.bf16.mxu0 %v12862_v9  ;;  %v1110_v9 = vmul.f32 %v13726_v39, %v1073_v1 }
  0x81   : > { %v1118_v26 = vadd.f32 %v1110_v9, %v1056_v8 }
  0x82   : > { %1714 = vmatpush1.bf16.msra.mxu0 %v12860_v10  ;;  %v1117_v10 = vadd.f32 %v1109_v51, %v1055_v47 }
  0x83   : > { %1715 = vmatprep.subr.bf16.mxu0 %v12867_v11  ;;  %v1207_v11 = vcombine.low %v1200_v55, %v1204_v56 }
  0x84   : > { %v1171_v32 = vadd.f32 %v1163_v18, %v1117_v10 }
  0x85   : > { %v13753_v27 = vrot.slane %v1207_v11, %v13613_v59 }
  0x86   : > { %1716 = vmatpush1.bf16.msra.mxu0 %v12865_v12 }
 0x11c   : > { %v904_v44 = vpop.f32.mrb[0].mxu0 }
 0x11d   : > { %v906_v46 = vpop.f32.mrb[1].mxu0 }
 0x11e   : > { %v964_v48 = vcombine.low %v904_v44, %v906_v46  ;;  %v965_v49 = vcombine.high %v904_v44, %v906_v46  ;;  %v908_v50 = vpop.f32.mrb[2].mxu0 }
 0x11f   : > { %v910_v54 = vpop.f32.mrb[3].mxu0 }
 0x120   : > { %v972_v60 = vrot.slane %v964_v48, %v13613_v59  ;;  %v979_v61 = vrot.slane %v965_v49, %v13613_v59  ;;  %12150 = vst.sshfl [vmem:[#allocation3 + $0xc] sm:$0x33 pattern:$0x76325410] %v964_v48  ;;  %v982_v62 = vcombine.low %v908_v50, %v910_v54  ;;  %v983_v63 = vcombine.high %v908_v50, %v910_v54 }
 0x121   : > { %12151 = vst.sshfl [vmem:[#allocation3 + $0x14] sm:$0x33 pattern:$0x76325410] %v965_v49 }
 0x122   : > { %v980_v3 = vcombine.high %v972_v60, %v972_v60  ;;  %v981_v4 = vcombine.high %v979_v61, %v979_v61  ;;  %v990_v5 = vrot.slane %v982_v62, %v13613_v59  ;;  %v997_v6 = vrot.slane %v983_v63, %v13613_v59  ;;  %12152 = vst.sshfl [vmem:[#allocation3 + $0x1c] sm:$0x33 pattern:$0x76325410] %v982_v62 }
 0x123   : > { %12153 = vst.sshfl [vmem:[#allocation3 + $0x24] sm:$0x33 pattern:$0x76325410] %v983_v63 }
 0x124   : > { %1010 = vst [vmem:[#allocation3 + $0x10] sm:$0xf] %v980_v3  ;;  %1012 = vst [vmem:[#allocation3 + $0x18] sm:$0xf] %v981_v4  ;;  %v998_v12 = vcombine.high %v990_v5, %v990_v5  ;;  %v999_v15 = vcombine.high %v997_v6, %v997_v6 }
 0x126   : > { %1014 = vst [vmem:[#allocation3 + $0x20] sm:$0xf] %v998_v12  ;;  %1016 = vst [vmem:[#allocation3 + $0x28] sm:$0xf] %v999_v15 }
 0x127   : > { %v1020_v21 = vld [vmem:[#allocation3 + $0xc] sm:$0xf] }
 0x128   : > { %v1022_v24 = vld [vmem:[#allocation3 + $0x14] sm:$0xf]  ;;  %v1074_v25 = vld [vmem:[#allocation3 + $0xc] sm:$0xf]  ;;  %v1058_v40 = vmul.f32 %v13723_v37, %v1020_v21 }
 0x129   : > { %v1076_v28 = vld [vmem:[#allocation3 + $0x14] sm:$0xf]  ;;  %v1111_v29 = vmul.f32 %v13726_v39, %v1074_v25  ;;  %v1127_v30 = vld [vmem:[#allocation3 + $0xc] sm:$0xf]  ;;  %v1024_v38 = vld [vmem:[#allocation3 + $0x1c] sm:$0xf]  ;;  %v1060_v41 = vmul.f32 %v13723_v37, %v1022_v24 }
 0x12a   : > { %v1129_v31 = vld [vmem:[#allocation3 + $0x14] sm:$0xf]  ;;  %v1078_v42 = vld [vmem:[#allocation3 + $0x1c] sm:$0xf]  ;;  %v1113_v43 = vmul.f32 %v13726_v39, %v1076_v28  ;;  %v1164_v45 = vmul.f32 %v13738_v52, %v1127_v30  ;;  %v1062_v46 = vmul.f32 %v13723_v37, %v1024_v38  ;;  %v1133_v49 = vld [vmem:[#allocation3 + $0x24] sm:$0xf] }
 0x12b   : > { %v1131_v44 = vld [vmem:[#allocation3 + $0x1c] sm:$0xf]  ;;  %v1115_v47 = vmul.f32 %v13726_v39, %v1078_v42  ;;  %v1119_v48 = vadd.f32 %v1111_v29, %v1057_v20  ;;  %v1166_v50 = vmul.f32 %v13738_v52, %v1129_v31  ;;  %v1179_v51 = vld [vmem:[#allocation3 + $0xc] sm:$0xf]  ;;  %v1181_v54 = vld [vmem:[#allocation3 + $0x14] sm:$0xf]  ;;  %v1170_v60 = vmul.f32 %v13738_v52, %v1133_v49 }
 0x12c   : > { %v1021_v55 = vld [vmem:[#allocation3 + $0x10] sm:$0xf]  ;;  %v1023_v56 = vld [vmem:[#allocation3 + $0x18] sm:$0xf]  ;;  %v1168_v58 = vmul.f32 %v13738_v52, %v1131_v44  ;;  %v1172_v61 = vadd.f32 %v1164_v45, %v1118_v26  ;;  %v1216_v62 = vmul.f32 %v13753_v27, %v1179_v51  ;;  %v1218_v5 = vmul.f32 %v13753_v27, %v1181_v54  ;;  %v1183_v21 = vld [vmem:[#allocation3 + $0x1c] sm:$0xf] }
 0x12d   : > { %v1075_v57 = vld [vmem:[#allocation3 + $0x10] sm:$0xf]  ;;  %v1059_v63 = vmul.f32 %v13723_v37, %v1021_v55  ;;  %v1061_v0 = vmul.f32 %v13723_v37, %v1023_v56  ;;  %v1077_v1 = vld [vmem:[#allocation3 + $0x18] sm:$0xf]  ;;  %v1079_v6 = vld [vmem:[#allocation3 + $0x20] sm:$0xf] }
 0x12e   : > { %v1112_v2 = vmul.f32 %v13726_v39, %v1075_v57  ;;  %v1128_v3 = vld [vmem:[#allocation3 + $0x10] sm:$0xf]  ;;  %v1130_v4 = vld [vmem:[#allocation3 + $0x18] sm:$0xf]  ;;  %v1114_v7 = vmul.f32 %v13726_v39, %v1077_v1  ;;  %v1132_v8 = vld [vmem:[#allocation3 + $0x20] sm:$0xf]  ;;  %v1224_v12 = vadd.f32 %v1216_v62, %v1171_v32  ;;  %v1116_v15 = vmul.f32 %v13726_v39, %v1079_v6 }
 0x12f   : > { %v1165_v9 = vmul.f32 %v13738_v52, %v1128_v3  ;;  %v1167_v10 = vmul.f32 %v13738_v52, %v1130_v4  ;;  %v1180_v11 = vld [vmem:[#allocation3 + $0x10] sm:$0xf]  ;;  %v1121_v18 = vadd.f32 %v1113_v43, %v1059_v63  ;;  %v1123_v19 = vadd.f32 %v1115_v47, %v1061_v0  ;;  %v1182_v20 = vld [vmem:[#allocation3 + $0x18] sm:$0xf]  ;;  %v1184_v24 = vld [vmem:[#allocation3 + $0x20] sm:$0xf] }
 0x130   : > { %v1120_v37 = vadd.f32 %v1112_v2, %v1058_v40  ;;  %v1122_v25 = vadd.f32 %v1114_v7, %v1060_v41  ;;  %v1169_v26 = vmul.f32 %v13738_v52, %v1132_v8  ;;  %v1185_v29 = vld [vmem:[#allocation3 + $0x24] sm:$0xf]  ;;  %v1186_v30 = vld [vmem:[#allocation3 + $0x28] sm:$0xf]  ;;  %v1217_v31 = vmul.f32 %v13753_v27, %v1180_v11 }
 0x131   : > { %v1173_v28 = vadd.f32 %v1165_v9, %v1119_v48  ;;  %v1124_v38 = vadd.f32 %v1116_v15, %v1062_v46  ;;  %v1175_v44 = vadd.f32 %v1167_v10, %v1121_v18  ;;  %v1219_v32 = vmul.f32 %v13753_v27, %v1182_v20 }
 0x132   : > { %v1174_v42 = vadd.f32 %v1166_v50, %v1120_v37  ;;  %v1176_v39 = vadd.f32 %v1168_v58, %v1122_v25  ;;  %v1177_v40 = vadd.f32 %v1169_v26, %v1123_v19  ;;  %v1220_v43 = vmul.f32 %v13753_v27, %v1183_v21 }
 0x133   : > { %v1221_v45 = vmul.f32 %v13753_v27, %v1184_v24  ;;  %v1178_v47 = vadd.f32 %v1170_v60, %v1124_v38  ;;  %v1222_v41 = vmul.f32 %v13753_v27, %v1185_v29  ;;  %v1223_v52 = vmul.f32 %v13753_v27, %v1186_v30 }
 0x134   : > { %v1225_v48 = vadd.f32 %v1217_v31, %v1172_v61  ;;  %v1226_v49 = vadd.f32 %v1218_v5, %v1173_v28  ;;  %v1227_v51 = vadd.f32 %v1219_v32, %v1174_v42  ;;  %v1228_v54 = vadd.f32 %v1220_v43, %v1175_v44 }
 0x135   : > { %v1229_v46 = vadd.f32 %v1221_v45, %v1176_v39  ;;  %v1230_v50 = vadd.f32 %v1222_v41, %v1177_v40  ;;  %v1231_v55 = vadd.f32 %v1223_v52, %v1178_v47  ;;  %v1251_v56 = vadd.f32 %v13757_v34, %v1224_v12 }
 0x136   : > { %v1252_v57 = vadd.f32 %v13757_v34, %v1225_v48  ;;  %v1253_v58 = vadd.f32 %v13757_v34, %v1226_v49  ;;  %v1254_v62 = vadd.f32 %v13757_v34, %v1227_v51  ;;  %v1255_v60 = vadd.f32 %v13757_v34, %v1228_v54 }
 0x137   : > { %v1256_v63 = vadd.f32 %v13757_v34, %v1229_v46  ;;  %v1257_v27 = vadd.f32 %v13757_v34, %v1230_v50  ;;  %v12154_v61 = vmul.f32 -1.442695, %v1251_v56  ;;  %v1258_v1 = vadd.f32 %v13757_v34, %v1231_v55 }
 0x138   : > { %v12155_v0 = vmul.f32 -1.442695, %v1252_v57  ;;  %v12156_v2 = vmul.f32 -1.442695, %v1253_v58  ;;  %v12157_v3 = vmul.f32 -1.442695, %v1254_v62 }
 0x139   : > { %13014 = vpow2.f32 %v12154_v61  ;;  %v12158_v4 = vmul.f32 -1.442695, %v1255_v60  ;;  %v12159_v5 = vmul.f32 -1.442695, %v1256_v63  ;;  %v12160_v6 = vmul.f32 -1.442695, %v1257_v27 }
 0x13a   : > { %13016 = vpow2.f32 %v12155_v0  ;;  %v12161_v7 = vmul.f32 -1.442695, %v1258_v1 }
 0x13b   : > { %13018 = vpow2.f32 %v12156_v2 }
 0x13c   : > { %13020 = vpow2.f32 %v12157_v3 }
 0x13d   : > { %13022 = vpow2.f32 %v12158_v4 }
 0x13e   : > { %13024 = vpow2.f32 %v12159_v5 }
 0x13f   : > { %13026 = vpow2.f32 %v12160_v6 }
 0x140   : > { %13028 = vpow2.f32 %v12161_v7 }
 0x143   : > { %v13015_v8 = vpop.eup %13014 }
 0x144   : > { %v13017_v9 = vpop.eup %13016  ;;  %v1283_v10 = vadd.f32 1.0, %v13015_v8 }
 0x145   : > { %v13019_v11 = vpop.eup %13018  ;;  %v1284_v12 = vadd.f32 1.0, %v13017_v9 }
 0x146   : > { %v13021_v34 = vpop.eup %13020  ;;  %v1285_v15 = vadd.f32 1.0, %v13019_v11  ;;  %13030 = vrcp.f32 %v1283_v10 }
 0x147   : > { %v13023_v37 = vpop.eup %13022  ;;  %v1286_v18 = vadd.f32 1.0, %v13021_v34  ;;  %13032 = vrcp.f32 %v1284_v12 }
 0x148   : > { %v13025_v19 = vpop.eup %13024  ;;  %v1287_v20 = vadd.f32 1.0, %v13023_v37  ;;  %13034 = vrcp.f32 %v1285_v15 }
 0x149   : > { %v13027_v21 = vpop.eup %13026  ;;  %v1288_v24 = vadd.f32 1.0, %v13025_v19  ;;  %13036 = vrcp.f32 %v1286_v18 }
 0x14a   : > { %v13029_v25 = vpop.eup %13028  ;;  %v1289_v26 = vadd.f32 1.0, %v13027_v21  ;;  %13038 = vrcp.f32 %v1287_v20 }
 0x14b   : > { %v1290_v28 = vadd.f32 1.0, %v13029_v25  ;;  %13040 = vrcp.f32 %v1288_v24 }
 0x14c   : > { %13042 = vrcp.f32 %v1289_v26 }
 0x14d   : > { %13044 = vrcp.f32 %v1290_v28 }
 0x150   : > { %v13031_v29 = vpop.eup %13030 }
 0x151   : > { %v13033_v30 = vpop.eup %13032  ;;  %v13800_v47 = vmul.f32 %v13031_v29, %v1251_v56 }
 0x152   : > { %v13035_v31 = vpop.eup %13034  ;;  %v13792_v44 = vmul.f32 %v13033_v30, %v1252_v57  ;;  %v16675_v30 = vmov 19  }
 0x153   : > { %v13037_v38 = vpop.eup %13036  ;;  %v13794_v32 = vmul.f32 %v13035_v31, %v1253_v58  ;;  %16817 = vst [vmem:[#allocation19_spill] sm:$0xff] %v13800_v47 }
 0x154   : > { %v13039_v42 = vpop.eup %13038  ;;  %16813 = vst [vmem:[#allocation15_spill] sm:$0xff] %v13792_v44  ;;  %v13796_v39 = vmul.f32 %v13037_v38, %v1254_v62  ;;  %v1323_v54 = vcombine.low %v13800_v47, %v13792_v44  ;;  %v13917_v38 = vld [vmem:[%s13576_s2 + $0x18] sm:$0xff] }
 0x155   : > { %16814 = vst [vmem:[#allocation16_spill] sm:$0xff] %v13794_v32  ;;  %v13041_v40 = vpop.eup %13040  ;;  %v13798_v43 = vmul.f32 %v13039_v42, %v1255_v60  ;;  %v7321_v29 = vrot.slane %v13917_v38, %v13720_v36 }
 0x156   : > { %16815 = vst [vmem:[#allocation17_spill] sm:$0xff] %v13796_v39  ;;  %v13043_v45 = vpop.eup %13042  ;;  %v13802_v41 = vmul.f32 %v13041_v40, %v1256_v63  ;;  %v1324_v52 = vcombine.low %v13794_v32, %v13796_v39  ;;  %v1331_v56 = vrot.slane %v1323_v54, %v13613_v59  ;;  %v16676_v40 = vmov 17  }
 0x157   : > { %16816 = vst [vmem:[#allocation18_spill] sm:$0xff] %v13798_v43  ;;  %v13045_v48 = vpop.eup %13044  ;;  %v13806_v49 = vmul.f32 %v13043_v45, %v1257_v27  ;;  %12620 = vset.pattern.permute.xlu0 %v16676_v40  ;;  %v16677_v45 = vmov 16  }
 0x158   : > { %16818 = vst [vmem:[#allocation20_spill] sm:$0xff] %v13802_v41  ;;  %v13808_v51 = vmul.f32 %v13045_v48, %v1258_v1  ;;  %v1341_v46 = vcombine.low %v13798_v43, %v13802_v41  ;;  %v1338_v50 = vrot.slane %v1324_v52, %v13613_v59  ;;  %v947_v1 = vpop.f32.mrb[0].mxu1  ;;  %12619 = vset.pattern.permute.xlu1 %v16677_v45  ;;  %v1769_v52 = vld [vmem:[%s528_s23] sm:$0x3] }
 0x159   : > { %16819 = vst [vmem:[#allocation21_spill] sm:$0xff] %v13806_v49  ;;  %v12466_v2 = vmul.f32 -1.442695, %v947_v1  ;;  %v949_v3 = vpop.f32.mrb[1].mxu1  ;;  %v1774_v48 = vrot.slane %v1769_v52, %v13686_v13  ;;  %v1778_v54 = vrot.slane %v1769_v52, %v13693_v16 }
 0x15a   : > { %16820 = vst [vmem:[#allocation22_spill] sm:$0xff] %v13808_v51  ;;  %v1342_v55 = vcombine.low %v13806_v49, %v13808_v51  ;;  %v1349_v57 = vrot.slane %v1341_v46, %v13613_v59  ;;  %v13820_v62 = vcombine.high %v1331_v56, %v1338_v50  ;;  %v13824_v63 = vcombine.low %v1331_v56, %v1338_v50  ;;  %v951_v5 = vpop.f32.mrb[2].mxu1  ;;  %v13858_v46 = vld [vmem:[%s13576_s2] sm:$0xff]  ;;  %v13861_v50 = vld [vmem:[%s13576_s2 + $0x8] sm:$0xff] }
 0x15b   : > { %v12467_v4 = vmul.f32 -1.442695, %v949_v3  ;;  %13046 = vpow2.f32 %v12466_v2  ;;  %v12468_v6 = vmul.f32 -1.442695, %v951_v5  ;;  %v953_v7 = vpop.f32.mrb[3].mxu1  ;;  %v3424_v52 = vrot.slane %v13861_v50, %v13689_v14 }
 0x15c   : > { %v1356_v58 = vrot.slane %v1342_v55, %v13613_v59  ;;  %v12469_v8 = vmul.f32 -1.442695, %v953_v7  ;;  %v4134_v42 = vrot.slane %v13861_v50, %v13706_v23 }
 0x15d   : > { %13048 = vpow2.f32 %v12467_v4 }
 0x15e   : > { %v13822_v60 = vcombine.high %v1349_v57, %v1356_v58  ;;  %v13826_v27 = vcombine.low %v1349_v57, %v1356_v58  ;;  %13050 = vpow2.f32 %v12468_v6  ;;  %v2347_v6 = vrot.slane %v13858_v46, %v13693_v16 }
 0x15f   : > { %13052 = vpow2.f32 %v12469_v8 }
 0x160   : > { %v1364_v61 = vpack.c.bf16 %v13822_v60, %v13820_v62  ;;  %v1363_v0 = vpack.c.bf16 %v13826_v27, %v13824_v63 }
 0x162   : > { %1717 = vmatprep.mubr.bf16.mxu0 %v1364_v61  ;;  %1760 = vmatprep.mubr.bf16.mxu1 %v1364_v61 }
 0x163   : > { %1718 = vmatmul.mubr.bf16.vlgmr.msra.gmra.mrb[4].mxu0 %v1363_v0  ;;  %1761 = vmatmul.mubr.bf16.vlgmr.msra.gmra.mrb[4].mxu1 %v1363_v0  ;;  %v1964_v0 = vrot.slane %v13858_v46, %v13686_v13 }
 0x165   : > { %v13047_v9 = vpop.eup %13046 }
 0x166   : > { %v11167_v11 = vadd.f32 1.0, %v13047_v9 }
 0x167   : > { %v13049_v10 = vpop.eup %13048 }
 0x168   : > { %v13051_v12 = vpop.eup %13050  ;;  %v11168_v34 = vadd.f32 1.0, %v13049_v10  ;;  %13054 = vrcp.f32 %v11167_v11  ;;  %v2351_v11 = vrot.slane %v13861_v50, %v13693_v16 }
 0x169   : > { %v13053_v15 = vpop.eup %13052  ;;  %v11169_v37 = vadd.f32 1.0, %v13051_v12  ;;  %v2710_v12 = vrot.slane %v13858_v46, %v13703_v22 }
 0x16a   : > { %13056 = vrcp.f32 %v11168_v34  ;;  %v11170_v18 = vadd.f32 1.0, %v13053_v15 }
 0x16b   : > { %13058 = vrcp.f32 %v11169_v37 }
 0x16c   : > { %13060 = vrcp.f32 %v11170_v18 }
 0x172   : > { %v13055_v19 = vpop.eup %13054 }
 0x173   : > { %v13832_v21 = vmul.f32 %v13055_v19, %v947_v1  ;;  %v2714_v19 = vrot.slane %v13861_v50, %v13703_v22 }
 0x174   : > { %v13057_v20 = vpop.eup %13056 }
 0x175   : > { %16821 = vst [vmem:[#allocation23_spill] sm:$0xff] %v13832_v21  ;;  %v13059_v24 = vpop.eup %13058  ;;  %v13834_v25 = vmul.f32 %v13057_v20, %v949_v3  ;;  %v3420_v20 = vrot.slane %v13858_v46, %v13689_v14  ;;  %v16725_v21 = vmov 13  }
 0x176   : > { %v13061_v26 = vpop.eup %13060  ;;  %v13836_v28 = vmul.f32 %v13059_v24, %v951_v5  ;;  %v1968_v5 = vrot.slane %v13861_v50, %v13686_v13 }
 0x177   : > { %16822 = vst [vmem:[#allocation24_spill] sm:$0xff] %v13834_v25  ;;  %v13842_v31 = vmul.f32 %v13061_v26, %v953_v7 }
 0x178   : > { %16823 = vst [vmem:[#allocation25_spill] sm:$0xff] %v13836_v28 }
 0x179   : > { %16824 = vst [vmem:[#allocation26_spill] sm:$0xff] %v13842_v31 }
 0x236   : > { %v1719_v55 = vpop.f32.mrb[4].mxu0  ;;  %v12515_v56 = vpop.f32.mrb[4].mxu1 }
 0x237   : > { %v13863_v57 = vadd.f32 %v1774_v48, %v1719_v55  ;;  %v1721_v58 = vpop.f32.mrb[5].mxu0  ;;  %v12516_v61 = vpop.f32.mrb[5].mxu1 }
 0x238   : > { %v13867_v1 = vadd.f32 %v1778_v54, %v1721_v58  ;;  %v13869_v2 = vadd.f32 %v12516_v61, %v12515_v56  ;;  %v1723_v3 = vpop.f32.mrb[6].mxu0  ;;  %v12518_v4 = vpop.f32.mrb[6].mxu1  ;;  %v3767_v56 = vrot.slane %v13858_v46, %v13696_v17  ;;  %v3771_v58 = vrot.slane %v13861_v50, %v13696_v17 }
 0x239   : > { %v1797_v7 = vand.u32 2147483647, %v13863_v57  ;;  %v13876_v8 = vadd.f32 %v1774_v48, %v1723_v3  ;;  %v1725_v9 = vpop.f32.mrb[7].mxu0  ;;  %v12519_v10 = vpop.f32.mrb[7].mxu1  ;;  %vm1789_vm0 = vcmp.ne.f32.partialorder %v13863_v57, %v13863_v57 }
 0x23a   : > { %v1798_v34 = vand.u32 2147483647, %v13867_v1  ;;  %v13883_v15 = vadd.f32 %v1778_v54, %v1725_v9  ;;  %8354 = vperm.xlu0 %12620, %v13869_v2   ;;  %8156 = vperm.xlu1 %12619, %v13869_v2   ;;  %v13895_v55 = vadd.f32 %v12519_v10, %v12518_v4  ;;  %v16681_v9 = vmov 18  }
 0x23b   : > { %v1801_v37 = vsub.f32 0.0, %v1797_v7  ;;  %v1799_v18 = vand.u32 2147483647, %v13876_v8  ;;  %v16674_v7 = vmov 20   ;;  %v3057_v4 = vrot.slane %v13858_v46, %v13717_v35 }
 0x23c   : > { %v1802_v24 = vsub.f32 0.0, %v1798_v34  ;;  %v1800_v26 = vand.u32 2147483647, %v13883_v15  ;;  %16825 = vst [vmem:[#allocation27_spill] sm:$0xff] %v13895_v55  ;;  %v3061_v10 = vrot.slane %v13861_v50, %v13717_v35  ;;  %vm1790_vm1 = vcmp.ne.f32.partialorder %v13867_v1, %v13867_v1 }
 0x23d   : > { %v1805_v48 = vmul.f32 1.442695, %v1801_v37  ;;  %v1803_v54 = vsub.f32 0.0, %v1799_v18  ;;  %v13910_v18 = vld [vmem:[%s13576_s2 + $0x10] sm:$0xff]  ;;  %vm1791_vm5 = vcmp.ne.f32.partialorder %v13876_v8, %v13876_v8  ;;  %vm1792_vm7 = vcmp.ne.f32.partialorder %v13883_v15, %v13883_v15 }
 0x23e   : > { %v1807_v61 = vmul.f32 1.442695, %v1802_v24  ;;  %v1804_v3 = vsub.f32 0.0, %v1800_v26  ;;  %12623 = vset.pattern.permute.xlu0 %v16674_v7  ;;  %12621 = vset.pattern.permute.xlu1 %v16681_v9  ;;  %v3427_v24 = vcombine.low %v3420_v20, %v3424_v52  ;;  %v4130_v26 = vrot.slane %v13858_v46, %v13706_v23 }
 0x23f   : > { %13062 = vpow2.f32 %v1805_v48  ;;  %v1809_v34 = vmul.f32 1.442695, %v1803_v54  ;;  %8932 = vperm.xlu0 %12623, %v13869_v2   ;;  %8544 = vperm.xlu1 %12621, %v13869_v2   ;;  %v3774_v48 = vcombine.low %v3767_v56, %v3771_v58  ;;  %v4477_v54 = vrot.slane %v13858_v46, %v13720_v36 }
 0x240   : > { %13064 = vpow2.f32 %v1807_v61  ;;  %v1811_v37 = vmul.f32 1.442695, %v1804_v3  ;;  %v4481_v61 = vrot.slane %v13861_v50, %v13720_v36  ;;  %v13923_v3 = vcombine.low %v1964_v0, %v1968_v5 }
 0x241   : > { %13066 = vpow2.f32 %v1809_v34  ;;  %v13925_v20 = vcombine.low %v2347_v6, %v2351_v11  ;;  %v16673_v52 = vmov 23   ;;  %v13929_v34 = vcombine.low %v2710_v12, %v2714_v19 }
 0x242   : > { %13068 = vpow2.f32 %v1811_v37  ;;  %v13931_v56 = vcombine.low %v3057_v4, %v3061_v10  ;;  %v4840_v46 = vrot.slane %v13910_v18, %v13686_v13  ;;  %v13938_v50 = vrot.slane %v3427_v24, %v13613_v59 }
 0x243   : > { %12626 = vset.pattern.permute.xlu0 %v16673_v52  ;;  %12622 = vset.pattern.permute.xlu1 %v16675_v30  ;;  %v4137_v0 = vcombine.low %v4130_v26, %v4134_v42  ;;  %v4844_v5 = vrot.slane %v13917_v38, %v13686_v13  ;;  %v13943_v6 = vrot.slane %v3774_v48, %v13613_v59  ;;  %v16680_v48 = vmov 21  }
 0x244   : > { %9518 = vperm.xlu0 %12626, %v13869_v2   ;;  %8742 = vperm.xlu1 %12622, %v13869_v2   ;;  %16826 = vst [vmem:[#allocation28_spill] sm:$0xff] %v13938_v50  ;;  %v4484_v11 = vcombine.low %v4477_v54, %v4481_v61  ;;  %v5187_v12 = vrot.slane %v13910_v18, %v13693_v16 }
 0x245   : > { %16827 = vst [vmem:[#allocation29_spill] sm:$0xff] %v13943_v6  ;;  %v5191_v19 = vrot.slane %v13917_v38, %v13693_v16  ;;  %v5550_v58 = vrot.slane %v13910_v18, %v13703_v22  ;;  %v5554_v4 = vrot.slane %v13917_v38, %v13703_v22  ;;  %v6260_v42 = vrot.slane %v13910_v18, %v13689_v14 }
 0x246   : > { %v13957_v10 = vrot.slane %v13869_v2, %v13613_v59  ;;  %v6264_v37 = vrot.slane %v13917_v38, %v13689_v14  ;;  %v6607_v24 = vrot.slane %v13910_v18, %v13696_v17  ;;  %v6611_v26 = vrot.slane %v13917_v38, %v13696_v17 }
 0x247   : > { %v6970_v54 = vrot.slane %v13910_v18, %v13706_v23  ;;  %v6974_v61 = vrot.slane %v13917_v38, %v13706_v23  ;;  %v7317_v14 = vrot.slane %v13910_v18, %v13720_v36  ;;  %v13985_v30 = vrot.slane %v4137_v0, %v13613_v59 }
 0x248   : > { %12629 = vset.pattern.permute.xlu0 %v16678_v33  ;;  %12624 = vset.pattern.permute.xlu1 %v16680_v48  ;;  %v13987_v23 = vcombine.low %v4840_v46, %v4844_v5  ;;  %v5897_v40 = vrot.slane %v13910_v18, %v13717_v35  ;;  %v5557_v48 = vcombine.low %v5550_v58, %v5554_v4  ;;  %v16691_v46 = vmov 22  }
 0x249   : > { %v13967_v22 = vpop.eup %13062  ;;  %9130 = vperm.xlu1 %12624, %v13869_v2   ;;  %2145 = vperm.xlu0 %12629, %v13957_v10   ;;  %16828 = vst [vmem:[#allocation30_spill] sm:$0xff] %v13985_v30  ;;  %v5901_v36 = vrot.slane %v13917_v38, %v13717_v35  ;;  %v6267_v31 = vcombine.low %v6260_v42, %v6264_v37  ;;  %v16689_v5 = vmov 1   ;;  %v16692_v42 = vmov 24  }
 0x24a   : > { %v13977_v17 = vpop.eup %13064  ;;  %v1813_v52 = vadd.f32 1.0, %v13967_v22  ;;  %v6614_v28 = vcombine.low %v6607_v24, %v6611_v26  ;;  %v6977_v0 = vcombine.low %v6970_v54, %v6974_v61  ;;  %v13999_v18 = vcombine.low %v5187_v12, %v5191_v19 }
 0x24b   : > { %v13982_v7 = vpop.eup %13066  ;;  %v1822_v45 = vadd.f32 1.0, %v13977_v17  ;;  %v7324_v51 = vcombine.low %v7317_v14, %v7321_v29  ;;  %v14005_v35 = vrot.slane %v4484_v11, %v13613_v59  ;;  %v1816_v38 = vmul.f32 -0.5, %v13967_v22 }
 0x24c   : > { %v13992_v33 = vpop.eup %13068  ;;  %13070 = vlog2.f32 %v1813_v52  ;;  %v1831_v9 = vadd.f32 1.0, %v13982_v7  ;;  %v14011_v52 = vcombine.low %v5897_v40, %v5901_v36  ;;  %v1825_v12 = vmul.f32 -0.5, %v13977_v17 }
 0x24d   : > { %13072 = vlog2.f32 %v1822_v45  ;;  %12625 = vset.pattern.permute.xlu1 %v16691_v46  ;;  %12630 = vset.pattern.permute.xlu0 %v16689_v5  ;;  %v1840_v58 = vadd.f32 1.0, %v13992_v33  ;;  %16829 = vst [vmem:[#allocation31_spill] sm:$0xff] %v14005_v35  ;;  %v14009_v45 = vrot.slane %v5557_v48, %v13613_v59  ;;  %v14015_v29 = vrot.slane %v6267_v31, %v13613_v59 }
 0x24e   : > { %13074 = vlog2.f32 %v1831_v9  ;;  %9320 = vperm.xlu1 %12625, %v13869_v2   ;;  %2500 = vperm.xlu0 %12630, %v13957_v10   ;;  %v14018_v9 = vrot.slane %v6614_v28, %v13613_v59  ;;  %v14021_v19 = vrot.slane %v6977_v0, %v13613_v59  ;;  %v1834_v11 = vmul.f32 -0.5, %v13982_v7 }
 0x24f   : > { %13076 = vlog2.f32 %v1840_v58  ;;  %v14025_v4 = vrot.slane %v7324_v51, %v13613_v59  ;;  %v16687_v40 = vmov 3   ;;  %v1817_v37 = vadd.f32 1.0, %v1816_v38 }
 0x250   : > { %v1843_v31 = vmul.f32 -0.5, %v13992_v33  ;;  %v1819_v28 = vand.u32 2147483647, %v13967_v22  ;;  %v1826_v24 = vadd.f32 1.0, %v1825_v12  ;;  %v14035_v51 = vrot.slane %v13923_v3, %v13613_v59 }
 0x251   : > { %v1828_v26 = vand.u32 2147483647, %v13977_v17  ;;  %v1835_v48 = vadd.f32 1.0, %v1834_v11  ;;  %v14040_v54 = vrot.slane %v13925_v20, %v13613_v59  ;;  %v14044_v61 = vrot.slane %v13929_v34, %v13613_v59 }
 0x252   : > { %12627 = vset.pattern.permute.xlu1 %v16692_v42  ;;  %12632 = vset.pattern.permute.xlu0 %v16687_v40  ;;  %16830 = vst [vmem:[#allocation32_spill] sm:$0xff] %v14035_v51  ;;  %v1785_v36 = vmax.f32 %v13863_v57, 0.0  ;;  %v1786_v3 = vmax.f32 %v13867_v1, 0.0  ;;  %v1837_v0 = vand.u32 2147483647, %v13982_v7  ;;  %v1818_v12 = vmul.f32 %v13967_v22, %v1817_v37 }
 0x253   : > { %9708 = vperm.xlu1 %12627, %v13869_v2   ;;  %3210 = vperm.xlu0 %12632, %v13957_v10   ;;  %16831 = vst [vmem:[#allocation33_spill] sm:$0xff] %v14040_v54  ;;  %16832 = vst [vmem:[#allocation34_spill] sm:$0xff] %v14044_v61  ;;  %v1844_v20 = vadd.f32 1.0, %v1843_v31  ;;  %v16693_v34 = vmov 25   ;;  %v16695_v11 = vmov 5   ;;  %v1827_v46 = vmul.f32 %v13977_v17, %v1826_v24 }
 0x254   : > { %vm1820_vm2 = vcmp.lt.f32.partialorder %v1819_v28, 0.0004427343  ;;  %v1846_v42 = vand.u32 2147483647, %v13992_v33  ;;  %vm1829_vm3 = vcmp.lt.f32.partialorder %v1828_v26, 0.0004427343  ;;  %v1836_v31 = vmul.f32 %v13982_v7, %v1835_v48 }
 0x255   : > { %vm1838_vm4 = vcmp.lt.f32.partialorder %v1837_v0, 0.0004427343  ;;  %v1845_v24 = vmul.f32 %v13992_v33, %v1844_v20  ;;  %v16701_v20 = vmov 10   ;;  %v16859_v16 = vmov 3  }
 0x256   : > { %v13071_v14 = vpop.eup %13070  ;;  %vm1847_vm6 = vcmp.lt.f32.partialorder %v1846_v42, 0.0004427343 }
 0x257   : > { %v13073_v58 = vpop.eup %13072  ;;  %v1815_v38 = vmul.f32 0.6931472, %v13071_v14  ;;  %12628 = vset.pattern.permute.xlu1 %v16693_v34  ;;  %12634 = vset.pattern.permute.xlu0 %v16695_v11  ;;  %v1787_v11 = vmax.f32 %v13876_v8, 0.0 }
 0x258   : > { %v13075_v40 = vpop.eup %13074  ;;  %v1824_v5 = vmul.f32 0.6931472, %v13073_v58  ;;  %9906 = vperm.xlu1 %12628, %v13869_v2   ;;  %3920 = vperm.xlu0 %12634, %v13957_v10  }
 0x259   : > { %v1821_v22 = vsel %vm1820_vm2, %v1818_v12, %v1815_v38  ;;  %v1833_v37 = vmul.f32 0.6931472, %v13075_v40  ;;  %v13077_v14 = vpop.eup %13076 }
 0x25a   : > { %v1849_v34 = vadd.f32 %v1821_v22, %v1785_v36  ;;  %v1830_v49 = vsel %vm1829_vm3, %v1827_v46, %v1824_v5  ;;  %v1842_v17 = vmul.f32 0.6931472, %v13077_v14  ;;  %v16711_v46 = vmov 2  }
 0x25b   : > { %v1850_v28 = vadd.f32 %v1830_v49, %v1786_v3  ;;  %v1839_v58 = vsel %vm1838_vm4, %v1836_v31, %v1833_v37  ;;  %v16699_v5 = vmov 7   ;;  %v14097_v36 = vrot.slane %v13931_v56, %v13613_v59 }
 0x25c   : > { %v14067_v38 = vsel %vm1789_vm0, %v13863_v57, %v1849_v34  ;;  %v1851_v7 = vadd.f32 %v1839_v58, %v1787_v11  ;;  %12631 = vset.pattern.permute.xlu1 %v16711_v46  ;;  %12636 = vset.pattern.permute.xlu0 %v16699_v5  ;;  %v1788_v57 = vmax.f32 %v13883_v15, 0.0  ;;  %v1848_v40 = vsel %vm1847_vm6, %v1845_v24, %v1842_v17 }
 0x25d   : > { %v14075_v33 = vmul.f32 %v14067_v38, %v13824_v63  ;;  %v1854_v49 = vsel %vm1790_vm1, %v13867_v1, %v1850_v28  ;;  %2855 = vperm.xlu1 %12631, %v13957_v10   ;;  %4630 = vperm.xlu0 %12636, %v13957_v10   ;;  %16833 = vst [vmem:[#allocation35_spill] sm:$0xff] %v14097_v36  ;;  %v16707_v56 = vmov 4   ;;  %v16705_v17 = vmov 6  }
 0x25e   : > { %v14085_v42 = vmul.f32 %v1854_v49, %v13820_v62  ;;  %v1869_v26 = vcombine.low %v14067_v38, %v1854_v49  ;;  %v1870_v63 = vcombine.high %v14067_v38, %v1854_v49  ;;  %v14093_v48 = vsel %vm1791_vm5, %v13876_v8, %v1851_v7 }
 0x25f   : > { %v1852_v1 = vadd.f32 %v1848_v40, %v1788_v57  ;;  %v14110_v8 = vmul.f32 %v14093_v48, %v13826_v27  ;;  %v14124_v11 = vrot.slane %v13987_v23, %v13613_v59  ;;  %v14128_v27 = vrot.slane %v13999_v18, %v13613_v59 }
 0x260   : > { %v14100_v3 = vrot.slane %v1869_v26, %v13613_v59  ;;  %v16697_v57 = vmov 14   ;;  %v14163_v40 = vcombine.high %v13957_v10, %v13957_v10  ;;  %v14167_v26 = vrot.slane %v13895_v55, %v13613_v59 }
 0x261   : > { %v14113_v12 = vsel %vm1792_vm7, %v13883_v15, %v1852_v1  ;;  %12633 = vset.pattern.permute.xlu1 %v16707_v56  ;;  %12640 = vset.pattern.permute.xlu0 %v16701_v20  ;;  %v14132_v15 = vrot.slane %v14011_v52, %v13613_v59  ;;  %v16703_v28 = vmov 8   ;;  %v16834_v5 = vmov 18  }
 0x262   : > { %v14119_v34 = vcombine.high %v14100_v3, %v14100_v3  ;;  %3565 = vperm.xlu1 %12633, %v13957_v10   ;;  %v14136_v22 = vmul.f32 %v14113_v12, %v13822_v60  ;;  %5695 = vperm.xlu0 %12640, %v13957_v10   ;;  %v1980_v23 = vmul.f32 %v14035_v51, %v14100_v3  ;;  %v16709_v37 = vmov 9  }
 0x263   : > { %v2363_v52 = vmul.f32 %v14040_v54, %v14100_v3  ;;  %v2726_v14 = vmul.f32 %v14044_v61, %v14100_v3  ;;  %v3436_v0 = vmul.f32 %v13938_v50, %v14100_v3  ;;  %v5566_v56 = vmul.f32 %v14009_v45, %v14100_v3 }
 0x264   : > { %v1981_v18 = vmul.f32 %v14035_v51, %v14119_v34  ;;  %v2364_v60 = vmul.f32 %v14040_v54, %v14119_v34  ;;  %v1988_v24 = vmul.f32 1.442695, %v1980_v23  ;;  %v2727_v49 = vmul.f32 %v14044_v61, %v14119_v34 }
 0x265   : > { %v2371_v7 = vmul.f32 1.442695, %v2363_v52  ;;  %v2734_v23 = vmul.f32 1.442695, %v2726_v14  ;;  %v3073_v52 = vmul.f32 %v14097_v36, %v14100_v3  ;;  %v3074_v58 = vmul.f32 %v14097_v36, %v14119_v34 }
 0x266   : > { %12635 = vset.pattern.permute.xlu1 %v16705_v17  ;;  %v1990_v38 = vmul.f32 1.442695, %v1981_v18  ;;  %12644 = vset.pattern.permute.xlu0 %v16697_v57  ;;  %13078 = vpow2.f32 %v1988_v24  ;;  %v2373_v1 = vmul.f32 1.442695, %v2364_v60  ;;  %v2736_v18 = vmul.f32 1.442695, %v2727_v49 }
 0x267   : > { %4275 = vperm.xlu1 %12635, %v13957_v10   ;;  %7115 = vperm.xlu0 %12644, %v13957_v10   ;;  %v14178_v57 = vrot.slane %v1870_v63, %v13613_v59  ;;  %v3437_v24 = vmul.f32 %v13938_v50, %v14119_v34  ;;  %v3783_v60 = vmul.f32 %v13943_v6, %v14100_v3  ;;  %v3081_v14 = vmul.f32 1.442695, %v3073_v52 }
 0x268   : > { %13080 = vpow2.f32 %v1990_v38  ;;  %v3083_v38 = vmul.f32 1.442695, %v3074_v58  ;;  %v3784_v49 = vmul.f32 %v13943_v6, %v14119_v34  ;;  %v3444_v63 = vmul.f32 1.442695, %v3436_v0 }
 0x269   : > { %13082 = vpow2.f32 %v2371_v7  ;;  %v3446_v7 = vmul.f32 1.442695, %v3437_v24  ;;  %v3791_v62 = vmul.f32 1.442695, %v3783_v60  ;;  %v4146_v58 = vmul.f32 %v13985_v30, %v14100_v3 }
 0x26a   : > { %13084 = vpow2.f32 %v2373_v1  ;;  %v4147_v1 = vmul.f32 %v13985_v30, %v14119_v34  ;;  %v4493_v52 = vmul.f32 %v14005_v35, %v14100_v3  ;;  %v4856_v0 = vmul.f32 %v14124_v11, %v14100_v3 }
 0x26b   : > { %12637 = vset.pattern.permute.xlu1 %v16703_v28  ;;  %12647 = vset.pattern.permute.xlu0 %v16834_v5  ;;  %13086 = vpow2.f32 %v2734_v23  ;;  %v4494_v5 = vmul.f32 %v14005_v35, %v14119_v34  ;;  %v5203_v23 = vmul.f32 %v14128_v27, %v14100_v3  ;;  %v4154_v24 = vmul.f32 1.442695, %v4146_v58 }
 0x26c   : > { %4985 = vperm.xlu1 %12637, %v13957_v10   ;;  %8547 = vperm.xlu0 %12647, %v13895_v55   ;;  %13088 = vpow2.f32 %v2736_v18  ;;  %v3793_v18 = vmul.f32 1.442695, %v3784_v49  ;;  %v4156_v60 = vmul.f32 1.442695, %v4147_v1  ;;  %v4501_v20 = vmul.f32 1.442695, %v4493_v52 }
 0x26d   : > { %13090 = vpow2.f32 %v3081_v14  ;;  %v4503_v28 = vmul.f32 1.442695, %v4494_v5  ;;  %v4864_v31 = vmul.f32 1.442695, %v4856_v0  ;;  %v16835_v14 = vmov 21  }
 0x26e   : > { %13092 = vpow2.f32 %v3083_v38  ;;  %v5211_v17 = vmul.f32 1.442695, %v5203_v23  ;;  %v5913_v38 = vmul.f32 %v14132_v15, %v14100_v3  ;;  %v6277_v58 = vmul.f32 %v14015_v29, %v14119_v34 }
 0x26f   : > { %13094 = vpow2.f32 %v3444_v63  ;;  %v6276_v63 = vmul.f32 %v14015_v29, %v14100_v3  ;;  %v5574_v5 = vmul.f32 1.442695, %v5566_v56  ;;  %v6624_v25 = vmul.f32 %v14018_v9, %v14119_v34 }
 0x270   : > { %12638 = vset.pattern.permute.xlu1 %v16709_v37  ;;  %12650 = vset.pattern.permute.xlu0 %v16835_v14  ;;  %13096 = vpow2.f32 %v3446_v7  ;;  %v13079_v49 = vpop.eup %13078  ;;  %v6623_v7 = vmul.f32 %v14018_v9, %v14100_v3  ;;  %v5921_v0 = vmul.f32 1.442695, %v5913_v38  ;;  %v14220_v37 = vmul.f32 1.442695, %v6277_v58 }
 0x271   : > { %5340 = vperm.xlu1 %12638, %v13957_v10   ;;  %9133 = vperm.xlu0 %12650, %v13895_v55   ;;  %13098 = vpow2.f32 %v3791_v62  ;;  %v2018_v52 = vrot.slane %v13079_v49, %v13613_v59  ;;  %12210 = vst.sshfl [vmem:[#allocation4] sm:$0x3 pattern:$0x76325410] %v13079_v49  ;;  %v14218_v62 = vmul.f32 1.442695, %v6276_v63 }
 0x272   : > { %v13081_v1 = vpop.eup %13080  ;;  %13100 = vpow2.f32 %v3793_v18  ;;  %v16717_v18 = vmov 11   ;;  %v16836_v56 = vmov 24  }
 0x273   : > { %v13083_v23 = vpop.eup %13082  ;;  %v2026_v14 = vrot.slane %v13081_v1, %v13613_v59  ;;  %12211 = vst.sshfl [vmem:[#allocation4 + $0x40] sm:$0x3 pattern:$0x76325410] %v13081_v1  ;;  %13102 = vpow2.f32 %v4154_v24  ;;  %v2019_v41 = vcombine.high %v2018_v52, %v2018_v52  ;;  %v6631_v24 = vmul.f32 1.442695, %v6623_v7 }
 0x274   : > { %v13085_v46 = vpop.eup %13084  ;;  %v2395_v43 = vcombine.low %v13083_v23, %v13083_v23  ;;  %13104 = vpow2.f32 %v4156_v60  ;;  %v6633_v52 = vmul.f32 1.442695, %v6624_v25 }
 0x275   : > { %v13087_v49 = vpop.eup %13086  ;;  %12639 = vset.pattern.permute.xlu1 %v16717_v18  ;;  %12653 = vset.pattern.permute.xlu0 %v16836_v56  ;;  %v2027_v38 = vcombine.high %v2026_v14, %v2026_v14  ;;  %v2404_v1 = vcombine.low %v13085_v46, %v13085_v46  ;;  %13106 = vpow2.f32 %v4501_v20  ;;  %2093 = vst [vmem:[#allocation4 + $0x8] sm:$0x3] %v2019_v41 }
 0x276   : > { %v13089_v63 = vpop.eup %13088  ;;  %6050 = vperm.xlu1 %12639, %v13957_v10   ;;  %9711 = vperm.xlu0 %12653, %v13895_v55   ;;  %v2402_v60 = vrot.slane %v2395_v43, %v13613_v59  ;;  %12226 = vst.sshfl [vmem:[#allocation4] sm:$0x30 pattern:$0x76325410] %v2395_v43  ;;  %v2764_v58 = vrot.slane %v13087_v49, %v13613_v59  ;;  %13108 = vpow2.f32 %v4503_v28 }
 0x277   : > { %12242 = vst.sshfl [vmem:[#allocation4 + $0x8] sm:$0xc pattern:$0x76325410] %v13087_v49  ;;  %v13091_v23 = vpop.eup %13090  ;;  %2095 = vst [vmem:[#allocation4 + $0x48] sm:$0x3] %v2027_v38  ;;  %v2411_v46 = vrot.slane %v2404_v1, %v13613_v59  ;;  %v2772_v20 = vrot.slane %v13089_v63, %v13613_v59  ;;  %13110 = vpow2.f32 %v4864_v31  ;;  %v6986_v41 = vmul.f32 %v14021_v19, %v14100_v3 }
 0x278   : > { %12227 = vst.sshfl [vmem:[#allocation4 + $0x40] sm:$0x30 pattern:$0x76325410] %v2404_v1  ;;  %v13093_v7 = vpop.eup %13092  ;;  %v2403_v14 = vcombine.high %v2402_v60, %v2402_v60  ;;  %v2765_v43 = vcombine.low %v2764_v58, %v2764_v58  ;;  %v3105_v56 = vcombine.low %v13091_v23, %v13091_v23  ;;  %13112 = vpow2.f32 %v5211_v17 }
 0x279   : > { %12243 = vst.sshfl [vmem:[#allocation4 + $0x48] sm:$0xc pattern:$0x76325410] %v13089_v63  ;;  %v13095_v49 = vpop.eup %13094  ;;  %v2412_v28 = vcombine.high %v2411_v46, %v2411_v46  ;;  %v2773_v25 = vcombine.low %v2772_v20, %v2772_v20  ;;  %v3114_v18 = vcombine.low %v13093_v7, %v13093_v7  ;;  %13114 = vpow2.f32 %v5574_v5 }
 0x27a   : > { %v13097_v38 = vpop.eup %13096  ;;  %12641 = vset.pattern.permute.xlu1 %v16725_v21  ;;  %v16837_v1 = vmov 0   ;;  %2484 = vst [vmem:[#allocation4 + $0x8] sm:$0xc] %v2403_v14  ;;  %2838 = vst [vmem:[#allocation4] sm:$0x30] %v2765_v43  ;;  %v3112_v31 = vrot.slane %v3105_v56, %v13613_v59  ;;  %v3474_v63 = vrot.slane %v13095_v49, %v13613_v59  ;;  %13116 = vpow2.f32 %v5921_v0 }
 0x27b   : > { %12654 = vset.pattern.permute.xlu0 %v16837_v1  ;;  %12258 = vst.sshfl [vmem:[#allocation4 + $0x8] sm:$0xc0 pattern:$0x76325410] %v3105_v56  ;;  %v6987_v17 = vmul.f32 %v14021_v19, %v14119_v34  ;;  %v13099_v60 = vpop.eup %13098  ;;  %6760 = vperm.xlu1 %12641, %v13957_v10   ;;  %2486 = vst [vmem:[#allocation4 + $0x48] sm:$0xc] %v2412_v28  ;;  %v3121_v5 = vrot.slane %v3114_v18, %v13613_v59  ;;  %13118 = vpow2.f32 %v14218_v62 }
 0x27c   : > { %12274 = vst.sshfl [vmem:[#allocation4 + $0x10] sm:$0x3 pattern:$0x76325410] %v13095_v49  ;;  %2156 = vperm.xlu0 %12654, %v14163_v40   ;;  %2840 = vst [vmem:[#allocation4 + $0x40] sm:$0x30] %v2773_v25  ;;  %v3482_v58 = vrot.slane %v13097_v38, %v13613_v59  ;;  %v13101_v0 = vpop.eup %13100  ;;  %v3113_v46 = vcombine.low %v3112_v31, %v3112_v31  ;;  %v3475_v20 = vcombine.high %v3474_v63, %v3474_v63 }
 0x27d   : > { %12259 = vst.sshfl [vmem:[#allocation4 + $0x48] sm:$0xc0 pattern:$0x76325410] %v3114_v18  ;;  %v6994_v23 = vmul.f32 1.442695, %v6986_v41  ;;  %v3815_v7 = vcombine.low %v13099_v60, %v13099_v60  ;;  %13120 = vpow2.f32 %v14220_v37  ;;  %v13103_v14 = vpop.eup %13102  ;;  %v3122_v43 = vcombine.low %v3121_v5, %v3121_v5 }
 0x27e   : > { %12275 = vst.sshfl [vmem:[#allocation4 + $0x50] sm:$0x3 pattern:$0x76325410] %v13097_v38  ;;  %v3483_v56 = vcombine.high %v3482_v58, %v3482_v58  ;;  %v3824_v49 = vcombine.low %v13101_v0, %v13101_v0  ;;  %13122 = vpow2.f32 %v6631_v24  ;;  %v13105_v28 = vpop.eup %13104  ;;  %3193 = vst [vmem:[#allocation4] sm:$0xc0] %v3113_v46  ;;  %v4184_v62 = vrot.slane %v13103_v14, %v13613_v59 }
 0x27f   : > { %3549 = vst [vmem:[#allocation4 + $0x18] sm:$0x3] %v3475_v20  ;;  %v3822_v18 = vrot.slane %v3815_v7, %v13613_v59  ;;  %12290 = vst.sshfl [vmem:[#allocation4 + $0x10] sm:$0x30 pattern:$0x76325410] %v3815_v7  ;;  %13124 = vpow2.f32 %v6633_v52  ;;  %v13107_v25 = vpop.eup %13106  ;;  %v4192_v24 = vrot.slane %v13105_v28, %v13613_v59  ;;  %v7333_v31 = vmul.f32 %v14025_v4, %v14100_v3 }
 0x280   : > { %12306 = vst.sshfl [vmem:[#allocation4 + $0x18] sm:$0xc pattern:$0x76325410] %v13103_v14  ;;  %v6996_v41 = vmul.f32 1.442695, %v6987_v17  ;;  %2189 = vperm.xlu0 %12654, %v14167_v26   ;;  %v3831_v37 = vrot.slane %v3824_v49, %v13613_v59  ;;  %13126 = vpow2.f32 %v6994_v23  ;;  %v13109_v52 = vpop.eup %13108  ;;  %v4185_v17 = vcombine.low %v4184_v62, %v4184_v62 }
 0x281   : > { %v16723_v38 = vmov 15   ;;  %3195 = vst [vmem:[#allocation4 + $0x40] sm:$0xc0] %v3122_v43  ;;  %3551 = vst [vmem:[#allocation4 + $0x58] sm:$0x3] %v3483_v56  ;;  %v3823_v63 = vcombine.high %v3822_v18, %v3822_v18  ;;  %v4525_v60 = vcombine.low %v13107_v25, %v13107_v25  ;;  %v13111_v5 = vpop.eup %13110  ;;  %v4193_v0 = vcombine.low %v4192_v24, %v4192_v24 }
 0x282   : > { %12642 = vset.pattern.permute.xlu1 %v16723_v38  ;;  %12291 = vst.sshfl [vmem:[#allocation4 + $0x50] sm:$0x30 pattern:$0x76325410] %v3824_v49  ;;  %13128 = vpow2.f32 %v6996_v41  ;;  %v3832_v58 = vcombine.high %v3831_v37, %v3831_v37  ;;  %v4534_v46 = vcombine.low %v13109_v52, %v13109_v52  ;;  %v7334_v20 = vmul.f32 %v14025_v4, %v14119_v34  ;;  %v13113_v7 = vpop.eup %13112 }
 0x283   : > { %12307 = vst.sshfl [vmem:[#allocation4 + $0x58] sm:$0xc pattern:$0x76325410] %v13105_v28  ;;  %7470 = vperm.xlu1 %12642, %v13957_v10   ;;  %3904 = vst [vmem:[#allocation4 + $0x18] sm:$0xc] %v3823_v63  ;;  %v4532_v23 = vrot.slane %v4525_v60, %v13613_v59  ;;  %v4894_v3 = vrot.slane %v13111_v5, %v13613_v59  ;;  %v13115_v43 = vpop.eup %13114  ;;  %v5235_v28 = vcombine.low %v13113_v7, %v13113_v7 }
 0x284   : > { %4258 = vst [vmem:[#allocation4 + $0x10] sm:$0x30] %v4185_v17  ;;  %12322 = vst.sshfl [vmem:[#allocation4 + $0x18] sm:$0xc0 pattern:$0x76325410] %v4525_v60  ;;  %v4541_v49 = vrot.slane %v4534_v46, %v13613_v59  ;;  %v1982_v62 = vmul.f32 %v14035_v51, %v14178_v57  ;;  %v13117_v41 = vpop.eup %13116 }
 0x285   : > { %12338 = vst.sshfl [vmem:[#allocation4 + $0x20] sm:$0x3 pattern:$0x76325410] %v13111_v5  ;;  %v7341_v14 = vmul.f32 1.442695, %v7333_v31  ;;  %v4533_v37 = vcombine.low %v4532_v23, %v4532_v23  ;;  %v4895_v24 = vcombine.high %v4894_v3, %v4894_v3  ;;  %v5604_v31 = vrot.slane %v13115_v43, %v13613_v59  ;;  %v13119_v52 = vpop.eup %13118 }
 0x286   : > { %v16838_v56 = vmov 2   ;;  %3906 = vst [vmem:[#allocation4 + $0x58] sm:$0xc] %v3832_v58  ;;  %4260 = vst [vmem:[#allocation4 + $0x50] sm:$0x30] %v4193_v0  ;;  %v16721_v25 = vmov 12   ;;  %v4542_v63 = vcombine.low %v4541_v49, %v4541_v49  ;;  %v5242_v17 = vrot.slane %v5235_v28, %v13613_v59 }
 0x287   : > { %12657 = vset.pattern.permute.xlu0 %v16838_v56  ;;  %12323 = vst.sshfl [vmem:[#allocation4 + $0x58] sm:$0xc0 pattern:$0x76325410] %v4534_v46  ;;  %v7343_v18 = vmul.f32 1.442695, %v7334_v20  ;;  %12643 = vset.pattern.permute.xlu1 %v16721_v25  ;;  %13130 = vpow2.f32 %v7341_v14  ;;  %v5945_v60 = vcombine.low %v13117_v41, %v13117_v41  ;;  %v14268_v5 = vpop.eup %13120  ;;  %v5605_v58 = vcombine.low %v5604_v31, %v5604_v31 }
 0x288   : > { %2866 = vperm.xlu0 %12657, %v14163_v40   ;;  %12370 = vst.sshfl [vmem:[#allocation4 + $0x28] sm:$0xc pattern:$0x76325410] %v13115_v43  ;;  %6405 = vperm.xlu1 %12643, %v13957_v10   ;;  %4613 = vst [vmem:[#allocation4 + $0x10] sm:$0xc0] %v4533_v37  ;;  %v6314_v0 = vrot.slane %v13119_v52, %v13613_v59  ;;  %v13123_v20 = vpop.eup %13122  ;;  %v5243_v7 = vcombine.high %v5242_v17, %v5242_v17 }
 0x289   : > { %12354 = vst.sshfl [vmem:[#allocation4 + $0x20] sm:$0x30 pattern:$0x76325410] %v5235_v28  ;;  %13132 = vpow2.f32 %v7343_v18  ;;  %4969 = vst [vmem:[#allocation4 + $0x28] sm:$0x3] %v4895_v24  ;;  %v5952_v10 = vrot.slane %v5945_v60, %v13613_v59  ;;  %v2365_v23 = vmul.f32 %v14040_v54, %v14178_v57  ;;  %v2728_v3 = vmul.f32 %v14044_v61, %v14178_v57  ;;  %v13125_v14 = vpop.eup %13124 }
 0x28a   : > { %12402 = vst.sshfl [vmem:[#allocation4 + $0x30] sm:$0x3 pattern:$0x76325410] %v13119_v52  ;;  %v1992_v46 = vmul.f32 1.442695, %v1982_v62  ;;  %v6315_v43 = vcombine.high %v6314_v0, %v6314_v0  ;;  %v6655_v49 = vcombine.low %v13123_v20, %v13123_v20  ;;  %v3075_v28 = vmul.f32 %v14097_v36, %v14178_v57  ;;  %v13127_v18 = vpop.eup %13126 }
 0x28b   : > { %4615 = vst [vmem:[#allocation4 + $0x50] sm:$0xc0] %v4542_v63  ;;  %12386 = vst.sshfl [vmem:[#allocation4 + $0x28] sm:$0xc0 pattern:$0x76325410] %v5945_v60  ;;  %v5953_v41 = vcombine.low %v5952_v10, %v5952_v10  ;;  %v14281_v37 = vcombine.low %v13125_v14, %v13125_v14  ;;  %v7024_v17 = vrot.slane %v13127_v18, %v13613_v59 }
 0x28c   : > { %12403 = vst.sshfl [vmem:[#allocation4 + $0x70] sm:$0x3 pattern:$0x76325410] %v14268_v5  ;;  %2899 = vperm.xlu0 %12657, %v14167_v26   ;;  %5678 = vst [vmem:[#allocation4 + $0x20] sm:$0x30] %v5605_v58  ;;  %13134 = vpow2.f32 %v1992_v46  ;;  %v13129_v52 = vpop.eup %13128  ;;  %v6662_v63 = vrot.slane %v6655_v49, %v13613_v59  ;;  %v2110_v58 = vcombine.high %v13869_v2, %v13869_v2 }
 0x28d   : > { %v16839_v62 = vmov 16   ;;  %5324 = vst [vmem:[#allocation4 + $0x28] sm:$0xc] %v5243_v7  ;;  %v2375_v24 = vmul.f32 1.442695, %v2365_v23  ;;  %v7032_v0 = vrot.slane %v13129_v52, %v13613_v59  ;;  %v16840_v46 = vmov 4  }
 0x28e   : > { %12645 = vset.pattern.permute.xlu1 %v16839_v62  ;;  %v2738_v31 = vmul.f32 1.442695, %v2728_v3  ;;  %6389 = vst [vmem:[#allocation4 + $0x38] sm:$0x3] %v6315_v43  ;;  %v3085_v60 = vmul.f32 1.442695, %v3075_v28  ;;  %v6663_v20 = vcombine.high %v6662_v63, %v6662_v63  ;;  %v7025_v7 = vcombine.low %v7024_v17, %v7024_v17 }
 0x28f   : > { %8159 = vperm.xlu1 %12645, %v13895_v55   ;;  %12418 = vst.sshfl [vmem:[#allocation4 + $0x30] sm:$0x30 pattern:$0x76325410] %v6655_v49  ;;  %6033 = vst [vmem:[#allocation4 + $0x20] sm:$0xc0] %v5953_v41  ;;  %13136 = vpow2.f32 %v2375_v24  ;;  %v3438_v10 = vmul.f32 %v13938_v50, %v14178_v57  ;;  %v7033_v23 = vcombine.low %v7032_v0, %v7032_v0 }
 0x290   : > { %12434 = vst.sshfl [vmem:[#allocation4 + $0x38] sm:$0xc pattern:$0x76325410] %v13127_v18  ;;  %12660 = vset.pattern.permute.xlu0 %v16840_v46  ;;  %13138 = vpow2.f32 %v2738_v31  ;;  %v3785_v3 = vmul.f32 %v13943_v6, %v14178_v57  ;;  %v4148_v14 = vmul.f32 %v13985_v30, %v14178_v57  ;;  %v16841_v49 = vmov 17  }
 0x291   : > { %12419 = vst.sshfl [vmem:[#allocation4 + $0x70] sm:$0x30 pattern:$0x76325410] %v14281_v37  ;;  %3576 = vperm.xlu0 %12660, %v14163_v40   ;;  %13140 = vpow2.f32 %v3085_v60  ;;  %v13131_v43 = vpop.eup %13130  ;;  %6744 = vst [vmem:[#allocation4 + $0x38] sm:$0xc] %v6663_v20  ;;  %v4495_v18 = vmul.f32 %v14005_v35, %v14178_v57  ;;  %v4857_v62 = vmul.f32 %v14124_v11, %v14119_v34 }
 0x292   : > { %12435 = vst.sshfl [vmem:[#allocation4 + $0x78] sm:$0xc pattern:$0x76325410] %v13129_v52  ;;  %7098 = vst [vmem:[#allocation4 + $0x30] sm:$0x30] %v7025_v7  ;;  %v7365_v24 = vcombine.low %v13131_v43, %v13131_v43  ;;  %v5204_v63 = vmul.f32 %v14128_v27, %v14119_v34  ;;  %v14308_v20 = vrot.slane %v2110_v58, %v13613_v59 }
 0x293   : > { %12646 = vset.pattern.permute.xlu1 %v16841_v49  ;;  %v3448_v28 = vmul.f32 1.442695, %v3438_v10  ;;  %v13133_v41 = vpop.eup %13132  ;;  %7100 = vst [vmem:[#allocation4 + $0x70] sm:$0x30] %v7033_v23  ;;  %v3795_v31 = vmul.f32 1.442695, %v3785_v3  ;;  %v5914_v43 = vmul.f32 %v14132_v15, %v14119_v34  ;;  %v14318_v58 = vcombine.high %v14178_v57, %v14178_v57 }
 0x294   : > { %8357 = vperm.xlu1 %12646, %v13895_v55   ;;  %v4158_v52 = vmul.f32 1.442695, %v4148_v14  ;;  %v7374_v17 = vcombine.low %v13133_v41, %v13133_v41  ;;  %v4505_v60 = vmul.f32 1.442695, %v4495_v18  ;;  %v4866_v0 = vmul.f32 1.442695, %v4857_v62 }
 0x295   : > { %13142 = vpow2.f32 %v3448_v28  ;;  %3609 = vperm.xlu0 %12660, %v14167_v26   ;;  %v7372_v7 = vrot.slane %v7365_v24, %v13613_v59  ;;  %12450 = vst.sshfl [vmem:[#allocation4 + $0x38] sm:$0xc0 pattern:$0x76325410] %v7365_v24  ;;  %v5213_v10 = vmul.f32 1.442695, %v5204_v63  ;;  %v5567_v14 = vmul.f32 %v14009_v45, %v14119_v34 }
 0x296   : > { %13144 = vpow2.f32 %v3795_v31  ;;  %v13135_v23 = vpop.eup %13134  ;;  %v7381_v3 = vrot.slane %v7374_v17, %v13613_v59  ;;  %12451 = vst.sshfl [vmem:[#allocation4 + $0x78] sm:$0xc0 pattern:$0x76325410] %v7374_v17  ;;  %v16842_v49 = vmov 19   ;;  %v4858_v63 = vmul.f32 %v14124_v11, %v14178_v57 }
 0x297   : > { %13146 = vpow2.f32 %v4158_v52  ;;  %v7373_v28 = vcombine.low %v7372_v7, %v7372_v7  ;;  %v2034_v18 = vrot.slane %v13135_v23, %v13613_v59  ;;  %12212 = vst.sshfl [vmem:[#allocation4 + $0x80] sm:$0x3 pattern:$0x76325410] %v13135_v23  ;;  %v5576_v41 = vmul.f32 1.442695, %v5567_v14 }
 0x298   : > { %12648 = vset.pattern.permute.xlu1 %v16842_v49  ;;  %13148 = vpow2.f32 %v4505_v60  ;;  %v7382_v62 = vcombine.low %v7381_v3, %v7381_v3  ;;  %v5923_v24 = vmul.f32 1.442695, %v5914_v43  ;;  %v16843_v52 = vmov 6  }
 0x299   : > { %8745 = vperm.xlu1 %12648, %v13895_v55   ;;  %13150 = vpow2.f32 %v4866_v0  ;;  %v13137_v31 = vpop.eup %13136  ;;  %12663 = vset.pattern.permute.xlu0 %v16843_v52  ;;  %7453 = vst [vmem:[#allocation4 + $0x30] sm:$0xc0] %v7373_v28  ;;  %v2035_v34 = vcombine.high %v2034_v18, %v2034_v18  ;;  %v5205_v17 = vmul.f32 %v14128_v27, %v14178_v57  ;;  %v4868_v14 = vmul.f32 1.442695, %v4858_v63 }
 0x29a   : > { %13152 = vpow2.f32 %v5213_v10  ;;  %v13139_v7 = vpop.eup %13138  ;;  %4286 = vperm.xlu0 %12663, %v14163_v40   ;;  %7455 = vst [vmem:[#allocation4 + $0x70] sm:$0xc0] %v7382_v62  ;;  %v2413_v60 = vcombine.low %v13137_v31, %v13137_v31  ;;  %v5568_v0 = vmul.f32 %v14009_v45, %v14178_v57  ;;  %v5915_v23 = vmul.f32 %v14132_v15, %v14178_v57 }
 0x29b   : > { %13154 = vpow2.f32 %v5576_v41  ;;  %v13141_v3 = vpop.eup %13140  ;;  %2097 = vst [vmem:[#allocation4 + $0x88] sm:$0x3] %v2035_v34  ;;  %v2780_v10 = vrot.slane %v13139_v7, %v13613_v59  ;;  %12244 = vst.sshfl [vmem:[#allocation4 + $0x88] sm:$0xc pattern:$0x76325410] %v13139_v7  ;;  %v16845_v31 = vcombine.low %v14093_v48, %v14113_v12 }
 0x29c   : > { %13156 = vpow2.f32 %v5923_v24  ;;  %v5215_v43 = vmul.f32 1.442695, %v5205_v17  ;;  %v16844_v49 = vmov 20   ;;  %v2420_v28 = vrot.slane %v2413_v60, %v13613_v59 }
 0x29d   : > { %12649 = vset.pattern.permute.xlu1 %v16844_v49  ;;  %12228 = vst.sshfl [vmem:[#allocation4 + $0x80] sm:$0x30 pattern:$0x76325410] %v2413_v60  ;;  %v3123_v18 = vcombine.low %v13141_v3, %v13141_v3  ;;  %v5578_v62 = vmul.f32 1.442695, %v5568_v0  ;;  %v14340_v25 = vrot.slane %v16845_v31, %v13613_v59  ;;  %v2781_v34 = vcombine.low %v2780_v10, %v2780_v10 }
 0x29e   : > { %v5925_v41 = vmul.f32 1.442695, %v5915_v23  ;;  %8935 = vperm.xlu1 %12649, %v13895_v55   ;;  %13158 = vpow2.f32 %v4868_v14  ;;  %v6322_v24 = vrot.slane %v14268_v5, %v13613_v59  ;;  %4319 = vperm.xlu0 %12663, %v14167_v26   ;;  %v2421_v17 = vcombine.high %v2420_v28, %v2420_v28 }
 0x29f   : > { %v13143_v63 = vpop.eup %13142  ;;  %v3130_v7 = vrot.slane %v3123_v18, %v13613_v59  ;;  %12260 = vst.sshfl [vmem:[#allocation4 + $0x88] sm:$0xc0 pattern:$0x76325410] %v3123_v18  ;;  %13160 = vpow2.f32 %v5215_v43  ;;  %v6671_v60 = vrot.slane %v14281_v37, %v13613_v59  ;;  %2842 = vst [vmem:[#allocation4 + $0x80] sm:$0x30] %v2781_v34  ;;  %v6278_v5 = vmul.f32 %v14015_v29, %v14178_v57 }
 0x2a0   : > { %v13145_v0 = vpop.eup %13144  ;;  %v3490_v23 = vrot.slane %v13143_v63, %v13613_v59  ;;  %12276 = vst.sshfl [vmem:[#allocation4 + $0x90] sm:$0x3 pattern:$0x76325410] %v13143_v63  ;;  %13162 = vpow2.f32 %v5578_v62  ;;  %v6323_v3 = vcombine.high %v6322_v24, %v6322_v24  ;;  %2488 = vst [vmem:[#allocation4 + $0x88] sm:$0xc] %v2421_v17  ;;  %v16846_v37 = vcombine.high %v14093_v48, %v14113_v12 }
 0x2a1   : > { %v13147_v10 = vpop.eup %13146  ;;  %v3131_v14 = vcombine.low %v3130_v7, %v3130_v7  ;;  %v3833_v49 = vcombine.low %v13145_v0, %v13145_v0  ;;  %13164 = vpow2.f32 %v5925_v41  ;;  %v6672_v28 = vcombine.high %v6671_v60, %v6671_v60 }
 0x2a2   : > { %v13149_v43 = vpop.eup %13148  ;;  %v14356_v18 = vrot.slane %v16846_v37, %v13613_v59  ;;  %v16847_v31 = vmov 22   ;;  %v3491_v62 = vcombine.high %v3490_v23, %v3490_v23  ;;  %v4200_v34 = vrot.slane %v13147_v10, %v13613_v59  ;;  %12308 = vst.sshfl [vmem:[#allocation4 + $0x98] sm:$0xc pattern:$0x76325410] %v13147_v10 }
 0x2a3   : > { %12651 = vset.pattern.permute.xlu1 %v16847_v31  ;;  %6391 = vst [vmem:[#allocation4 + $0x78] sm:$0x3] %v6323_v3  ;;  %v6288_v24 = vmul.f32 1.442695, %v6278_v5  ;;  %v13151_v63 = vpop.eup %13150  ;;  %v16848_v41 = vmov 8   ;;  %v3840_v17 = vrot.slane %v3833_v49, %v13613_v59  ;;  %v4543_v48 = vcombine.low %v13149_v43, %v13149_v43 }
 0x2a4   : > { %9323 = vperm.xlu1 %12651, %v13895_v55   ;;  %12666 = vset.pattern.permute.xlu0 %v16848_v41  ;;  %3197 = vst [vmem:[#allocation4 + $0x80] sm:$0xc0] %v3131_v14  ;;  %12292 = vst.sshfl [vmem:[#allocation4 + $0x90] sm:$0x30 pattern:$0x76325410] %v3833_v49  ;;  %v6625_v12 = vmul.f32 %v14018_v9, %v14178_v57  ;;  %v13153_v7 = vpop.eup %13152  ;;  %v4201_v60 = vcombine.low %v4200_v34, %v4200_v34 }
 0x2a5   : > { %6746 = vst [vmem:[#allocation4 + $0x78] sm:$0xc] %v6672_v28  ;;  %4996 = vperm.xlu0 %12666, %v14163_v40   ;;  %3553 = vst [vmem:[#allocation4 + $0x98] sm:$0x3] %v3491_v62  ;;  %v4902_v0 = vrot.slane %v13151_v63, %v13613_v59  ;;  %13166 = vpow2.f32 %v6288_v24  ;;  %v6988_v23 = vmul.f32 %v14021_v19, %v14178_v57  ;;  %v13155_v3 = vpop.eup %13154  ;;  %v16849_v34 = vmov 23  }
 0x2a6   : > { %12339 = vst.sshfl [vmem:[#allocation4 + $0x60] sm:$0x3 pattern:$0x76325410] %v13151_v63  ;;  %v3841_v5 = vcombine.high %v3840_v17, %v3840_v17  ;;  %v4550_v10 = vrot.slane %v4543_v48, %v13613_v59  ;;  %v5244_v14 = vcombine.low %v13153_v7, %v13153_v7  ;;  %v6635_v49 = vmul.f32 1.442695, %v6625_v12  ;;  %v13157_v28 = vpop.eup %13156 }
 0x2a7   : > { %12324 = vst.sshfl [vmem:[#allocation4 + $0x98] sm:$0xc0 pattern:$0x76325410] %v4543_v48  ;;  %4262 = vst [vmem:[#allocation4 + $0x90] sm:$0x30] %v4201_v60  ;;  %v4903_v43 = vcombine.high %v4902_v0, %v4902_v0  ;;  %v5612_v37 = vrot.slane %v13155_v3, %v13613_v59  ;;  %v7335_v62 = vmul.f32 %v14025_v4, %v14178_v57 }
 0x2a8   : > { %12371 = vst.sshfl [vmem:[#allocation4 + $0x68] sm:$0xc pattern:$0x76325410] %v13155_v3  ;;  %v6998_v31 = vmul.f32 1.442695, %v6988_v23  ;;  %12652 = vset.pattern.permute.xlu1 %v16849_v34  ;;  %v4551_v24 = vcombine.low %v4550_v10, %v4550_v10  ;;  %v5251_v63 = vrot.slane %v5244_v14, %v13613_v59  ;;  %v5954_v17 = vcombine.low %v13157_v28, %v13157_v28  ;;  %v13159_v48 = vpop.eup %13158 }
 0x2a9   : > { %3908 = vst [vmem:[#allocation4 + $0x98] sm:$0xc] %v3841_v5  ;;  %12355 = vst.sshfl [vmem:[#allocation4 + $0x60] sm:$0x30 pattern:$0x76325410] %v5244_v14  ;;  %13168 = vpow2.f32 %v6635_v49  ;;  %v14377_v12 = vcombine.high %v14340_v25, %v14340_v25  ;;  %9521 = vperm.xlu1 %12652, %v13895_v55   ;;  %v5613_v57 = vcombine.low %v5612_v37, %v5612_v37  ;;  %v13161_v0 = vpop.eup %13160 }
 0x2aa   : > { %v16850_v7 = vmov 10   ;;  %4971 = vst [vmem:[#allocation4 + $0x68] sm:$0x3] %v4903_v43  ;;  %13170 = vpow2.f32 %v6998_v31  ;;  %v7345_v60 = vmul.f32 1.442695, %v7335_v62  ;;  %v5252_v23 = vcombine.high %v5251_v63, %v5251_v63  ;;  %v13163_v14 = vpop.eup %13162 }
 0x2ab   : > { %12669 = vset.pattern.permute.xlu0 %v16850_v7  ;;  %4617 = vst [vmem:[#allocation4 + $0x90] sm:$0xc0] %v4551_v24  ;;  %v5961_v3 = vrot.slane %v5954_v17, %v13613_v59  ;;  %12387 = vst.sshfl [vmem:[#allocation4 + $0x68] sm:$0xc0 pattern:$0x76325410] %v5954_v17  ;;  %v4910_v5 = vrot.slane %v13159_v48, %v13613_v59  ;;  %v1983_v10 = vmul.f32 %v14035_v51, %v14318_v58  ;;  %v13165_v37 = vpop.eup %13164 }
 0x2ac   : > { %5706 = vperm.xlu0 %12669, %v14163_v40   ;;  %12340 = vst.sshfl [vmem:[#allocation4 + $0xa0] sm:$0x3 pattern:$0x76325410] %v13159_v48  ;;  %5680 = vst [vmem:[#allocation4 + $0x60] sm:$0x30] %v5613_v57  ;;  %v5253_v49 = vcombine.low %v13161_v0, %v13161_v0  ;;  %13172 = vpow2.f32 %v7345_v60  ;;  %v2366_v28 = vmul.f32 %v14040_v54, %v14318_v58 }
 0x2ad   : > { %v2729_v43 = vmul.f32 %v14044_v61, %v14318_v58  ;;  %5326 = vst [vmem:[#allocation4 + $0x68] sm:$0xc] %v5252_v23  ;;  %v5962_v31 = vcombine.low %v5961_v3, %v5961_v3  ;;  %v4911_v62 = vcombine.high %v4910_v5, %v4910_v5  ;;  %v5620_v34 = vrot.slane %v13163_v14, %v13613_v59 }
 0x2ae   : > { %12372 = vst.sshfl [vmem:[#allocation4 + $0xa8] sm:$0xc pattern:$0x76325410] %v13163_v14  ;;  %v1994_v24 = vmul.f32 1.442695, %v1983_v10  ;;  %12655 = vset.pattern.permute.xlu1 %v16837_v1  ;;  %v5260_v63 = vrot.slane %v5253_v49, %v13613_v59  ;;  %v5963_v17 = vcombine.low %v13165_v37, %v13165_v37  ;;  %v3076_v23 = vmul.f32 %v14097_v36, %v14318_v58 }
 0x2af   : > { %12356 = vst.sshfl [vmem:[#allocation4 + $0xa0] sm:$0x30 pattern:$0x76325410] %v5253_v49  ;;  %v2377_v48 = vmul.f32 1.442695, %v2366_v28  ;;  %2167 = vperm.xlu1 %12655, %v14308_v20   ;;  %v5621_v0 = vcombine.low %v5620_v34, %v5620_v34  ;;  %v1984_v3 = vmul.f32 %v14035_v51, %v14340_v25  ;;  %v13167_v5 = vpop.eup %13166  ;;  %v1985_v49 = vmul.f32 %v14035_v51, %v14377_v12 }
 0x2b0   : > { %v2740_v57 = vmul.f32 1.442695, %v2729_v43  ;;  %v16851_v60 = vmov 11   ;;  %6035 = vst [vmem:[#allocation4 + $0x60] sm:$0xc0] %v5962_v31  ;;  %13174 = vpow2.f32 %v1994_v24  ;;  %v5261_v10 = vcombine.high %v5260_v63, %v5260_v63 }
 0x2b1   : > { %12671 = vset.pattern.permute.xlu0 %v16851_v60  ;;  %4973 = vst [vmem:[#allocation4 + $0xa8] sm:$0x3] %v4911_v62  ;;  %v5970_v14 = vrot.slane %v5963_v17, %v13613_v59  ;;  %12388 = vst.sshfl [vmem:[#allocation4 + $0xa8] sm:$0xc0 pattern:$0x76325410] %v5963_v17  ;;  %13176 = vpow2.f32 %v2377_v48  ;;  %v6330_v28 = vrot.slane %v13167_v5, %v13613_v59 }
 0x2b2   : > { %6072 = vperm.xlu0 %12671, %v14308_v20   ;;  %5682 = vst [vmem:[#allocation4 + $0xa0] sm:$0x30] %v5621_v0  ;;  %12404 = vst.sshfl [vmem:[#allocation4 + $0xb0] sm:$0x3 pattern:$0x76325410] %v13167_v5  ;;  %13178 = vpow2.f32 %v2740_v57  ;;  %v1986_v37 = vmul.f32 %v14035_v51, %v14356_v18  ;;  %v2367_v24 = vmul.f32 %v14040_v54, %v14340_v25 }
 0x2b3   : > { %v3087_v43 = vmul.f32 1.442695, %v3076_v23  ;;  %5328 = vst [vmem:[#allocation4 + $0xa8] sm:$0xc] %v5261_v10  ;;  %v5971_v31 = vcombine.low %v5970_v14, %v5970_v14  ;;  %v1996_v62 = vmul.f32 1.442695, %v1984_v3  ;;  %v13169_v63 = vpop.eup %13168  ;;  %v6331_v48 = vcombine.high %v6330_v28, %v6330_v28 }
 0x2b4   : > { %v1998_v34 = vmul.f32 1.442695, %v1985_v49  ;;  %v16852_v17 = vmov 1   ;;  %v2000_v0 = vmul.f32 1.442695, %v1986_v37  ;;  %v2368_v57 = vmul.f32 %v14040_v54, %v14377_v12  ;;  %v13171_v23 = vpop.eup %13170 }
 0x2b5   : > { %12656 = vset.pattern.permute.xlu1 %v16852_v17  ;;  %13180 = vpow2.f32 %v3087_v43  ;;  %6037 = vst [vmem:[#allocation4 + $0xa0] sm:$0xc0] %v5971_v31  ;;  %v6673_v3 = vcombine.low %v13169_v63, %v13169_v63  ;;  %v2369_v5 = vmul.f32 %v14040_v54, %v14356_v18  ;;  %v2379_v10 = vmul.f32 1.442695, %v2367_v24  ;;  %6393 = vst [vmem:[#allocation4 + $0xb8] sm:$0x3] %v6331_v48 }
 0x2b6   : > { %12672 = vset.pattern.permute.xlu0 %v16848_v41  ;;  %2511 = vperm.xlu1 %12656, %v14163_v40   ;;  %13182 = vpow2.f32 %v1996_v62  ;;  %v7040_v14 = vrot.slane %v13171_v23, %v13613_v59  ;;  %12436 = vst.sshfl [vmem:[#allocation4 + $0xb8] sm:$0xc pattern:$0x76325410] %v13171_v23  ;;  %v2381_v49 = vmul.f32 1.442695, %v2368_v57  ;;  %v2730_v28 = vmul.f32 %v14044_v61, %v14340_v25  ;;  %v13173_v43 = vpop.eup %13172 }
 0x2b7   : > { %5007 = vperm.xlu0 %12672, %v14308_v20   ;;  %13184 = vpow2.f32 %v1998_v34  ;;  %v6680_v37 = vrot.slane %v6673_v3, %v13613_v59  ;;  %12420 = vst.sshfl [vmem:[#allocation4 + $0xb0] sm:$0x30 pattern:$0x76325410] %v6673_v3  ;;  %v2383_v31 = vmul.f32 1.442695, %v2369_v5  ;;  %v2731_v62 = vmul.f32 %v14044_v61, %v14377_v12 }
 0x2b8   : > { %13186 = vpow2.f32 %v2000_v0  ;;  %v7041_v24 = vcombine.low %v7040_v14, %v7040_v14  ;;  %v7383_v63 = vcombine.low %v13173_v43, %v13173_v43  ;;  %v2732_v48 = vmul.f32 %v14044_v61, %v14356_v18 }
 0x2b9   : > { %13188 = vpow2.f32 %v2379_v10  ;;  %v6681_v34 = vcombine.high %v6680_v37, %v6680_v37  ;;  %v2742_v57 = vmul.f32 1.442695, %v2730_v28  ;;  %v2744_v23 = vmul.f32 1.442695, %v2731_v62 }
 0x2ba   : > { %2522 = vperm.xlu1 %12656, %v14308_v20   ;;  %13190 = vpow2.f32 %v2381_v49  ;;  %v13175_v38 = vpop.eup %13174  ;;  %7102 = vst [vmem:[#allocation4 + $0xb0] sm:$0x30] %v7041_v24  ;;  %v7390_v0 = vrot.slane %v7383_v63, %v13613_v59  ;;  %12452 = vst.sshfl [vmem:[#allocation4 + $0xb8] sm:$0xc0 pattern:$0x76325410] %v7383_v63  ;;  %v3077_v5 = vmul.f32 %v14097_v36, %v14340_v25 }
 0x2bb   : > { %12674 = vset.pattern.permute.xlu0 %v16725_v21  ;;  %13192 = vpow2.f32 %v2383_v31  ;;  %v2746_v3 = vmul.f32 1.442695, %v2732_v48  ;;  %v13177_v10 = vpop.eup %13176  ;;  %6748 = vst [vmem:[#allocation4 + $0xb8] sm:$0xc] %v6681_v34  ;;  %v2042_v14 = vrot.slane %v13175_v38, %v13613_v59  ;;  %v3078_v49 = vmul.f32 %v14097_v36, %v14377_v12 }
 0x2bc   : > { %6771 = vperm.xlu0 %12674, %v14163_v40   ;;  %12213 = vst.sshfl [vmem:[#allocation4 + $0xc0] sm:$0x3 pattern:$0x76325410] %v13175_v38  ;;  %13194 = vpow2.f32 %v2742_v57  ;;  %v3079_v28 = vmul.f32 %v14097_v36, %v14356_v18  ;;  %v13179_v43 = vpop.eup %13178  ;;  %v7391_v37 = vcombine.low %v7390_v0, %v7390_v0  ;;  %v2422_v31 = vcombine.low %v13177_v10, %v13177_v10 }
 0x2bd   : > { %13196 = vpow2.f32 %v2744_v23  ;;  %v3089_v62 = vmul.f32 1.442695, %v3077_v5  ;;  %v2043_v24 = vcombine.high %v2042_v14, %v2042_v14  ;;  %v2788_v63 = vrot.slane %v13179_v43, %v13613_v59  ;;  %12245 = vst.sshfl [vmem:[#allocation4 + $0xc8] sm:$0xc pattern:$0x76325410] %v13179_v43 }
 0x2be   : > { %2544 = vperm.xlu1 %12656, %v14167_v26   ;;  %13198 = vpow2.f32 %v2746_v3  ;;  %v3091_v38 = vmul.f32 1.442695, %v3078_v49  ;;  %7457 = vst [vmem:[#allocation4 + $0xb0] sm:$0xc0] %v7391_v37  ;;  %v2429_v34 = vrot.slane %v2422_v31, %v13613_v59  ;;  %v3093_v57 = vmul.f32 1.442695, %v3079_v28  ;;  %v14442_v3 = vpop.permute.xlu0 %8354  ;;  %v14444_v49 = vpop.permute.xlu1 %8156 }
 0x2bf   : > { %v13181_v48 = vpop.eup %13180  ;;  %12229 = vst.sshfl [vmem:[#allocation4 + $0xc0] sm:$0x30 pattern:$0x76325410] %v2422_v31  ;;  %13200 = vpow2.f32 %v3089_v62  ;;  %v3439_v0 = vmul.f32 %v13938_v50, %v14318_v58  ;;  %v16853_v5 = vmov 9   ;;  %v2789_v10 = vcombine.low %v2788_v63, %v2788_v63  ;;  %16854 = vst [vmem:[#allocation36_spill] sm:$0xff] %v14442_v3 }
 0x2c0   : > { %v13183_v23 = vpop.eup %13182  ;;  %12678 = vset.pattern.permute.xlu0 %v16853_v5  ;;  %2099 = vst [vmem:[#allocation4 + $0xc8] sm:$0x3] %v2043_v24  ;;  %v3132_v14 = vcombine.low %v13181_v48, %v13181_v48  ;;  %13202 = vpow2.f32 %v3091_v38  ;;  %16855 = vst [vmem:[#allocation37_spill] sm:$0xff] %v14444_v49  ;;  %v2430_v37 = vcombine.high %v2429_v34, %v2429_v34  ;;  %v13451_v63 = vmov 269488144  }
 0x2c1   : > { %v13185_v43 = vpop.eup %13184  ;;  %5384 = vperm.xlu0 %12678, %v14167_v26   ;;  %v2050_v28 = vrot.slane %v13183_v23, %v13613_v59  ;;  %12214 = vst.sshfl [vmem:[#allocation4 + $0x100] sm:$0x3 pattern:$0x76325410] %v13183_v23  ;;  %v3450_v31 = vmul.f32 1.442695, %v3439_v0  ;;  %v3786_v62 = vmul.f32 %v13943_v6, %v14318_v58  ;;  %13204 = vpow2.f32 %v3093_v57 }
 0x2c2   : > { %v13187_v21 = vpop.eup %13186  ;;  %12658 = vset.pattern.permute.xlu1 %v16838_v56  ;;  %2844 = vst [vmem:[#allocation4 + $0xc0] sm:$0x30] %v2789_v10  ;;  %12261 = vst.sshfl [vmem:[#allocation4 + $0xc8] sm:$0xc0 pattern:$0x76325410] %v3132_v14  ;;  %v2149_v38 = vunpack.c.l.s4 %v13451_v63  ;;  %v3139_v34 = vrot.slane %v3132_v14, %v13613_v59  ;;  %v2058_v23 = vrot.slane %v13185_v43, %v13613_v59  ;;  %v14458_v44 = vpop.permute.xlu1 %8544 }
 0x2c3   : > { %12215 = vst.sshfl [vmem:[#allocation4 + $0x140] sm:$0x3 pattern:$0x76325410] %v13185_v43  ;;  %v13189_v24 = vpop.eup %13188  ;;  %2877 = vperm.xlu1 %12658, %v14308_v20   ;;  %2490 = vst [vmem:[#allocation4 + $0xc8] sm:$0xc] %v2430_v37  ;;  %v2051_v0 = vcombine.high %v2050_v28, %v2050_v28  ;;  %v2066_v49 = vrot.slane %v13187_v21, %v13613_v59  ;;  %13206 = vpow2.f32 %v3450_v31  ;;  %v14456_v37 = vpop.permute.xlu0 %8932 }
 0x2c4   : > { %12216 = vst.sshfl [vmem:[#allocation4 + $0x180] sm:$0x3 pattern:$0x76325410] %v13187_v21  ;;  %v13191_v48 = vpop.eup %13190  ;;  %v16856_v10 = vmov 15   ;;  %v2431_v39 = vcombine.low %v13189_v24, %v13189_v24  ;;  %16857 = vst [vmem:[#allocation38_spill] sm:$0xff] %v14456_v37  ;;  %v3140_v14 = vcombine.low %v3139_v34, %v3139_v34  ;;  %v2059_v28 = vcombine.high %v2058_v23, %v2058_v23 }
 0x2c5   : > { %v13193_v3 = vpop.eup %13192  ;;  %12681 = vset.pattern.permute.xlu0 %v16856_v10  ;;  %v2440_v57 = vcombine.low %v13191_v48, %v13191_v48  ;;  %v3797_v32 = vmul.f32 1.442695, %v3786_v62  ;;  %16858 = vst [vmem:[#allocation39_spill] sm:$0xff] %v14458_v44  ;;  %v2067_v47 = vcombine.high %v2066_v49, %v2066_v49  ;;  %2101 = vst [vmem:[#allocation4 + $0x108] sm:$0x3] %v2051_v0  ;;  %v2150_v62 = vunpack.c.0.s8 %v2149_v38 }
 0x2c6   : > { %v13195_v63 = vpop.eup %13194  ;;  %7492 = vperm.xlu0 %12681, %v14308_v20   ;;  %v2449_v43 = vcombine.low %v13193_v3, %v13193_v3  ;;  %12230 = vst.sshfl [vmem:[#allocation4 + $0x100] sm:$0x30 pattern:$0x76325410] %v2431_v39  ;;  %3199 = vst [vmem:[#allocation4 + $0xc0] sm:$0xc0] %v3140_v14  ;;  %v2438_v49 = vrot.slane %v2431_v39, %v13613_v59  ;;  %v14472_v39 = vpop.permute.xlu1 %8742 }
 0x2c7   : > { %v13197_v21 = vpop.eup %13196  ;;  %12659 = vset.pattern.permute.xlu1 %v16859_v16  ;;  %12231 = vst.sshfl [vmem:[#allocation4 + $0x140] sm:$0x30 pattern:$0x76325410] %v2440_v57  ;;  %2103 = vst [vmem:[#allocation4 + $0x148] sm:$0x3] %v2059_v28  ;;  %v2447_v3 = vrot.slane %v2440_v57, %v13613_v59  ;;  %v2796_v34 = vrot.slane %v13195_v63, %v13613_v59  ;;  %13208 = vpow2.f32 %v3797_v32  ;;  %v14470_v28 = vpop.permute.xlu0 %9518 }
 0x2c8   : > { %12246 = vst.sshfl [vmem:[#allocation4 + $0x108] sm:$0xc pattern:$0x76325410] %v13195_v63  ;;  %v13199_v31 = vpop.eup %13198  ;;  %3221 = vperm.xlu1 %12659, %v14163_v40   ;;  %2105 = vst [vmem:[#allocation4 + $0x188] sm:$0x3] %v2067_v47  ;;  %v2456_v48 = vrot.slane %v2449_v43, %v13613_v59  ;;  %v2804_v38 = vrot.slane %v13197_v21, %v13613_v59  ;;  %v2439_v57 = vcombine.high %v2438_v49, %v2438_v49 }
 0x2c9   : > { %12232 = vst.sshfl [vmem:[#allocation4 + $0x180] sm:$0x30 pattern:$0x76325410] %v2449_v43  ;;  %v13201_v24 = vpop.eup %13200  ;;  %v16860_v23 = vmov 12   ;;  %v2812_v14 = vrot.slane %v13199_v31, %v13613_v59  ;;  %16861 = vst [vmem:[#allocation40_spill] sm:$0xff] %v14470_v28  ;;  %v2448_v43 = vcombine.high %v2447_v3, %v2447_v3  ;;  %v2797_v63 = vcombine.low %v2796_v34, %v2796_v34 }
 0x2ca   : > { %12247 = vst.sshfl [vmem:[#allocation4 + $0x148] sm:$0xc pattern:$0x76325410] %v13197_v21  ;;  %v13203_v0 = vpop.eup %13202  ;;  %12684 = vset.pattern.permute.xlu0 %v16860_v23  ;;  %v3141_v47 = vcombine.low %v13201_v24, %v13201_v24  ;;  %16862 = vst [vmem:[#allocation41_spill] sm:$0xff] %v14472_v39  ;;  %v2457_v44 = vcombine.high %v2456_v48, %v2456_v48  ;;  %v14476_v21 = vsub.s32 %v2150_v62, %v13606_v53  ;;  %v16863_v34 = vmov 13  }
 0x2cb   : > { %12248 = vst.sshfl [vmem:[#allocation4 + $0x188] sm:$0xc pattern:$0x76325410] %v13199_v31  ;;  %6427 = vperm.xlu0 %12684, %v14308_v20   ;;  %v13205_v37 = vpop.eup %13204  ;;  %v2127_v32 = vcombine.high %v13895_v55, %v13895_v55  ;;  %2492 = vst [vmem:[#allocation4 + $0x108] sm:$0xc] %v2439_v57  ;;  %v2805_v31 = vcombine.low %v2804_v38, %v2804_v38  ;;  %v2813_v24 = vcombine.low %v2812_v14, %v2812_v14 }
 0x2cc   : > { %3232 = vperm.xlu1 %12659, %v14308_v20   ;;  %12262 = vst.sshfl [vmem:[#allocation4 + $0x108] sm:$0xc0 pattern:$0x76325410] %v3141_v47  ;;  %2494 = vst [vmem:[#allocation4 + $0x148] sm:$0xc] %v2448_v43  ;;  %v3148_v49 = vrot.slane %v3141_v47, %v13613_v59  ;;  %v3150_v3 = vcombine.low %v13203_v0, %v13203_v0  ;;  %v3159_v39 = vcombine.low %v13205_v37, %v13205_v37  ;;  %v2146_v0 = vpop.permute.xlu0 %2145 }
 0x2cd   : > { %2496 = vst [vmem:[#allocation4 + $0x188] sm:$0xc] %v2457_v44  ;;  %2846 = vst [vmem:[#allocation4 + $0x100] sm:$0x30] %v2797_v63  ;;  %v13207_v48 = vpop.eup %13206  ;;  %v4149_v62 = vmul.f32 %v13985_v30, %v14318_v58  ;;  %v4496_v28 = vmul.f32 %v14005_v35, %v14318_v58  ;;  %v3440_v57 = vmul.f32 %v13938_v50, %v14340_v25  ;;  %v14490_v44 = vpop.permute.xlu1 %9130 }
 0x2ce   : > { %16864 = vst [vmem:[#allocation42_spill] sm:$0xff] %v14490_v44  ;;  %2848 = vst [vmem:[#allocation4 + $0x140] sm:$0x30] %v2805_v31  ;;  %v3149_v38 = vcombine.low %v3148_v49, %v3148_v49  ;;  %v3157_v37 = vrot.slane %v3150_v3, %v13613_v59  ;;  %v3498_v14 = vrot.slane %v13207_v48, %v13613_v59 }
 0x2cf   : > { %12686 = vset.pattern.permute.xlu0 %v16863_v34  ;;  %2850 = vst [vmem:[#allocation4 + $0x180] sm:$0x30] %v2813_v24  ;;  %12263 = vst.sshfl [vmem:[#allocation4 + $0x148] sm:$0xc0 pattern:$0x76325410] %v3150_v3  ;;  %v16865_v47 = vcombine.low %v14075_v33, %v14085_v42  ;;  %v14501_v63 = vrot.slane %v2127_v32, %v13613_v59  ;;  %v2154_v31 = vrot.slane %v2146_v0, %v14476_v21 }
 0x2d0   : > { %6804 = vperm.xlu0 %12686, %v14167_v26   ;;  %3254 = vperm.xlu1 %12659, %v14167_v26   ;;  %12277 = vst.sshfl [vmem:[#allocation4 + $0xd0] sm:$0x3 pattern:$0x76325410] %v13207_v48  ;;  %v3158_v24 = vcombine.low %v3157_v37, %v3157_v37  ;;  %v3166_v49 = vrot.slane %v3159_v39, %v13613_v59  ;;  %3201 = vst [vmem:[#allocation4 + $0x100] sm:$0xc0] %v3149_v38 }
 0x2d1   : > { %v14498_v43 = vrot.slane %v16865_v47, %v13613_v59  ;;  %12264 = vst.sshfl [vmem:[#allocation4 + $0x188] sm:$0xc0 pattern:$0x76325410] %v3159_v39  ;;  %v3499_v3 = vcombine.high %v3498_v14, %v3498_v14  ;;  %v4160_v44 = vmul.f32 1.442695, %v4149_v62  ;;  %v3441_v48 = vmul.f32 %v13938_v50, %v14377_v12  ;;  %v13209_v13 = vpop.eup %13208  ;;  %v2501_v62 = vpop.permute.xlu0 %2500 }
 0x2d2   : > { %v4507_v53 = vmul.f32 1.442695, %v4496_v28  ;;  %v3442_v47 = vmul.f32 %v13938_v50, %v14356_v18  ;;  %v3167_v0 = vcombine.low %v3166_v49, %v3166_v49  ;;  %3203 = vst [vmem:[#allocation4 + $0x140] sm:$0xc0] %v3158_v24  ;;  %v3452_v39 = vmul.f32 1.442695, %v3440_v57  ;;  %v14514_v28 = vpop.permute.xlu1 %9320 }
 0x2d3   : > { %v2232_v32 = vmul.f32 %v2154_v31, %v14498_v43  ;;  %3555 = vst [vmem:[#allocation4 + $0xd8] sm:$0x3] %v3499_v3  ;;  %16866 = vst [vmem:[#allocation43_spill] sm:$0xff] %v14514_v28  ;;  %v3842_v38 = vcombine.low %v13209_v13, %v13209_v13  ;;  %13210 = vpow2.f32 %v4160_v44  ;;  %v3454_v37 = vmul.f32 1.442695, %v3441_v48 }
 0x2d4   : > { %12691 = vset.pattern.permute.xlu0 %v16837_v1  ;;  %12661 = vset.pattern.permute.xlu1 %v16840_v46  ;;  %v3787_v14 = vmul.f32 %v13943_v6, %v14340_v25  ;;  %3205 = vst [vmem:[#allocation4 + $0x180] sm:$0xc0] %v3167_v0  ;;  %v3456_v24 = vmul.f32 1.442695, %v3442_v47  ;;  %v2509_v57 = vrot.slane %v2501_v62, %v14476_v21  ;;  %13212 = vpow2.f32 %v4507_v53 }
 0x2d5   : > { %2211 = vperm.xlu0 %12691, %v14501_v63   ;;  %3587 = vperm.xlu1 %12661, %v14308_v20   ;;  %v2254_v31 = vrot.slane %v2232_v32, %v13613_v59  ;;  %12218 = vst.sshfl [vmem:[#allocation5] sm:$0x3 pattern:$0x76325410] %v2232_v32  ;;  %v14522_v49 = vcombine.high %v14308_v20, %v14308_v20  ;;  %13214 = vpow2.f32 %v3452_v39  ;;  %v16867_v32 = vmov 5   ;;  %v3211_v39 = vpop.permute.xlu0 %3210 }
 0x2d6   : > { %v3849_v3 = vrot.slane %v3842_v38, %v13613_v59  ;;  %12293 = vst.sshfl [vmem:[#allocation4 + $0xd0] sm:$0x30 pattern:$0x76325410] %v3842_v38  ;;  %v3788_v44 = vmul.f32 %v13943_v6, %v14377_v12  ;;  %v3789_v48 = vmul.f32 %v13943_v6, %v14356_v18  ;;  %v2587_v47 = vmul.f32 %v2509_v57, %v14498_v43  ;;  %v14534_v53 = vpop.permute.xlu1 %9708 }
 0x2d7   : > { %v2255_v13 = vcombine.high %v2254_v31, %v2254_v31  ;;  %13216 = vpow2.f32 %v3454_v37  ;;  %v3799_v62 = vmul.f32 1.442695, %v3787_v14  ;;  %16868 = vst [vmem:[#allocation44_spill] sm:$0xff] %v14534_v53  ;;  %v4150_v57 = vmul.f32 %v13985_v30, %v14340_v25 }
 0x2d8   : > { %v3850_v0 = vcombine.high %v3849_v3, %v3849_v3  ;;  %13218 = vpow2.f32 %v3456_v24  ;;  %v3801_v38 = vmul.f32 1.442695, %v3788_v44  ;;  %v3803_v31 = vmul.f32 1.442695, %v3789_v48 }
 0x2d9   : > { %12692 = vset.pattern.permute.xlu0 %v16852_v17  ;;  %12662 = vset.pattern.permute.xlu1 %v16867_v32  ;;  %2329 = vst [vmem:[#allocation5 + $0x8] sm:$0x3] %v2255_v13  ;;  %v2603_v28 = vcombine.low %v2587_v47, %v2587_v47  ;;  %v3219_v3 = vrot.slane %v3211_v39, %v14476_v21  ;;  %13220 = vpow2.f32 %v3799_v62  ;;  %v4162_v44 = vmul.f32 1.442695, %v4150_v57  ;;  %v3921_v53 = vpop.permute.xlu0 %3920 }
 0x2da   : > { %3931 = vperm.xlu1 %12662, %v14163_v40   ;;  %2533 = vperm.xlu0 %12692, %v14522_v49   ;;  %3910 = vst [vmem:[#allocation4 + $0xd8] sm:$0xc] %v3850_v0  ;;  %v14541_v37 = vcombine.high %v14167_v26, %v14167_v26  ;;  %v4151_v14 = vmul.f32 %v13985_v30, %v14377_v12  ;;  %13222 = vpow2.f32 %v3801_v38  ;;  %v14551_v39 = vpop.permute.xlu1 %9906 }
 0x2db   : > { %v2610_v13 = vrot.slane %v2603_v28, %v13613_v59  ;;  %12234 = vst.sshfl [vmem:[#allocation5] sm:$0x30 pattern:$0x76325410] %v2603_v28  ;;  %v4152_v24 = vmul.f32 %v13985_v30, %v14356_v18  ;;  %v3297_v48 = vmul.f32 %v3219_v3, %v14498_v43  ;;  %13224 = vpow2.f32 %v3803_v31  ;;  %16869 = vst [vmem:[#allocation45_spill] sm:$0xff] %v14551_v39 }
 0x2dc   : > { %v4164_v47 = vmul.f32 1.442695, %v4151_v14  ;;  %13226 = vpow2.f32 %v4162_v44  ;;  %v3929_v57 = vrot.slane %v3921_v53, %v14476_v21  ;;  %v4497_v30 = vmul.f32 %v14005_v35, %v14340_v25 }
 0x2dd   : > { %v13211_v0 = vpop.eup %13210  ;;  %v2611_v62 = vcombine.high %v2610_v13, %v2610_v13  ;;  %v4166_v28 = vmul.f32 1.442695, %v4152_v24  ;;  %v3313_v38 = vcombine.low %v3297_v48, %v3297_v48  ;;  %v4498_v24 = vmul.f32 %v14005_v35, %v14377_v12  ;;  %v4631_v50 = vpop.permute.xlu0 %4630 }
 0x2de   : > { %3942 = vperm.xlu1 %12662, %v14308_v20   ;;  %2555 = vperm.xlu0 %12692, %v14541_v37   ;;  %12309 = vst.sshfl [vmem:[#allocation4 + $0xd8] sm:$0xc pattern:$0x76325410] %v13211_v0  ;;  %v13213_v6 = vpop.eup %13212  ;;  %v4208_v3 = vrot.slane %v13211_v0, %v13613_v59  ;;  %13228 = vpow2.f32 %v4164_v47  ;;  %v4007_v53 = vmul.f32 %v3929_v57, %v14498_v43  ;;  %v2856_v39 = vpop.permute.xlu1 %2855  ;;  %v4509_v54 = vmul.f32 1.442695, %v4497_v30 }
 0x2df   : > { %2692 = vst [vmem:[#allocation5 + $0x8] sm:$0xc] %v2611_v62  ;;  %v13215_v31 = vpop.eup %13214  ;;  %v3320_v14 = vrot.slane %v3313_v38, %v13613_v59  ;;  %12266 = vst.sshfl [vmem:[#allocation5 + $0x8] sm:$0xc0 pattern:$0x76325410] %v3313_v38  ;;  %v4552_v13 = vcombine.low %v13213_v6, %v13213_v6  ;;  %13230 = vpow2.f32 %v4166_v28  ;;  %v14569_v57 = vmul.f32 %v14005_v35, %v14356_v18 }
 0x2e0   : > { %v4209_v48 = vcombine.low %v4208_v3, %v4208_v3  ;;  %v3506_v0 = vrot.slane %v13215_v31, %v13613_v59  ;;  %12278 = vst.sshfl [vmem:[#allocation4 + $0x110] sm:$0x3 pattern:$0x76325410] %v13215_v31  ;;  %v4023_v36 = vcombine.low %v4007_v53, %v4007_v53  ;;  %v2864_v3 = vrot.slane %v2856_v39, %v14476_v21 }
 0x2e1   : > { %v13217_v44 = vpop.eup %13216  ;;  %v3321_v38 = vcombine.low %v3320_v14, %v3320_v14  ;;  %v4559_v6 = vrot.slane %v4552_v13, %v13613_v59  ;;  %12325 = vst.sshfl [vmem:[#allocation4 + $0xd8] sm:$0xc0 pattern:$0x76325410] %v4552_v13  ;;  %v4639_v31 = vrot.slane %v4631_v50, %v14476_v21  ;;  %v4511_v53 = vmul.f32 1.442695, %v4498_v24  ;;  %v5696_v24 = vpop.permute.xlu0 %5695 }
 0x2e2   : > { %3964 = vperm.xlu1 %12662, %v14167_v26   ;;  %12695 = vset.pattern.permute.xlu0 %v16838_v56  ;;  %v13219_v62 = vpop.eup %13218  ;;  %v3514_v47 = vrot.slane %v13217_v44, %v13613_v59  ;;  %12279 = vst.sshfl [vmem:[#allocation4 + $0x150] sm:$0x3 pattern:$0x76325410] %v13217_v44  ;;  %4264 = vst [vmem:[#allocation4 + $0xd0] sm:$0x30] %v4209_v48  ;;  %v3507_v28 = vcombine.high %v3506_v0, %v3506_v0  ;;  %13232 = vpow2.f32 %v4509_v54 }
 0x2e3   : > { %2921 = vperm.xlu0 %12695, %v14501_v63   ;;  %12280 = vst.sshfl [vmem:[#allocation4 + $0x190] sm:$0x3 pattern:$0x76325410] %v13219_v62  ;;  %v13221_v14 = vpop.eup %13220  ;;  %3401 = vst [vmem:[#allocation5] sm:$0xc0] %v3321_v38  ;;  %v4560_v13 = vcombine.low %v4559_v6, %v4559_v6  ;;  %v3522_v44 = vrot.slane %v13219_v62, %v13613_v59  ;;  %v4030_v35 = vrot.slane %v4023_v36, %v13613_v59 }
 0x2e4   : > { %v3515_v61 = vcombine.high %v3514_v47, %v3514_v47  ;;  %v13223_v51 = vpop.eup %13222  ;;  %12298 = vst.sshfl [vmem:[#allocation5 + $0x10] sm:$0x30 pattern:$0x76325410] %v4023_v36  ;;  %v2942_v39 = vmul.f32 %v2864_v3, %v14498_v43  ;;  %v4717_v50 = vmul.f32 %v4639_v31, %v14498_v43  ;;  %3557 = vst [vmem:[#allocation4 + $0x118] sm:$0x3] %v3507_v28  ;;  %v3566_v3 = vpop.permute.xlu1 %3565  ;;  %13234 = vpow2.f32 %v4511_v53 }
 0x2e5   : > { %v13225_v48 = vpop.eup %13224  ;;  %4619 = vst [vmem:[#allocation4 + $0xd0] sm:$0xc0] %v4560_v13  ;;  %v3523_v0 = vcombine.high %v3522_v44, %v3522_v44  ;;  %v3851_v30 = vcombine.low %v13221_v14, %v13221_v14  ;;  %v3860_v62 = vcombine.low %v13223_v51, %v13223_v51  ;;  %v4031_v38 = vcombine.high %v4030_v35, %v4030_v35 }
 0x2e6   : > { %12664 = vset.pattern.permute.xlu1 %v16843_v52  ;;  %3559 = vst [vmem:[#allocation4 + $0x158] sm:$0x3] %v3515_v61  ;;  %v13227_v36 = vpop.eup %13226  ;;  %v2964_v6 = vrot.slane %v2942_v39, %v13613_v59  ;;  %12250 = vst.sshfl [vmem:[#allocation5 + $0x8] sm:$0xc pattern:$0x76325410] %v2942_v39  ;;  %v4733_v47 = vcombine.low %v4717_v50, %v4717_v50  ;;  %v3869_v31 = vcombine.low %v13225_v48, %v13225_v48 }
 0x2e7   : > { %4297 = vperm.xlu1 %12664, %v14308_v20   ;;  %12696 = vset.pattern.permute.xlu0 %v16859_v16  ;;  %v3574_v28 = vrot.slane %v3566_v3, %v14476_v21  ;;  %3561 = vst [vmem:[#allocation4 + $0x198] sm:$0x3] %v3523_v0  ;;  %v3858_v55 = vrot.slane %v3851_v30, %v13613_v59  ;;  %12294 = vst.sshfl [vmem:[#allocation4 + $0x110] sm:$0x30 pattern:$0x76325410] %v3851_v30 }
 0x2e8   : > { %3243 = vperm.xlu0 %12696, %v14522_v49   ;;  %v3867_v13 = vrot.slane %v3860_v62, %v13613_v59  ;;  %12295 = vst.sshfl [vmem:[#allocation4 + $0x150] sm:$0x30 pattern:$0x76325410] %v3860_v62  ;;  %v4216_v51 = vrot.slane %v13227_v36, %v13613_v59  ;;  %4112 = vst [vmem:[#allocation5 + $0x18] sm:$0xc] %v4031_v38  ;;  %v2965_v35 = vcombine.low %v2964_v6, %v2964_v6  ;;  %v13229_v39 = vpop.eup %13228 }
 0x2e9   : > { %12310 = vst.sshfl [vmem:[#allocation4 + $0x118] sm:$0xc pattern:$0x76325410] %v13227_v36  ;;  %v4740_v54 = vrot.slane %v4733_v47, %v13613_v59  ;;  %v5704_v61 = vrot.slane %v5696_v24, %v14476_v21  ;;  %v16870_v14 = vmov 7   ;;  %v3876_v44 = vrot.slane %v3869_v31, %v13613_v59  ;;  %v7678_v50 = vld [vmem:[#allocation4 + $0x8] sm:$0xff]  ;;  %v13231_v62 = vpop.eup %13230 }
 0x2ea   : > { %12330 = vst.sshfl [vmem:[#allocation5 + $0x18] sm:$0xc0 pattern:$0x76325410] %v4733_v47  ;;  %v3652_v48 = vmul.f32 %v3574_v28, %v14498_v43  ;;  %v3859_v0 = vcombine.high %v3858_v55, %v3858_v55  ;;  %v3868_v30 = vcombine.high %v3867_v13, %v3867_v13  ;;  %3038 = vst [vmem:[#allocation5] sm:$0x30] %v2965_v35  ;;  %v4276_v13 = vpop.permute.xlu1 %4275  ;;  %v7116_v35 = vpop.permute.xlu0 %7115 }
 0x2eb   : > { %12665 = vset.pattern.permute.xlu1 %v16870_v14  ;;  %12296 = vst.sshfl [vmem:[#allocation4 + $0x190] sm:$0x30 pattern:$0x76325410] %v3869_v31  ;;  %v4741_v36 = vcombine.low %v4740_v54, %v4740_v54  ;;  %v5782_v38 = vmul.f32 %v5704_v61, %v14498_v43  ;;  %v3877_v6 = vcombine.high %v3876_v44, %v3876_v44  ;;  %v7686_v55 = vmul.f32 0.0, %v7678_v50  ;;  %v7677_v61 = vld [vmem:[#allocation4] sm:$0xff] }
 0x2ec   : > { %4641 = vperm.xlu1 %12665, %v14163_v40   ;;  %3265 = vperm.xlu0 %12696, %v14541_v37   ;;  %v4217_v47 = vcombine.low %v4216_v51, %v4216_v51  ;;  %12311 = vst.sshfl [vmem:[#allocation4 + $0x158] sm:$0xc pattern:$0x76325410] %v13229_v39  ;;  %v3674_v3 = vrot.slane %v3652_v48, %v13613_v59  ;;  %3912 = vst [vmem:[#allocation4 + $0x118] sm:$0xc] %v3859_v0 }
 0x2ed   : > { %12282 = vst.sshfl [vmem:[#allocation5 + $0x10] sm:$0x3 pattern:$0x76325410] %v3652_v48  ;;  %3914 = vst [vmem:[#allocation4 + $0x158] sm:$0xc] %v3868_v30  ;;  %v4224_v31 = vrot.slane %v13229_v39, %v13613_v59  ;;  %v4232_v28 = vrot.slane %v13231_v62, %v13613_v59  ;;  %v5804_v24 = vrot.slane %v5782_v38, %v13613_v59 }
 0x2ee   : > { %12312 = vst.sshfl [vmem:[#allocation4 + $0x198] sm:$0xc pattern:$0x76325410] %v13231_v62  ;;  %4821 = vst [vmem:[#allocation5 + $0x10] sm:$0xc0] %v4741_v36  ;;  %v4859_v54 = vmul.f32 %v14124_v11, %v14318_v58  ;;  %v3675_v39 = vcombine.high %v3674_v3, %v3674_v3  ;;  %v4284_v48 = vrot.slane %v4276_v13, %v14476_v21  ;;  %v13233_v62 = vpop.eup %13232 }
 0x2ef   : > { %12378 = vst.sshfl [vmem:[#allocation5 + $0x28] sm:$0xc pattern:$0x76325410] %v5782_v38  ;;  %3916 = vst [vmem:[#allocation4 + $0x198] sm:$0xc] %v3877_v6  ;;  %v7124_v53 = vrot.slane %v7116_v35, %v14476_v21  ;;  %v5805_v0 = vcombine.low %v5804_v24, %v5804_v24  ;;  %v4225_v30 = vcombine.low %v4224_v31, %v4224_v31 }
 0x2f0   : > { %4266 = vst [vmem:[#allocation4 + $0x110] sm:$0x30] %v4217_v47  ;;  %v4513_v51 = vmul.f32 1.442695, %v14569_v57  ;;  %v7694_v44 = vld [vmem:[#allocation5 + $0x8] sm:$0xff]  ;;  %4652 = vperm.xlu1 %12665, %v14308_v20   ;;  %12699 = vset.pattern.permute.xlu0 %v16840_v46  ;;  %v4233_v57 = vcombine.low %v4232_v28, %v4232_v28  ;;  %v4362_v36 = vmul.f32 %v4284_v48, %v14498_v43  ;;  %v7685_v47 = vmul.f32 0.0, %v7677_v61 }
 0x2f1   : > { %v7702_v50 = vadd.f32 %v7694_v44, %v7686_v55  ;;  %3631 = vperm.xlu0 %12699, %v14501_v63   ;;  %3749 = vst [vmem:[#allocation5 + $0x18] sm:$0x3] %v3675_v39  ;;  %v7202_v38 = vmul.f32 %v7124_v53, %v14498_v43  ;;  %v4860_v6 = vmul.f32 %v14124_v11, %v14340_v25  ;;  %5878 = vst [vmem:[#allocation5 + $0x20] sm:$0x30] %v5805_v0  ;;  %v7693_v28 = vld [vmem:[#allocation5] sm:$0xff]  ;;  %v7680_v13 = vld [vmem:[#allocation4 + $0x18] sm:$0xff]  ;;  %v14614_v44 = vpop.permute.xlu0 %8547 }
 0x2f2   : > { %13236 = vpow2.f32 %v4513_v51  ;;  %4268 = vst [vmem:[#allocation4 + $0x150] sm:$0x30] %v4225_v30  ;;  %4270 = vst [vmem:[#allocation4 + $0x190] sm:$0x30] %v4233_v57  ;;  %v4561_v3 = vcombine.low %v13233_v62, %v13233_v62  ;;  %v4870_v55 = vmul.f32 1.442695, %v4859_v54  ;;  %v5206_v31 = vmul.f32 %v14128_v27, %v14318_v58  ;;  %v4986_v51 = vpop.permute.xlu1 %4985  ;;  %v13235_v62 = vpop.eup %13234 }
 0x2f3   : > { %7710 = vst [vmem:[#allocation5 + $0x8] sm:$0xff] %v7702_v50  ;;  %v4384_v24 = vrot.slane %v4362_v36, %v13613_v59  ;;  %12314 = vst.sshfl [vmem:[#allocation5 + $0x18] sm:$0xc pattern:$0x76325410] %v4362_v36  ;;  %v7224_v35 = vrot.slane %v7202_v38, %v13613_v59  ;;  %v5207_v54 = vmul.f32 %v14128_v27, %v14340_v25  ;;  %v7688_v0 = vmul.f32 0.0, %v7680_v13 }
 0x2f4   : > { %12442 = vst.sshfl [vmem:[#allocation5 + $0x38] sm:$0xc pattern:$0x76325410] %v7202_v38  ;;  %16871 = vst [vmem:[#allocation46_spill] sm:$0xff] %v14614_v44  ;;  %4674 = vperm.xlu1 %12665, %v14167_v26   ;;  %v7701_v39 = vadd.f32 %v7693_v28, %v7685_v47  ;;  %v4994_v48 = vrot.slane %v4986_v51, %v14476_v21  ;;  %v4568_v57 = vrot.slane %v4561_v3, %v13613_v59 }
 0x2f5   : > { %v4872_v61 = vmul.f32 1.442695, %v4860_v6  ;;  %12700 = vset.pattern.permute.xlu0 %v16867_v32  ;;  %12326 = vst.sshfl [vmem:[#allocation4 + $0x118] sm:$0xc0 pattern:$0x76325410] %v4561_v3  ;;  %v4385_v53 = vcombine.low %v4384_v24, %v4384_v24  ;;  %v7225_v50 = vcombine.low %v7224_v35, %v7224_v35  ;;  %13238 = vpow2.f32 %v4870_v55  ;;  %v14628_v24 = vpop.permute.xlu0 %9133 }
 0x2f6   : > { %3953 = vperm.xlu0 %12700, %v14522_v49   ;;  %7709 = vst [vmem:[#allocation5] sm:$0xff] %v7701_v39  ;;  %v5072_v30 = vmul.f32 %v4994_v48, %v14498_v43  ;;  %v5217_v36 = vmul.f32 1.442695, %v5206_v31  ;;  %v5219_v38 = vmul.f32 1.442695, %v5207_v54  ;;  %v5569_v6 = vmul.f32 %v14009_v45, %v14318_v58  ;;  %v5341_v28 = vpop.permute.xlu1 %5340  ;;  %16872 = vst [vmem:[#allocation47_spill] sm:$0xff] %v14628_v24 }
 0x2f7   : > { %4458 = vst [vmem:[#allocation5 + $0x10] sm:$0x30] %v4385_v53  ;;  %7298 = vst [vmem:[#allocation5 + $0x30] sm:$0x30] %v7225_v50  ;;  %13240 = vpow2.f32 %v4872_v61  ;;  %v4569_v3 = vcombine.low %v4568_v57, %v4568_v57  ;;  %v4570_v55 = vcombine.low %v13235_v62, %v13235_v62  ;;  %v5570_v13 = vmul.f32 %v14009_v45, %v14340_v25  ;;  %v7679_v31 = vld [vmem:[#allocation4 + $0x10] sm:$0xff] }
 0x2f8   : > { %12667 = vset.pattern.permute.xlu1 %v16853_v5  ;;  %v5094_v47 = vrot.slane %v5072_v30, %v13613_v59  ;;  %12346 = vst.sshfl [vmem:[#allocation5 + $0x20] sm:$0x3 pattern:$0x76325410] %v5072_v30  ;;  %v5349_v35 = vrot.slane %v5341_v28, %v14476_v21  ;;  %13242 = vpow2.f32 %v5217_v36  ;;  %v5580_v50 = vmul.f32 1.442695, %v5569_v6 }
 0x2f9   : > { %5351 = vperm.xlu1 %12667, %v14163_v40   ;;  %v4577_v54 = vrot.slane %v4570_v55, %v13613_v59  ;;  %4621 = vst [vmem:[#allocation4 + $0x110] sm:$0xc0] %v4569_v3  ;;  %12327 = vst.sshfl [vmem:[#allocation4 + $0x158] sm:$0xc0 pattern:$0x76325410] %v4570_v55  ;;  %13244 = vpow2.f32 %v5219_v38  ;;  %v14638_v44 = vpop.permute.xlu0 %9711  ;;  %v5916_v3 = vmul.f32 %v14132_v15, %v14318_v58 }
 0x2fa   : > { %3975 = vperm.xlu0 %12700, %v14541_v37   ;;  %v7696_v51 = vld [vmem:[#allocation5 + $0x18] sm:$0xff]  ;;  %v5095_v61 = vcombine.high %v5094_v47, %v5094_v47  ;;  %v5427_v53 = vmul.f32 %v5349_v35, %v14498_v43  ;;  %v5582_v62 = vmul.f32 1.442695, %v5570_v13  ;;  %v7687_v28 = vmul.f32 0.0, %v7679_v31  ;;  %v6051_v24 = vpop.permute.xlu1 %6050  ;;  %16873 = vst [vmem:[#allocation48_spill] sm:$0xff] %v14638_v44 }
 0x2fb   : > { %v7704_v48 = vadd.f32 %v7696_v51, %v7688_v0  ;;  %v4578_v30 = vcombine.low %v4577_v54, %v4577_v54  ;;  %13246 = vpow2.f32 %v5580_v50  ;;  %v6059_v36 = vrot.slane %v6051_v24, %v14476_v21 }
 0x2fc   : > { %v13237_v39 = vpop.eup %13236  ;;  %5169 = vst [vmem:[#allocation5 + $0x28] sm:$0x3] %v5095_v61  ;;  %v5443_v47 = vcombine.low %v5427_v53, %v5427_v53  ;;  %13248 = vpow2.f32 %v5582_v62  ;;  %v5927_v50 = vmul.f32 1.442695, %v5916_v3 }
 0x2fd   : > { %12668 = vset.pattern.permute.xlu1 %v16851_v60  ;;  %v4579_v57 = vcombine.low %v13237_v39, %v13237_v39  ;;  %7712 = vst [vmem:[#allocation5 + $0x18] sm:$0xff] %v7704_v48  ;;  %4623 = vst [vmem:[#allocation4 + $0x150] sm:$0xc0] %v4578_v30  ;;  %v6137_v13 = vmul.f32 %v6059_v36, %v14498_v43  ;;  %v2157_v54 = vpop.permute.xlu0 %2156  ;;  %v14655_v48 = vcombine.high %v14498_v43, %v14498_v43 }
 0x2fe   : > { %6061 = vperm.xlu1 %12668, %v14163_v40   ;;  %12703 = vset.pattern.permute.xlu0 %v16843_v52  ;;  %v7695_v0 = vld [vmem:[#allocation5 + $0x10] sm:$0xff]  ;;  %v5450_v6 = vrot.slane %v5443_v47, %v13613_v59  ;;  %12362 = vst.sshfl [vmem:[#allocation5 + $0x20] sm:$0x30 pattern:$0x76325410] %v5443_v47  ;;  %v6761_v61 = vpop.permute.xlu1 %6760  ;;  %v2165_v53 = vrot.slane %v2157_v54, %v14476_v21  ;;  %13250 = vpow2.f32 %v5927_v50 }
 0x2ff   : > { %4341 = vperm.xlu0 %12703, %v14501_v63   ;;  %12328 = vst.sshfl [vmem:[#allocation4 + $0x198] sm:$0xc0 pattern:$0x76325410] %v4579_v57  ;;  %v7703_v38 = vadd.f32 %v7695_v0, %v7687_v28  ;;  %v13239_v55 = vpop.eup %13238  ;;  %v4586_v35 = vrot.slane %v4579_v57, %v13613_v59  ;;  %v6153_v51 = vcombine.low %v6137_v13, %v6137_v13 }
 0x300   : > { %v5451_v24 = vcombine.high %v5450_v6, %v5450_v6  ;;  %12341 = vst.sshfl [vmem:[#allocation4 + $0xe0] sm:$0x3 pattern:$0x76325410] %v13239_v55  ;;  %v6769_v39 = vrot.slane %v6761_v61, %v14476_v21  ;;  %v2233_v47 = vmul.f32 %v2165_v53, %v14655_v48  ;;  %v4918_v0 = vrot.slane %v13239_v55, %v13613_v59  ;;  %v7682_v61 = vld [vmem:[#allocation4 + $0x28] sm:$0xff] }
 0x301   : > { %v13241_v31 = vpop.eup %13240  ;;  %7711 = vst [vmem:[#allocation5 + $0x10] sm:$0xff] %v7703_v38  ;;  %v6160_v57 = vrot.slane %v6153_v51, %v13613_v59  ;;  %12394 = vst.sshfl [vmem:[#allocation5 + $0x28] sm:$0xc0 pattern:$0x76325410] %v6153_v51  ;;  %v4587_v62 = vcombine.low %v4586_v35, %v4586_v35  ;;  %v16874_v6 = vcombine.low %v14110_v8, %v14136_v22 }
 0x302   : > { %12670 = vset.pattern.permute.xlu1 %v16853_v5  ;;  %12342 = vst.sshfl [vmem:[#allocation4 + $0x120] sm:$0x3 pattern:$0x76325410] %v13241_v31  ;;  %5532 = vst [vmem:[#allocation5 + $0x28] sm:$0xc] %v5451_v24  ;;  %v13243_v30 = vpop.eup %13242  ;;  %v6847_v28 = vmul.f32 %v6769_v39, %v14498_v43  ;;  %v4926_v36 = vrot.slane %v13241_v31, %v13613_v59  ;;  %v2190_v24 = vpop.permute.xlu0 %2189  ;;  %v2262_v55 = vrot.slane %v2233_v47, %v13613_v59 }
 0x303   : > { %5362 = vperm.xlu1 %12670, %v14308_v20   ;;  %12704 = vset.pattern.permute.xlu0 %v16870_v14  ;;  %v13245_v38 = vpop.eup %13244  ;;  %v14668_v13 = vrot.slane %v16874_v6, %v13613_v59  ;;  %v6161_v3 = vcombine.low %v6160_v57, %v6160_v57  ;;  %4625 = vst [vmem:[#allocation4 + $0x190] sm:$0xc0] %v4587_v62  ;;  %12219 = vst.sshfl [vmem:[#allocation5 + $0x40] sm:$0x3 pattern:$0x76325410] %v2233_v47  ;;  %v7471_v39 = vpop.permute.xlu1 %7470 }
 0x304   : > { %4663 = vperm.xlu0 %12704, %v14522_v49   ;;  %v5262_v35 = vcombine.low %v13243_v30, %v13243_v30  ;;  %v6863_v54 = vcombine.low %v6847_v28, %v6847_v28  ;;  %v2198_v31 = vrot.slane %v2190_v24, %v14476_v21  ;;  %v7479_v53 = vrot.slane %v7471_v39, %v14476_v21 }
 0x305   : > { %v14671_v51 = vpop.eup %13246  ;;  %6241 = vst [vmem:[#allocation5 + $0x20] sm:$0xc0] %v6161_v3  ;;  %v4919_v57 = vcombine.high %v4918_v0, %v4918_v0  ;;  %v4927_v62 = vcombine.high %v4926_v36, %v4926_v36  ;;  %v2263_v28 = vcombine.high %v2262_v55, %v2262_v55  ;;  %v7690_v24 = vmul.f32 0.0, %v7682_v61  ;;  %v7681_v36 = vld [vmem:[#allocation4 + $0x20] sm:$0xff] }
 0x306   : > { %12357 = vst.sshfl [vmem:[#allocation4 + $0xe0] sm:$0x30 pattern:$0x76325410] %v5262_v35  ;;  %v6870_v30 = vrot.slane %v6863_v54, %v13613_v59  ;;  %v2236_v47 = vmul.f32 %v2198_v31, %v14668_v13  ;;  %v14681_v6 = vpop.eup %13248  ;;  %v7557_v44 = vmul.f32 %v7479_v53, %v14498_v43  ;;  %v5271_v3 = vcombine.low %v13245_v38, %v13245_v38 }
 0x307   : > { %12673 = vset.pattern.permute.xlu1 %v16850_v7  ;;  %12373 = vst.sshfl [vmem:[#allocation4 + $0xe8] sm:$0xc pattern:$0x76325410] %v14671_v51  ;;  %4975 = vst [vmem:[#allocation4 + $0xe8] sm:$0x3] %v4919_v57  ;;  %v5917_v0 = vmul.f32 %v14132_v15, %v14340_v25  ;;  %v2867_v55 = vpop.permute.xlu0 %2866  ;;  %v6406_v31 = vpop.permute.xlu1 %6405 }
 0x308   : > { %5717 = vperm.xlu1 %12673, %v14308_v20   ;;  %4685 = vperm.xlu0 %12704, %v14541_v37   ;;  %12426 = vst.sshfl [vmem:[#allocation5 + $0x30] sm:$0x30 pattern:$0x76325410] %v6863_v54  ;;  %4977 = vst [vmem:[#allocation4 + $0x128] sm:$0x3] %v4927_v62  ;;  %v6871_v52 = vcombine.high %v6870_v30, %v6870_v30  ;;  %v2286_v54 = vrot.slane %v2236_v47, %v13613_v59 }
 0x309   : > { %v7698_v39 = vld [vmem:[#allocation5 + $0x28] sm:$0xff]  ;;  %2331 = vst [vmem:[#allocation5 + $0x48] sm:$0x3] %v2263_v28  ;;  %v7573_v61 = vcombine.low %v7557_v44, %v7557_v44  ;;  %v2875_v38 = vrot.slane %v2867_v55, %v14476_v21  ;;  %v6414_v57 = vrot.slane %v6406_v31, %v14476_v21  ;;  %v7689_v62 = vmul.f32 0.0, %v7681_v36  ;;  %v7683_v31 = vld [vmem:[#allocation4 + $0x30] sm:$0xff] }
 0x30a   : > { %12222 = vst.sshfl [vmem:[#allocation5 + $0x100] sm:$0x3 pattern:$0x76325410] %v2236_v47  ;;  %v7706_v50 = vadd.f32 %v7698_v39, %v7690_v24  ;;  %6952 = vst [vmem:[#allocation5 + $0x38] sm:$0xc] %v6871_v52  ;;  %v2287_v53 = vcombine.high %v2286_v54, %v2286_v54  ;;  %v5269_v55 = vrot.slane %v5262_v35, %v13613_v59 }
 0x30b   : > { %12374 = vst.sshfl [vmem:[#allocation4 + $0x128] sm:$0xc pattern:$0x76325410] %v14681_v6  ;;  %v7580_v30 = vrot.slane %v7573_v61, %v13613_v59  ;;  %v2943_v28 = vmul.f32 %v2875_v38, %v14655_v48  ;;  %v5929_v44 = vmul.f32 1.442695, %v5917_v0  ;;  %v6492_v24 = vmul.f32 %v6414_v57, %v14498_v43  ;;  %v2900_v39 = vpop.permute.xlu0 %2899 }
 0x30c   : > { %12675 = vset.pattern.permute.xlu1 %v16856_v10  ;;  %12709 = vset.pattern.permute.xlu0 %v16850_v7  ;;  %12358 = vst.sshfl [vmem:[#allocation4 + $0x120] sm:$0x30 pattern:$0x76325410] %v5271_v3  ;;  %7714 = vst [vmem:[#allocation5 + $0x28] sm:$0xff] %v7706_v50  ;;  %v7697_v47 = vld [vmem:[#allocation5 + $0x20] sm:$0xff]  ;;  %v2908_v36 = vrot.slane %v2900_v39, %v14476_v21 }
 0x30d   : > { %7481 = vperm.xlu1 %12675, %v14163_v40   ;;  %5728 = vperm.xlu0 %12709, %v14522_v49   ;;  %12458 = vst.sshfl [vmem:[#allocation5 + $0x38] sm:$0xc0 pattern:$0x76325410] %v7573_v61  ;;  %2337 = vst [vmem:[#allocation5 + $0x108] sm:$0x3] %v2287_v53  ;;  %v7705_v46 = vadd.f32 %v7697_v47, %v7689_v62  ;;  %v7581_v52 = vcombine.low %v7580_v30, %v7580_v30  ;;  %13252 = vpow2.f32 %v5929_v44  ;;  %v13251_v61 = vpop.eup %13250 }
 0x30e   : > { %v2972_v54 = vrot.slane %v2943_v28, %v13613_v59  ;;  %12251 = vst.sshfl [vmem:[#allocation5 + $0x48] sm:$0xc pattern:$0x76325410] %v2943_v28  ;;  %v6514_v50 = vrot.slane %v6492_v24, %v13613_v59  ;;  %v14703_v0 = vpop.permute.xlu1 %8159  ;;  %v2946_v35 = vmul.f32 %v2908_v36, %v14668_v13  ;;  %v5270_v62 = vcombine.high %v5269_v55, %v5269_v55 }
 0x30f   : > { %12410 = vst.sshfl [vmem:[#allocation5 + $0x30] sm:$0x3 pattern:$0x76325410] %v6492_v24  ;;  %16875 = vst [vmem:[#allocation49_spill] sm:$0xff] %v14703_v0  ;;  %v5278_v28 = vrot.slane %v5271_v3, %v13613_v59  ;;  %v5628_v47 = vrot.slane %v14671_v51, %v13613_v59  ;;  %v5636_v44 = vrot.slane %v14681_v6, %v13613_v59  ;;  %v7684_v3 = vld [vmem:[#allocation4 + $0x38] sm:$0xff] }
 0x310   : > { %7713 = vst [vmem:[#allocation5 + $0x20] sm:$0xff] %v7705_v46  ;;  %7661 = vst [vmem:[#allocation5 + $0x30] sm:$0xc0] %v7581_v52  ;;  %v2973_v43 = vcombine.low %v2972_v54, %v2972_v54  ;;  %v6515_v38 = vcombine.high %v6514_v50, %v6514_v50  ;;  %v2996_v53 = vrot.slane %v2946_v35, %v13613_v59  ;;  %v3577_v57 = vpop.permute.xlu0 %3576  ;;  %v16876_v46 = vmov 14  }
 0x311   : > { %12676 = vset.pattern.permute.xlu1 %v16860_v23  ;;  %12711 = vset.pattern.permute.xlu0 %v16851_v60  ;;  %12254 = vst.sshfl [vmem:[#allocation5 + $0x108] sm:$0xc pattern:$0x76325410] %v2946_v35  ;;  %v3585_v30 = vrot.slane %v3577_v57, %v14476_v21  ;;  %5330 = vst [vmem:[#allocation4 + $0xe8] sm:$0xc] %v5270_v62  ;;  %v5972_v55 = vcombine.low %v13251_v61, %v13251_v61 }
 0x312   : > { %6416 = vperm.xlu1 %12676, %v14163_v40   ;;  %6105 = vperm.xlu0 %12711, %v14541_v37   ;;  %3040 = vst [vmem:[#allocation5 + $0x40] sm:$0x30] %v2973_v43  ;;  %6589 = vst [vmem:[#allocation5 + $0x38] sm:$0x3] %v6515_v38  ;;  %v2997_v24 = vcombine.low %v2996_v53, %v2996_v53  ;;  %v7691_v54 = vmul.f32 0.0, %v7683_v31  ;;  %v5279_v36 = vcombine.high %v5278_v28, %v5278_v28 }
 0x313   : > { %v14717_v39 = vpop.permute.xlu1 %8357  ;;  %v3653_v52 = vmul.f32 %v3585_v30, %v14655_v48  ;;  %v5629_v50 = vcombine.low %v5628_v47, %v5628_v47  ;;  %12389 = vst.sshfl [vmem:[#allocation4 + $0xe8] sm:$0xc0 pattern:$0x76325410] %v5972_v55  ;;  %v5979_v61 = vrot.slane %v5972_v55, %v13613_v59  ;;  %v7692_v31 = vmul.f32 0.0, %v7684_v3 }
 0x314   : > { %16877 = vst [vmem:[#allocation50_spill] sm:$0xff] %v14717_v39  ;;  %3046 = vst [vmem:[#allocation5 + $0x100] sm:$0x30] %v2997_v24  ;;  %v3610_v51 = vpop.permute.xlu0 %3609  ;;  %v4861_v47 = vmul.f32 %v14124_v11, %v14377_v12 }
 0x315   : > { %v3682_v43 = vrot.slane %v3653_v52, %v13613_v59  ;;  %12283 = vst.sshfl [vmem:[#allocation5 + $0x50] sm:$0x3 pattern:$0x76325410] %v3653_v52  ;;  %v3618_v35 = vrot.slane %v3610_v51, %v14476_v21  ;;  %5332 = vst [vmem:[#allocation4 + $0x128] sm:$0xc] %v5279_v36  ;;  %v4862_v52 = vmul.f32 %v14124_v11, %v14356_v18 }
 0x316   : > { %12677 = vset.pattern.permute.xlu1 %v16876_v46  ;;  %12714 = vset.pattern.permute.xlu0 %v16848_v41  ;;  %5684 = vst [vmem:[#allocation4 + $0xe0] sm:$0x30] %v5629_v50  ;;  %v5208_v50 = vmul.f32 %v14128_v27, %v14377_v12 }
 0x317   : > { %7126 = vperm.xlu1 %12677, %v14163_v40   ;;  %5040 = vperm.xlu0 %12714, %v14541_v37   ;;  %v7699_v6 = vld [vmem:[#allocation5 + $0x30] sm:$0xff]  ;;  %v5637_v40 = vcombine.low %v5636_v44, %v5636_v44  ;;  %v3683_v53 = vcombine.high %v3682_v43, %v3682_v43  ;;  %v3656_v57 = vmul.f32 %v3618_v35, %v14668_v13  ;;  %v13253_v30 = vpop.eup %13252  ;;  %v4874_v35 = vmul.f32 1.442695, %v4861_v47 }
 0x318   : > { %v7707_v38 = vadd.f32 %v7699_v6, %v7691_v54  ;;  %v14728_v62 = vpop.permute.xlu1 %8745  ;;  %v5980_v54 = vcombine.low %v5979_v61, %v5979_v61  ;;  %v5981_v36 = vcombine.low %v13253_v30, %v13253_v30  ;;  %v5221_v30 = vmul.f32 1.442695, %v5208_v50 }
 0x319   : > { %16878 = vst [vmem:[#allocation51_spill] sm:$0xff] %v14728_v62  ;;  %5686 = vst [vmem:[#allocation4 + $0x120] sm:$0x30] %v5637_v40  ;;  %v7700_v28 = vld [vmem:[#allocation5 + $0x38] sm:$0xff]  ;;  %v3706_v24 = vrot.slane %v3656_v57, %v13613_v59  ;;  %v4287_v55 = vpop.permute.xlu0 %4286  ;;  %13254 = vpow2.f32 %v4874_v35  ;;  %v16881_v35 = vcombine.high %v14075_v33, %v14085_v42 }
 0x31a   : > { %7715 = vst [vmem:[#allocation5 + $0x30] sm:$0xff] %v7707_v38  ;;  %v7708_v44 = vadd.f32 %v7700_v28, %v7692_v31  ;;  %3751 = vst [vmem:[#allocation5 + $0x58] sm:$0x3] %v3683_v53  ;;  %v4295_v3 = vrot.slane %v4287_v55, %v14476_v21  ;;  %v4876_v38 = vmul.f32 1.442695, %v4862_v52  ;;  %v5988_v53 = vrot.slane %v5981_v36, %v13613_v59 }
 0x31b   : > { %12679 = vset.pattern.permute.xlu1 %v16851_v60  ;;  %12717 = vset.pattern.permute.xlu0 %v16876_v46  ;;  %12286 = vst.sshfl [vmem:[#allocation5 + $0x110] sm:$0x3 pattern:$0x76325410] %v3656_v57  ;;  %v3707_v51 = vcombine.high %v3706_v24, %v3706_v24  ;;  %6039 = vst [vmem:[#allocation4 + $0xe0] sm:$0xc0] %v5980_v54  ;;  %v5209_v57 = vmul.f32 %v14128_v27, %v14356_v18 }
 0x31c   : > { %6094 = vperm.xlu1 %12679, %v14167_v26   ;;  %7148 = vperm.xlu0 %12717, %v14522_v49   ;;  %7716 = vst [vmem:[#allocation5 + $0x38] sm:$0xff] %v7708_v44  ;;  %v4363_v6 = vmul.f32 %v4295_v3, %v14655_v48  ;;  %12390 = vst.sshfl [vmem:[#allocation4 + $0x128] sm:$0xc0 pattern:$0x76325410] %v5981_v36  ;;  %v5571_v28 = vmul.f32 %v14009_v45, %v14377_v12  ;;  %13256 = vpow2.f32 %v4876_v38 }
 0x31d   : > { %v14743_v43 = vpop.permute.xlu1 %8935  ;;  %3757 = vst [vmem:[#allocation5 + $0x118] sm:$0x3] %v3707_v51  ;;  %v4320_v40 = vpop.permute.xlu0 %4319  ;;  %v5989_v24 = vcombine.low %v5988_v53, %v5988_v53  ;;  %v5223_v52 = vmul.f32 1.442695, %v5209_v57  ;;  %v5572_v3 = vmul.f32 %v14009_v45, %v14356_v18  ;;  %13258 = vpow2.f32 %v5221_v30 }
 0x31e   : > { %16879 = vst [vmem:[#allocation52_spill] sm:$0xff] %v14743_v43  ;;  %v4392_v61 = vrot.slane %v4363_v6, %v13613_v59  ;;  %12315 = vst.sshfl [vmem:[#allocation5 + $0x58] sm:$0xc pattern:$0x76325410] %v4363_v6  ;;  %v4328_v31 = vrot.slane %v4320_v40, %v14476_v21  ;;  %v14769_v40 = vrot.slane %v16881_v35, %v13613_v59 }
 0x31f   : > { %v5584_v54 = vmul.f32 1.442695, %v5571_v28  ;;  %6041 = vst [vmem:[#allocation4 + $0x120] sm:$0xc0] %v5989_v24  ;;  %v5586_v6 = vmul.f32 1.442695, %v5572_v3  ;;  %13260 = vpow2.f32 %v5223_v52  ;;  %v5919_v53 = vmul.f32 %v14132_v15, %v14356_v18 }
 0x320   : > { %12680 = vset.pattern.permute.xlu1 %v16863_v34  ;;  %12721 = vset.pattern.permute.xlu0 %v16850_v7  ;;  %v4393_v47 = vcombine.low %v4392_v61, %v4392_v61  ;;  %v4366_v44 = vmul.f32 %v4328_v31, %v14668_v13  ;;  %v5918_v61 = vmul.f32 %v14132_v15, %v14377_v12 }
 0x321   : > { %6782 = vperm.xlu1 %12680, %v14308_v20   ;;  %5761 = vperm.xlu0 %12721, %v14501_v63   ;;  %13262 = vpow2.f32 %v5584_v54  ;;  %v6279_v57 = vmul.f32 %v14015_v29, %v14318_v58  ;;  %v6280_v30 = vmul.f32 %v14015_v29, %v14340_v25  ;;  %v14787_v28 = vcombine.high %v14356_v18, %v14356_v18 }
 0x322   : > { %4460 = vst [vmem:[#allocation5 + $0x50] sm:$0x30] %v4393_v47  ;;  %v4416_v51 = vrot.slane %v4366_v44, %v13613_v59  ;;  %12318 = vst.sshfl [vmem:[#allocation5 + $0x118] sm:$0xc pattern:$0x76325410] %v4366_v44  ;;  %13264 = vpow2.f32 %v5586_v6  ;;  %v16883_v47 = vcombine.high %v14110_v8, %v14136_v22  ;;  %v14799_v3 = vcombine.high %v14501_v63, %v14501_v63 }
 0x323   : > { %v14757_v55 = vpop.permute.xlu1 %9323  ;;  %v5931_v42 = vmul.f32 1.442695, %v5918_v61  ;;  %v5933_v8 = vmul.f32 1.442695, %v5919_v53  ;;  %v13255_v22 = vpop.eup %13254  ;;  %v6292_v6 = vmul.f32 1.442695, %v6280_v30  ;;  %v6626_v35 = vmul.f32 %v14018_v9, %v14318_v58 }
 0x324   : > { %16880 = vst [vmem:[#allocation53_spill] sm:$0xff] %v14757_v55  ;;  %v4997_v36 = vpop.permute.xlu0 %4996  ;;  %v4417_v38 = vcombine.low %v4416_v51, %v4416_v51  ;;  %v14793_v44 = vrot.slane %v16883_v47, %v13613_v59  ;;  %v14804_v51 = vcombine.high %v14769_v40, %v14769_v40  ;;  %v4934_v61 = vrot.slane %v13255_v22, %v13613_v59 }
 0x325   : > { %12682 = vset.pattern.permute.xlu1 %v16848_v41  ;;  %12723 = vset.pattern.permute.xlu0 %v16856_v10  ;;  %v5005_v50 = vrot.slane %v4997_v36, %v14476_v21  ;;  %13266 = vpow2.f32 %v5931_v42  ;;  %12343 = vst.sshfl [vmem:[#allocation4 + $0x160] sm:$0x3 pattern:$0x76325410] %v13255_v22  ;;  %v6989_v30 = vmul.f32 %v14021_v19, %v14318_v58 }
 0x326   : > { %5029 = vperm.xlu1 %12682, %v14167_v26   ;;  %7525 = vperm.xlu0 %12723, %v14541_v37   ;;  %4466 = vst [vmem:[#allocation5 + $0x110] sm:$0x30] %v4417_v38  ;;  %13268 = vpow2.f32 %v5933_v8  ;;  %v13257_v42 = vpop.eup %13256  ;;  %v6990_v47 = vmul.f32 %v14021_v19, %v14340_v25  ;;  %v4935_v8 = vcombine.high %v4934_v61, %v4934_v61 }
 0x327   : > { %v5073_v31 = vmul.f32 %v5005_v50, %v14655_v48  ;;  %v6290_v50 = vmul.f32 1.442695, %v6279_v57  ;;  %v6637_v57 = vmul.f32 1.442695, %v6626_v35  ;;  %v13259_v22 = vpop.eup %13258  ;;  %v7000_v35 = vmul.f32 1.442695, %v6989_v30 }
 0x328   : > { %v14780_v33 = vpop.permute.xlu1 %9521  ;;  %12344 = vst.sshfl [vmem:[#allocation4 + $0x1a0] sm:$0x3 pattern:$0x76325410] %v13257_v42  ;;  %4979 = vst [vmem:[#allocation4 + $0x168] sm:$0x3] %v4935_v8 }
 0x329   : > { %16882 = vst [vmem:[#allocation54_spill] sm:$0xff] %v14780_v33  ;;  %v5102_v24 = vrot.slane %v5073_v31, %v13613_v59  ;;  %12347 = vst.sshfl [vmem:[#allocation5 + $0x60] sm:$0x3 pattern:$0x76325410] %v5073_v31  ;;  %v6627_v31 = vmul.f32 %v14018_v9, %v14340_v25  ;;  %13270 = vpow2.f32 %v6290_v50  ;;  %v13261_v33 = vpop.eup %13260 }
 0x32a   : > { %12683 = vset.pattern.permute.xlu1 %v16850_v7  ;;  %12724 = vset.pattern.permute.xlu0 %v16860_v23  ;;  %13272 = vpow2.f32 %v6292_v6  ;;  %v5289_v61 = vcombine.low %v13261_v33, %v13261_v33 }
 0x32b   : > { %5739 = vperm.xlu1 %12683, %v14167_v26   ;;  %6460 = vperm.xlu0 %12724, %v14541_v37   ;;  %v5707_v52 = vpop.permute.xlu0 %5706  ;;  %v5103_v36 = vcombine.high %v5102_v24, %v5102_v24  ;;  %v6639_v50 = vmul.f32 1.442695, %v6627_v31  ;;  %v13263_v62 = vpop.eup %13262  ;;  %13274 = vpow2.f32 %v6637_v57 }
 0x32c   : > { %v5715_v54 = vrot.slane %v5707_v52, %v14476_v21  ;;  %v14827_v0 = vpop.eup %13264  ;;  %12375 = vst.sshfl [vmem:[#allocation4 + $0x168] sm:$0xc pattern:$0x76325410] %v13263_v62 }
 0x32d   : > { %5171 = vst [vmem:[#allocation5 + $0x68] sm:$0x3] %v5103_v36  ;;  %13276 = vpow2.f32 %v6639_v50  ;;  %12376 = vst.sshfl [vmem:[#allocation4 + $0x1a8] sm:$0xc pattern:$0x76325410] %v14827_v0 }
 0x32e   : > { %v5783_v38 = vmul.f32 %v5715_v54, %v14655_v48  ;;  %v2168_v53 = vpop.permute.xlu1 %2167  ;;  %12360 = vst.sshfl [vmem:[#allocation4 + $0x1a0] sm:$0x30 pattern:$0x76325410] %v5289_v61  ;;  %13278 = vpow2.f32 %v7000_v35 }
 0x32f   : > { %12685 = vset.pattern.permute.xlu1 %v16876_v46  ;;  %12727 = vset.pattern.permute.xlu0 %v16856_v10  ;;  %v2176_v52 = vrot.slane %v2168_v53, %v14476_v21  ;;  %v5280_v53 = vcombine.low %v13259_v22, %v13259_v22 }
 0x330   : > { %7137 = vperm.xlu1 %12685, %v14308_v20   ;;  %v5812_v24 = vrot.slane %v5783_v38, %v13613_v59  ;;  %12379 = vst.sshfl [vmem:[#allocation5 + $0x68] sm:$0xc pattern:$0x76325410] %v5783_v38  ;;  %7536 = vperm.xlu0 %12727, %v14501_v63   ;;  %v4942_v20 = vrot.slane %v13257_v42, %v13613_v59  ;;  %v7002_v42 = vmul.f32 1.442695, %v6990_v47  ;;  %v13267_v47 = vpop.eup %13266 }
 0x331   : > { %v6073_v54 = vpop.permute.xlu0 %6072  ;;  %v2234_v43 = vmul.f32 %v2176_v52, %v14769_v40  ;;  %v5287_v30 = vrot.slane %v5280_v53, %v13613_v59  ;;  %12359 = vst.sshfl [vmem:[#allocation4 + $0x160] sm:$0x30 pattern:$0x76325410] %v5280_v53  ;;  %v13269_v50 = vpop.eup %13268  ;;  %v7336_v53 = vmul.f32 %v14025_v4, %v14318_v58 }
 0x332   : > { %v6081_v36 = vrot.slane %v6073_v54, %v14476_v21  ;;  %v5813_v55 = vcombine.low %v5812_v24, %v5812_v24  ;;  %v4943_v38 = vcombine.high %v4942_v20, %v4942_v20  ;;  %v5644_v24 = vrot.slane %v13263_v62, %v13613_v59 }
 0x333   : > { %v2270_v6 = vrot.slane %v2234_v43, %v13613_v59  ;;  %12220 = vst.sshfl [vmem:[#allocation5 + $0x80] sm:$0x3 pattern:$0x76325410] %v2234_v43  ;;  %v5296_v43 = vrot.slane %v5289_v61, %v13613_v59  ;;  %v5288_v8 = vcombine.high %v5287_v30, %v5287_v30  ;;  %13280 = vpow2.f32 %v7002_v42 }
 0x334   : > { %v6139_v39 = vmul.f32 %v6081_v36, %v14769_v40  ;;  %12687 = vset.pattern.permute.xlu1 %v16856_v10  ;;  %5880 = vst [vmem:[#allocation5 + $0x60] sm:$0x30] %v5813_v55  ;;  %12731 = vset.pattern.permute.xlu0 %v16852_v17  ;;  %4981 = vst [vmem:[#allocation4 + $0x1a8] sm:$0x3] %v4943_v38  ;;  %v5645_v20 = vcombine.low %v5644_v24, %v5644_v24 }
 0x335   : > { %7514 = vperm.xlu1 %12687, %v14167_v26   ;;  %v2512_v31 = vpop.permute.xlu1 %2511  ;;  %2577 = vperm.xlu0 %12731, %v14799_v3   ;;  %v2271_v52 = vcombine.high %v2270_v6, %v2270_v6  ;;  %v5297_v22 = vcombine.high %v5296_v43, %v5296_v43  ;;  %v5990_v36 = vcombine.low %v13267_v47, %v13267_v47  ;;  %v13271_v6 = vpop.eup %13270 }
 0x336   : > { %v6171_v33 = vcombine.low %v6139_v39, %v6139_v39  ;;  %v2520_v57 = vrot.slane %v2512_v31, %v14476_v21  ;;  %v5008_v55 = vpop.permute.xlu0 %5007  ;;  %5334 = vst [vmem:[#allocation4 + $0x168] sm:$0xc] %v5288_v8  ;;  %5688 = vst [vmem:[#allocation4 + $0x160] sm:$0x30] %v5645_v20  ;;  %v7337_v61 = vmul.f32 %v14025_v4, %v14340_v25 }
 0x337   : > { %v5016_v54 = vrot.slane %v5008_v55, %v14476_v21  ;;  %2333 = vst [vmem:[#allocation5 + $0x88] sm:$0x3] %v2271_v52  ;;  %5336 = vst [vmem:[#allocation4 + $0x1a8] sm:$0xc] %v5297_v22  ;;  %v5997_v42 = vrot.slane %v5990_v36, %v13613_v59  ;;  %v14853_v25 = vcombine.low %v13269_v50, %v13269_v50  ;;  %v13273_v55 = vpop.eup %13272 }
 0x338   : > { %v6178_v62 = vrot.slane %v6171_v33, %v13613_v59  ;;  %12396 = vst.sshfl [vmem:[#allocation5 + $0xa8] sm:$0xc0 pattern:$0x76325410] %v6171_v33  ;;  %v2588_v39 = vmul.f32 %v2520_v57, %v14655_v48  ;;  %v6338_v57 = vrot.slane %v13271_v6, %v13613_v59  ;;  %v6346_v22 = vrot.slane %v13273_v55, %v13613_v59 }
 0x339   : > { %v5074_v38 = vmul.f32 %v5016_v54, %v14769_v40  ;;  %12688 = vset.pattern.permute.xlu1 %v16860_v23  ;;  %v2523_v35 = vpop.permute.xlu1 %2522  ;;  %12733 = vset.pattern.permute.xlu0 %v16859_v16  ;;  %12391 = vst.sshfl [vmem:[#allocation4 + $0x168] sm:$0xc0 pattern:$0x76325410] %v5990_v36  ;;  %v7347_v54 = vmul.f32 1.442695, %v7336_v53  ;;  %v13275_v36 = vpop.eup %13274 }
 0x33a   : > { %v6179_v31 = vcombine.low %v6178_v62, %v6178_v62  ;;  %v2612_v30 = vcombine.low %v2588_v39, %v2588_v39  ;;  %v2531_v24 = vrot.slane %v2523_v35, %v14476_v21  ;;  %6449 = vperm.xlu1 %12688, %v14167_v26   ;;  %3287 = vperm.xlu0 %12733, %v14799_v3  }
 0x33b   : > { %v5110_v33 = vrot.slane %v5074_v38, %v13613_v59  ;;  %12348 = vst.sshfl [vmem:[#allocation5 + $0xa0] sm:$0x3 pattern:$0x76325410] %v5074_v38  ;;  %v6772_v58 = vpop.permute.xlu0 %6771  ;;  %v5998_v62 = vcombine.low %v5997_v42, %v5997_v42  ;;  %v6339_v39 = vcombine.high %v6338_v57, %v6338_v57  ;;  %v6347_v53 = vcombine.high %v6346_v22, %v6346_v22 }
 0x33c   : > { %12405 = vst.sshfl [vmem:[#allocation4 + $0xf0] sm:$0x3 pattern:$0x76325410] %v13271_v6  ;;  %6245 = vst [vmem:[#allocation5 + $0xa0] sm:$0xc0] %v6179_v31  ;;  %v2619_v43 = vrot.slane %v2612_v30, %v13613_v59  ;;  %v2589_v47 = vmul.f32 %v2531_v24, %v14769_v40  ;;  %v6780_v52 = vrot.slane %v6772_v58, %v14476_v21  ;;  %v13277_v31 = vpop.eup %13276  ;;  %13282 = vpow2.f32 %v7347_v54 }
 0x33d   : > { %12235 = vst.sshfl [vmem:[#allocation5 + $0x40] sm:$0x30 pattern:$0x76325410] %v2612_v30  ;;  %v5111_v8 = vcombine.high %v5110_v33, %v5110_v33  ;;  %v2545_v20 = vpop.permute.xlu1 %2544  ;;  %6043 = vst [vmem:[#allocation4 + $0x160] sm:$0xc0] %v5998_v62  ;;  %v6682_v30 = vcombine.low %v13275_v36, %v13275_v36  ;;  %v13279_v33 = vpop.eup %13278 }
 0x33e   : > { %12392 = vst.sshfl [vmem:[#allocation4 + $0x1a8] sm:$0xc0 pattern:$0x76325410] %v14853_v25  ;;  %v2620_v50 = vcombine.high %v2619_v43, %v2619_v43  ;;  %v2621_v38 = vcombine.low %v2589_v47, %v2589_v47  ;;  %v6848_v35 = vmul.f32 %v6780_v52, %v14655_v48  ;;  %v2553_v6 = vrot.slane %v2545_v20, %v14476_v21 }
 0x33f   : > { %12406 = vst.sshfl [vmem:[#allocation4 + $0x130] sm:$0x3 pattern:$0x76325410] %v13273_v55  ;;  %12689 = vset.pattern.permute.xlu1 %v16876_v46  ;;  %5173 = vst [vmem:[#allocation5 + $0xa8] sm:$0x3] %v5111_v8  ;;  %12735 = vset.pattern.permute.xlu0 %v16867_v32  ;;  %v6691_v43 = vcombine.low %v13277_v31, %v13277_v31  ;;  %v6689_v47 = vrot.slane %v6682_v30, %v13613_v59 }
 0x340   : > { %7159 = vperm.xlu1 %12689, %v14167_v26   ;;  %6395 = vst [vmem:[#allocation4 + $0xf8] sm:$0x3] %v6339_v39  ;;  %v7349_v24 = vmul.f32 1.442695, %v7337_v61  ;;  %2694 = vst [vmem:[#allocation5 + $0x48] sm:$0xc] %v2620_v50  ;;  %v2628_v58 = vrot.slane %v2621_v38, %v13613_v59  ;;  %v6872_v42 = vcombine.low %v6848_v35, %v6848_v35  ;;  %3997 = vperm.xlu0 %12735, %v14799_v3   ;;  %v5385_v55 = vpop.permute.xlu0 %5384  ;;  %v13281_v39 = vpop.eup %13280 }
 0x341   : > { %12236 = vst.sshfl [vmem:[#allocation5 + $0x80] sm:$0x30 pattern:$0x76325410] %v2621_v38  ;;  %v2591_v57 = vmul.f32 %v2553_v6, %v14668_v13  ;;  %v5393_v26 = vrot.slane %v5385_v55, %v14476_v21  ;;  %6397 = vst [vmem:[#allocation4 + $0x138] sm:$0x3] %v6347_v53  ;;  %v7048_v61 = vrot.slane %v13279_v33, %v13613_v59 }
 0x342   : > { %12421 = vst.sshfl [vmem:[#allocation4 + $0xf0] sm:$0x30 pattern:$0x76325410] %v6682_v30  ;;  %13284 = vpow2.f32 %v7349_v24  ;;  %v2629_v52 = vcombine.high %v2628_v58, %v2628_v58  ;;  %v6879_v54 = vrot.slane %v6872_v42, %v13613_v59  ;;  %v2878_v20 = vpop.permute.xlu1 %2877  ;;  %v6698_v62 = vrot.slane %v6691_v43, %v13613_v59 }
 0x343   : > { %12437 = vst.sshfl [vmem:[#allocation4 + $0xf8] sm:$0xc pattern:$0x76325410] %v13279_v33  ;;  %v2639_v8 = vcombine.low %v2591_v57, %v2591_v57  ;;  %v5431_v22 = vmul.f32 %v5393_v26, %v14668_v13  ;;  %v2886_v36 = vrot.slane %v2878_v20, %v14476_v21  ;;  %v6690_v50 = vcombine.high %v6689_v47, %v6689_v47 }
 0x344   : > { %12427 = vst.sshfl [vmem:[#allocation5 + $0x70] sm:$0x30 pattern:$0x76325410] %v6872_v42  ;;  %12690 = vset.pattern.permute.xlu1 %v16837_v1  ;;  %v7049_v38 = vcombine.low %v7048_v61, %v7048_v61  ;;  %2696 = vst [vmem:[#allocation5 + $0x88] sm:$0xc] %v2629_v52  ;;  %v6880_v35 = vcombine.high %v6879_v54, %v6879_v54  ;;  %12737 = vset.pattern.permute.xlu0 %v16870_v14 }
 0x345   : > { %12422 = vst.sshfl [vmem:[#allocation4 + $0x130] sm:$0x30 pattern:$0x76325410] %v6691_v43  ;;  %v2646_v6 = vrot.slane %v2639_v8, %v13613_v59  ;;  %2178 = vperm.xlu1 %12690, %v14522_v49   ;;  %v6699_v31 = vcombine.high %v6698_v62, %v6698_v62  ;;  %v5479_v53 = vcombine.low %v5431_v22, %v5431_v22  ;;  %v7493_v24 = vpop.permute.xlu0 %7492  ;;  %6750 = vst [vmem:[#allocation4 + $0xf8] sm:$0xc] %v6690_v50 }
 0x346   : > { %12238 = vst.sshfl [vmem:[#allocation5 + $0x100] sm:$0x30 pattern:$0x76325410] %v2639_v8  ;;  %v2944_v30 = vmul.f32 %v2886_v36, %v14769_v40  ;;  %4707 = vperm.xlu0 %12737, %v14799_v3   ;;  %v7056_v33 = vrot.slane %v13281_v39, %v13613_v59  ;;  %7104 = vst [vmem:[#allocation4 + $0xf0] sm:$0x30] %v7049_v38  ;;  %v4863_v58 = vmul.f32 %v14124_v11, %v14787_v28  ;;  %v13283_v62 = vpop.eup %13282 }
 0x347   : > { %12438 = vst.sshfl [vmem:[#allocation4 + $0x138] sm:$0xc pattern:$0x76325410] %v13281_v39  ;;  %6954 = vst [vmem:[#allocation5 + $0x78] sm:$0xc] %v6880_v35  ;;  %v2647_v42 = vcombine.high %v2646_v6, %v2646_v6  ;;  %v7501_v57 = vrot.slane %v7493_v24, %v14476_v21  ;;  %v5210_v55 = vmul.f32 %v14128_v27, %v14787_v28  ;;  %v3222_v61 = vpop.permute.xlu1 %3221 }
 0x348   : > { %6752 = vst [vmem:[#allocation4 + $0x138] sm:$0xc] %v6699_v31  ;;  %v5573_v43 = vmul.f32 %v14009_v45, %v14787_v28  ;;  %v5486_v26 = vrot.slane %v5479_v53, %v13613_v59  ;;  %12366 = vst.sshfl [vmem:[#allocation5 + $0x120] sm:$0x30 pattern:$0x76325410] %v5479_v53  ;;  %v2980_v47 = vrot.slane %v2944_v30, %v13613_v59 }
 0x349   : > { %12252 = vst.sshfl [vmem:[#allocation5 + $0x88] sm:$0xc pattern:$0x76325410] %v2944_v30  ;;  %v7057_v52 = vcombine.low %v7056_v33, %v7056_v33  ;;  %v4878_v11 = vmul.f32 1.442695, %v4863_v58  ;;  %v7559_v54 = vmul.f32 %v7501_v57, %v14769_v40  ;;  %v3230_v8 = vrot.slane %v3222_v61, %v14476_v21  ;;  %2200 = vperm.xlu1 %12690, %v14541_v37  }
 0x34a   : > { %2700 = vst [vmem:[#allocation5 + $0x108] sm:$0xc] %v2647_v42  ;;  %v5225_v27 = vmul.f32 1.442695, %v5210_v55  ;;  %v5588_v20 = vmul.f32 1.442695, %v5573_v43  ;;  %v5487_v45 = vcombine.high %v5486_v26, %v5486_v26  ;;  %v2981_v39 = vcombine.low %v2980_v47, %v2980_v47  ;;  %12738 = vset.pattern.permute.xlu0 %v16853_v5  ;;  %v6428_v38 = vpop.permute.xlu0 %6427 }
 0x34b   : > { %7106 = vst [vmem:[#allocation4 + $0x130] sm:$0x30] %v7057_v52  ;;  %13286 = vpow2.f32 %v4878_v11  ;;  %v5652_v22 = vrot.slane %v14827_v0, %v13613_v59  ;;  %v7591_v36 = vcombine.low %v7559_v54, %v7559_v54  ;;  %v3298_v50 = vmul.f32 %v3230_v8, %v14655_v48  ;;  %5417 = vperm.xlu0 %12738, %v14799_v3   ;;  %v3233_v53 = vpop.permute.xlu1 %3232 }
 0x34c   : > { %v7392_v35 = vcombine.low %v13283_v62, %v13283_v62  ;;  %13288 = vpow2.f32 %v5225_v27  ;;  %v13285_v6 = vpop.eup %13284  ;;  %5540 = vst [vmem:[#allocation5 + $0x128] sm:$0xc] %v5487_v45  ;;  %3042 = vst [vmem:[#allocation5 + $0x80] sm:$0x30] %v2981_v39  ;;  %v6436_v31 = vrot.slane %v6428_v38, %v14476_v21  ;;  %v5920_v24 = vmul.f32 %v14132_v15, %v14787_v28  ;;  %v7718_v38 = vld [vmem:[#allocation4 + $0x40] sm:$0xff] }
 0x34d   : > { %13290 = vpow2.f32 %v5588_v20  ;;  %v5653_v30 = vcombine.low %v5652_v22, %v5652_v22  ;;  %v7598_v0 = vrot.slane %v7591_v36, %v13613_v59  ;;  %12460 = vst.sshfl [vmem:[#allocation5 + $0xb8] sm:$0xc0 pattern:$0x76325410] %v7591_v36  ;;  %v3322_v33 = vcombine.low %v3298_v50, %v3298_v50  ;;  %12693 = vset.pattern.permute.xlu1 %v16852_v17 }
 0x34e   : > { %v3241_v58 = vrot.slane %v3233_v53, %v14476_v21  ;;  %v7399_v42 = vrot.slane %v7392_v35, %v13613_v59  ;;  %12453 = vst.sshfl [vmem:[#allocation4 + $0xf8] sm:$0xc0 pattern:$0x76325410] %v7392_v35  ;;  %v6494_v57 = vmul.f32 %v6436_v31, %v14769_v40  ;;  %2566 = vperm.xlu1 %12693, %v14501_v63   ;;  %v5935_v43 = vmul.f32 1.442695, %v5920_v24 }
 0x34f   : > { %v7401_v55 = vcombine.low %v13285_v6, %v13285_v6  ;;  %5690 = vst [vmem:[#allocation4 + $0x1a0] sm:$0x30] %v5653_v30  ;;  %v6006_v15 = vrot.slane %v14853_v25, %v13613_v59  ;;  %v7599_v26 = vcombine.low %v7598_v0, %v7598_v0  ;;  %v3329_v47 = vrot.slane %v3322_v33, %v13613_v59  ;;  %v6805_v11 = vpop.permute.xlu0 %6804  ;;  %v3255_v54 = vpop.permute.xlu1 %3254  ;;  %v7719_v35 = vld [vmem:[#allocation4 + $0x48] sm:$0xff]  ;;  %v13334_v0 = vld [vmem:[#allocation5] sm:$0xff] }
 0x350   : > { %12267 = vst.sshfl [vmem:[#allocation5 + $0x48] sm:$0xc0 pattern:$0x76325410] %v3322_v33  ;;  %v3299_v61 = vmul.f32 %v3241_v58, %v14769_v40  ;;  %12742 = vset.pattern.permute.xlu0 %v16863_v34  ;;  %v7400_v17 = vcombine.low %v7399_v42, %v7399_v42  ;;  %v6530_v52 = vrot.slane %v6494_v57, %v13613_v59  ;;  %13292 = vpow2.f32 %v5935_v43  ;;  %v13335_v58 = vld [vmem:[#allocation5 + $0x8] sm:$0xff] }
 0x351   : > { %12412 = vst.sshfl [vmem:[#allocation5 + $0xb0] sm:$0x3 pattern:$0x76325410] %v6494_v57  ;;  %6837 = vperm.xlu0 %12742, %v14799_v3   ;;  %v7408_v8 = vrot.slane %v7401_v55, %v13613_v59  ;;  %v6007_v25 = vcombine.low %v6006_v15, %v6006_v15  ;;  %7665 = vst [vmem:[#allocation5 + $0xb0] sm:$0xc0] %v7599_v26  ;;  %v3330_v27 = vcombine.low %v3329_v47, %v3329_v47 }
 0x352   : > { %12454 = vst.sshfl [vmem:[#allocation4 + $0x138] sm:$0xc0 pattern:$0x76325410] %v7401_v55  ;;  %v3331_v20 = vcombine.low %v3299_v61, %v3299_v61  ;;  %v6813_v62 = vrot.slane %v6805_v11, %v14476_v21  ;;  %v3263_v45 = vrot.slane %v3255_v54, %v14476_v21  ;;  %7459 = vst [vmem:[#allocation4 + $0xf0] sm:$0xc0] %v7400_v17  ;;  %12694 = vset.pattern.permute.xlu1 %v16838_v56 }
 0x353   : > { %v6531_v39 = vcombine.high %v6530_v52, %v6530_v52  ;;  %v7409_v22 = vcombine.low %v7408_v8, %v7408_v8  ;;  %6045 = vst [vmem:[#allocation4 + $0x1a0] sm:$0xc0] %v6007_v25  ;;  %v6281_v36 = vmul.f32 %v14015_v29, %v14377_v12  ;;  %v6628_v50 = vmul.f32 %v14018_v9, %v14377_v12 }
 0x354   : > { %3403 = vst [vmem:[#allocation5 + $0x40] sm:$0xc0] %v3330_v27  ;;  %v3338_v6 = vrot.slane %v3331_v20, %v13613_v59  ;;  %12268 = vst.sshfl [vmem:[#allocation5 + $0x88] sm:$0xc0 pattern:$0x76325410] %v3331_v20  ;;  %v6851_v31 = vmul.f32 %v6813_v62, %v14668_v13  ;;  %v3301_v53 = vmul.f32 %v3263_v45, %v14668_v13  ;;  %2888 = vperm.xlu1 %12694, %v14522_v49   ;;  %v2212_v61 = vpop.permute.xlu0 %2211  ;;  %v3588_v17 = vpop.permute.xlu1 %3587 }
 0x355   : > { %v6991_v30 = vmul.f32 %v14021_v19, %v14377_v12  ;;  %v14930_v24 = vpop.eup %13286  ;;  %v7726_v33 = vmul.f32 %v13334_v0, %v7718_v38  ;;  %v7727_v42 = vmul.f32 %v13335_v58, %v7719_v35  ;;  %6593 = vst [vmem:[#allocation5 + $0xb8] sm:$0x3] %v6531_v39  ;;  %12746 = vset.pattern.permute.xlu0 %v16876_v46  ;;  %7461 = vst [vmem:[#allocation4 + $0x130] sm:$0xc0] %v7409_v22  ;;  %v7761_v22 = vld [vmem:[#allocation4 + $0x88] sm:$0xff] }
 0x356   : > { %v6294_v57 = vmul.f32 1.442695, %v6281_v36  ;;  %v6641_v55 = vmul.f32 1.442695, %v6628_v50  ;;  %v13289_v43 = vpop.eup %13288  ;;  %v3339_v15 = vcombine.low %v3338_v6, %v3338_v6  ;;  %v6899_v26 = vcombine.low %v6851_v31, %v6851_v31  ;;  %7192 = vperm.xlu0 %12746, %v14799_v3  }
 0x357   : > { %v3349_v47 = vcombine.low %v3301_v53, %v3301_v53  ;;  %12345 = vst.sshfl [vmem:[#allocation4 + $0x1e0] sm:$0x3 pattern:$0x76325410] %v14930_v24  ;;  %v7004_v52 = vmul.f32 1.442695, %v6991_v30  ;;  %v13291_v11 = vpop.eup %13290  ;;  %v2220_v8 = vrot.slane %v2212_v61, %v14476_v21  ;;  %v3596_v25 = vrot.slane %v3588_v17, %v14476_v21 }
 0x358   : > { %v7736_v54 = vld [vmem:[#allocation5 + $0x48] sm:$0xff]  ;;  %v14937_v27 = vcombine.low %v13289_v43, %v13289_v43  ;;  %13294 = vpow2.f32 %v6294_v57  ;;  %3405 = vst [vmem:[#allocation5 + $0x80] sm:$0xc0] %v3339_v15  ;;  %v6906_v62 = vrot.slane %v6899_v26, %v13613_v59  ;;  %2910 = vperm.xlu1 %12694, %v14541_v37   ;;  %v5660_v39 = vrot.slane %v13291_v11, %v13613_v59 }
 0x359   : > { %v7744_v20 = vadd.f32 %v7736_v54, %v7727_v42  ;;  %12430 = vst.sshfl [vmem:[#allocation5 + $0x130] sm:$0x30 pattern:$0x76325410] %v6899_v26  ;;  %v3356_v45 = vrot.slane %v3349_v47, %v13613_v59  ;;  %v2238_v36 = vmul.f32 %v2220_v8, %v14793_v44  ;;  %v3654_v50 = vmul.f32 %v3596_v25, %v14769_v40  ;;  %v2534_v15 = vpop.permute.xlu0 %2533  ;;  %v7760_v54 = vld [vmem:[#allocation4 + $0x80] sm:$0xff] }
 0x35a   : > { %12270 = vst.sshfl [vmem:[#allocation5 + $0x108] sm:$0xc0 pattern:$0x76325410] %v3349_v47  ;;  %13296 = vpow2.f32 %v6641_v55  ;;  %v6282_v38 = vmul.f32 %v14015_v29, %v14356_v18  ;;  %v6907_v6 = vcombine.high %v6906_v62, %v6906_v62  ;;  %v13452_v53 = vmov 26   ;;  %v13293_v0 = vpop.eup %13292  ;;  %v3932_v55 = vpop.permute.xlu1 %3931 }
 0x35b   : > { %12377 = vst.sshfl [vmem:[#allocation4 + $0x1e8] sm:$0xc pattern:$0x76325410] %v13291_v11  ;;  %7752 = vst [vmem:[#allocation5 + $0x48] sm:$0xff] %v7744_v20  ;;  %v7769_v35 = vmul.f32 %v7761_v22, %v7744_v20  ;;  %v3357_v31 = vcombine.low %v3356_v45, %v3356_v45  ;;  %12747 = vset.pattern.permute.xlu0 %v13452_v53  ;;  %v5661_v30 = vcombine.low %v5660_v39, %v5660_v39  ;;  %v7735_v58 = vld [vmem:[#allocation5 + $0x40] sm:$0xff] }
 0x35c   : > { %12361 = vst.sshfl [vmem:[#allocation4 + $0x1e0] sm:$0x30 pattern:$0x76325410] %v14937_v27  ;;  %v7778_v42 = vld [vmem:[#allocation5 + $0x88] sm:$0xff]  ;;  %v2302_v57 = vrot.slane %v2238_v36, %v13613_v59  ;;  %v3690_v43 = vrot.slane %v3654_v50, %v13613_v59  ;;  %10096 = vperm.xlu0 %12747, %v13869_v2   ;;  %13298 = vpow2.f32 %v7004_v52  ;;  %v6283_v26 = vmul.f32 %v14015_v29, %v14787_v28 }
 0x35d   : > { %12224 = vst.sshfl [vmem:[#allocation5 + $0x180] sm:$0x3 pattern:$0x76325410] %v2238_v36  ;;  %v7743_v47 = vadd.f32 %v7735_v58, %v7726_v33  ;;  %v7786_v61 = vadd.f32 %v7778_v42, %v7769_v35  ;;  %6960 = vst [vmem:[#allocation5 + $0x138] sm:$0xc] %v6907_v6  ;;  %v3940_v17 = vrot.slane %v3932_v55, %v14476_v21  ;;  %12697 = vset.pattern.permute.xlu1 %v16859_v16  ;;  %v2556_v39 = vpop.permute.xlu0 %2555 }
 0x35e   : > { %12284 = vst.sshfl [vmem:[#allocation5 + $0x90] sm:$0x3 pattern:$0x76325410] %v3654_v50  ;;  %3409 = vst [vmem:[#allocation5 + $0x100] sm:$0xc0] %v3357_v31  ;;  %v2542_v11 = vrot.slane %v2534_v15, %v14476_v21  ;;  %v2303_v8 = vcombine.high %v2302_v57, %v2302_v57  ;;  %v3691_v25 = vcombine.high %v3690_v43, %v3690_v43  ;;  %3276 = vperm.xlu1 %12697, %v14501_v63   ;;  %v3943_v16 = vpop.permute.xlu1 %3942 }
 0x35f   : > { %5692 = vst [vmem:[#allocation4 + $0x1e0] sm:$0x30] %v5661_v30  ;;  %v6008_v52 = vcombine.low %v13293_v0, %v13293_v0  ;;  %7751 = vst [vmem:[#allocation5 + $0x40] sm:$0xff] %v7743_v47  ;;  %v7768_v20 = vmul.f32 %v7760_v54, %v7743_v47  ;;  %v4008_v29 = vmul.f32 %v3940_v17, %v14655_v48  ;;  %v7777_v62 = vld [vmem:[#allocation5 + $0x80] sm:$0xff]  ;;  %v13453_v45 = vmov 27   ;;  %v16884_v0 = vld [vmem:[#allocation27_spill] sm:$0xff] }
 0x360   : > { %7794 = vst [vmem:[#allocation5 + $0x88] sm:$0xff] %v7786_v61  ;;  %v2590_v33 = vmul.f32 %v2542_v11, %v14804_v51  ;;  %2341 = vst [vmem:[#allocation5 + $0x188] sm:$0x3] %v2303_v8  ;;  %12750 = vset.pattern.permute.xlu0 %v13453_v45  ;;  %v6296_v36 = vmul.f32 1.442695, %v6282_v38  ;;  %v3951_v30 = vrot.slane %v3943_v16, %v14476_v21  ;;  %v16885_v43 = vmov 4  }
 0x361   : > { %3753 = vst [vmem:[#allocation5 + $0x98] sm:$0x3] %v3691_v25  ;;  %v6015_v22 = vrot.slane %v6008_v52, %v13613_v59  ;;  %12393 = vst.sshfl [vmem:[#allocation4 + $0x1e8] sm:$0xc0 pattern:$0x76325410] %v6008_v52  ;;  %v7785_v35 = vadd.f32 %v7777_v62, %v7768_v20  ;;  %v4032_v6 = vcombine.low %v4008_v29, %v4008_v29  ;;  %10297 = vperm.xlu0 %12750, %v16884_v0  }
 0x362   : > { %v6298_v50 = vmul.f32 1.442695, %v6283_v26  ;;  %v2630_v31 = vcombine.low %v2590_v33, %v2590_v33  ;;  %v13295_v58 = vpop.eup %13294  ;;  %v14966_v42 = vcombine.high %v14668_v13, %v14668_v13  ;;  %v2564_v57 = vrot.slane %v2556_v39, %v14476_v21  ;;  %12698 = vset.pattern.permute.xlu1 %v16885_v43  ;;  %v3965_v11 = vpop.permute.xlu1 %3964 }
 0x363   : > { %v6016_v55 = vcombine.low %v6015_v22, %v6015_v22  ;;  %13300 = vpow2.f32 %v6296_v36  ;;  %7793 = vst [vmem:[#allocation5 + $0x80] sm:$0xff] %v7785_v35  ;;  %v4039_v38 = vrot.slane %v4032_v6, %v13613_v59  ;;  %12299 = vst.sshfl [vmem:[#allocation5 + $0x50] sm:$0x30 pattern:$0x76325410] %v4032_v6  ;;  %v4009_v26 = vmul.f32 %v3951_v30, %v14769_v40  ;;  %v2922_v33 = vpop.permute.xlu0 %2921 }
 0x364   : > { %v2637_v15 = vrot.slane %v2630_v31, %v13613_v59  ;;  %12237 = vst.sshfl [vmem:[#allocation5 + $0xc0] sm:$0x30 pattern:$0x76325410] %v2630_v31  ;;  %3598 = vperm.xlu1 %12698, %v14522_v49   ;;  %v7338_v47 = vmul.f32 %v14025_v4, %v14377_v12  ;;  %v13297_v61 = vpop.eup %13296  ;;  %v2592_v17 = vmul.f32 %v2564_v57, %v14966_v42  ;;  %13302 = vpow2.f32 %v6298_v50 }
 0x365   : > { %12407 = vst.sshfl [vmem:[#allocation4 + $0x170] sm:$0x3 pattern:$0x76325410] %v13295_v58  ;;  %6047 = vst [vmem:[#allocation4 + $0x1e0] sm:$0xc0] %v6016_v55  ;;  %v6354_v54 = vrot.slane %v13295_v58, %v13613_v59  ;;  %v4040_v8 = vcombine.high %v4039_v38, %v4039_v38  ;;  %v4041_v52 = vcombine.low %v4009_v26, %v4009_v26 }
 0x366   : > { %v2638_v25 = vcombine.high %v2637_v15, %v2637_v15  ;;  %v3973_v20 = vrot.slane %v3965_v11, %v14476_v21  ;;  %v16768_v29 = vmov 29   ;;  %v13299_v62 = vpop.eup %13298  ;;  %v2648_v16 = vcombine.low %v2592_v17, %v2592_v17  ;;  %v4298_v38 = vpop.permute.xlu1 %4297 }
 0x367   : > { %12752 = vset.pattern.permute.xlu0 %v16768_v29  ;;  %v2930_v12 = vrot.slane %v2922_v33, %v14476_v21  ;;  %v6355_v39 = vcombine.high %v6354_v54, %v6354_v54  ;;  %v14982_v22 = vcombine.low %v13297_v61, %v13297_v61  ;;  %4114 = vst [vmem:[#allocation5 + $0x58] sm:$0xc] %v4040_v8  ;;  %12300 = vst.sshfl [vmem:[#allocation5 + $0x90] sm:$0x30 pattern:$0x76325410] %v4041_v52  ;;  %v3244_v11 = vpop.permute.xlu0 %3243 }
 0x368   : > { %10682 = vperm.xlu0 %12752, %v13869_v2   ;;  %2698 = vst [vmem:[#allocation5 + $0xc8] sm:$0xc] %v2638_v25  ;;  %v4048_v36 = vrot.slane %v4041_v52, %v13613_v59  ;;  %v4011_v50 = vmul.f32 %v3973_v20, %v14668_v13  ;;  %3620 = vperm.xlu1 %12698, %v14541_v37   ;;  %12439 = vst.sshfl [vmem:[#allocation4 + $0x178] sm:$0xc pattern:$0x76325410] %v13299_v62 }
 0x369   : > { %v7064_v35 = vrot.slane %v13299_v62, %v13613_v59  ;;  %v7351_v6 = vmul.f32 1.442695, %v7338_v47  ;;  %v2655_v31 = vrot.slane %v2648_v16, %v13613_v59  ;;  %12239 = vst.sshfl [vmem:[#allocation5 + $0x140] sm:$0x30 pattern:$0x76325410] %v2648_v16  ;;  %v2948_v30 = vmul.f32 %v2930_v12, %v14793_v44 }
 0x36a   : > { %6399 = vst [vmem:[#allocation4 + $0x178] sm:$0x3] %v6355_v39  ;;  %12423 = vst.sshfl [vmem:[#allocation4 + $0x170] sm:$0x30 pattern:$0x76325410] %v14982_v22  ;;  %v6629_v58 = vmul.f32 %v14018_v9, %v14356_v18  ;;  %v4049_v57 = vcombine.high %v4048_v36, %v4048_v36  ;;  %v4059_v55 = vcombine.low %v4011_v50, %v4011_v50 }
 0x36b   : > { %v7065_v15 = vcombine.low %v7064_v35, %v7064_v35  ;;  %v2656_v26 = vcombine.high %v2655_v31, %v2655_v31  ;;  %v3012_v61 = vrot.slane %v2948_v30, %v13613_v59  ;;  %12256 = vst.sshfl [vmem:[#allocation5 + $0x188] sm:$0xc pattern:$0x76325410] %v2948_v30  ;;  %v4306_v47 = vrot.slane %v4298_v38, %v14476_v21  ;;  %v4642_v39 = vpop.permute.xlu1 %4641  ;;  %v3266_v36 = vpop.permute.xlu0 %3265 }
 0x36c   : > { %v16767_v17 = vmov 30   ;;  %4116 = vst [vmem:[#allocation5 + $0x98] sm:$0xc] %v4049_v57  ;;  %v4066_v54 = vrot.slane %v4059_v55, %v13613_v59  ;;  %v3252_v8 = vrot.slane %v3244_v11, %v14476_v21  ;;  %12701 = vset.pattern.permute.xlu1 %v16867_v32  ;;  %13304 = vpow2.f32 %v7351_v6 }
 0x36d   : > { %12755 = vset.pattern.permute.xlu0 %v16767_v17  ;;  %12302 = vst.sshfl [vmem:[#allocation5 + $0x110] sm:$0x30 pattern:$0x76325410] %v4059_v55  ;;  %7108 = vst [vmem:[#allocation4 + $0x170] sm:$0x30] %v7065_v15  ;;  %v15000_v25 = vpop.eup %13300  ;;  %v3013_v52 = vcombine.low %v3012_v61, %v3012_v61  ;;  %v4364_v20 = vmul.f32 %v4306_v47, %v14769_v40  ;;  %3986 = vperm.xlu1 %12701, %v14501_v63  }
 0x36e   : > { %10875 = vperm.xlu0 %12755, %v16884_v0   ;;  %2702 = vst [vmem:[#allocation5 + $0x148] sm:$0xc] %v2656_v26  ;;  %v6643_v33 = vmul.f32 1.442695, %v6629_v58  ;;  %v4067_v62 = vcombine.high %v4066_v54, %v4066_v54  ;;  %v3300_v16 = vmul.f32 %v3252_v8, %v14804_v51  ;;  %v15006_v12 = vpop.eup %13302  ;;  %v4650_v35 = vrot.slane %v4642_v39, %v14476_v21 }
 0x36f   : > { %12408 = vst.sshfl [vmem:[#allocation4 + $0x1b0] sm:$0x3 pattern:$0x76325410] %v15000_v25  ;;  %3050 = vst [vmem:[#allocation5 + $0x180] sm:$0x30] %v3013_v52  ;;  %v4400_v32 = vrot.slane %v4364_v20, %v13613_v59  ;;  %v3274_v6 = vrot.slane %v3266_v36, %v14476_v21  ;;  %v4653_v38 = vpop.permute.xlu1 %4652  ;;  %v6707_v15 = vrot.slane %v14982_v22, %v13613_v59 }
 0x370   : > { %12316 = vst.sshfl [vmem:[#allocation5 + $0x98] sm:$0xc pattern:$0x76325410] %v4364_v20  ;;  %4120 = vst [vmem:[#allocation5 + $0x118] sm:$0xc] %v4067_v62  ;;  %v3340_v50 = vcombine.low %v3300_v16, %v3300_v16  ;;  %v4718_v57 = vmul.f32 %v4650_v35, %v14655_v48  ;;  %13306 = vpow2.f32 %v6643_v33  ;;  %v4661_v11 = vrot.slane %v4653_v38, %v14476_v21  ;;  %v3632_v54 = vpop.permute.xlu0 %3631 }
 0x371   : > { %12409 = vst.sshfl [vmem:[#allocation4 + $0x1f0] sm:$0x3 pattern:$0x76325410] %v15006_v12  ;;  %v4401_v31 = vcombine.low %v4400_v32, %v4400_v32  ;;  %v16886_v30 = vmov 6   ;;  %v3302_v55 = vmul.f32 %v3274_v6, %v14966_v42  ;;  %v3640_v8 = vrot.slane %v3632_v54, %v14476_v21  ;;  %v7721_v20 = vld [vmem:[#allocation4 + $0x58] sm:$0xff] }
 0x372   : > { %12702 = vset.pattern.permute.xlu1 %v16886_v30  ;;  %v3347_v58 = vrot.slane %v3340_v50, %v13613_v59  ;;  %12269 = vst.sshfl [vmem:[#allocation5 + $0xc8] sm:$0xc0 pattern:$0x76325410] %v3340_v50  ;;  %v4742_v61 = vcombine.low %v4718_v57, %v4718_v57  ;;  %v4719_v16 = vmul.f32 %v4661_v11, %v14769_v40  ;;  %v13336_v22 = vld [vmem:[#allocation5 + $0x18] sm:$0xff]  ;;  %v7720_v35 = vld [vmem:[#allocation4 + $0x50] sm:$0xff] }
 0x373   : > { %4308 = vperm.xlu1 %12702, %v14522_v49   ;;  %4462 = vst [vmem:[#allocation5 + $0x90] sm:$0x30] %v4401_v31  ;;  %v3358_v47 = vcombine.low %v3302_v55, %v3302_v55  ;;  %v7729_v32 = vmul.f32 %v13336_v22, %v7721_v20  ;;  %v3658_v39 = vmul.f32 %v3640_v8, %v14793_v44  ;;  %v4675_v36 = vpop.permute.xlu1 %4674  ;;  %v13337_v55 = vld [vmem:[#allocation5 + $0x10] sm:$0xff] }
 0x374   : > { %v3348_v26 = vcombine.low %v3347_v58, %v3347_v58  ;;  %v4749_v62 = vrot.slane %v4742_v61, %v13613_v59  ;;  %12331 = vst.sshfl [vmem:[#allocation5 + $0x58] sm:$0xc0 pattern:$0x76325410] %v4742_v61  ;;  %v6708_v50 = vcombine.high %v6707_v15, %v6707_v15  ;;  %v4751_v58 = vcombine.low %v4719_v16, %v4719_v16 }
 0x375   : > { %v3365_v33 = vrot.slane %v3358_v47, %v13613_v59  ;;  %12271 = vst.sshfl [vmem:[#allocation5 + $0x148] sm:$0xc0 pattern:$0x76325410] %v3358_v47  ;;  %v4683_v57 = vrot.slane %v4675_v36, %v14476_v21  ;;  %v15027_v38 = vmul.f32 %v13337_v55, %v7720_v35  ;;  %v3954_v61 = vpop.permute.xlu0 %3953  ;;  %v6630_v11 = vmul.f32 %v14018_v9, %v14787_v28 }
 0x376   : > { %v13305_v52 = vpop.eup %13304  ;;  %3407 = vst [vmem:[#allocation5 + $0xc0] sm:$0xc0] %v3348_v26  ;;  %v4750_v6 = vcombine.low %v4749_v62, %v4749_v62  ;;  %v3722_v26 = vrot.slane %v3658_v39, %v13613_v59  ;;  %12288 = vst.sshfl [vmem:[#allocation5 + $0x190] sm:$0x3 pattern:$0x76325410] %v3658_v39  ;;  %v4758_v15 = vrot.slane %v4751_v58, %v13613_v59 }
 0x377   : > { %4330 = vperm.xlu1 %12702, %v14541_v37   ;;  %v3366_v31 = vcombine.low %v3365_v33, %v3365_v33  ;;  %6754 = vst [vmem:[#allocation4 + $0x178] sm:$0xc] %v6708_v50  ;;  %v7410_v47 = vcombine.low %v13305_v52, %v13305_v52  ;;  %12332 = vst.sshfl [vmem:[#allocation5 + $0x98] sm:$0xc0 pattern:$0x76325410] %v4751_v58  ;;  %v4721_v54 = vmul.f32 %v4683_v57, %v14668_v13 }
 0x378   : > { %4823 = vst [vmem:[#allocation5 + $0x50] sm:$0xc0] %v4750_v6  ;;  %v3962_v8 = vrot.slane %v3954_v61, %v14476_v21  ;;  %v6362_v20 = vrot.slane %v15000_v25, %v13613_v59  ;;  %v3723_v62 = vcombine.high %v3722_v26, %v3722_v26  ;;  %v6370_v9 = vrot.slane %v15006_v12, %v13613_v59  ;;  %v5352_v36 = vpop.permute.xlu1 %5351 }
 0x379   : > { %3411 = vst [vmem:[#allocation5 + $0x140] sm:$0xc0] %v3366_v31  ;;  %v7417_v52 = vrot.slane %v7410_v47, %v13613_v59  ;;  %12455 = vst.sshfl [vmem:[#allocation4 + $0x178] sm:$0xc0 pattern:$0x76325410] %v7410_v47  ;;  %v6992_v33 = vmul.f32 %v14021_v19, %v14356_v18  ;;  %v4759_v22 = vcombine.low %v4758_v15, %v4758_v15  ;;  %v3976_v6 = vpop.permute.xlu0 %3975 }
 0x37a   : > { %v13307_v16 = vpop.eup %13306  ;;  %v4769_v39 = vcombine.low %v4721_v54, %v4721_v54  ;;  %v6363_v50 = vcombine.high %v6362_v20, %v6362_v20  ;;  %3761 = vst [vmem:[#allocation5 + $0x198] sm:$0x3] %v3723_v62  ;;  %v5360_v35 = vrot.slane %v5352_v36, %v14476_v21  ;;  %v6371_v58 = vcombine.high %v6370_v9, %v6370_v9  ;;  %v7763_v47 = vld [vmem:[#allocation4 + $0x98] sm:$0xff] }
 0x37b   : > { %12705 = vset.pattern.permute.xlu1 %v16870_v14  ;;  %v4010_v14 = vmul.f32 %v3962_v8, %v14804_v51  ;;  %v7738_v25 = vld [vmem:[#allocation5 + $0x58] sm:$0xff]  ;;  %v7418_v31 = vcombine.low %v7417_v52, %v7417_v52  ;;  %v6645_v57 = vmul.f32 1.442695, %v6630_v11  ;;  %4825 = vst [vmem:[#allocation5 + $0x90] sm:$0xc0] %v4759_v22  ;;  %v3984_v61 = vrot.slane %v3976_v6, %v14476_v21 }
 0x37c   : > { %4696 = vperm.xlu1 %12705, %v14501_v63   ;;  %v7746_v55 = vadd.f32 %v7738_v25, %v7729_v32  ;;  %v4776_v12 = vrot.slane %v4769_v39, %v13613_v59  ;;  %12334 = vst.sshfl [vmem:[#allocation5 + $0x118] sm:$0xc0 pattern:$0x76325410] %v4769_v39  ;;  %6401 = vst [vmem:[#allocation4 + $0x1b8] sm:$0x3] %v6363_v50  ;;  %v5428_v15 = vmul.f32 %v5360_v35, %v14655_v48 }
 0x37d   : > { %v4050_v26 = vcombine.low %v4010_v14, %v4010_v14  ;;  %7463 = vst [vmem:[#allocation4 + $0x170] sm:$0xc0] %v7418_v31  ;;  %6403 = vst [vmem:[#allocation4 + $0x1f8] sm:$0x3] %v6371_v58  ;;  %13308 = vpow2.f32 %v6645_v57  ;;  %v6709_v54 = vcombine.low %v13307_v16, %v13307_v16  ;;  %v6993_v32 = vmul.f32 %v14021_v19, %v14787_v28  ;;  %v6062_v39 = vpop.permute.xlu1 %6061  ;;  %v7762_v31 = vld [vmem:[#allocation4 + $0x90] sm:$0xff] }
 0x37e   : > { %7754 = vst [vmem:[#allocation5 + $0x58] sm:$0xff] %v7746_v55  ;;  %v7771_v11 = vmul.f32 %v7763_v47, %v7746_v55  ;;  %v4777_v8 = vcombine.low %v4776_v12, %v4776_v12  ;;  %v4012_v62 = vmul.f32 %v3984_v61, %v14966_v42  ;;  %v7780_v9 = vld [vmem:[#allocation5 + $0x98] sm:$0xff]  ;;  %v5452_v22 = vcombine.low %v5428_v15, %v5428_v15  ;;  %v4342_v6 = vpop.permute.xlu0 %4341 }
 0x37f   : > { %v4057_v20 = vrot.slane %v4050_v26, %v13613_v59  ;;  %12301 = vst.sshfl [vmem:[#allocation5 + $0xd0] sm:$0x30 pattern:$0x76325410] %v4050_v26  ;;  %v7737_v52 = vld [vmem:[#allocation5 + $0x50] sm:$0xff]  ;;  %v6716_v14 = vrot.slane %v6709_v54, %v13613_v59  ;;  %v6070_v57 = vrot.slane %v6062_v39, %v14476_v21  ;;  %v4350_v55 = vrot.slane %v4342_v6, %v14476_v21 }
 0x380   : > { %12706 = vset.pattern.permute.xlu1 %v16853_v5  ;;  %12424 = vst.sshfl [vmem:[#allocation4 + $0x1b0] sm:$0x30 pattern:$0x76325410] %v6709_v54  ;;  %v7006_v16 = vmul.f32 1.442695, %v6992_v33  ;;  %v7745_v19 = vadd.f32 %v7737_v52, %v15027_v38  ;;  %v7788_v50 = vadd.f32 %v7780_v9, %v7771_v11  ;;  %v4068_v35 = vcombine.low %v4012_v62, %v4012_v62 }
 0x381   : > { %5373 = vperm.xlu1 %12706, %v14522_v49   ;;  %v7008_v36 = vmul.f32 1.442695, %v6993_v32  ;;  %4829 = vst [vmem:[#allocation5 + $0x110] sm:$0xc0] %v4777_v8  ;;  %v4058_v25 = vcombine.high %v4057_v20, %v4057_v20  ;;  %v5459_v58 = vrot.slane %v5452_v22, %v13613_v59  ;;  %v6717_v12 = vcombine.high %v6716_v14, %v6716_v14  ;;  %v16887_v9 = vld [vmem:[#allocation32_spill] sm:$0xff] }
 0x382   : > { %12363 = vst.sshfl [vmem:[#allocation5 + $0x60] sm:$0x30 pattern:$0x76325410] %v5452_v22  ;;  %7753 = vst [vmem:[#allocation5 + $0x50] sm:$0xff] %v7745_v19  ;;  %v7770_v26 = vmul.f32 %v7762_v31, %v7745_v19  ;;  %v4075_v38 = vrot.slane %v4068_v35, %v13613_v59  ;;  %13310 = vpow2.f32 %v7006_v16  ;;  %v7779_v33 = vld [vmem:[#allocation5 + $0x90] sm:$0xff]  ;;  %v6138_v47 = vmul.f32 %v6070_v57, %v14655_v48  ;;  %v5363_v11 = vpop.permute.xlu1 %5362 }
 0x383   : > { %7796 = vst [vmem:[#allocation5 + $0x98] sm:$0xff] %v7788_v50  ;;  %4118 = vst [vmem:[#allocation5 + $0xd8] sm:$0xc] %v4058_v25  ;;  %v5460_v61 = vcombine.high %v5459_v58, %v5459_v58  ;;  %v4368_v15 = vmul.f32 %v4350_v55, %v14793_v44  ;;  %13312 = vpow2.f32 %v7008_v36  ;;  %v5371_v62 = vrot.slane %v5363_v11, %v14476_v21  ;;  %v4664_v52 = vpop.permute.xlu0 %4663 }
 0x384   : > { %12303 = vst.sshfl [vmem:[#allocation5 + $0x150] sm:$0x30 pattern:$0x76325410] %v4068_v35  ;;  %6756 = vst [vmem:[#allocation4 + $0x1b8] sm:$0xc] %v6717_v12  ;;  %v7787_v54 = vadd.f32 %v7779_v33, %v7770_v26  ;;  %v4076_v32 = vcombine.high %v4075_v38, %v4075_v38  ;;  %v6162_v8 = vcombine.low %v6138_v47, %v6138_v47 }
 0x385   : > { %12707 = vset.pattern.permute.xlu1 %v16851_v60  ;;  %5534 = vst [vmem:[#allocation5 + $0x68] sm:$0xc] %v5460_v61  ;;  %v4432_v20 = vrot.slane %v4368_v15, %v13613_v59  ;;  %12320 = vst.sshfl [vmem:[#allocation5 + $0x198] sm:$0xc pattern:$0x76325410] %v4368_v15  ;;  %v1987_v22 = vmul.f32 %v16887_v9, %v14787_v28  ;;  %v4672_v39 = vrot.slane %v4664_v52, %v14476_v21 }
 0x386   : > { %6083 = vperm.xlu1 %12707, %v14522_v49   ;;  %7795 = vst [vmem:[#allocation5 + $0x90] sm:$0xff] %v7787_v54  ;;  %4122 = vst [vmem:[#allocation5 + $0x158] sm:$0xc] %v4076_v32  ;;  %v6169_v16 = vrot.slane %v6162_v8, %v13613_v59  ;;  %v5429_v19 = vmul.f32 %v5371_v62, %v14769_v40  ;;  %v7339_v55 = vmul.f32 %v14025_v4, %v14356_v18  ;;  %v7723_v54 = vld [vmem:[#allocation4 + $0x68] sm:$0xff] }
 0x387   : > { %v13309_v14 = vpop.eup %13308  ;;  %12395 = vst.sshfl [vmem:[#allocation5 + $0x68] sm:$0xc0 pattern:$0x76325410] %v6162_v8  ;;  %v4433_v36 = vcombine.low %v4432_v20, %v4432_v20  ;;  %v2002_v50 = vmul.f32 1.442695, %v1987_v22  ;;  %v4720_v25 = vmul.f32 %v4672_v39, %v14804_v51  ;;  %v5718_v58 = vpop.permute.xlu1 %5717  ;;  %v7340_v47 = vmul.f32 %v14025_v4, %v14787_v28 }
 0x388   : > { %v6718_v35 = vcombine.low %v13309_v14, %v13309_v14  ;;  %v6170_v6 = vcombine.low %v6169_v16, %v6169_v16  ;;  %v5461_v31 = vcombine.low %v5429_v19, %v5429_v19  ;;  %v4686_v57 = vpop.permute.xlu0 %4685  ;;  %v5726_v26 = vrot.slane %v5718_v58, %v14476_v21  ;;  %v13338_v20 = vld [vmem:[#allocation5 + $0x28] sm:$0xff] }
 0x389   : > { %4470 = vst [vmem:[#allocation5 + $0x190] sm:$0x30] %v4433_v36  ;;  %v4760_v12 = vcombine.low %v4720_v25, %v4720_v25  ;;  %v4694_v38 = vrot.slane %v4686_v57, %v14476_v21  ;;  %13314 = vpow2.f32 %v2002_v50  ;;  %v7731_v62 = vmul.f32 %v13338_v20, %v7723_v54  ;;  %v7722_v50 = vld [vmem:[#allocation4 + $0x60] sm:$0xff] }
 0x38a   : > { %12708 = vset.pattern.permute.xlu1 %v16848_v41  ;;  %v6725_v33 = vrot.slane %v6718_v35, %v13613_v59  ;;  %12425 = vst.sshfl [vmem:[#allocation4 + $0x1f0] sm:$0x30 pattern:$0x76325410] %v6718_v35  ;;  %6243 = vst [vmem:[#allocation5 + $0x60] sm:$0xc0] %v6170_v6  ;;  %v5468_v61 = vrot.slane %v5461_v31, %v13613_v59  ;;  %v5784_v32 = vmul.f32 %v5726_v26, %v14769_v40 }
 0x38b   : > { %5018 = vperm.xlu1 %12708, %v14522_v49   ;;  %12364 = vst.sshfl [vmem:[#allocation5 + $0xa0] sm:$0x30 pattern:$0x76325410] %v5461_v31  ;;  %v4767_v18 = vrot.slane %v4760_v12, %v13613_v59  ;;  %v4722_v11 = vmul.f32 %v4694_v38, %v14966_v42  ;;  %v7353_v9 = vmul.f32 1.442695, %v7339_v55 }
 0x38c   : > { %v15083_v15 = vpop.eup %13310  ;;  %12333 = vst.sshfl [vmem:[#allocation5 + $0xd8] sm:$0xc0 pattern:$0x76325410] %v4760_v12  ;;  %v5469_v52 = vcombine.high %v5468_v61, %v5468_v61  ;;  %v6726_v4 = vcombine.high %v6725_v33, %v6725_v33  ;;  %v5820_v14 = vrot.slane %v5784_v32, %v13613_v59  ;;  %v7482_v36 = vpop.permute.xlu1 %7481  ;;  %v7355_v31 = vmul.f32 1.442695, %v7340_v47 }
 0x38d   : > { %v15089_v8 = vpop.eup %13312  ;;  %12440 = vst.sshfl [vmem:[#allocation4 + $0x1b8] sm:$0xc pattern:$0x76325410] %v15083_v15  ;;  %v4768_v39 = vcombine.low %v4767_v18, %v4767_v18  ;;  %v4778_v16 = vcombine.low %v4722_v11, %v4722_v11  ;;  %v5729_v19 = vpop.permute.xlu0 %5728  ;;  %v7490_v35 = vrot.slane %v7482_v36, %v14476_v21  ;;  %v13339_v55 = vld [vmem:[#allocation5 + $0x20] sm:$0xff]  ;;  %13316 = vpow2.f32 %v7353_v9  ;;  %v7765_v11 = vld [vmem:[#allocation4 + $0xa8] sm:$0xff] }
 0x38e   : > { %v7740_v22 = vld [vmem:[#allocation5 + $0x68] sm:$0xff]  ;;  %12380 = vst.sshfl [vmem:[#allocation5 + $0xa8] sm:$0xc pattern:$0x76325410] %v5784_v32  ;;  %v5737_v6 = vrot.slane %v5729_v19, %v14476_v21  ;;  %v5821_v58 = vcombine.low %v5820_v14, %v5820_v14  ;;  %v7730_v12 = vmul.f32 %v13339_v55, %v7722_v50  ;;  %13318 = vpow2.f32 %v7355_v31  ;;  %v7764_v36 = vld [vmem:[#allocation4 + $0xa0] sm:$0xff] }
 0x38f   : > { %12710 = vset.pattern.permute.xlu1 %v16853_v5  ;;  %12441 = vst.sshfl [vmem:[#allocation4 + $0x1f8] sm:$0xc pattern:$0x76325410] %v15089_v8  ;;  %v7748_v25 = vadd.f32 %v7740_v22, %v7731_v62  ;;  %5536 = vst [vmem:[#allocation5 + $0xa8] sm:$0xc] %v5469_v52  ;;  %v4785_v57 = vrot.slane %v4778_v16, %v13613_v59  ;;  %v7558_v26 = vmul.f32 %v7490_v35, %v14655_v48 }
 0x390   : > { %5395 = vperm.xlu1 %12710, %v14541_v37   ;;  %6758 = vst [vmem:[#allocation4 + $0x1f8] sm:$0xc] %v6726_v4  ;;  %4827 = vst [vmem:[#allocation5 + $0xd0] sm:$0xc0] %v4768_v39  ;;  %v5785_v38 = vmul.f32 %v5737_v6, %v14804_v51 }
 0x391   : > { %12335 = vst.sshfl [vmem:[#allocation5 + $0x158] sm:$0xc0 pattern:$0x76325410] %v4778_v16  ;;  %7756 = vst [vmem:[#allocation5 + $0x68] sm:$0xff] %v7748_v25  ;;  %v7739_v33 = vld [vmem:[#allocation5 + $0x60] sm:$0xff]  ;;  %v4786_v61 = vcombine.low %v4785_v57, %v4785_v57  ;;  %v7582_v54 = vcombine.low %v7558_v26, %v7558_v26  ;;  %v6417_v32 = vpop.permute.xlu1 %6416  ;;  %v6106_v62 = vpop.permute.xlu0 %6105  ;;  %v7773_v4 = vmul.f32 %v7765_v11, %v7748_v25 }
 0x392   : > { %5882 = vst [vmem:[#allocation5 + $0xa0] sm:$0x30] %v5821_v58  ;;  %v7747_v47 = vadd.f32 %v7739_v33, %v7730_v12  ;;  %v5828_v18 = vrot.slane %v5785_v38, %v13613_v59  ;;  %12381 = vst.sshfl [vmem:[#allocation5 + $0xe8] sm:$0xc pattern:$0x76325410] %v5785_v38  ;;  %v6425_v20 = vrot.slane %v6417_v32, %v14476_v21 }
 0x393   : > { %4831 = vst [vmem:[#allocation5 + $0x150] sm:$0xc0] %v4786_v61  ;;  %v15104_v52 = vpop.eup %13314  ;;  %v7589_v9 = vrot.slane %v7582_v54, %v13613_v59  ;;  %12459 = vst.sshfl [vmem:[#allocation5 + $0x78] sm:$0xc0 pattern:$0x76325410] %v7582_v54  ;;  %v6114_v39 = vrot.slane %v6106_v62, %v14476_v21  ;;  %v7072_v58 = vrot.slane %v15083_v15, %v13613_v59 }
 0x394   : > { %12712 = vset.pattern.permute.xlu1 %v16863_v34  ;;  %7755 = vst [vmem:[#allocation5 + $0x60] sm:$0xff] %v7747_v47  ;;  %v5829_v22 = vcombine.low %v5828_v18, %v5828_v18  ;;  %v6493_v16 = vmul.f32 %v6425_v20, %v14655_v48  ;;  %12217 = vst.sshfl [vmem:[#allocation4 + $0x1c0] sm:$0x3 pattern:$0x76325410] %v15104_v52  ;;  %v7772_v25 = vmul.f32 %v7764_v36, %v7747_v47 }
 0x395   : > { %6793 = vperm.xlu1 %12712, %v14522_v49   ;;  %v7590_v50 = vcombine.low %v7589_v9, %v7589_v9  ;;  %v6142_v35 = vmul.f32 %v6114_v39, %v14966_v42  ;;  %v7073_v32 = vcombine.low %v7072_v58, %v7072_v58 }
 0x396   : > { %v7782_v14 = vld [vmem:[#allocation5 + $0xa8] sm:$0xff]  ;;  %5884 = vst [vmem:[#allocation5 + $0xe0] sm:$0x30] %v5829_v22  ;;  %v6522_v6 = vrot.slane %v6493_v16, %v13613_v59  ;;  %v7127_v31 = vpop.permute.xlu1 %7126  ;;  %v5041_v26 = vpop.permute.xlu0 %5040 }
 0x397   : > { %v7790_v19 = vadd.f32 %v7782_v14, %v7773_v4  ;;  %12411 = vst.sshfl [vmem:[#allocation5 + $0x70] sm:$0x3 pattern:$0x76325410] %v6493_v16  ;;  %7663 = vst [vmem:[#allocation5 + $0x70] sm:$0xc0] %v7590_v50  ;;  %v6198_v55 = vcombine.low %v6142_v35, %v6142_v35  ;;  %v7135_v12 = vrot.slane %v7127_v31, %v14476_v21  ;;  %v13317_v54 = vpop.eup %13316 }
 0x398   : > { %v6523_v33 = vcombine.high %v6522_v6, %v6522_v6  ;;  %v5049_v61 = vrot.slane %v5041_v26, %v14476_v21  ;;  %v13319_v4 = vpop.eup %13318  ;;  %7110 = vst [vmem:[#allocation4 + $0x1b0] sm:$0x30] %v7073_v32  ;;  %v7419_v39 = vcombine.low %v13317_v54, %v13317_v54  ;;  %v16888_v14 = vld [vmem:[#allocation33_spill] sm:$0xff] }
 0x399   : > { %12713 = vset.pattern.permute.xlu1 %v16856_v10  ;;  %v7781_v57 = vld [vmem:[#allocation5 + $0xa0] sm:$0xff]  ;;  %7798 = vst [vmem:[#allocation5 + $0xa8] sm:$0xff] %v7790_v19  ;;  %v6205_v47 = vrot.slane %v6198_v55, %v13613_v59  ;;  %12399 = vst.sshfl [vmem:[#allocation5 + $0x168] sm:$0xc0 pattern:$0x76325410] %v6198_v55  ;;  %v7203_v18 = vmul.f32 %v7135_v12, %v14655_v48  ;;  %v2370_v16 = vmul.f32 %v16888_v14, %v14787_v28 }
 0x39a   : > { %7503 = vperm.xlu1 %12713, %v14522_v49   ;;  %v7789_v38 = vadd.f32 %v7781_v57, %v7772_v25  ;;  %6591 = vst [vmem:[#allocation5 + $0x78] sm:$0x3] %v6523_v33  ;;  %v5077_v15 = vmul.f32 %v5049_v61, %v14966_v42  ;;  %12456 = vst.sshfl [vmem:[#allocation4 + $0x1b8] sm:$0xc0 pattern:$0x76325410] %v7419_v39  ;;  %v7426_v31 = vrot.slane %v7419_v39, %v13613_v59 }
 0x39b   : > { %v6206_v11 = vcombine.low %v6205_v47, %v6205_v47  ;;  %v7232_v20 = vrot.slane %v7203_v18, %v13613_v59  ;;  %12443 = vst.sshfl [vmem:[#allocation5 + $0x78] sm:$0xc pattern:$0x76325410] %v7203_v18  ;;  %v6095_v62 = vpop.permute.xlu1 %6094  ;;  %v7149_v22 = vpop.permute.xlu0 %7148  ;;  %v7725_v25 = vld [vmem:[#allocation4 + $0x78] sm:$0xff]  ;;  %v15134_v58 = vcombine.low %v13319_v4, %v13319_v4  ;;  %v16889_v18 = vld [vmem:[#allocation34_spill] sm:$0xff] }
 0x39c   : > { %7797 = vst [vmem:[#allocation5 + $0xa0] sm:$0xff] %v7789_v38  ;;  %v5134_v9 = vrot.slane %v5077_v15, %v13613_v59  ;;  %12351 = vst.sshfl [vmem:[#allocation5 + $0x160] sm:$0x3 pattern:$0x76325410] %v5077_v15  ;;  %v6103_v48 = vrot.slane %v6095_v62, %v14476_v21  ;;  %v7157_v19 = vrot.slane %v7149_v22, %v14476_v21  ;;  %v13340_v57 = vld [vmem:[#allocation5 + $0x38] sm:$0xff] }
 0x39d   : > { %6251 = vst [vmem:[#allocation5 + $0x160] sm:$0xc0] %v6206_v11  ;;  %v7233_v36 = vcombine.low %v7232_v20, %v7232_v20  ;;  %v7733_v55 = vmul.f32 %v13340_v57, %v7725_v25  ;;  %v2074_v38 = vrot.slane %v15104_v52, %v13613_v59  ;;  %v2385_v33 = vmul.f32 1.442695, %v2370_v16  ;;  %v13341_v14 = vld [vmem:[#allocation5 + $0x30] sm:$0xff] }
 0x39e   : > { %12715 = vset.pattern.permute.xlu1 %v16850_v7  ;;  %v5135_v50 = vcombine.high %v5134_v9, %v5134_v9  ;;  %v6141_v35 = vmul.f32 %v6103_v48, %v14668_v13  ;;  %v7205_v6 = vmul.f32 %v7157_v19, %v14804_v51  ;;  %12457 = vst.sshfl [vmem:[#allocation4 + $0x1f8] sm:$0xc0 pattern:$0x76325410] %v15134_v58  ;;  %v7724_v48 = vld [vmem:[#allocation4 + $0x70] sm:$0xff] }
 0x39f   : > { %5750 = vperm.xlu1 %12715, %v14541_v37   ;;  %7300 = vst [vmem:[#allocation5 + $0x70] sm:$0x30] %v7233_v36  ;;  %v2733_v15 = vmul.f32 %v16889_v18, %v14787_v28  ;;  %v2075_v52 = vcombine.high %v2074_v38, %v2074_v38  ;;  %13320 = vpow2.f32 %v2385_v33  ;;  %v7732_v16 = vmul.f32 %v13341_v14, %v7724_v48 }
 0x3a0   : > { %5179 = vst [vmem:[#allocation5 + $0x168] sm:$0x3] %v5135_v50  ;;  %v6189_v12 = vcombine.low %v6141_v35, %v6141_v35  ;;  %v6783_v26 = vpop.permute.xlu1 %6782  ;;  %v7248_v61 = vrot.slane %v7205_v6, %v13613_v59  ;;  %12445 = vst.sshfl [vmem:[#allocation5 + $0xf8] sm:$0xc pattern:$0x76325410] %v7205_v6  ;;  %v5762_v47 = vpop.permute.xlu0 %5761 }
 0x3a1   : > { %v6791_v54 = vrot.slane %v6783_v26, %v14476_v21  ;;  %v5770_v20 = vrot.slane %v5762_v47, %v14476_v21  ;;  %2107 = vst [vmem:[#allocation4 + $0x1c8] sm:$0x3] %v2075_v52  ;;  %v16890_v50 = vld [vmem:[#allocation35_spill] sm:$0xff]  ;;  %v2748_v57 = vmul.f32 1.442695, %v2733_v15 }
 0x3a2   : > { %v7742_v32 = vld [vmem:[#allocation5 + $0x78] sm:$0xff]  ;;  %v6196_v11 = vrot.slane %v6189_v12, %v13613_v59  ;;  %12398 = vst.sshfl [vmem:[#allocation5 + $0x128] sm:$0xc0 pattern:$0x76325410] %v6189_v12  ;;  %v7249_v4 = vcombine.low %v7248_v61, %v7248_v61  ;;  %v3080_v35 = vmul.f32 %v16890_v50, %v14787_v28 }
 0x3a3   : > { %12716 = vset.pattern.permute.xlu1 %v16860_v23  ;;  %v15145_v62 = vadd.f32 %v7742_v32, %v7733_v55  ;;  %v6849_v9 = vmul.f32 %v6791_v54, %v14769_v40  ;;  %v5788_v39 = vmul.f32 %v5770_v20, %v14793_v44  ;;  %v16891_v55 = vld [vmem:[#allocation28_spill] sm:$0xff]  ;;  %13322 = vpow2.f32 %v2748_v57  ;;  %v16892_v20 = vld [vmem:[#allocation29_spill] sm:$0xff]  ;;  %v16894_v57 = vld [vmem:[#allocation31_spill] sm:$0xff] }
 0x3a4   : > { %6438 = vperm.xlu1 %12716, %v14522_v49   ;;  %v7427_v49 = vcombine.low %v7426_v31, %v7426_v31  ;;  %v6197_v22 = vcombine.low %v6196_v11, %v6196_v11  ;;  %7304 = vst [vmem:[#allocation5 + $0xf0] sm:$0x30] %v7249_v4  ;;  %v3443_v12 = vmul.f32 %v16891_v55, %v14787_v28  ;;  %v3095_v18 = vmul.f32 1.442695, %v3080_v35 }
 0x3a5   : > { %7758 = vst [vmem:[#allocation5 + $0x78] sm:$0xff] %v15145_v62  ;;  %v6881_v36 = vcombine.low %v6849_v9, %v6849_v9  ;;  %v5030_v19 = vpop.permute.xlu1 %5029  ;;  %12384 = vst.sshfl [vmem:[#allocation5 + $0x1a8] sm:$0xc pattern:$0x76325410] %v5788_v39  ;;  %v7526_v31 = vpop.permute.xlu0 %7525  ;;  %v3790_v52 = vmul.f32 %v16892_v20, %v14787_v28  ;;  %v4500_v55 = vmul.f32 %v16894_v57, %v14787_v28 }
 0x3a6   : > { %7465 = vst [vmem:[#allocation4 + $0x1b0] sm:$0xc0] %v7427_v49  ;;  %v7741_v25 = vld [vmem:[#allocation5 + $0x70] sm:$0xff]  ;;  %6249 = vst [vmem:[#allocation5 + $0x120] sm:$0xc0] %v6197_v22  ;;  %v5038_v6 = vrot.slane %v5030_v19, %v14476_v21  ;;  %v7534_v33 = vrot.slane %v7526_v31, %v14476_v21  ;;  %13324 = vpow2.f32 %v3095_v18  ;;  %v16893_v22 = vld [vmem:[#allocation30_spill] sm:$0xff] }
 0x3a7   : > { %v15158_v26 = vadd.f32 %v7741_v25, %v7732_v16  ;;  %v6888_v38 = vrot.slane %v6881_v36, %v13613_v59  ;;  %12428 = vst.sshfl [vmem:[#allocation5 + $0xb0] sm:$0x30 pattern:$0x76325410] %v6881_v36  ;;  %v3458_v11 = vmul.f32 1.442695, %v3443_v12  ;;  %v4950_v12 = vrot.slane %v14930_v24, %v13613_v59 }
 0x3a8   : > { %12718 = vset.pattern.permute.xlu1 %v16853_v5  ;;  %v5852_v5 = vrot.slane %v5788_v39, %v13613_v59  ;;  %v5076_v54 = vmul.f32 %v5038_v6, %v14668_v13  ;;  %v7562_v49 = vmul.f32 %v7534_v33, %v14966_v42  ;;  %v4153_v39 = vmul.f32 %v16893_v22, %v14787_v28 }
 0x3a9   : > { %5406 = vperm.xlu1 %12718, %v14501_v63   ;;  %7757 = vst [vmem:[#allocation5 + $0x70] sm:$0xff] %v15158_v26  ;;  %v6889_v47 = vcombine.high %v6888_v38, %v6888_v38  ;;  %v13321_v14 = vpop.eup %13320  ;;  %13326 = vpow2.f32 %v3458_v11  ;;  %v3805_v25 = vmul.f32 1.442695, %v3790_v52  ;;  %v4951_v28 = vcombine.high %v4950_v12, %v4950_v12 }
 0x3aa   : > { %v5853_v61 = vcombine.low %v5852_v5, %v5852_v5  ;;  %v5126_v15 = vrot.slane %v5076_v54, %v13613_v59  ;;  %12350 = vst.sshfl [vmem:[#allocation5 + $0x120] sm:$0x3 pattern:$0x76325410] %v5076_v54  ;;  %v5740_v32 = vpop.permute.xlu1 %5739  ;;  %v7618_v4 = vcombine.low %v7562_v49, %v7562_v49  ;;  %v6461_v48 = vpop.permute.xlu0 %6460  ;;  %v2458_v35 = vcombine.low %v13321_v14, %v13321_v14 }
 0x3ab   : > { %6956 = vst [vmem:[#allocation5 + $0xb8] sm:$0xc] %v6889_v47  ;;  %v5748_v9 = vrot.slane %v5740_v32, %v14476_v21  ;;  %v6469_v36 = vrot.slane %v6461_v48, %v14476_v21  ;;  %v16766_v5 = vmov 31   ;;  %v4168_v31 = vmul.f32 1.442695, %v4153_v39 }
 0x3ac   : > { %5890 = vst [vmem:[#allocation5 + $0x1a0] sm:$0x30] %v5853_v61  ;;  %v5127_v16 = vcombine.high %v5126_v15, %v5126_v15  ;;  %v7625_v19 = vrot.slane %v7618_v4, %v13613_v59  ;;  %12463 = vst.sshfl [vmem:[#allocation5 + $0x178] sm:$0xc0 pattern:$0x76325410] %v7618_v4  ;;  %12757 = vset.pattern.permute.xlu0 %v16766_v5  ;;  %v2465_v54 = vrot.slane %v2458_v35, %v13613_v59 }
 0x3ad   : > { %12719 = vset.pattern.permute.xlu1 %v16851_v60  ;;  %v5786_v50 = vmul.f32 %v5748_v9, %v14668_v13  ;;  %v6497_v6 = vmul.f32 %v6469_v36, %v14966_v42  ;;  %12233 = vst.sshfl [vmem:[#allocation4 + $0x1c0] sm:$0x30 pattern:$0x76325410] %v2458_v35  ;;  %13328 = vpow2.f32 %v3805_v25  ;;  %v4515_v11 = vmul.f32 1.442695, %v4500_v55  ;;  %v13323_v20 = vpop.eup %13322 }
 0x3ae   : > { %6116 = vperm.xlu1 %12719, %v14501_v63   ;;  %5177 = vst [vmem:[#allocation5 + $0x128] sm:$0x3] %v5127_v16  ;;  %v7626_v38 = vcombine.low %v7625_v19, %v7625_v19  ;;  %13330 = vpow2.f32 %v4168_v31  ;;  %v2466_v32 = vcombine.high %v2465_v54, %v2465_v54  ;;  %4983 = vst [vmem:[#allocation4 + $0x1e8] sm:$0x3] %v4951_v28  ;;  %v7767_v54 = vld [vmem:[#allocation4 + $0xb8] sm:$0xff]  ;;  %v16925_v5 = vld [vmem:[#allocation40_spill] sm:$0xff] }
 0x3af   : > { %v5836_v33 = vrot.slane %v5786_v50, %v13613_v59  ;;  %12382 = vst.sshfl [vmem:[#allocation5 + $0x128] sm:$0xc pattern:$0x76325410] %v5786_v50  ;;  %v7138_v61 = vpop.permute.xlu1 %7137  ;;  %v6554_v47 = vrot.slane %v6497_v6, %v13613_v59  ;;  %v7537_v18 = vpop.permute.xlu0 %7536  ;;  %v5305_v9 = vrot.slane %v14937_v27, %v13613_v59  ;;  %v2820_v22 = vrot.slane %v13323_v20, %v13613_v59 }
 0x3b0   : > { %12415 = vst.sshfl [vmem:[#allocation5 + $0x170] sm:$0x3 pattern:$0x76325410] %v6497_v6  ;;  %v7146_v49 = vrot.slane %v7138_v61, %v14476_v21  ;;  %7671 = vst [vmem:[#allocation5 + $0x170] sm:$0xc0] %v7626_v38  ;;  %v7545_v24 = vrot.slane %v7537_v18, %v14476_v21  ;;  %13332 = vpow2.f32 %v4515_v11  ;;  %v7080_v39 = vrot.slane %v15089_v8, %v13613_v59  ;;  %v13325_v19 = vpop.eup %13324 }
 0x3b1   : > { %v5837_v15 = vcombine.low %v5836_v33, %v5836_v33  ;;  %v6555_v52 = vcombine.high %v6554_v47, %v6554_v47  ;;  %2498 = vst [vmem:[#allocation4 + $0x1c8] sm:$0xc] %v2466_v32  ;;  %12249 = vst.sshfl [vmem:[#allocation4 + $0x1c8] sm:$0xc pattern:$0x76325410] %v13323_v20  ;;  %v15201_v27 = vcombine.high %v14793_v44, %v14793_v44 }
 0x3b2   : > { %12720 = vset.pattern.permute.xlu1 %v16848_v41  ;;  %v7204_v4 = vmul.f32 %v7146_v49, %v14769_v40  ;;  %v7563_v48 = vmul.f32 %v7545_v24, %v14793_v44  ;;  %v5306_v16 = vcombine.high %v5305_v9, %v5305_v9  ;;  %v7435_v36 = vrot.slane %v15134_v58, %v13613_v59 }
 0x3b3   : > { %5051 = vperm.xlu1 %12720, %v14501_v63   ;;  %5886 = vst [vmem:[#allocation5 + $0x120] sm:$0x30] %v5837_v15  ;;  %6599 = vst [vmem:[#allocation5 + $0x178] sm:$0x3] %v6555_v52  ;;  %v2821_v6 = vcombine.low %v2820_v22, %v2820_v22  ;;  %v7081_v8 = vcombine.low %v7080_v39, %v7080_v39  ;;  %v13327_v31 = vpop.eup %13326  ;;  %v3168_v12 = vcombine.low %v13325_v19, %v13325_v19 }
 0x3b4   : > { %v7240_v40 = vrot.slane %v7204_v4, %v13613_v59  ;;  %12444 = vst.sshfl [vmem:[#allocation5 + $0xb8] sm:$0xc pattern:$0x76325410] %v7204_v4  ;;  %v7515_v14 = vpop.permute.xlu1 %7514  ;;  %16895 = vst [vmem:[#allocation27_spill] sm:$0xff] %v15201_v27  ;;  %v7627_v50 = vcombine.low %v7563_v48, %v7563_v48  ;;  %v2578_v25 = vpop.permute.xlu0 %2577  ;;  %v7436_v38 = vcombine.low %v7435_v36, %v7435_v36 }
 0x3b5   : > { %v7523_v35 = vrot.slane %v7515_v14, %v14476_v21  ;;  %v2586_v55 = vrot.slane %v2578_v25, %v14476_v21  ;;  %5338 = vst [vmem:[#allocation4 + $0x1e8] sm:$0xc] %v5306_v16  ;;  %2852 = vst [vmem:[#allocation4 + $0x1c0] sm:$0x30] %v2821_v6  ;;  %v3530_v58 = vrot.slane %v13327_v31, %v13613_v59 }
 0x3b6   : > { %v7241_v57 = vcombine.low %v7240_v40, %v7240_v40  ;;  %v7634_v33 = vrot.slane %v7627_v50, %v13613_v59  ;;  %12464 = vst.sshfl [vmem:[#allocation5 + $0x1b8] sm:$0xc0 pattern:$0x76325410] %v7627_v50  ;;  %7112 = vst [vmem:[#allocation4 + $0x1f0] sm:$0x30] %v7081_v8  ;;  %v3175_v49 = vrot.slane %v3168_v12, %v13613_v59 }
 0x3b7   : > { %12722 = vset.pattern.permute.xlu1 %v16863_v34  ;;  %v7561_v61 = vmul.f32 %v7523_v35, %v14668_v13  ;;  %12281 = vst.sshfl [vmem:[#allocation4 + $0x1d0] sm:$0x3 pattern:$0x76325410] %v13327_v31  ;;  %v2594_v47 = vmul.f32 %v2586_v55, %v15201_v27  ;;  %7467 = vst [vmem:[#allocation4 + $0x1f0] sm:$0xc0] %v7436_v38  ;;  %v13329_v18 = vpop.eup %13328  ;;  %v7775_v28 = vmul.f32 %v7767_v54, %v15145_v62 }
 0x3b8   : > { %6815 = vperm.xlu1 %12722, %v14541_v37   ;;  %7302 = vst [vmem:[#allocation5 + $0xb0] sm:$0x30] %v7241_v57  ;;  %12265 = vst.sshfl [vmem:[#allocation4 + $0x1c8] sm:$0xc0 pattern:$0x76325410] %v3168_v12  ;;  %v7635_v15 = vcombine.low %v7634_v33, %v7634_v33  ;;  %v3531_v11 = vcombine.high %v3530_v58, %v3530_v58  ;;  %v13331_v20 = vpop.eup %13330  ;;  %v3176_v48 = vcombine.low %v3175_v49, %v3175_v49 }
 0x3b9   : > { %v7609_v24 = vcombine.low %v7561_v61, %v7561_v61  ;;  %v6450_v32 = vpop.permute.xlu1 %6449  ;;  %v2666_v52 = vcombine.low %v2594_v47, %v2594_v47  ;;  %v3288_v9 = vpop.permute.xlu0 %3287  ;;  %v3878_v22 = vcombine.low %v13329_v18, %v13329_v18  ;;  %v4240_v62 = vrot.slane %v13331_v20, %v13613_v59  ;;  %12313 = vst.sshfl [vmem:[#allocation4 + $0x1d8] sm:$0xc pattern:$0x76325410] %v13331_v20  ;;  %v7766_v35 = vld [vmem:[#allocation4 + $0xb0] sm:$0xff] }
 0x3ba   : > { %v6458_v4 = vrot.slane %v6450_v32, %v14476_v21  ;;  %7673 = vst [vmem:[#allocation5 + $0x1b0] sm:$0xc0] %v7635_v15  ;;  %v3296_v40 = vrot.slane %v3288_v9, %v14476_v21  ;;  %3563 = vst [vmem:[#allocation4 + $0x1d8] sm:$0x3] %v3531_v11  ;;  %v13333_v50 = vpop.eup %13332  ;;  %v7774_v31 = vmul.f32 %v7766_v35, %v15158_v26  ;;  %v8011_v38 = vld [vmem:[%s537_s14] sm:$0x3] }
 0x3bb   : > { %v7784_v39 = vld [vmem:[#allocation5 + $0xb8] sm:$0xff]  ;;  %12462 = vst.sshfl [vmem:[#allocation5 + $0x138] sm:$0xc0 pattern:$0x76325410] %v7609_v24  ;;  %v2673_v16 = vrot.slane %v2666_v52, %v13613_v59  ;;  %v3885_v19 = vrot.slane %v3878_v22, %v13613_v59  ;;  %v4241_v8 = vcombine.low %v4240_v62, %v4240_v62  ;;  %v4588_v26 = vcombine.low %v13333_v50, %v13333_v50 }
 0x3bc   : > { %12725 = vset.pattern.permute.xlu1 %v16876_v46  ;;  %v7792_v14 = vadd.f32 %v7784_v39, %v7775_v28  ;;  %12241 = vst.sshfl [vmem:[#allocation5 + $0x1c0] sm:$0x30 pattern:$0x76325410] %v2666_v52  ;;  %v6496_v36 = vmul.f32 %v6458_v4, %v14668_v13  ;;  %3207 = vst [vmem:[#allocation4 + $0x1c0] sm:$0xc0] %v3176_v48  ;;  %v3304_v6 = vmul.f32 %v3296_v40, %v15201_v27 }
 0x3bd   : > { %7170 = vperm.xlu1 %12725, %v14541_v37   ;;  %v7616_v37 = vrot.slane %v7609_v24, %v13613_v59  ;;  %12297 = vst.sshfl [vmem:[#allocation4 + $0x1d0] sm:$0x30 pattern:$0x76325410] %v3878_v22  ;;  %v2674_v57 = vcombine.high %v2673_v16, %v2673_v16  ;;  %v3886_v12 = vcombine.high %v3885_v19, %v3885_v19  ;;  %4272 = vst [vmem:[#allocation4 + $0x1d0] sm:$0x30] %v4241_v8 }
 0x3be   : > { %7800 = vst [vmem:[#allocation5 + $0xb8] sm:$0xff] %v7792_v14  ;;  %v6546_v55 = vrot.slane %v6496_v36, %v13613_v59  ;;  %12414 = vst.sshfl [vmem:[#allocation5 + $0x130] sm:$0x3 pattern:$0x76325410] %v6496_v36  ;;  %v3376_v61 = vcombine.low %v3304_v6, %v3304_v6  ;;  %v4595_v24 = vrot.slane %v4588_v26, %v13613_v59  ;;  %v16896_v32 = vld [vmem:[#allocation13_spill] sm:$0xff] }
 0x3bf   : > { %v7617_v25 = vcombine.low %v7616_v37, %v7616_v37  ;;  %v7783_v33 = vld [vmem:[#allocation5 + $0xb0] sm:$0xff]  ;;  %v3998_v54 = vpop.permute.xlu0 %3997  ;;  %2706 = vst [vmem:[#allocation5 + $0x1c8] sm:$0xc] %v2674_v57  ;;  %3918 = vst [vmem:[#allocation4 + $0x1d8] sm:$0xc] %v3886_v12  ;;  %v8016_v11 = vrot.slane %v8011_v38, %v16896_v32  ;;  %v16897_v52 = vld [vmem:[#allocation14_spill] sm:$0xff]  ;;  %v9529_v17 = vrot.slane %v16925_v5, %v14476_v21 }
 0x3c0   : > { %v7791_v47 = vadd.f32 %v7783_v33, %v7774_v31  ;;  %v6547_v49 = vcombine.high %v6546_v55, %v6546_v55  ;;  %v4006_v18 = vrot.slane %v3998_v54, %v14476_v21  ;;  %v3383_v28 = vrot.slane %v3376_v61, %v13613_v59  ;;  %12273 = vst.sshfl [vmem:[#allocation5 + $0x1c8] sm:$0xc0 pattern:$0x76325410] %v3376_v61 }
 0x3c1   : > { %12726 = vset.pattern.permute.xlu1 %v16863_v34  ;;  %v7160_v34 = vpop.permute.xlu1 %7159  ;;  %7669 = vst [vmem:[#allocation5 + $0x130] sm:$0xc0] %v7617_v25  ;;  %12329 = vst.sshfl [vmem:[#allocation4 + $0x1d8] sm:$0xc0 pattern:$0x76325410] %v4588_v26  ;;  %v8020_v4 = vrot.slane %v8011_v38, %v16897_v52  ;;  %v4596_v22 = vcombine.low %v4595_v24, %v4595_v24 }
 0x3c2   : > { %6826 = vperm.xlu1 %12726, %v14501_v63   ;;  %v7168_v58 = vrot.slane %v7160_v34, %v14476_v21  ;;  %7799 = vst [vmem:[#allocation5 + $0xb0] sm:$0xff] %v7791_v47  ;;  %6597 = vst [vmem:[#allocation5 + $0x138] sm:$0x3] %v6547_v49  ;;  %v4014_v20 = vmul.f32 %v4006_v18, %v15201_v27  ;;  %v3384_v9 = vcombine.low %v3383_v28, %v3383_v28  ;;  %v13457_v24 = vmov 842150450  }
 0x3c3   : > { %4627 = vst [vmem:[#allocation4 + $0x1d0] sm:$0xc0] %v4596_v22  ;;  %v8021_v19 = vcombine.low %v8016_v11, %v8020_v4  ;;  %v8022_v50 = vcombine.high %v8016_v11, %v8020_v4  ;;  %v8169_v32 = vunpack.c.l.s4 %v13457_v24  ;;  %v13458_v11 = vmov 1414812756   ;;  %v16898_v22 = vld [vmem:[#allocation19_spill] sm:$0xff]  ;;  %v16909_v24 = vld [vmem:[#allocation18_spill] sm:$0xff] }
 0x3c4   : > { %v7206_v15 = vmul.f32 %v7168_v58, %v14668_v13  ;;  %v4086_v39 = vcombine.low %v4014_v20, %v4014_v20  ;;  %3415 = vst [vmem:[#allocation5 + $0x1c0] sm:$0xc0] %v3384_v9  ;;  %v13459_v9 = vmov 1987475062  }
 0x3c5   : > { %v2179_v13 = vpop.permute.xlu1 %2178  ;;  %v4708_v37 = vpop.permute.xlu0 %4707  ;;  %v8029_v38 = vrot.slane %v8021_v19, %v13613_v59  ;;  %v15256_v33 = vrot.slane %v8022_v50, %v13613_v59 }
 0x3c6   : > { %12728 = vset.pattern.permute.xlu1 %v16860_v23  ;;  %v7256_v48 = vrot.slane %v7206_v15, %v13613_v59  ;;  %12446 = vst.sshfl [vmem:[#allocation5 + $0x138] sm:$0xc pattern:$0x76325410] %v7206_v15  ;;  %v2187_v40 = vrot.slane %v2179_v13, %v14476_v21  ;;  %v4716_v14 = vrot.slane %v4708_v37, %v14476_v21 }
 0x3c7   : > { %6471 = vperm.xlu1 %12728, %v14501_v63   ;;  %v4093_v16 = vrot.slane %v4086_v39, %v13613_v59  ;;  %12305 = vst.sshfl [vmem:[#allocation5 + $0x1d0] sm:$0x30 pattern:$0x76325410] %v4086_v39  ;;  %v8037_v49 = vcombine.high %v8029_v38, %v8029_v38  ;;  %v8038_v4 = vcombine.high %v15256_v33, %v15256_v33 }
 0x3c8   : > { %v7257_v62 = vcombine.low %v7256_v48, %v7256_v48  ;;  %v2235_v36 = vmul.f32 %v2187_v40, %v14804_v51  ;;  %v4724_v35 = vmul.f32 %v4716_v14, %v15201_v27  ;;  %v8183_v48 = vunpack.c.l.s4 %v13459_v9  ;;  %v16899_v14 = vld [vmem:[#allocation15_spill] sm:$0xff] }
 0x3c9   : > { %v2201_v25 = vpop.permute.xlu1 %2200  ;;  %v4094_v6 = vcombine.high %v4093_v16, %v4093_v16  ;;  %v15271_v39 = vmul.f32 %v8029_v38, %v16898_v22  ;;  %v15276_v16 = vmul.f32 %v8037_v49, %v16899_v14  ;;  %v16912_v14 = vld [vmem:[#allocation21_spill] sm:$0xff] }
 0x3ca   : > { %7306 = vst [vmem:[#allocation5 + $0x130] sm:$0x30] %v7257_v62  ;;  %v2278_v8 = vrot.slane %v2235_v36, %v13613_v59  ;;  %12221 = vst.sshfl [vmem:[#allocation5 + $0xc0] sm:$0x3 pattern:$0x76325410] %v2235_v36  ;;  %v2209_v31 = vrot.slane %v2201_v25, %v14476_v21  ;;  %v4796_v57 = vcombine.low %v4724_v35, %v4724_v35  ;;  %v5418_v55 = vpop.permute.xlu0 %5417 }
 0x3cb   : > { %12729 = vset.pattern.permute.xlu1 %v16876_v46  ;;  %4126 = vst [vmem:[#allocation5 + $0x1d8] sm:$0xc] %v4094_v6  ;;  %v5426_v12 = vrot.slane %v5418_v55, %v14476_v21  ;;  %v16900_v36 = vld [vmem:[#allocation16_spill] sm:$0xff] }
 0x3cc   : > { %7181 = vperm.xlu1 %12729, %v14501_v63   ;;  %v2279_v34 = vcombine.high %v2278_v8, %v2278_v8  ;;  %v2237_v46 = vmul.f32 %v2209_v31, %v14966_v42  ;;  %v4803_v63 = vrot.slane %v4796_v57, %v13613_v59  ;;  %12337 = vst.sshfl [vmem:[#allocation5 + $0x1d8] sm:$0xc0 pattern:$0x76325410] %v4796_v57  ;;  %v16901_v57 = vld [vmem:[#allocation17_spill] sm:$0xff] }
 0x3cd   : > { %v5434_v58 = vmul.f32 %v5426_v12, %v15201_v27  ;;  %v2567_v54 = vpop.permute.xlu1 %2566  ;;  %v15280_v19 = vmul.f32 %v15256_v33, %v16900_v36  ;;  %v15285_v55 = vmul.f32 %v8038_v4, %v16901_v57  ;;  %v16913_v36 = vld [vmem:[#allocation22_spill] sm:$0xff] }
 0x3ce   : > { %2335 = vst [vmem:[#allocation5 + $0xc8] sm:$0x3] %v2279_v34  ;;  %v2294_v61 = vrot.slane %v2237_v46, %v13613_v59  ;;  %12223 = vst.sshfl [vmem:[#allocation5 + $0x140] sm:$0x3 pattern:$0x76325410] %v2237_v46  ;;  %v4804_v26 = vcombine.low %v4803_v63, %v4803_v63  ;;  %v2575_v47 = vrot.slane %v2567_v54, %v14476_v21  ;;  %v8184_v34 = vunpack.c.0.s8 %v8183_v48 }
 0x3cf   : > { %v5506_v28 = vcombine.low %v5434_v58, %v5434_v58  ;;  %16902 = vst [vmem:[#allocation32_spill] sm:$0xff] %v15285_v55  ;;  %v16903_v63 = vld [vmem:[#allocation23_spill] sm:$0xff]  ;;  %v16911_v48 = vld [vmem:[#allocation12_spill] sm:$0xff] }
 0x3d0   : > { %12730 = vset.pattern.permute.xlu1 %v16837_v1  ;;  %v2295_v18 = vcombine.high %v2294_v61, %v2294_v61  ;;  %v6838_v15 = vpop.permute.xlu0 %6837  ;;  %v8176_v1 = vunpack.c.l.s4 %v13458_v11  ;;  %4835 = vst [vmem:[#allocation5 + $0x1d0] sm:$0xc0] %v4804_v26  ;;  %v2593_v20 = vmul.f32 %v2575_v47, %v14793_v44  ;;  %v16904_v61 = vld [vmem:[#allocation24_spill] sm:$0xff]  ;;  %v15320_v22 = vsub.s32 %v8184_v34, %v16911_v48 }
 0x3d1   : > { %2222 = vperm.xlu1 %12730, %v14799_v3   ;;  %v6846_v52 = vrot.slane %v6838_v15, %v14476_v21  ;;  %v5513_v13 = vrot.slane %v5506_v28, %v13613_v59  ;;  %12369 = vst.sshfl [vmem:[#allocation5 + $0x1e0] sm:$0x30 pattern:$0x76325410] %v5506_v28  ;;  %v16905_v58 = vcombine.low %v16903_v63, %v16904_v61 }
 0x3d2   : > { %2339 = vst [vmem:[#allocation5 + $0x148] sm:$0x3] %v2295_v18  ;;  %v2657_v37 = vcombine.low %v2593_v20, %v2593_v20  ;;  %v8177_v25 = vunpack.c.0.s8 %v8176_v1  ;;  %v16907_v26 = vcombine.high %v16903_v63, %v16904_v61  ;;  %v16921_v61 = vld [vmem:[#allocation36_spill] sm:$0xff] }
 0x3d3   : > { %v6854_v40 = vmul.f32 %v6846_v52, %v15201_v27  ;;  %v2889_v62 = vpop.permute.xlu1 %2888  ;;  %v5514_v50 = vcombine.high %v5513_v13, %v5513_v13  ;;  %v15293_v54 = vrot.slane %v16905_v58, %v13613_v59  ;;  %v16910_v52 = vld [vmem:[#allocation20_spill] sm:$0xff]  ;;  %v8365_v58 = vrot.slane %v16921_v61, %v14476_v21 }
 0x3d4   : > { %v2897_v35 = vrot.slane %v2889_v62, %v14476_v21  ;;  %v2664_v6 = vrot.slane %v2657_v37, %v13613_v59  ;;  %12240 = vst.sshfl [vmem:[#allocation5 + $0x180] sm:$0x30 pattern:$0x76325410] %v2657_v37  ;;  %v15299_v47 = vrot.slane %v16907_v26, %v13613_v59  ;;  %v15311_v9 = vmul.f32 %v8037_v49, %v16910_v52  ;;  %v7928_v26 = vld [vmem:[#allocation4 + $0x180] sm:$0xff] }
 0x3d5   : > { %12732 = vset.pattern.permute.xlu1 %v16838_v56  ;;  %v8170_v56 = vunpack.c.0.s8 %v8169_v32  ;;  %v6926_v8 = vcombine.low %v6854_v40, %v6854_v40  ;;  %v7193_v31 = vpop.permute.xlu0 %7192  ;;  %5546 = vst [vmem:[#allocation5 + $0x1e8] sm:$0xc] %v5514_v50  ;;  %16906 = vst [vmem:[#allocation33_spill] sm:$0xff] %v15293_v54  ;;  %v15304_v32 = vmul.f32 %v8029_v38, %v16909_v24  ;;  %v7862_v24 = vld [vmem:[#allocation5 + $0x108] sm:$0xff] }
 0x3d6   : > { %2932 = vperm.xlu1 %12732, %v14799_v3   ;;  %v2945_v46 = vmul.f32 %v2897_v35, %v14804_v51  ;;  %v7201_v12 = vrot.slane %v7193_v31, %v14476_v21  ;;  %16908 = vst [vmem:[#allocation34_spill] sm:$0xff] %v15299_v47  ;;  %v2665_v18 = vcombine.high %v2664_v6, %v2664_v6  ;;  %v12873_v6 = vld [vmem:[#allocation5] ss:$8 sps:$4 sm:$0xcc]  }
 0x3d7   : > { %v6933_v28 = vrot.slane %v6926_v8, %v13613_v59  ;;  %12433 = vst.sshfl [vmem:[#allocation5 + $0x1f0] sm:$0x30 pattern:$0x76325410] %v6926_v8  ;;  %v2911_v15 = vpop.permute.xlu1 %2910  ;;  %v15314_v13 = vsub.s32 %v8170_v56, %v16911_v48  ;;  %v15326_v49 = vmul.f32 %v15256_v33, %v16912_v14  ;;  %v15329_v50 = vmul.f32 %v8038_v4, %v16913_v36  ;;  %v16915_v8 = vld [vmem:[#allocation25_spill] sm:$0xff]  ;;  %v16916_v31 = vld [vmem:[#allocation26_spill] sm:$0xff] }
 0x3d8   : > { %v2988_v11 = vrot.slane %v2945_v46, %v13613_v59  ;;  %12253 = vst.sshfl [vmem:[#allocation5 + $0xc8] sm:$0xc pattern:$0x76325410] %v2945_v46  ;;  %v7209_v1 = vmul.f32 %v7201_v12, %v15201_v27  ;;  %v2919_v20 = vrot.slane %v2911_v15, %v14476_v21  ;;  %2704 = vst [vmem:[#allocation5 + $0x188] sm:$0xc] %v2665_v18 }
 0x3d9   : > { %v6934_v38 = vcombine.high %v6933_v28, %v6933_v28  ;;  %16914 = vst [vmem:[#allocation35_spill] sm:$0xff] %v15329_v50  ;;  %v16917_v57 = vcombine.low %v16915_v8, %v16916_v31  ;;  %v16919_v33 = vcombine.high %v16915_v8, %v16916_v31  ;;  %v7803_v28 = vld [vmem:[#allocation4 + $0xc8] sm:$0xff]  ;;  %v16923_v8 = vld [vmem:[#allocation38_spill] sm:$0xff] }
 0x3da   : > { %12734 = vset.pattern.permute.xlu1 %v16885_v43  ;;  %v15317_v43 = vsub.s32 %v8177_v25, %v16911_v48  ;;  %v2989_v37 = vcombine.low %v2988_v11, %v2988_v11  ;;  %v7280_v40 = vrot.slane %v7209_v1, %v13613_v59  ;;  %12449 = vst.sshfl [vmem:[#allocation5 + $0x1f8] sm:$0xc pattern:$0x76325410] %v7209_v1  ;;  %v13342_v1 = vld [vmem:[#allocation5 + $0x88] sm:$0xff]  ;;  %v7863_v48 = vld [vmem:[#allocation5 + $0x110] sm:$0xff] }
 0x3db   : > { %3642 = vperm.xlu1 %12734, %v14799_v3   ;;  %v2947_v62 = vmul.f32 %v2919_v20, %v14966_v42  ;;  %6966 = vst [vmem:[#allocation5 + $0x1f8] sm:$0xc] %v6934_v38  ;;  %v12870_v25 = vld [vmem:[#allocation5] ss:$8 sps:$4 sm:$0x33]   ;;  %v15339_v34 = vrot.slane %v16917_v57, %v13613_v59  ;;  %v15345_v4 = vrot.slane %v16919_v33, %v13613_v59 }
 0x3dc   : > { %3044 = vst [vmem:[#allocation5 + $0xc0] sm:$0x30] %v2989_v37  ;;  %v7281_v46 = vcombine.low %v7280_v40, %v7280_v40  ;;  %v7811_v20 = vmul.f32 %v13342_v1, %v7803_v28  ;;  %v8090_v37 = vrot.slane %v12870_v25, %v13613_v59  ;;  %v8280_v40 = vrot.slane %v12873_v6, %v13613_v59  ;;  %v7886_v33 = vld [vmem:[#allocation4 + $0x140] sm:$0xff] }
 0x3dd   : > { %16918 = vst [vmem:[#allocation28_spill] sm:$0xff] %v15339_v34  ;;  %16920 = vst [vmem:[#allocation29_spill] sm:$0xff] %v15345_v4  ;;  %v3004_v12 = vrot.slane %v2947_v62, %v13613_v59  ;;  %v3277_v63 = vpop.permute.xlu1 %3276  ;;  %v8943_v31 = vrot.slane %v16923_v8, %v14476_v21  ;;  %v12877_v4 = vld [vmem:[#allocation5 + $0x44] ss:$8 sps:$4 sm:$0x33]  }
 0x3de   : > { %12255 = vst.sshfl [vmem:[#allocation5 + $0x148] sm:$0xc pattern:$0x76325410] %v2947_v62  ;;  %v3285_v15 = vrot.slane %v3277_v63, %v14476_v21  ;;  %7312 = vst [vmem:[#allocation5 + $0x1f0] sm:$0x30] %v7281_v46  ;;  %v8281_v36 = vcombine.high %v8280_v40, %v8280_v40 }
 0x3df   : > { %12736 = vset.pattern.permute.xlu1 %v16886_v30  ;;  %v16922_v30 = vld [vmem:[#allocation37_spill] sm:$0xff]  ;;  %v3005_v52 = vcombine.low %v3004_v12, %v3004_v12  ;;  %v7820_v38 = vld [vmem:[#allocation5 + $0xc8] sm:$0xff]  ;;  %v7802_v46 = vld [vmem:[#allocation4 + $0xc0] sm:$0xff] }
 0x3e0   : > { %4352 = vperm.xlu1 %12736, %v14799_v3   ;;  %v8167_v11 = vrot.slane %v16922_v30, %v14476_v21  ;;  %v3303_v62 = vmul.f32 %v3285_v15, %v14793_v44  ;;  %v7828_v57 = vadd.f32 %v7820_v38, %v7811_v20  ;;  %v7845_v12 = vld [vmem:[#allocation4 + $0x108] sm:$0xff]  ;;  %v13343_v20 = vld [vmem:[#allocation5 + $0x80] sm:$0xff] }
 0x3e1   : > { %3048 = vst [vmem:[#allocation5 + $0x140] sm:$0x30] %v3005_v52  ;;  %v16924_v15 = vld [vmem:[#allocation39_spill] sm:$0xff]  ;;  %v7810_v52 = vmul.f32 %v13343_v20, %v7802_v46 }
 0x3e2   : > { %v3367_v63 = vcombine.low %v3303_v62, %v3303_v62  ;;  %v8555_v1 = vrot.slane %v16924_v15, %v14476_v21  ;;  %7836 = vst [vmem:[#allocation5 + $0xc8] sm:$0xff] %v7828_v57  ;;  %v7853_v38 = vmul.f32 %v7845_v12, %v7828_v57  ;;  %v8225_v62 = vmul.f32 %v8167_v11, %v8090_v37  ;;  %v12879_v12 = vld [vmem:[#allocation5 + $0x4] ss:$8 sps:$4 sm:$0xcc]  }
 0x3e3   : > { %v3599_v28 = vpop.permute.xlu1 %3598  ;;  %v7819_v6 = vld [vmem:[#allocation5 + $0xc0] sm:$0xff]  ;;  %v7887_v40 = vld [vmem:[#allocation4 + $0x148] sm:$0xff] }
 0x3e4   : > { %12739 = vset.pattern.permute.xlu1 %v16851_v60  ;;  %v3607_v56 = vrot.slane %v3599_v28, %v14476_v21  ;;  %v12876_v60 = vld [vmem:[#allocation5 + $0x4] ss:$8 sps:$4 sm:$0x33]   ;;  %v3374_v25 = vrot.slane %v3367_v63, %v13613_v59  ;;  %v7827_v20 = vadd.f32 %v7819_v6, %v7810_v52  ;;  %v7870_v57 = vadd.f32 %v7862_v24, %v7853_v38 }
 0x3e5   : > { %6127 = vperm.xlu1 %12739, %v14799_v3   ;;  %12272 = vst.sshfl [vmem:[#allocation5 + $0x188] sm:$0xc0 pattern:$0x76325410] %v3367_v63  ;;  %v7844_v37 = vld [vmem:[#allocation4 + $0x100] sm:$0xff]  ;;  %v7904_v46 = vld [vmem:[#allocation5 + $0x148] sm:$0xff]  ;;  %v8233_v18 = vadd.f32 %v8225_v62, %v15271_v39  ;;  %v8478_v6 = vrot.slane %v12876_v60, %v13613_v59 }
 0x3e6   : > { %v3655_v28 = vmul.f32 %v3607_v56, %v14804_v51  ;;  %v3375_v63 = vcombine.low %v3374_v25, %v3374_v25  ;;  %7835 = vst [vmem:[#allocation5 + $0xc0] sm:$0xff] %v7827_v20  ;;  %v7852_v24 = vmul.f32 %v7844_v37, %v7827_v20  ;;  %7878 = vst [vmem:[#allocation5 + $0x108] sm:$0xff] %v7870_v57  ;;  %v7861_v38 = vld [vmem:[#allocation5 + $0x100] sm:$0xff]  ;;  %v7929_v11 = vld [vmem:[#allocation4 + $0x188] sm:$0xff] }
 0x3e7   : > { %v3621_v35 = vpop.permute.xlu1 %3620  ;;  %v7895_v56 = vmul.f32 %v7887_v40, %v7870_v57  ;;  %v8423_v25 = vmul.f32 %v8365_v58, %v8281_v36  ;;  %v12882_v37 = vld [vmem:[#allocation5 + $0x10] ss:$8 sps:$4 sm:$0x33]   ;;  %v12885_v40 = vld [vmem:[#allocation5 + $0x10] ss:$8 sps:$4 sm:$0xcc]  }
 0x3e8   : > { %v3698_v52 = vrot.slane %v3655_v28, %v13613_v59  ;;  %12285 = vst.sshfl [vmem:[#allocation5 + $0xd0] sm:$0x3 pattern:$0x76325410] %v3655_v28  ;;  %3413 = vst [vmem:[#allocation5 + $0x180] sm:$0xc0] %v3375_v63  ;;  %v3629_v20 = vrot.slane %v3621_v35, %v14476_v21  ;;  %v7869_v57 = vadd.f32 %v7861_v38, %v7852_v24 }
 0x3e9   : > { %12740 = vset.pattern.permute.xlu1 %v16848_v41  ;;  %v7912_v28 = vadd.f32 %v7904_v46, %v7895_v56  ;;  %v8668_v41 = vrot.slane %v12879_v12, %v13613_v59  ;;  %v16926_v62 = vld [vmem:[#allocation41_spill] sm:$0xff]  ;;  %v7903_v39 = vld [vmem:[#allocation5 + $0x140] sm:$0xff]  ;;  %v8431_v36 = vadd.f32 %v8423_v25, %v8233_v18  ;;  %v9056_v18 = vrot.slane %v12885_v40, %v13613_v59 }
 0x3ea   : > { %5062 = vperm.xlu1 %12740, %v14799_v3   ;;  %v3699_v29 = vcombine.high %v3698_v52, %v3698_v52  ;;  %v8753_v58 = vrot.slane %v16926_v62, %v14476_v21  ;;  %v3657_v35 = vmul.f32 %v3629_v20, %v14966_v42  ;;  %7877 = vst [vmem:[#allocation5 + $0x100] sm:$0xff] %v7869_v57  ;;  %v16927_v52 = vld [vmem:[#allocation42_spill] sm:$0xff] }
 0x3eb   : > { %v7894_v12 = vmul.f32 %v7886_v33, %v7869_v57  ;;  %7920 = vst [vmem:[#allocation5 + $0x148] sm:$0xff] %v7912_v28  ;;  %v7937_v63 = vmul.f32 %v7929_v11, %v7912_v28  ;;  %v9141_v38 = vrot.slane %v16927_v52, %v14476_v21  ;;  %v8613_v33 = vmul.f32 %v8555_v1, %v8478_v6  ;;  %v12977_v27 = vld [vmem:[%s13585_s20 + $0x40] sm:$0xff]  }
 0x3ec   : > { %v7946_v24 = vld [vmem:[#allocation5 + $0x188] sm:$0xff]  ;;  %3755 = vst [vmem:[#allocation5 + $0xd8] sm:$0x3] %v3699_v29  ;;  %v3987_v56 = vpop.permute.xlu1 %3986  ;;  %v3714_v20 = vrot.slane %v3657_v35, %v13613_v59  ;;  %v8669_v29 = vcombine.high %v8668_v41, %v8668_v41  ;;  %v8866_v57 = vrot.slane %v12882_v37, %v13613_v59  ;;  %12521 = vmatprep.subr.bf16.mxu1 %v12977_v27 }
 0x3ed   : > { %12287 = vst.sshfl [vmem:[#allocation5 + $0x150] sm:$0x3 pattern:$0x76325410] %v3657_v35  ;;  %v3995_v60 = vrot.slane %v3987_v56, %v14476_v21  ;;  %v7911_v46 = vadd.f32 %v7903_v39, %v7894_v12  ;;  %v7954_v11 = vadd.f32 %v7946_v24, %v7937_v63  ;;  %v16928_v37 = vld [vmem:[#allocation43_spill] sm:$0xff]  ;;  %v16929_v56 = vld [vmem:[#allocation44_spill] sm:$0xff] }
 0x3ee   : > { %12741 = vset.pattern.permute.xlu1 %v16850_v7  ;;  %v3715_v25 = vcombine.high %v3714_v20, %v3714_v20  ;;  %v9331_v35 = vrot.slane %v16928_v37, %v14476_v21  ;;  %v12891_v20 = vld [vmem:[#allocation5 + $0x14] ss:$8 sps:$4 sm:$0xcc]   ;;  %v9719_v1 = vrot.slane %v16929_v56, %v14476_v21 }
 0x3ef   : > { %5772 = vperm.xlu1 %12741, %v14799_v3   ;;  %v4013_v28 = vmul.f32 %v3995_v60, %v14793_v44  ;;  %7919 = vst [vmem:[#allocation5 + $0x140] sm:$0xff] %v7911_v46  ;;  %v7936_v6 = vmul.f32 %v7928_v26, %v7911_v46  ;;  %v7945_v41 = vld [vmem:[#allocation5 + $0x180] sm:$0xff]  ;;  %7962 = vst [vmem:[#allocation5 + $0x188] sm:$0xff] %v7954_v11  ;;  %v8621_v60 = vadd.f32 %v8613_v33, %v8431_v36  ;;  %v13344_v7 = vld [vmem:[#allocation5 + $0x98] sm:$0xff] }
 0x3f0   : > { %3759 = vst [vmem:[#allocation5 + $0x158] sm:$0x3] %v3715_v25  ;;  %v8811_v11 = vmul.f32 %v8753_v58, %v8669_v29  ;;  %v9001_v36 = vmul.f32 %v8943_v31, %v8866_v57  ;;  %v9057_v33 = vcombine.high %v9056_v18, %v9056_v18  ;;  %v12888_v25 = vld [vmem:[#allocation5 + $0x14] ss:$8 sps:$4 sm:$0x33]  }
 0x3f1   : > { %v4077_v12 = vcombine.low %v4013_v28, %v4013_v28  ;;  %v7953_v26 = vadd.f32 %v7945_v41, %v7936_v6  ;;  %v16930_v29 = vld [vmem:[#allocation45_spill] sm:$0xff]  ;;  %v16934_v6 = vmov 25  }
 0x3f2   : > { %v4309_v63 = vpop.permute.xlu1 %4308  ;;  %v8819_v18 = vadd.f32 %v8811_v11, %v8621_v60  ;;  %v9199_v24 = vmul.f32 %v9141_v38, %v9057_v33  ;;  %v9444_v60 = vrot.slane %v12891_v20, %v13613_v59  ;;  %v16931_v11 = vld [vmem:[#allocation46_spill] sm:$0xff]  ;;  %v16932_v20 = vld [vmem:[#allocation47_spill] sm:$0xff]  ;;  %v9254_v33 = vrot.slane %v12888_v25, %v13613_v59 }
 0x3f3   : > { %v4317_v46 = vrot.slane %v4309_v63, %v14476_v21  ;;  %12743 = vset.pattern.permute.xlu1 %v16856_v10  ;;  %v4084_v28 = vrot.slane %v4077_v12, %v13613_v59  ;;  %12304 = vst.sshfl [vmem:[#allocation5 + $0x190] sm:$0x30 pattern:$0x76325410] %v4077_v12  ;;  %7961 = vst [vmem:[#allocation5 + $0x180] sm:$0xff] %v7953_v26 }
 0x3f4   : > { %7547 = vperm.xlu1 %12743, %v14799_v3   ;;  %v9009_v31 = vadd.f32 %v9001_v36, %v8819_v18  ;;  %v9445_v40 = vcombine.high %v9444_v60, %v9444_v60  ;;  %v16935_v36 = vld [vmem:[#allocation49_spill] sm:$0xff]  ;;  %v12897_v60 = vld [vmem:[#allocation5 + $0x20] ss:$8 sps:$4 sm:$0xcc]  }
 0x3f5   : > { %v4365_v58 = vmul.f32 %v4317_v46, %v14804_v51  ;;  %v4085_v41 = vcombine.high %v4084_v28, %v4084_v28  ;;  %v16933_v46 = vld [vmem:[#allocation48_spill] sm:$0xff] }
 0x3f6   : > { %v4331_v12 = vpop.permute.xlu1 %4330  ;;  %v9207_v25 = vadd.f32 %v9199_v24, %v9009_v31  ;;  %v9389_v31 = vmul.f32 %v9331_v35, %v9254_v33  ;;  %v9587_v35 = vmul.f32 %v9529_v17, %v9445_v40  ;;  %v7804_v33 = vld [vmem:[#allocation4 + $0xd0] sm:$0xff]  ;;  %v9832_v40 = vrot.slane %v12897_v60, %v13613_v59  ;;  %v16938_v60 = vld [vmem:[#allocation51_spill] sm:$0xff] }
 0x3f7   : > { %v4408_v10 = vrot.slane %v4365_v58, %v13613_v59  ;;  %12317 = vst.sshfl [vmem:[#allocation5 + $0xd8] sm:$0xc pattern:$0x76325410] %v4365_v58  ;;  %v4339_v26 = vrot.slane %v4331_v12, %v14476_v21  ;;  %4124 = vst [vmem:[#allocation5 + $0x198] sm:$0xc] %v4085_v41  ;;  %v16957_v27 = vrot.slane %v16938_v60, %v14476_v21 }
 0x3f8   : > { %12744 = vset.pattern.permute.xlu1 %v16860_v23  ;;  %v12894_v41 = vld [vmem:[#allocation5 + $0x20] ss:$8 sps:$4 sm:$0x33]   ;;  %v7805_v12 = vld [vmem:[#allocation4 + $0xd8] sm:$0xff] }
 0x3f9   : > { %v4409_v63 = vcombine.low %v4408_v10, %v4408_v10  ;;  %v4367_v58 = vmul.f32 %v4339_v26, %v14966_v42  ;;  %6482 = vperm.xlu1 %12744, %v14799_v3   ;;  %v7847_v3 = vld [vmem:[#allocation4 + $0x118] sm:$0xff]  ;;  %v12911_v50 = vld [vmem:[#allocation5 + $0x140] ss:$8 sps:$4 sm:$0xcc]  }
 0x3fb   : > { %4464 = vst [vmem:[#allocation5 + $0xd0] sm:$0x30] %v4409_v63  ;;  %v4424_v26 = vrot.slane %v4367_v58, %v13613_v59  ;;  %12319 = vst.sshfl [vmem:[#allocation5 + $0x158] sm:$0xc pattern:$0x76325410] %v4367_v58  ;;  %v4697_v38 = vpop.permute.xlu1 %4696  ;;  %v7813_v63 = vmul.f32 %v13344_v7, %v7805_v12  ;;  %v9397_v58 = vadd.f32 %v9389_v31, %v9207_v25 }
 0x3fc   : > { %v4705_v39 = vrot.slane %v4697_v38, %v14476_v21  ;;  %v16936_v7 = vld [vmem:[#allocation50_spill] sm:$0xff] }
 0x3fd   : > { %v4425_v18 = vcombine.low %v4424_v26, %v4424_v26  ;;  %12745 = vset.pattern.permute.xlu1 %v16934_v6  ;;  %v13345_v6 = vld [vmem:[#allocation5 + $0x90] sm:$0xff]  ;;  %v15531_v31 = vld [vmem:[#allocation5 + $0x24] ss:$8 sps:$4 sm:$0x33]   ;;  %v9595_v24 = vadd.f32 %v9587_v35, %v9397_v58  ;;  %v9833_v35 = vcombine.high %v9832_v40, %v9832_v40 }
 0x3fe   : > { %v7822_v38 = vld [vmem:[#allocation5 + $0xd8] sm:$0xff]  ;;  %v4723_v10 = vmul.f32 %v4705_v39, %v14793_v44  ;;  %9909 = vperm.xlu1 %12745, %v16884_v0   ;;  %v9642_v39 = vrot.slane %v12894_v41, %v13613_v59  ;;  %v7812_v14 = vmul.f32 %v13345_v6, %v7804_v33  ;;  %16937 = vst [vmem:[#allocation30_spill] sm:$0xff] %v15531_v31  ;;  %v12871_v25 = vld [vmem:[#allocation5 + $0x40] ss:$8 sps:$4 sm:$0x33]  }
 0x3ff   : > { %v7830_v26 = vadd.f32 %v7822_v38, %v7813_v63  ;;  %4468 = vst [vmem:[#allocation5 + $0x150] sm:$0x30] %v4425_v18  ;;  %v7846_v38 = vld [vmem:[#allocation4 + $0x110] sm:$0xff]  ;;  %v8098_v40 = vrot.slane %v12871_v25, %v13613_v59  ;;  %v12875_v25 = vld [vmem:[#allocation5 + $0x80] ss:$8 sps:$4 sm:$0xcc]  }
 0x400   : > { %v4787_v23 = vcombine.low %v4723_v10, %v4723_v10  ;;  %v5374_v28 = vpop.permute.xlu1 %5373  ;;  %v7864_v10 = vld [vmem:[#allocation5 + $0x118] sm:$0xff] }
 0x401   : > { %7838 = vst [vmem:[#allocation5 + $0xd8] sm:$0xff] %v7830_v26  ;;  %v7855_v12 = vmul.f32 %v7847_v3, %v7830_v26  ;;  %v5382_v18 = vrot.slane %v5374_v28, %v14476_v21  ;;  %v7889_v26 = vld [vmem:[#allocation4 + $0x158] sm:$0xff] }
 0x402   : > { %v7821_v41 = vld [vmem:[#allocation5 + $0xd0] sm:$0xff]  ;;  %v4794_v63 = vrot.slane %v4787_v23, %v13613_v59  ;;  %12336 = vst.sshfl [vmem:[#allocation5 + $0x198] sm:$0xc0 pattern:$0x76325410] %v4787_v23  ;;  %12748 = vset.pattern.permute.xlu1 %v13452_v53  ;;  %v9777_v53 = vmul.f32 %v9719_v1, %v9642_v39  ;;  %v7906_v57 = vld [vmem:[#allocation5 + $0x158] sm:$0xff] }
 0x403   : > { %v7829_v28 = vadd.f32 %v7821_v41, %v7812_v14  ;;  %v7872_v6 = vadd.f32 %v7864_v10, %v7855_v12  ;;  %v5430_v33 = vmul.f32 %v5382_v18, %v14804_v51  ;;  %10099 = vperm.xlu1 %12748, %v16884_v0   ;;  %v12874_v23 = vld [vmem:[#allocation5 + $0x40] ss:$8 sps:$4 sm:$0xcc]   ;;  %v15547_v39 = vld [vmem:[#allocation5 + $0x80] ss:$8 sps:$4 sm:$0x33]  }
 0x404   : > { %v4795_v3 = vcombine.low %v4794_v63, %v4794_v63  ;;  %v9785_v58 = vadd.f32 %v9777_v53, %v9595_v24  ;;  %v16940_v24 = vrot.slane %v16930_v29, %v14476_v21  ;;  %v12906_v14 = vld [vmem:[#allocation5 + $0x100] ss:$8 sps:$4 sm:$0x33]   ;;  %v15647_v31 = vld [vmem:[#allocation5 + $0x50] ss:$8 sps:$4 sm:$0x33]  }
 0x405   : > { %7837 = vst [vmem:[#allocation5 + $0xd0] sm:$0xff] %v7829_v28  ;;  %v7854_v12 = vmul.f32 %v7846_v38, %v7829_v28  ;;  %7880 = vst [vmem:[#allocation5 + $0x118] sm:$0xff] %v7872_v6  ;;  %v7897_v18 = vmul.f32 %v7889_v26, %v7872_v6  ;;  %v5470_v41 = vcombine.low %v5430_v33, %v5430_v33  ;;  %v6084_v10 = vpop.permute.xlu1 %6083  ;;  %v7888_v38 = vld [vmem:[#allocation4 + $0x150] sm:$0xff]  ;;  %v7931_v26 = vld [vmem:[#allocation4 + $0x198] sm:$0xff] }
 0x406   : > { %4833 = vst [vmem:[#allocation5 + $0x190] sm:$0xc0] %v4795_v3  ;;  %v6092_v1 = vrot.slane %v6084_v10, %v14476_v21  ;;  %v8289_v3 = vrot.slane %v12874_v23, %v13613_v59  ;;  %v9975_v23 = vmul.f32 %v16940_v24, %v9833_v35  ;;  %v7905_v53 = vld [vmem:[#allocation5 + $0x150] sm:$0xff]  ;;  %v16941_v35 = vrot.slane %v16922_v30, %v15314_v13 }
 0x407   : > { %v7871_v28 = vadd.f32 %v7863_v48, %v7854_v12  ;;  %v7914_v6 = vadd.f32 %v7906_v57, %v7897_v18  ;;  %v5477_v33 = vrot.slane %v5470_v41, %v13613_v59  ;;  %12365 = vst.sshfl [vmem:[#allocation5 + $0xe0] sm:$0x30 pattern:$0x76325410] %v5470_v41  ;;  %12749 = vset.pattern.permute.xlu1 %v13453_v45  ;;  %v16939_v18 = vld [vmem:[#allocation52_spill] sm:$0xff] }
 0x408   : > { %v6140_v10 = vmul.f32 %v6092_v1, %v14804_v51  ;;  %10294 = vperm.xlu1 %12749, %v13869_v2   ;;  %v8106_v41 = vrot.slane %v15547_v39, %v13613_v59  ;;  %v7930_v24 = vld [vmem:[#allocation4 + $0x190] sm:$0xff]  ;;  %v8122_v39 = vrot.slane %v12906_v14, %v13613_v59  ;;  %v16945_v14 = vrot.slane %v16922_v30, %v15317_v43 }
 0x409   : > { %7879 = vst [vmem:[#allocation5 + $0x110] sm:$0xff] %v7871_v28  ;;  %v7896_v63 = vmul.f32 %v7888_v38, %v7871_v28  ;;  %7922 = vst [vmem:[#allocation5 + $0x158] sm:$0xff] %v7914_v6  ;;  %v7939_v48 = vmul.f32 %v7931_v26, %v7914_v6  ;;  %v7948_v57 = vld [vmem:[#allocation5 + $0x198] sm:$0xff]  ;;  %v5478_v12 = vcombine.high %v5477_v33, %v5477_v33 }
 0x40a   : > { %v6180_v1 = vcombine.low %v6140_v10, %v6140_v10  ;;  %v5019_v17 = vpop.permute.xlu1 %5018  ;;  %v12903_v38 = vld [vmem:[#allocation5 + $0x30] ss:$8 sps:$4 sm:$0xcc]   ;;  %v8226_v10 = vmul.f32 %v16941_v35, %v8098_v40  ;;  %v8298_v40 = vrot.slane %v12875_v25, %v13613_v59  ;;  %v15579_v35 = vadd.f32 %v9975_v23, %v9785_v58  ;;  %v15591_v25 = vld [vmem:[#allocation5 + $0x84] ss:$8 sps:$4 sm:$0x33]  }
 0x40b   : > { %v7913_v6 = vadd.f32 %v7905_v53, %v7896_v63  ;;  %v7956_v26 = vadd.f32 %v7948_v57, %v7939_v48  ;;  %5538 = vst [vmem:[#allocation5 + $0xe8] sm:$0xc] %v5478_v12  ;;  %v5027_v33 = vrot.slane %v5019_v17, %v14476_v21  ;;  %v13460_v63 = vmov 28   ;;  %v12910_v48 = vld [vmem:[#allocation5 + $0x100] ss:$8 sps:$4 sm:$0xcc]  }
 0x40c   : > { %v6187_v28 = vrot.slane %v6180_v1, %v13613_v59  ;;  %12397 = vst.sshfl [vmem:[#allocation5 + $0xe8] sm:$0xc0 pattern:$0x76325410] %v6180_v1  ;;  %12751 = vset.pattern.permute.xlu1 %v13460_v63  ;;  %v8290_v57 = vcombine.high %v8289_v3, %v8289_v3  ;;  %16942 = vst [vmem:[#allocation31_spill] sm:$0xff] %v15579_v35  ;;  %v8316_v1 = vrot.slane %v12910_v48, %v13613_v59  ;;  %v16943_v63 = vld [vmem:[#allocation53_spill] sm:$0xff] }
 0x40d   : > { %7921 = vst [vmem:[#allocation5 + $0x150] sm:$0xff] %v7913_v6  ;;  %v7938_v17 = vmul.f32 %v7930_v24, %v7913_v6  ;;  %v7947_v12 = vld [vmem:[#allocation5 + $0x190] sm:$0xff]  ;;  %7964 = vst [vmem:[#allocation5 + $0x198] sm:$0xff] %v7956_v26  ;;  %v5075_v53 = vmul.f32 %v5027_v33, %v14804_v51  ;;  %10484 = vperm.xlu1 %12751, %v13869_v2   ;;  %v15585_v6 = vrot.slane %v12903_v38, %v13613_v59 }
 0x40e   : > { %v6188_v45 = vcombine.low %v6187_v28, %v6187_v28  ;;  %v8227_v58 = vmul.f32 %v16945_v14, %v8106_v41  ;;  %v16946_v28 = vrot.slane %v16935_v36, %v14476_v21  ;;  %v8317_v38 = vcombine.high %v8316_v1, %v8316_v1  ;;  %v12880_v41 = vld [vmem:[#allocation5 + $0x44] ss:$8 sps:$4 sm:$0xcc]  }
 0x40f   : > { %16944 = vst [vmem:[#allocation13_spill] sm:$0xff] %v15585_v6  ;;  %v7955_v26 = vadd.f32 %v7947_v12, %v7938_v17  ;;  %v5118_v33 = vrot.slane %v5075_v53, %v13613_v59  ;;  %12349 = vst.sshfl [vmem:[#allocation5 + $0xe0] sm:$0x3 pattern:$0x76325410] %v5075_v53  ;;  %v5396_v24 = vpop.permute.xlu1 %5395  ;;  %v8234_v12 = vadd.f32 %v8226_v10, %v15276_v16  ;;  %v16948_v17 = vld [vmem:[#allocation54_spill] sm:$0xff] }
 0x410   : > { %6247 = vst [vmem:[#allocation5 + $0xe0] sm:$0xc0] %v6188_v45  ;;  %v5404_v23 = vrot.slane %v5396_v24, %v14476_v21  ;;  %v8229_v48 = vmul.f32 %v16946_v28, %v8122_v39  ;;  %v16947_v53 = vrot.slane %v16921_v61, %v15314_v13  ;;  %v12881_v14 = vld [vmem:[#allocation5 + $0x84] ss:$8 sps:$4 sm:$0xcc]   ;;  %v8299_v28 = vcombine.high %v8298_v40, %v8298_v40 }
 0x411   : > { %7963 = vst [vmem:[#allocation5 + $0x190] sm:$0xff] %v7955_v26  ;;  %v5119_v45 = vcombine.high %v5118_v33, %v5118_v33  ;;  %10487 = vperm.xlu1 %12751, %v16884_v0   ;;  %v12914_v24 = vld [vmem:[#allocation5 + $0x104] ss:$8 sps:$4 sm:$0x33]   ;;  %v8486_v33 = vrot.slane %v12877_v4, %v13613_v59  ;;  %v8235_v1 = vadd.f32 %v8227_v58, %v15280_v19 }
 0x412   : > { %v8424_v3 = vmul.f32 %v16947_v53, %v8290_v57  ;;  %v5432_v16 = vmul.f32 %v5404_v23, %v14966_v42  ;;  %v12918_v10 = vld [vmem:[#allocation5 + $0x104] ss:$8 sps:$4 sm:$0xcc]   ;;  %v15616_v39 = vld [vmem:[#allocation5 + $0x140] ss:$8 sps:$4 sm:$0x33]   ;;  %v8237_v23 = vadd.f32 %v8229_v48, %v15304_v32  ;;  %v16949_v57 = vrot.slane %v16936_v7, %v14476_v21 }
 0x413   : > { %5175 = vst [vmem:[#allocation5 + $0xe8] sm:$0x3] %v5119_v45  ;;  %v8494_v4 = vrot.slane %v15591_v25, %v13613_v59  ;;  %v7806_v26 = vld [vmem:[#allocation4 + $0xe0] sm:$0xff]  ;;  %v16950_v53 = vmov 29   ;;  %v8510_v19 = vrot.slane %v12914_v24, %v13613_v59  ;;  %v16951_v32 = vrot.slane %v16921_v61, %v15317_v43  ;;  %v7807_v48 = vld [vmem:[#allocation4 + $0xe8] sm:$0xff] }
 0x414   : > { %v5488_v40 = vcombine.low %v5432_v16, %v5432_v16  ;;  %v6794_v34 = vpop.permute.xlu1 %6793  ;;  %v8427_v47 = vmul.f32 %v16949_v57, %v8317_v38  ;;  %v15623_v54 = vadd.f32 %v8424_v3, %v8234_v12  ;;  %v13346_v16 = vld [vmem:[#allocation5 + $0xa0] sm:$0xff]  ;;  %v12922_v25 = vld [vmem:[#allocation5 + $0x110] ss:$8 sps:$4 sm:$0x33]   ;;  %v16952_v12 = vrot.slane %v16924_v15, %v15314_v13 }
 0x415   : > { %v6802_v45 = vrot.slane %v6794_v34, %v14476_v21  ;;  %12753 = vset.pattern.permute.xlu1 %v16950_v53  ;;  %v8425_v58 = vmul.f32 %v16951_v32, %v8299_v28  ;;  %v7814_v38 = vmul.f32 %v13346_v16, %v7806_v26  ;;  %v8704_v34 = vrot.slane %v12918_v10, %v13613_v59  ;;  %v13347_v32 = vld [vmem:[#allocation5 + $0xa8] sm:$0xff]  ;;  %v7848_v6 = vld [vmem:[#allocation4 + $0x120] sm:$0xff] }
 0x416   : > { %v5495_v3 = vrot.slane %v5488_v40, %v13613_v59  ;;  %12367 = vst.sshfl [vmem:[#allocation5 + $0x160] sm:$0x30 pattern:$0x76325410] %v5488_v40  ;;  %10685 = vperm.xlu1 %12753, %v16884_v0   ;;  %v8614_v24 = vmul.f32 %v16952_v12, %v8486_v33  ;;  %v15640_v57 = vrot.slane %v12880_v41, %v13613_v59  ;;  %v7865_v61 = vld [vmem:[#allocation5 + $0x120] sm:$0xff] }
 0x417   : > { %v15643_v28 = vrot.slane %v12881_v14, %v13613_v59  ;;  %v7823_v26 = vld [vmem:[#allocation5 + $0xe0] sm:$0xff]  ;;  %v6850_v53 = vmul.f32 %v6802_v45, %v14804_v51  ;;  %v7815_v40 = vmul.f32 %v13347_v32, %v7807_v48  ;;  %v8435_v10 = vadd.f32 %v8427_v47, %v8237_v23 }
 0x418   : > { %v7831_v16 = vadd.f32 %v7823_v26, %v7814_v38  ;;  %v5496_v35 = vcombine.high %v5495_v3, %v5495_v3  ;;  %v8130_v41 = vrot.slane %v15616_v39, %v13613_v59  ;;  %v8325_v14 = vrot.slane %v12911_v50, %v13613_v59 }
 0x419   : > { %v6890_v33 = vcombine.low %v6850_v53, %v6850_v53  ;;  %v7504_v12 = vpop.permute.xlu1 %7503  ;;  %v16953_v45 = vrot.slane %v16931_v11, %v14476_v21  ;;  %v16954_v23 = vmov 30   ;;  %v8705_v3 = vcombine.high %v8704_v34, %v8704_v34 }
 0x41a   : > { %v7824_v48 = vld [vmem:[#allocation5 + $0xe8] sm:$0xff]  ;;  %7839 = vst [vmem:[#allocation5 + $0xe0] sm:$0xff] %v7831_v16  ;;  %v7856_v38 = vmul.f32 %v7848_v6, %v7831_v16  ;;  %5542 = vst [vmem:[#allocation5 + $0x168] sm:$0xc] %v5496_v35  ;;  %v7512_v47 = vrot.slane %v7504_v12, %v14476_v21  ;;  %12754 = vset.pattern.permute.xlu1 %v16954_v23  ;;  %v8898_v26 = vrot.slane %v12922_v25, %v13613_v59 }
 0x41b   : > { %v8617_v55 = vmul.f32 %v16953_v45, %v8510_v19  ;;  %v8433_v53 = vadd.f32 %v8425_v58, %v8235_v1  ;;  %v16955_v39 = vrot.slane %v16924_v15, %v15317_v43  ;;  %v7832_v32 = vadd.f32 %v7824_v48, %v7815_v40  ;;  %12429 = vst.sshfl [vmem:[#allocation5 + $0xf0] sm:$0x30 pattern:$0x76325410] %v6890_v33  ;;  %v7849_v6 = vld [vmem:[#allocation4 + $0x128] sm:$0xff] }
 0x41c   : > { %v6897_v30 = vrot.slane %v6890_v33, %v13613_v59  ;;  %10872 = vperm.xlu1 %12754, %v13869_v2   ;;  %v8678_v35 = vcombine.high %v15640_v57, %v15640_v57  ;;  %v15665_v19 = vadd.f32 %v7865_v61, %v7856_v38  ;;  %v7560_v34 = vmul.f32 %v7512_v47, %v14804_v51  ;;  %v7866_v1 = vld [vmem:[#allocation5 + $0x128] sm:$0xff]  ;;  %v12926_v25 = vld [vmem:[#allocation5 + $0x110] ss:$8 sps:$4 sm:$0xcc]  }
 0x41d   : > { %v8615_v50 = vmul.f32 %v16955_v39, %v8494_v4  ;;  %v8625_v58 = vadd.f32 %v8617_v55, %v8435_v10  ;;  %v8687_v4 = vcombine.high %v15643_v28, %v15643_v28  ;;  %7840 = vst [vmem:[#allocation5 + $0xe8] sm:$0xff] %v7832_v32  ;;  %v7857_v40 = vmul.f32 %v7849_v6, %v7832_v32  ;;  %v15673_v57 = vld [vmem:[#allocation5 + $0x144] ss:$8 sps:$4 sm:$0x33]  }
 0x41e   : > { %v6898_v16 = vcombine.high %v6897_v30, %v6897_v30  ;;  %v16956_v33 = vrot.slane %v16935_v36, %v15314_v13  ;;  %v12982_v61 = vld [vmem:[%s13585_s20] sm:$0xff]   ;;  %7881 = vst [vmem:[#allocation5 + $0x120] sm:$0xff] %v15665_v19  ;;  %v7600_v45 = vcombine.low %v7560_v34, %v7560_v34  ;;  %v5751_v55 = vpop.permute.xlu1 %5750  ;;  %v8326_v10 = vcombine.high %v8325_v14, %v8325_v14  ;;  %v12930_v14 = vld [vmem:[#allocation5 + $0x114] ss:$8 sps:$4 sm:$0x33]   ;;  %v12983_v32 = vld [vmem:[%s13585_s20 + $0x48] sm:$0xff]  }
 0x41f   : > { %v8815_v28 = vmul.f32 %v16957_v27, %v8705_v3  ;;  %v16958_v30 = vrot.slane %v16939_v18, %v14476_v21  ;;  %v8622_v38 = vadd.f32 %v8614_v24, %v15623_v54  ;;  %v5759_v47 = vrot.slane %v5751_v55, %v14476_v21  ;;  %12522 = vmatpush3.bf16.msra.mxu1 %v12982_v61 }
 0x420   : > { %v8230_v12 = vmul.f32 %v16956_v33, %v8130_v41  ;;  %v8874_v41 = vrot.slane %v15647_v31, %v13613_v59  ;;  %6958 = vst [vmem:[#allocation5 + $0xf8] sm:$0xc] %v6898_v16  ;;  %v15687_v23 = vadd.f32 %v7866_v1, %v7857_v40  ;;  %v16959_v39 = vmov 31   ;;  %v12886_v16 = vld [vmem:[#allocation5 + $0x50] ss:$8 sps:$4 sm:$0xcc]   ;;  %12523 = vmatprep.subr.bf16.mxu1 %v12983_v32 }
 0x421   : > { %v9005_v48 = vmul.f32 %v16958_v30, %v8898_v26  ;;  %12756 = vset.pattern.permute.xlu1 %v16959_v39  ;;  %v8623_v6 = vadd.f32 %v8615_v50, %v8433_v53  ;;  %v7607_v3 = vrot.slane %v7600_v45, %v13613_v59  ;;  %12461 = vst.sshfl [vmem:[#allocation5 + $0xf8] sm:$0xc0 pattern:$0x76325410] %v7600_v45  ;;  %v12984_v30 = vld [vmem:[%s13585_s20 + $0x8] sm:$0xff]  }
 0x422   : > { %11070 = vperm.xlu1 %12756, %v13869_v2   ;;  %v12919_v26 = vld [vmem:[#allocation5 + $0x144] ss:$8 sps:$4 sm:$0xcc]   ;;  %v8823_v54 = vadd.f32 %v8815_v28, %v8625_v58  ;;  %v9092_v24 = vrot.slane %v12926_v25, %v13613_v59  ;;  %v16960_v31 = vrot.slane %v16926_v62, %v15314_v13  ;;  %v16961_v1 = vrot.slane %v16926_v62, %v15317_v43  ;;  %v15703_v2 = vld [vmem:[#allocation5 + $0x90] ss:$8 sps:$4 sm:$0x33]  }
 0x423   : > { %v5787_v53 = vmul.f32 %v5759_v47, %v14966_v42  ;;  %7882 = vst [vmem:[#allocation5 + $0x128] sm:$0xff] %v15687_v23  ;;  %v8238_v50 = vadd.f32 %v8230_v12, %v15311_v9  ;;  %v7608_v58 = vcombine.low %v7607_v3, %v7607_v3  ;;  %v16962_v25 = vrot.slane %v16936_v7, %v15314_v13  ;;  %v15708_v33 = vld [vmem:[#allocation5 + $0x150] ss:$8 sps:$4 sm:$0x33]   ;;  %v6439_v12 = vpop.permute.xlu1 %6438 }
 0x424   : > { %v8812_v34 = vmul.f32 %v16960_v31, %v8678_v35  ;;  %v8813_v40 = vmul.f32 %v16961_v1, %v8687_v4  ;;  %v9013_v45 = vadd.f32 %v9005_v48, %v8823_v54  ;;  %v9093_v4 = vcombine.high %v9092_v24, %v9092_v24  ;;  %v12927_v39 = vld [vmem:[#allocation5 + $0x150] ss:$8 sps:$4 sm:$0xcc]   ;;  %12524 = vmatpush3.bf16.msra.mxu1 %v12984_v30 }
 0x425   : > { %v8428_v35 = vmul.f32 %v16962_v25, %v8326_v10  ;;  %v16963_v55 = vrot.slane %v16923_v8, %v15314_v13  ;;  %v5844_v9 = vrot.slane %v5787_v53, %v13613_v59  ;;  %12383 = vst.sshfl [vmem:[#allocation5 + $0x168] sm:$0xc pattern:$0x76325410] %v5787_v53  ;;  %v8518_v61 = vrot.slane %v15673_v57, %v13613_v59  ;;  %v12990_v3 = vld [vmem:[%s13585_s20 + $0x50] sm:$0xff]  }
 0x426   : > { %v9286_v28 = vrot.slane %v12930_v14, %v13613_v59  ;;  %v12934_v10 = vld [vmem:[#allocation5 + $0x114] ss:$8 sps:$4 sm:$0xcc]   ;;  %v9571_v48 = vrot.slane %v16948_v17, %v15317_v43  ;;  %7667 = vst [vmem:[#allocation5 + $0xf0] sm:$0xc0] %v7608_v58  ;;  %v6447_v47 = vrot.slane %v6439_v12, %v14476_v21  ;;  %11073 = vperm.xlu1 %12756, %v16884_v0  }
 0x427   : > { %v9002_v27 = vmul.f32 %v16963_v55, %v8874_v41  ;;  %v8713_v41 = vrot.slane %v12919_v26, %v13613_v59  ;;  %v16964_v32 = vrot.slane %v16932_v20, %v14476_v21  ;;  %v8820_v14 = vadd.f32 %v8812_v34, %v8622_v38  ;;  %12525 = vmatprep.subr.bf16.mxu1 %v12990_v3  ;;  %v12991_v58 = vld [vmem:[%s13585_s20 + $0x10] sm:$0xff]   ;;  %v15738_v38 = vld [vmem:[#allocation5 + $0x180] ss:$8 sps:$4 sm:$0x33]  }
 0x428   : > { %v15727_v54 = vadd.f32 %v8813_v40, %v8623_v6  ;;  %v15730_v24 = vrot.slane %v12886_v16, %v13613_v59  ;;  %v5845_v31 = vcombine.low %v5844_v9, %v5844_v9  ;;  %v8882_v0 = vrot.slane %v15703_v2, %v13613_v59  ;;  %12526 = vmatpush3.bf16.msra.mxu1 %v12991_v58 }
 0x429   : > { %v9203_v57 = vmul.f32 %v16964_v32, %v9093_v4  ;;  %v6495_v26 = vmul.f32 %v6447_v47, %v14804_v51  ;;  %v8436_v1 = vadd.f32 %v8428_v35, %v8238_v50  ;;  %v15736_v25 = vadd.f32 %v9002_v27, %v8820_v14  ;;  %v12996_v51 = vld [vmem:[%s13585_s20 + $0x58] sm:$0xff]   ;;  %v7891_v50 = vld [vmem:[#allocation4 + $0x168] sm:$0xff] }
 0x42a   : > { %5888 = vst [vmem:[#allocation5 + $0x160] sm:$0x30] %v5845_v31  ;;  %v16965_v6 = vrot.slane %v16931_v11, %v15314_v13  ;;  %v16966_v40 = vrot.slane %v16943_v63, %v14476_v21  ;;  %v9480_v2 = vrot.slane %v12934_v10, %v13613_v59  ;;  %v8714_v4 = vcombine.high %v8713_v41, %v8713_v41  ;;  %v12938_v9 = vld [vmem:[#allocation5 + $0x120] ss:$8 sps:$4 sm:$0x33]  }
 0x42b   : > { %v9211_v53 = vadd.f32 %v9203_v57, %v9013_v45  ;;  %v6538_v35 = vrot.slane %v6495_v26, %v13613_v59  ;;  %12413 = vst.sshfl [vmem:[#allocation5 + $0xf0] sm:$0x3 pattern:$0x76325410] %v6495_v26  ;;  %v5407_v45 = vpop.permute.xlu1 %5406  ;;  %v8906_v55 = vrot.slane %v15708_v33, %v13613_v59  ;;  %v9101_v27 = vrot.slane %v12927_v39, %v13613_v59  ;;  %v12997_v47 = vld [vmem:[%s13585_s20 + $0x18] sm:$0xff]  }
 0x42c   : > { %v8618_v34 = vmul.f32 %v16965_v6, %v8518_v61  ;;  %v9393_v16 = vmul.f32 %v16966_v40, %v9286_v28  ;;  %v7899_v12 = vmul.f32 %v7891_v50, %v15687_v23  ;;  %v5415_v61 = vrot.slane %v5407_v45, %v14476_v21  ;;  %v12912_v28 = vld [vmem:[#allocation5 + $0x180] ss:$8 sps:$4 sm:$0xcc]   ;;  %v12887_v57 = vld [vmem:[#allocation5 + $0x90] ss:$8 sps:$4 sm:$0xcc]   ;;  %12527 = vmatprep.subr.bf16.mxu1 %v12996_v51 }
 0x42d   : > { %v9481_v30 = vcombine.high %v9480_v2, %v9480_v2  ;;  %v9066_v32 = vcombine.high %v15730_v24, %v15730_v24  ;;  %v7890_v41 = vld [vmem:[#allocation4 + $0x160] sm:$0xff]  ;;  %v7908_v3 = vld [vmem:[#allocation5 + $0x168] sm:$0xff]  ;;  %v6539_v33 = vcombine.high %v6538_v35, %v6538_v35  ;;  %v9674_v39 = vrot.slane %v12938_v9, %v13613_v59  ;;  %v7808_v6 = vld [vmem:[#allocation4 + $0xf0] sm:$0xff]  ;;  %12528 = vmatpush3.bf16.msra.mxu1 %v12997_v47 }
 0x42e   : > { %v9401_v10 = vadd.f32 %v9393_v16, %v9211_v53  ;;  %v8626_v14 = vadd.f32 %v8618_v34, %v8436_v1  ;;  %v15758_v23 = vadd.f32 %v7908_v3, %v7899_v12  ;;  %v5433_v31 = vmul.f32 %v5415_v61, %v14793_v44  ;;  %v13006_v50 = vld [vmem:[%s13585_s20 + $0x60] sm:$0xff]   ;;  %v15776_v35 = vld [vmem:[#allocation5 + $0x54] ss:$8 sps:$4 sm:$0x33]  }
 0x42f   : > { %v8138_v26 = vrot.slane %v15738_v38, %v13613_v59  ;;  %v16967_v53 = vrot.slane %v16948_v17, %v14476_v21  ;;  %6595 = vst [vmem:[#allocation5 + $0xf8] sm:$0x3] %v6539_v33  ;;  %v16968_v1 = vrot.slane %v16938_v60, %v15314_v13  ;;  %v16969_v40 = vrot.slane %v16939_v18, %v15314_v13  ;;  %v6117_v12 = vpop.permute.xlu1 %6116  ;;  %v15781_v61 = vld [vmem:[#allocation5 + $0x154] ss:$8 sps:$4 sm:$0x33]  }
 0x430   : > { %v9102_v2 = vcombine.high %v9101_v27, %v9101_v27  ;;  %v16970_v51 = vrot.slane %v16933_v46, %v14476_v21  ;;  %v7898_v45 = vmul.f32 %v7890_v41, %v15665_v19  ;;  %7924 = vst [vmem:[#allocation5 + $0x168] sm:$0xff] %v15758_v23  ;;  %v5497_v9 = vcombine.low %v5433_v31, %v5433_v31 }
 0x431   : > { %v9591_v58 = vmul.f32 %v16967_v53, %v9481_v30  ;;  %v8816_v34 = vmul.f32 %v16968_v1, %v8714_v4  ;;  %v9006_v16 = vmul.f32 %v16969_v40, %v8906_v55  ;;  %v8334_v4 = vrot.slane %v12912_v28, %v13613_v59  ;;  %v13007_v55 = vld [vmem:[%s13585_s20 + $0x20] sm:$0xff]   ;;  %v12935_v1 = vld [vmem:[#allocation5 + $0x154] ss:$8 sps:$4 sm:$0xcc]   ;;  %12529 = vmatprep.subr.bf16.mxu1 %v13006_v50 }
 0x432   : > { %v9781_v38 = vmul.f32 %v16970_v51, %v9674_v39  ;;  %v16971_v27 = vrot.slane %v16923_v8, %v15317_v43  ;;  %v7907_v33 = vld [vmem:[#allocation5 + $0x160] sm:$0xff]  ;;  %v13348_v39 = vld [vmem:[#allocation5 + $0xb0] sm:$0xff]  ;;  %v6125_v19 = vrot.slane %v6117_v12, %v14476_v21  ;;  %v15789_v31 = vrot.slane %v12887_v57, %v13613_v59  ;;  %12368 = vst.sshfl [vmem:[#allocation5 + $0x1a0] sm:$0x30 pattern:$0x76325410] %v5497_v9 }
 0x433   : > { %v9599_v30 = vadd.f32 %v9591_v58, %v9401_v10  ;;  %v7816_v53 = vmul.f32 %v13348_v39, %v7808_v6  ;;  %v8824_v41 = vadd.f32 %v8816_v34, %v8626_v14  ;;  %v15791_v28 = vadd.f32 %v7907_v33, %v7898_v45  ;;  %v7825_v10 = vld [vmem:[#allocation5 + $0xf0] sm:$0xff]  ;;  %v13349_v57 = vld [vmem:[#allocation5 + $0xb8] sm:$0xff]  ;;  %12530 = vmatpush3.bf16.msra.mxu1 %v13007_v55 }
 0x434   : > { %v9003_v3 = vmul.f32 %v16971_v27, %v8882_v0  ;;  %v5504_v47 = vrot.slane %v5497_v9, %v13613_v59  ;;  %v7809_v0 = vld [vmem:[#allocation4 + $0xf8] sm:$0xff]  ;;  %v6143_v6 = vmul.f32 %v6125_v19, %v14793_v44  ;;  %v16972_v14 = vrot.slane %v16932_v20, %v15314_v13  ;;  %v7850_v45 = vld [vmem:[#allocation4 + $0x130] sm:$0xff] }
 0x435   : > { %v15794_v58 = vadd.f32 %v9781_v38, %v9599_v30  ;;  %v7833_v40 = vadd.f32 %v7825_v10, %v7816_v53  ;;  %v9014_v51 = vadd.f32 %v9006_v16, %v8824_v41  ;;  %7923 = vst [vmem:[#allocation5 + $0x160] sm:$0xff] %v15791_v28  ;;  %v7817_v50 = vmul.f32 %v13349_v57, %v7809_v0  ;;  %v7867_v12 = vld [vmem:[#allocation5 + $0x130] sm:$0xff]  ;;  %v15806_v53 = vld [vmem:[#allocation5 + $0x184] ss:$8 sps:$4 sm:$0x33]  }
 0x436   : > { %v9204_v34 = vmul.f32 %v16972_v14, %v9102_v2  ;;  %v5505_v27 = vcombine.high %v5504_v47, %v5504_v47  ;;  %v16973_v38 = vrot.slane %v16935_v36, %v15317_v43  ;;  %v8335_v30 = vcombine.high %v8334_v4, %v8334_v4  ;;  %v15804_v33 = vld [vmem:[#allocation5 + $0x94] ss:$8 sps:$4 sm:$0x33]   ;;  %v5052_v2 = vpop.permute.xlu1 %5051  ;;  %v13008_v10 = vld [vmem:[%s13585_s20 + $0x68] sm:$0xff]  }
 0x437   : > { %7841 = vst [vmem:[#allocation5 + $0xf0] sm:$0xff] %v7833_v40  ;;  %v7858_v16 = vmul.f32 %v7850_v45, %v7833_v40  ;;  %v6207_v39 = vcombine.low %v6143_v6, %v6143_v6  ;;  %v9294_v19 = vrot.slane %v15781_v61, %v13613_v59  ;;  %v9489_v41 = vrot.slane %v12935_v1, %v13613_v59  ;;  %v12892_v0 = vld [vmem:[#allocation5 + $0x54] ss:$8 sps:$4 sm:$0xcc]  }
 0x438   : > { %v8231_v9 = vmul.f32 %v16973_v38, %v8138_v26  ;;  %v15813_v47 = vadd.f32 %v9003_v3, %v15727_v54  ;;  %v16974_v26 = vrot.slane %v16927_v52, %v15314_v13  ;;  %v9262_v55 = vrot.slane %v15776_v35, %v13613_v59  ;;  %v7826_v40 = vld [vmem:[#allocation5 + $0xf8] sm:$0xff]  ;;  %5544 = vst [vmem:[#allocation5 + $0x1a8] sm:$0xc] %v5505_v27  ;;  %v12920_v6 = vld [vmem:[#allocation5 + $0x184] ss:$8 sps:$4 sm:$0xcc]  }
 0x439   : > { %v7851_v61 = vld [vmem:[#allocation4 + $0x138] sm:$0xff]  ;;  %v5060_v1 = vrot.slane %v5052_v2, %v14476_v21  ;;  %v7834_v54 = vadd.f32 %v7826_v40, %v7817_v50  ;;  %v15824_v3 = vadd.f32 %v7867_v12, %v7858_v16  ;;  %v6214_v24 = vrot.slane %v6207_v39, %v13613_v59  ;;  %12400 = vst.sshfl [vmem:[#allocation5 + $0x1a8] sm:$0xc0 pattern:$0x76325410] %v6207_v39  ;;  %v13009_v50 = vld [vmem:[%s13585_s20 + $0x28] sm:$0xff]  }
 0x43a   : > { %v9200_v4 = vmul.f32 %v16974_v26, %v9066_v32  ;;  %v9212_v14 = vadd.f32 %v9204_v34, %v9014_v51  ;;  %12531 = vmatprep.subr.bf16.mxu1 %v13008_v10  ;;  %v9075_v32 = vcombine.high %v15789_v31, %v15789_v31  ;;  %v12893_v35 = vld [vmem:[#allocation5 + $0x94] ss:$8 sps:$4 sm:$0xcc]   ;;  %v8239_v45 = vadd.f32 %v8231_v9, %v15326_v49  ;;  %v15836_v16 = vld [vmem:[#allocation5 + $0x190] ss:$8 sps:$4 sm:$0x33]   ;;  %v6816_v2 = vpop.permute.xlu1 %6815 }
 0x43b   : > { %v5078_v57 = vmul.f32 %v5060_v1, %v14793_v44  ;;  %v16975_v27 = vrot.slane %v16936_v7, %v15317_v43  ;;  %7842 = vst [vmem:[#allocation5 + $0xf8] sm:$0xff] %v7834_v54  ;;  %v7859_v12 = vmul.f32 %v7851_v61, %v7834_v54  ;;  %7883 = vst [vmem:[#allocation5 + $0x130] sm:$0xff] %v15824_v3  ;;  %v7868_v34 = vld [vmem:[#allocation5 + $0x138] sm:$0xff]  ;;  %12532 = vmatpush3.bf16.msra.mxu1 %v13009_v50 }
 0x43c   : > { %v6215_v51 = vcombine.low %v6214_v24, %v6214_v24  ;;  %v16976_v31 = vrot.slane %v16943_v63, %v15314_v13  ;;  %v9490_v49 = vcombine.high %v9489_v41, %v9489_v41  ;;  %v15842_v9 = vadd.f32 %v9200_v4, %v15736_v25  ;;  %v12928_v40 = vld [vmem:[#allocation5 + $0x190] ss:$8 sps:$4 sm:$0xcc]   ;;  %v12939_v54 = vld [vmem:[#allocation5 + $0x160] ss:$8 sps:$4 sm:$0x33]  }
 0x43d   : > { %v8429_v38 = vmul.f32 %v16975_v27, %v8335_v30  ;;  %v5142_v30 = vrot.slane %v5078_v57, %v13613_v59  ;;  %12352 = vst.sshfl [vmem:[#allocation5 + $0x1a0] sm:$0x3 pattern:$0x76325410] %v5078_v57  ;;  %v8526_v10 = vrot.slane %v15806_v53, %v13613_v59  ;;  %v8722_v26 = vrot.slane %v12920_v6, %v13613_v59  ;;  %v13010_v61 = vld [vmem:[%s13585_s20 + $0x70] sm:$0xff]   ;;  %v13012_v24 = vld [vmem:[%s13585_s20 + $0x78] sm:$0xff]  }
 0x43e   : > { %v9394_v39 = vmul.f32 %v16976_v31, %v9294_v19  ;;  %v13011_v1 = vld [vmem:[%s13585_s20 + $0x30] sm:$0xff]   ;;  %v9270_v19 = vrot.slane %v15804_v33, %v13613_v59  ;;  %6253 = vst [vmem:[#allocation5 + $0x1a0] sm:$0xc0] %v6215_v51  ;;  %v6824_v25 = vrot.slane %v6816_v2, %v14476_v21  ;;  %v15853_v41 = vadd.f32 %v7868_v34, %v7859_v12  ;;  %v15865_v51 = vld [vmem:[#allocation5 + $0x60] ss:$8 sps:$4 sm:$0x33]  }
 0x43f   : > { %v16977_v53 = vrot.slane %v16927_v52, %v15317_v43  ;;  %v16978_v57 = vrot.slane %v16928_v37, %v15314_v13  ;;  %v15863_v50 = vrot.slane %v12892_v0, %v13613_v59  ;;  %v5143_v33 = vcombine.high %v5142_v30, %v5142_v30  ;;  %12533 = vmatprep.subr.bf16.mxu1 %v13010_v61 }
 0x440   : > { %v9402_v4 = vadd.f32 %v9394_v39, %v9212_v14  ;;  %v6852_v12 = vmul.f32 %v6824_v25, %v14966_v42  ;;  %7884 = vst [vmem:[#allocation5 + $0x138] sm:$0xff] %v15853_v41  ;;  %v8437_v14 = vadd.f32 %v8429_v38, %v8239_v45  ;;  %v16979_v34 = vrot.slane %v16948_v17, %v15314_v13  ;;  %v13013_v39 = vld [vmem:[%s13585_s20 + $0x38] sm:$0xff]   ;;  %v7171_v38 = vpop.permute.xlu1 %7170 }
 0x441   : > { %v9201_v6 = vmul.f32 %v16977_v53, %v9075_v32  ;;  %v9390_v27 = vmul.f32 %v16978_v57, %v9262_v55  ;;  %v9682_v31 = vrot.slane %v12939_v54, %v13613_v59  ;;  %v9462_v55 = vrot.slane %v12893_v35, %v13613_v59  ;;  %5181 = vst [vmem:[#allocation5 + $0x1a8] sm:$0x3] %v5143_v33  ;;  %v7932_v57 = vld [vmem:[#allocation4 + $0x1a0] sm:$0xff] }
 0x442   : > { %v9592_v32 = vmul.f32 %v16979_v34, %v9490_v49  ;;  %v16980_v0 = vrot.slane %v16931_v11, %v15317_v43  ;;  %v8723_v2 = vcombine.high %v8722_v26, %v8722_v26  ;;  %v8914_v61 = vrot.slane %v15836_v16, %v13613_v59  ;;  %12534 = vmatpush3.bf16.msra.mxu1 %v13011_v1  ;;  %v12898_v1 = vld [vmem:[#allocation5 + $0x60] ss:$8 sps:$4 sm:$0xcc]  }
 0x443   : > { %v6908_v45 = vcombine.low %v6852_v12, %v6852_v12  ;;  %v9110_v25 = vrot.slane %v12928_v40, %v13613_v59  ;;  %v16981_v54 = vrot.slane %v16933_v46, %v15314_v13  ;;  %12535 = vmatprep.subr.bf16.mxu1 %v13012_v24  ;;  %v9209_v35 = vadd.f32 %v9201_v6, %v15813_v47 }
 0x444   : > { %v8619_v30 = vmul.f32 %v16980_v0, %v8526_v10  ;;  %v9600_v49 = vadd.f32 %v9592_v32, %v9402_v4  ;;  %v16982_v10 = vrot.slane %v16928_v37, %v15317_v43  ;;  %v9454_v16 = vcombine.high %v15863_v50, %v15863_v50 }
 0x445   : > { %v9782_v53 = vmul.f32 %v16981_v54, %v9682_v31  ;;  %v7179_v33 = vrot.slane %v7171_v38, %v14476_v21  ;;  %v7940_v40 = vmul.f32 %v7932_v57, %v15791_v28  ;;  %v6915_v4 = vrot.slane %v6908_v45, %v13613_v59  ;;  %12431 = vst.sshfl [vmem:[#allocation5 + $0x170] sm:$0x30 pattern:$0x76325410] %v6908_v45  ;;  %v7933_v31 = vld [vmem:[#allocation4 + $0x1a8] sm:$0xff] }
 0x446   : > { %v9391_v26 = vmul.f32 %v16982_v10, %v9270_v19  ;;  %v8627_v12 = vadd.f32 %v8619_v30, %v8437_v14  ;;  %v9463_v47 = vcombine.high %v9462_v55, %v9462_v55  ;;  %v9650_v6 = vrot.slane %v15865_v51, %v13613_v59  ;;  %v7949_v19 = vld [vmem:[#allocation5 + $0x1a0] sm:$0xff]  ;;  %12536 = vmatpush3.bf16.msra.mxu1 %v13013_v39  ;;  %v12932_v45 = vld [vmem:[#allocation5 + $0x194] ss:$8 sps:$4 sm:$0x33]  }
 0x447   : > { %v15893_v24 = vadd.f32 %v9782_v53, %v9600_v49  ;;  %v7207_v34 = vmul.f32 %v7179_v33, %v14966_v42  ;;  %v16983_v50 = vrot.slane %v16938_v60, %v15317_v43  ;;  %v15901_v28 = vadd.f32 %v7949_v19, %v7940_v40  ;;  %v12950_v38 = vld [vmem:[#allocation5 + $0xc0] ss:$8 sps:$4 sm:$0x33]   ;;  %v15908_v54 = vld [vmem:[#allocation5 + $0x64] ss:$8 sps:$4 sm:$0x33]   ;;  %v6827_v53 = vpop.permute.xlu1 %6826 }
 0x448   : > { %v6916_v0 = vcombine.high %v6915_v4, %v6915_v4  ;;  %v16984_v14 = vrot.slane %v16939_v18, %v15317_v43  ;;  %v9111_v55 = vcombine.high %v9110_v25, %v9110_v25  ;;  %v9398_v51 = vadd.f32 %v9390_v27, %v15842_v9  ;;  %v12896_v49 = vld [vmem:[#allocation5 + $0xa0] ss:$8 sps:$4 sm:$0x33]   ;;  %v12951_v10 = vld [vmem:[#allocation5 + $0xc0] ss:$8 sps:$4 sm:$0xcc]  }
 0x449   : > { %v8817_v32 = vmul.f32 %v16983_v50, %v8723_v2  ;;  %v9841_v42 = vrot.slane %v12898_v1, %v13613_v59  ;;  %v7941_v39 = vmul.f32 %v7933_v31, %v15758_v23  ;;  %v7264_v2 = vrot.slane %v7207_v34, %v13613_v59  ;;  %12447 = vst.sshfl [vmem:[#allocation5 + $0x178] sm:$0xc pattern:$0x76325410] %v7207_v34  ;;  %v7950_v57 = vld [vmem:[#allocation5 + $0x1a8] sm:$0xff] }
 0x44a   : > { %v9007_v30 = vmul.f32 %v16984_v14, %v8914_v61  ;;  %v9399_v25 = vadd.f32 %v9391_v26, %v9209_v35  ;;  %7965 = vst [vmem:[#allocation5 + $0x1a0] sm:$0xff] %v15901_v28  ;;  %6962 = vst [vmem:[#allocation5 + $0x178] sm:$0xc] %v6916_v0  ;;  %v6835_v9 = vrot.slane %v6827_v53, %v14476_v21  ;;  %v12936_v1 = vld [vmem:[#allocation5 + $0x194] ss:$8 sps:$4 sm:$0xcc]  }
 0x44b   : > { %v8825_v27 = vadd.f32 %v8817_v32, %v8627_v12  ;;  %v16985_v23 = vrot.slane %v16925_v5, %v15314_v13  ;;  %v16986_v40 = vrot.slane %v16925_v5, %v15317_v43  ;;  %v12899_v19 = vld [vmem:[#allocation5 + $0xa0] ss:$8 sps:$4 sm:$0xcc]   ;;  %v15922_v34 = vadd.f32 %v7950_v57, %v7941_v39  ;;  %v6472_v57 = vpop.permute.xlu1 %6471 }
 0x44c   : > { %v7265_v35 = vcombine.low %v7264_v2, %v7264_v2  ;;  %v16987_v26 = vrot.slane %v16929_v56, %v15314_v13  ;;  %v6853_v31 = vmul.f32 %v6835_v9, %v14793_v44  ;;  %v16988_v32 = vrot.slane %v16932_v20, %v15317_v43 }
 0x44d   : > { %v9588_v33 = vmul.f32 %v16985_v23, %v9454_v16  ;;  %v9589_v4 = vmul.f32 %v16986_v40, %v9463_v47  ;;  %v9015_v12 = vadd.f32 %v9007_v30, %v8825_v27  ;;  %v9842_v14 = vcombine.high %v9841_v42, %v9841_v42  ;;  %7966 = vst [vmem:[#allocation5 + $0x1a8] sm:$0xff] %v15922_v34  ;;  %v7893_v42 = vld [vmem:[#allocation4 + $0x178] sm:$0xff]  ;;  %v12952_v23 = vld [vmem:[#allocation5 + $0xc4] ss:$8 sps:$4 sm:$0x33]  }
 0x44e   : > { %v9778_v50 = vmul.f32 %v16987_v26, %v9650_v6  ;;  %v9205_v0 = vmul.f32 %v16988_v32, %v9111_v55  ;;  %7308 = vst [vmem:[#allocation5 + $0x170] sm:$0x30] %v7265_v35  ;;  %v8114_v47 = vrot.slane %v12950_v38, %v13613_v59  ;;  %v8307_v39 = vrot.slane %v12951_v10, %v13613_v59  ;;  %v15943_v10 = vld [vmem:[#allocation5 + $0xa4] ss:$8 sps:$4 sm:$0x33]   ;;  %v16990_v35 = vld [vmem:[#allocation37_spill] sm:$0xff] }
 0x44f   : > { %v9596_v16 = vadd.f32 %v9588_v33, %v9398_v51  ;;  %v9597_v2 = vadd.f32 %v9589_v4, %v9399_v25  ;;  %v6917_v53 = vcombine.low %v6853_v31, %v6853_v31  ;;  %v9302_v6 = vrot.slane %v12932_v45, %v13613_v59 }
 0x450   : > { %v9498_v30 = vrot.slane %v12936_v1, %v13613_v59  ;;  %v9658_v9 = vrot.slane %v12896_v49, %v13613_v59  ;;  %v9850_v55 = vrot.slane %v12899_v19, %v13613_v59  ;;  %v6480_v27 = vrot.slane %v6472_v57, %v14476_v21  ;;  %v15947_v49 = vpop.permute.xlu0 %10096 }
 0x451   : > { %v15941_v38 = vadd.f32 %v9778_v50, %v9596_v16  ;;  %v7901_v25 = vmul.f32 %v7893_v42, %v15853_v41  ;;  %v6924_v45 = vrot.slane %v6917_v53, %v13613_v59  ;;  %12432 = vst.sshfl [vmem:[#allocation5 + $0x1b0] sm:$0x30 pattern:$0x76325410] %v6917_v53  ;;  %v9213_v1 = vadd.f32 %v9205_v0, %v9015_v12  ;;  %v7910_v4 = vld [vmem:[#allocation5 + $0x178] sm:$0xff]  ;;  %v7892_v41 = vld [vmem:[#allocation4 + $0x170] sm:$0xff] }
 0x452   : > { %v16989_v33 = vrot.slane %v16930_v29, %v15314_v13  ;;  %v6498_v19 = vmul.f32 %v6480_v27, %v14793_v44  ;;  %v16991_v26 = vrot.slane %v16990_v35, %v15320_v22  ;;  %v8308_v31 = vcombine.high %v8307_v39, %v8307_v39  ;;  %v12904_v27 = vld [vmem:[#allocation5 + $0x70] ss:$8 sps:$4 sm:$0xcc]   ;;  %v7182_v39 = vpop.permute.xlu1 %7181 }
 0x453   : > { %v15956_v32 = vadd.f32 %v7910_v4, %v7901_v25  ;;  %v6925_v16 = vcombine.high %v6924_v45, %v6924_v45  ;;  %v16992_v12 = vrot.slane %v16943_v63, %v15317_v43  ;;  %v9499_v53 = vcombine.high %v9498_v30, %v9498_v30  ;;  %v12953_v25 = vld [vmem:[#allocation5 + $0xc4] ss:$8 sps:$4 sm:$0xcc]  }
 0x454   : > { %v9976_v40 = vmul.f32 %v16989_v33, %v9842_v14  ;;  %v8228_v50 = vmul.f32 %v16991_v26, %v8114_v47  ;;  %v16993_v14 = vrot.slane %v16929_v56, %v15317_v43  ;;  %v9851_v42 = vcombine.high %v9850_v55, %v9850_v55  ;;  %12416 = vst.sshfl [vmem:[#allocation5 + $0x1b0] sm:$0x3 pattern:$0x76325410] %v6498_v19  ;;  %v16994_v26 = vld [vmem:[#allocation32_spill] sm:$0xff] }
 0x455   : > { %v9395_v0 = vmul.f32 %v16992_v12, %v9302_v6  ;;  %v7900_v33 = vmul.f32 %v7892_v41, %v15824_v3  ;;  %v6562_v47 = vrot.slane %v6498_v19, %v13613_v59  ;;  %v10046_v45 = vrot.slane %v15943_v10, %v13613_v59  ;;  %v7909_v30 = vld [vmem:[#allocation5 + $0x170] sm:$0xff]  ;;  %7926 = vst [vmem:[#allocation5 + $0x178] sm:$0xff] %v15956_v32  ;;  %v12940_v4 = vld [vmem:[#allocation5 + $0x1a0] ss:$8 sps:$4 sm:$0x33]  }
 0x456   : > { %v9779_v57 = vmul.f32 %v16993_v14, %v9658_v9  ;;  %v10107_v6 = vrot.slane %v15947_v49, %v14476_v21  ;;  %6964 = vst [vmem:[#allocation5 + $0x1b8] sm:$0xc] %v6925_v16  ;;  %v7190_v9 = vrot.slane %v7182_v39, %v14476_v21  ;;  %v12905_v3 = vld [vmem:[#allocation5 + $0xb0] ss:$8 sps:$4 sm:$0xcc]   ;;  %v8236_v41 = vadd.f32 %v8228_v50, %v16994_v26 }
 0x457   : > { %v9403_v55 = vadd.f32 %v9395_v0, %v9213_v1  ;;  %v15972_v35 = vadd.f32 %v7909_v30, %v7900_v33  ;;  %v6563_v19 = vcombine.high %v6562_v47, %v6562_v47  ;;  %v16995_v12 = vld [vmem:[#allocation36_spill] sm:$0xff]  ;;  %v9593_v16 = vmul.f32 %v9571_v48, %v9499_v53  ;;  %v15993_v53 = vpop.permute.xlu0 %10297 }
 0x458   : > { %v16996_v10 = vrot.slane %v16995_v12, %v15320_v22  ;;  %v7208_v61 = vmul.f32 %v7190_v9, %v14793_v44  ;;  %v9690_v39 = vrot.slane %v12940_v4, %v13613_v59  ;;  %v8502_v1 = vrot.slane %v12952_v23, %v13613_v59  ;;  %v12954_v0 = vld [vmem:[#allocation5 + $0xd0] ss:$8 sps:$4 sm:$0x33]   ;;  %v2223_v23 = vpop.permute.xlu1 %2222  ;;  %v16999_v12 = vld [vmem:[#allocation30_spill] sm:$0xff] }
 0x459   : > { %v9787_v33 = vadd.f32 %v9779_v57, %v9597_v2  ;;  %v16997_v47 = vrot.slane %v16930_v29, %v15317_v43  ;;  %v10114_v30 = vrot.slane %v15947_v49, %v15314_v13  ;;  %7925 = vst [vmem:[#allocation5 + $0x170] sm:$0xff] %v15972_v35  ;;  %6601 = vst [vmem:[#allocation5 + $0x1b8] sm:$0x3] %v6563_v19 }
 0x45a   : > { %v8426_v14 = vmul.f32 %v16996_v10, %v8308_v31  ;;  %v8695_v44 = vrot.slane %v12953_v25, %v13613_v59  ;;  %v12955_v31 = vld [vmem:[#allocation5 + $0xd0] ss:$8 sps:$4 sm:$0xcc]   ;;  %v10121_v48 = vrot.slane %v15947_v49, %v15317_v43  ;;  %v7272_v2 = vrot.slane %v7208_v61, %v13613_v59 }
 0x45b   : > { %v9977_v50 = vmul.f32 %v16997_v47, %v9851_v42  ;;  %12448 = vst.sshfl [vmem:[#allocation5 + $0x1b8] sm:$0xc pattern:$0x76325410] %v7208_v61  ;;  %v9601_v57 = vadd.f32 %v9593_v16, %v9403_v55  ;;  %v16998_v42 = vrot.slane %v16933_v46, %v15317_v43  ;;  %v16000_v4 = vrot.slane %v12904_v27, %v13613_v59 }
 0x45c   : > { %v16003_v25 = vrot.slane %v12905_v3, %v13613_v59  ;;  %v2231_v19 = vrot.slane %v2223_v23, %v14476_v21  ;;  %v8434_v26 = vadd.f32 %v8426_v14, %v8236_v41  ;;  %v17000_v10 = vrot.slane %v16999_v12, %v13613_v59 }
 0x45d   : > { %v9783_v9 = vmul.f32 %v16998_v42, %v9690_v39  ;;  %v7273_v61 = vcombine.low %v7272_v2, %v7272_v2  ;;  %v17001_v55 = vrot.slane %v16924_v15, %v15320_v22  ;;  %v17002_v39 = vld [vmem:[#allocation27_spill] sm:$0xff]  ;;  %v8696_v42 = vcombine.high %v8695_v44, %v8695_v44  ;;  %v7935_v44 = vld [vmem:[#allocation4 + $0x1b8] sm:$0xff] }
 0x45e   : > { %v10165_v47 = vmul.f32 %v10107_v6, %v17000_v10  ;;  %v2239_v27 = vmul.f32 %v2231_v19, %v17002_v39  ;;  %v8890_v3 = vrot.slane %v12954_v0, %v13613_v59  ;;  %v9083_v46 = vrot.slane %v12955_v31, %v13613_v59  ;;  %v2933_v31 = vpop.permute.xlu1 %2932 }
 0x45f   : > { %v16009_v51 = vadd.f32 %v9783_v9, %v9601_v57  ;;  %v8616_v16 = vmul.f32 %v17001_v55, %v8502_v1  ;;  %v9984_v41 = vadd.f32 %v9976_v40, %v15941_v38  ;;  %v9985_v14 = vadd.f32 %v9977_v50, %v9787_v33  ;;  %7310 = vst [vmem:[#allocation5 + $0x1b0] sm:$0x30] %v7273_v61  ;;  %v12961_v38 = vld [vmem:[#allocation5 + $0x24] ss:$8 sps:$4 sm:$0xcc]  }
 0x460   : > { %v17003_v6 = vrot.slane %v15908_v54, %v13613_v59  ;;  %v10167_v23 = vmul.f32 %v10121_v48, %v10046_v45  ;;  %v10618_v15 = vcombine.high %v16000_v4, %v16000_v4  ;;  %v10627_v1 = vcombine.high %v16003_v25, %v16003_v25  ;;  %12225 = vst.sshfl [vmem:[#allocation5 + $0x1c0] sm:$0x3 pattern:$0x76325410] %v2239_v27  ;;  %v17004_v54 = vld [vmem:[#allocation31_spill] sm:$0xff]  ;;  %v16031_v45 = vpop.permute.xlu0 %10682 }
 0x461   : > { %v2310_v0 = vrot.slane %v2239_v27, %v13613_v59  ;;  %v8624_v57 = vadd.f32 %v8616_v16, %v8434_v26  ;;  %v16029_v33 = vadd.f32 %v10165_v47, %v17004_v54  ;;  %v7943_v50 = vmul.f32 %v7935_v44, %v15956_v32  ;;  %v12956_v55 = vld [vmem:[#allocation5 + $0xd4] ss:$8 sps:$4 sm:$0x33]   ;;  %v12992_v54 = vld [vmem:[#allocation5 + $0x34] ss:$8 sps:$4 sm:$0xcc]  }
 0x462   : > { %v10166_v2 = vmul.f32 %v10114_v30, %v17003_v6  ;;  %v2941_v30 = vrot.slane %v2933_v31, %v14476_v21  ;;  %v7952_v48 = vld [vmem:[#allocation5 + $0x1b8] sm:$0xff]  ;;  %v17005_v4 = vrot.slane %v16926_v62, %v15320_v22  ;;  %v17006_v19 = vrot.slane %v16923_v8, %v15320_v22  ;;  %v7934_v27 = vld [vmem:[#allocation4 + $0x1b0] sm:$0xff]  ;;  %v16130_v40 = vld [vmem:[#allocation5 + $0x164] ss:$8 sps:$4 sm:$0x33]  }
 0x463   : > { %v2311_v9 = vcombine.high %v2310_v0, %v2310_v0  ;;  %v9084_v12 = vcombine.high %v9083_v46, %v9083_v46  ;;  %v16043_v47 = vadd.f32 %v10167_v23, %v9985_v14  ;;  %v16045_v61 = vadd.f32 %v7952_v48, %v7943_v50  ;;  %v16111_v23 = vld [vmem:[#allocation5 + $0xe4] ss:$8 sps:$4 sm:$0x33]  }
 0x464   : > { %v8814_v25 = vmul.f32 %v17005_v4, %v8696_v42  ;;  %v9004_v26 = vmul.f32 %v17006_v19, %v8890_v3  ;;  %v16041_v10 = vadd.f32 %v10166_v2, %v9984_v41  ;;  %v2949_v32 = vmul.f32 %v2941_v30, %v17002_v39  ;;  %v12957_v42 = vld [vmem:[#allocation5 + $0xd4] ss:$8 sps:$4 sm:$0xcc]   ;;  %v3643_v2 = vpop.permute.xlu1 %3642  ;;  %v16070_v50 = vpop.permute.xlu0 %10875  ;;  %v16096_v4 = vld [vmem:[#allocation5 + $0x30] ss:$8 sps:$4 sm:$0x33]  }
 0x465   : > { %17007 = vst [vmem:[#allocation14_spill] sm:$0xff] %v16043_v47  ;;  %v10693_v62 = vrot.slane %v16031_v45, %v14476_v21  ;;  %2343 = vst [vmem:[#allocation5 + $0x1c8] sm:$0x3] %v2311_v9  ;;  %v16053_v46 = vrot.slane %v12961_v38, %v13613_v59  ;;  %v10700_v3 = vrot.slane %v16031_v45, %v15314_v13 }
 0x466   : > { %v8822_v8 = vadd.f32 %v8814_v25, %v8624_v57  ;;  %v10707_v41 = vrot.slane %v16031_v45, %v15317_v43  ;;  %v7942_v14 = vmul.f32 %v7934_v27, %v15972_v35  ;;  %7968 = vst [vmem:[#allocation5 + $0x1b8] sm:$0xff] %v16045_v61  ;;  %v3020_v6 = vrot.slane %v2949_v32, %v13613_v59  ;;  %v7951_v44 = vld [vmem:[#allocation5 + $0x1b0] sm:$0xff]  ;;  %v17009_v27 = vld [vmem:[#allocation13_spill] sm:$0xff] }
 0x467   : > { %12257 = vst.sshfl [vmem:[#allocation5 + $0x1c8] sm:$0xc pattern:$0x76325410] %v2949_v32  ;;  %v3651_v0 = vrot.slane %v3643_v2, %v14476_v21  ;;  %v17008_v57 = vrot.slane %v16927_v52, %v15320_v22  ;;  %v9278_v9 = vrot.slane %v12956_v55, %v13613_v59  ;;  %v9471_v19 = vrot.slane %v12957_v42, %v13613_v59  ;;  %v7971_v42 = vld [vmem:[#allocation4 + $0x1c8] sm:$0xff] }
 0x468   : > { %v9012_v31 = vadd.f32 %v9004_v26, %v8822_v8  ;;  %v16072_v30 = vadd.f32 %v7951_v44, %v7942_v14  ;;  %v3021_v48 = vcombine.low %v3020_v6, %v3020_v6  ;;  %v12958_v52 = vld [vmem:[#allocation5 + $0xe0] ss:$8 sps:$4 sm:$0x33]   ;;  %v12959_v26 = vld [vmem:[#allocation5 + $0xe0] ss:$8 sps:$4 sm:$0xcc]   ;;  %v17010_v8 = vcombine.high %v17009_v27, %v17009_v27 }
 0x469   : > { %v9202_v38 = vmul.f32 %v17008_v57, %v9084_v12  ;;  %v3659_v25 = vmul.f32 %v3651_v0, %v17002_v39  ;;  %v16088_v55 = vmul.f32 %v10700_v3, %v10618_v15  ;;  %v16090_v6 = vmul.f32 %v10707_v41, %v10627_v1  ;;  %v4353_v0 = vpop.permute.xlu1 %4352  ;;  %v13350_v3 = vld [vmem:[#allocation5 + $0x188] sm:$0xff] }
 0x46a   : > { %v16086_v14 = vmul.f32 %v10693_v62, %v17010_v8  ;;  %7967 = vst [vmem:[#allocation5 + $0x1b0] sm:$0xff] %v16072_v30  ;;  %3052 = vst [vmem:[#allocation5 + $0x1c0] sm:$0x30] %v3021_v48  ;;  %v16098_v62 = vld [vmem:[#allocation5 + $0x34] ss:$8 sps:$4 sm:$0x33]   ;;  %v16101_v15 = vrot.slane %v12992_v54, %v13613_v59  ;;  %v7979_v41 = vmul.f32 %v13350_v3, %v7971_v42 }
 0x46b   : > { %17012 = vst [vmem:[#allocation15_spill] sm:$0xff] %v16088_v55  ;;  %17013 = vst [vmem:[#allocation16_spill] sm:$0xff] %v16090_v6  ;;  %v3730_v44 = vrot.slane %v3659_v25, %v13613_v59  ;;  %v9210_v57 = vadd.f32 %v9202_v38, %v9012_v31  ;;  %v4361_v48 = vrot.slane %v4353_v0, %v14476_v21  ;;  %v12942_v27 = vld [vmem:[#allocation5 + $0x120] ss:$8 sps:$4 sm:$0xcc]  }
 0x46c   : > { %17011 = vst [vmem:[#allocation19_spill] sm:$0xff] %v16086_v14  ;;  %12289 = vst.sshfl [vmem:[#allocation5 + $0x1d0] sm:$0x3 pattern:$0x76325410] %v3659_v25  ;;  %v17016_v25 = vrot.slane %v16928_v37, %v15320_v22  ;;  %v7970_v38 = vld [vmem:[#allocation4 + $0x1c0] sm:$0xff]  ;;  %v9472_v2 = vcombine.high %v9471_v19, %v9471_v19  ;;  %v9666_v54 = vrot.slane %v12958_v52, %v13613_v59 }
 0x46d   : > { %17014 = vst [vmem:[#allocation17_spill] sm:$0xff] %v16098_v62  ;;  %17015 = vst [vmem:[#allocation23_spill] sm:$0xff] %v16101_v15  ;;  %v12943_v8 = vld [vmem:[#allocation5 + $0x160] ss:$8 sps:$4 sm:$0xcc]   ;;  %v3731_v35 = vcombine.high %v3730_v44, %v3730_v44  ;;  %v9859_v32 = vrot.slane %v12959_v26, %v13613_v59  ;;  %v4369_v37 = vmul.f32 %v4361_v48, %v17002_v39  ;;  %v7972_v19 = vld [vmem:[#allocation4 + $0x1d0] sm:$0xff] }
 0x46e   : > { %v9392_v31 = vmul.f32 %v17016_v25, %v9278_v9  ;;  %v7988_v12 = vld [vmem:[#allocation5 + $0x1c8] sm:$0xff]  ;;  %v7973_v9 = vld [vmem:[#allocation4 + $0x1d8] sm:$0xff]  ;;  %v17017_v0 = vrot.slane %v16925_v5, %v15320_v22  ;;  %v16142_v55 = vrot.slane %v12943_v8, %v13613_v59  ;;  %v10054_v5 = vrot.slane %v16111_v23, %v13613_v59 }
 0x46f   : > { %v7996_v3 = vadd.f32 %v7988_v12, %v7979_v41  ;;  %v16118_v25 = vld [vmem:[#allocation5 + $0x124] ss:$8 sps:$4 sm:$0x33]   ;;  %3763 = vst [vmem:[#allocation5 + $0x1d8] sm:$0x3] %v3731_v35  ;;  %v4440_v48 = vrot.slane %v4369_v37, %v13613_v59  ;;  %v13352_v35 = vld [vmem:[#allocation5 + $0x198] sm:$0xff] }
 0x470   : > { %v9400_v44 = vadd.f32 %v9392_v31, %v9210_v57  ;;  %v12962_v52 = vld [vmem:[#allocation5 + $0x64] ss:$8 sps:$4 sm:$0xcc]   ;;  %v7981_v16 = vmul.f32 %v13352_v35, %v7973_v9  ;;  %v6128_v57 = vpop.permute.xlu1 %6127  ;;  %v16128_v31 = vrot.slane %v12942_v27, %v13613_v59  ;;  %v13353_v27 = vld [vmem:[#allocation5 + $0x190] sm:$0xff] }
 0x471   : > { %v12963_v1 = vld [vmem:[#allocation5 + $0xa4] ss:$8 sps:$4 sm:$0xcc]   ;;  %8004 = vst [vmem:[#allocation5 + $0x1c8] sm:$0xff] %v7996_v3  ;;  %v6136_v42 = vrot.slane %v6128_v57, %v14476_v21  ;;  %v17018_v3 = vrot.slane %v16929_v56, %v15320_v22  ;;  %v4441_v15 = vcombine.low %v4440_v48, %v4440_v48  ;;  %v16139_v62 = vmul.f32 %v13353_v27, %v7972_v19 }
 0x472   : > { %v13351_v12 = vld [vmem:[#allocation5 + $0x180] sm:$0xff]  ;;  %12321 = vst.sshfl [vmem:[#allocation5 + $0x1d8] sm:$0xc pattern:$0x76325410] %v4369_v37  ;;  %v16148_v56 = vrot.slane %v12962_v52, %v13613_v59 }
 0x473   : > { %v7978_v41 = vmul.f32 %v13351_v12, %v7970_v38  ;;  %v12964_v26 = vld [vmem:[#allocation5 + $0xe4] ss:$8 sps:$4 sm:$0xcc]   ;;  %v9590_v38 = vmul.f32 %v17017_v0, %v9472_v2  ;;  %v9780_v37 = vmul.f32 %v17018_v3, %v9666_v54  ;;  %v9860_v12 = vcombine.high %v9859_v32, %v9859_v32  ;;  %v16150_v32 = vld [vmem:[#allocation5 + $0x70] ss:$8 sps:$4 sm:$0x33]  }
 0x474   : > { %v7987_v6 = vld [vmem:[#allocation5 + $0x1c0] sm:$0xff]  ;;  %v6144_v57 = vmul.f32 %v6136_v42, %v17002_v39  ;;  %17019 = vst [vmem:[#allocation24_spill] sm:$0xff] %v16150_v32  ;;  %4472 = vst [vmem:[#allocation5 + $0x1d0] sm:$0x30] %v4441_v15  ;;  %v16159_v54 = vrot.slane %v12963_v1, %v13613_v59  ;;  %v5063_v0 = vpop.permute.xlu1 %5062  ;;  %v16165_v52 = vrot.slane %v12964_v26, %v13613_v59 }
 0x475   : > { %v12969_v9 = vld [vmem:[#allocation5 + $0x124] ss:$8 sps:$4 sm:$0xcc]   ;;  %v7995_v35 = vadd.f32 %v7987_v6, %v7978_v41  ;;  %v9598_v47 = vadd.f32 %v9590_v38, %v9400_v44  ;;  %v12978_v23 = vld [vmem:[#allocation5 + $0x130] ss:$8 sps:$4 sm:$0xcc]   ;;  %v17020_v44 = vrot.slane %v16930_v29, %v15320_v22  ;;  %v5071_v38 = vrot.slane %v5063_v0, %v14476_v21 }
 0x476   : > { %v12970_v14 = vld [vmem:[#allocation5 + $0x164] ss:$8 sps:$4 sm:$0xcc]   ;;  %v6216_v42 = vcombine.low %v6144_v57, %v6144_v57  ;;  %v16167_v41 = vld [vmem:[#allocation5 + $0xb0] ss:$8 sps:$4 sm:$0x33]   ;;  %v10256_v3 = vrot.slane %v12969_v9, %v13613_v59  ;;  %v16190_v2 = vrot.slane %v12978_v23, %v13613_v59 }
 0x477   : > { %8003 = vst [vmem:[#allocation5 + $0x1c0] sm:$0xff] %v7995_v35  ;;  %v9788_v19 = vadd.f32 %v9780_v37, %v9598_v47  ;;  %v9978_v15 = vmul.f32 %v17020_v44, %v9860_v12  ;;  %17021 = vst [vmem:[#allocation18_spill] sm:$0xff] %v16167_v41  ;;  %v16169_v48 = vld [vmem:[#allocation5 + $0xf0] ss:$8 sps:$4 sm:$0x33]   ;;  %v10265_v47 = vrot.slane %v12970_v14, %v13613_v59  ;;  %v7974_v9 = vld [vmem:[#allocation4 + $0x1e0] sm:$0xff] }
 0x478   : > { %17022 = vst [vmem:[#allocation20_spill] sm:$0xff] %v16169_v48  ;;  %v16176_v37 = vld [vmem:[#allocation5 + $0x130] ss:$8 sps:$4 sm:$0x33]   ;;  %v6223_v26 = vrot.slane %v6216_v42, %v13613_v59  ;;  %v17023_v35 = vrot.slane %v15947_v49, %v15320_v22  ;;  %v5079_v14 = vmul.f32 %v5071_v38, %v17002_v39  ;;  %17024 = vst [vmem:[#allocation21_spill] sm:$0xff] %v16190_v2  ;;  %v5773_v38 = vpop.permute.xlu1 %5772 }
 0x479   : > { %v12985_v29 = vld [vmem:[#allocation5 + $0xf0] ss:$8 sps:$4 sm:$0xcc]   ;;  %v16197_v0 = vld [vmem:[#allocation5 + $0x74] ss:$8 sps:$4 sm:$0x33]   ;;  %v10266_v8 = vcombine.high %v10265_v47, %v10265_v47 }
 0x47a   : > { %v7990_v12 = vld [vmem:[#allocation5 + $0x1d8] sm:$0xff]  ;;  %12401 = vst.sshfl [vmem:[#allocation5 + $0x1e8] sm:$0xc0 pattern:$0x76325410] %v6216_v42  ;;  %v10168_v27 = vmul.f32 %v17023_v35, %v10054_v5  ;;  %v16193_v42 = vmul.f32 %v7974_v9, %v15901_v28  ;;  %v6224_v49 = vcombine.low %v6223_v26, %v6223_v26  ;;  %v7975_v5 = vld [vmem:[#allocation4 + $0x1e8] sm:$0xff]  ;;  %v9986_v35 = vadd.f32 %v9978_v15, %v9788_v19 }
 0x47b   : > { %v7998_v44 = vadd.f32 %v7990_v12, %v7981_v16  ;;  %17025 = vst [vmem:[#allocation22_spill] sm:$0xff] %v16197_v0  ;;  %v5150_v16 = vrot.slane %v5079_v14, %v13613_v59  ;;  %12353 = vst.sshfl [vmem:[#allocation5 + $0x1e0] sm:$0x3 pattern:$0x76325410] %v5079_v14  ;;  %v10257_v12 = vcombine.high %v10256_v3, %v10256_v3  ;;  %v7989_v26 = vld [vmem:[#allocation5 + $0x1d0] sm:$0xff] }
 0x47c   : > { %v10635_v23 = vrot.slane %v12985_v29, %v13613_v59  ;;  %v16201_v1 = vld [vmem:[#allocation5 + $0xb4] ss:$8 sps:$4 sm:$0x33]   ;;  %v12993_v28 = vld [vmem:[#allocation5 + $0x74] ss:$8 sps:$4 sm:$0xcc]   ;;  %v5781_v19 = vrot.slane %v5773_v38, %v14476_v21  ;;  %v7997_v29 = vadd.f32 %v7989_v26, %v16139_v62  ;;  %v16212_v6 = vmul.f32 %v7975_v5, %v15922_v34  ;;  %v7548_v62 = vpop.permute.xlu1 %7547 }
 0x47d   : > { %8006 = vst [vmem:[#allocation5 + $0x1d8] sm:$0xff] %v7998_v44  ;;  %17026 = vst [vmem:[#allocation25_spill] sm:$0xff] %v16201_v1  ;;  %v12994_v47 = vld [vmem:[#allocation5 + $0xb4] ss:$8 sps:$4 sm:$0xcc]   ;;  %v5151_v57 = vcombine.high %v5150_v16, %v5150_v16  ;;  %v16218_v3 = vadd.f32 %v10168_v27, %v9986_v35  ;;  %v17027_v16 = vrot.slane %v15993_v53, %v14476_v21 }
 0x47e   : > { %6255 = vst [vmem:[#allocation5 + $0x1e0] sm:$0xc0] %v6224_v49  ;;  %v12909_v15 = vld [vmem:[#allocation5 + $0x1c0] ss:$8 sps:$4 sm:$0x33]   ;;  %v5789_v41 = vmul.f32 %v5781_v19, %v17002_v39  ;;  %8005 = vst [vmem:[#allocation5 + $0x1d0] sm:$0xff] %v7997_v29  ;;  %v17028_v19 = vrot.slane %v15993_v53, %v15314_v13  ;;  %v10636_v27 = vcombine.high %v10635_v23, %v10635_v23 }
 0x47f   : > { %v12995_v14 = vld [vmem:[#allocation5 + $0xf4] ss:$8 sps:$4 sm:$0xcc]   ;;  %v12913_v49 = vld [vmem:[#allocation5 + $0x1c0] ss:$8 sps:$4 sm:$0xcc]   ;;  %v8146_v44 = vrot.slane %v12909_v15, %v13613_v59  ;;  %v16226_v26 = vmul.f32 %v17027_v16, %v10257_v12  ;;  %v16242_v12 = vrot.slane %v12993_v28, %v13613_v59 }
 0x480   : > { %v12971_v38 = vld [vmem:[#allocation5 + $0x1a4] ss:$8 sps:$4 sm:$0xcc]   ;;  %v12998_v9 = vld [vmem:[#allocation5 + $0x134] ss:$8 sps:$4 sm:$0x33]   ;;  %v8343_v34 = vrot.slane %v12913_v49, %v13613_v59  ;;  %v16231_v15 = vmul.f32 %v17028_v19, %v10266_v8  ;;  %v5860_v35 = vrot.slane %v5789_v41, %v13613_v59  ;;  %v7556_v8 = vrot.slane %v7548_v62, %v14476_v21 }
 0x481   : > { %v12917_v48 = vld [vmem:[#allocation5 + $0x1c4] ss:$8 sps:$4 sm:$0x33]   ;;  %5183 = vst [vmem:[#allocation5 + $0x1e8] sm:$0x3] %v5151_v57  ;;  %v17029_v57 = vrot.slane %v16935_v36, %v15320_v22  ;;  %17030 = vst [vmem:[#allocation26_spill] sm:$0xff] %v16242_v12  ;;  %v16252_v49 = vrot.slane %v12995_v14, %v13613_v59  ;;  %v17034_v62 = vrot.slane %v16936_v7, %v15320_v22 }
 0x482   : > { %v12921_v5 = vld [vmem:[#allocation5 + $0x1c4] ss:$8 sps:$4 sm:$0xcc]   ;;  %v16239_v32 = vld [vmem:[#allocation5 + $0xf4] ss:$8 sps:$4 sm:$0x33]   ;;  %v8344_v23 = vcombine.high %v8343_v34, %v8343_v34  ;;  %v8534_v19 = vrot.slane %v12917_v48, %v13613_v59  ;;  %v5861_v2 = vcombine.low %v5860_v35, %v5860_v35  ;;  %v7564_v28 = vmul.f32 %v7556_v8, %v17002_v39 }
 0x483   : > { %12385 = vst.sshfl [vmem:[#allocation5 + $0x1e8] sm:$0xc pattern:$0x76325410] %v5789_v41  ;;  %v8232_v29 = vmul.f32 %v17029_v57, %v8146_v44  ;;  %v8731_v41 = vrot.slane %v12921_v5, %v13613_v59  ;;  %v17031_v36 = vld [vmem:[#allocation35_spill] sm:$0xff]  ;;  %v16249_v57 = vrot.slane %v12994_v47, %v13613_v59  ;;  %17033 = vst [vmem:[#allocation39_spill] sm:$0xff] %v16252_v49 }
 0x484   : > { %v13002_v16 = vld [vmem:[#allocation5 + $0x134] ss:$8 sps:$4 sm:$0xcc]   ;;  %v12944_v0 = vld [vmem:[#allocation5 + $0x1a0] ss:$8 sps:$4 sm:$0xcc]   ;;  %v8430_v34 = vmul.f32 %v17034_v62, %v8344_v23  ;;  %v10274_v48 = vrot.slane %v12971_v38, %v13613_v59  ;;  %v10838_v5 = vrot.slane %v12998_v9, %v13613_v59  ;;  %v17035_v47 = vrot.slane %v16031_v45, %v15320_v22  ;;  %v6483_v23 = vpop.permute.xlu1 %6482 }
 0x485   : > { %v8240_v44 = vadd.f32 %v8232_v29, %v17031_v36  ;;  %17032 = vst [vmem:[#allocation38_spill] sm:$0xff] %v16249_v57  ;;  %5892 = vst [vmem:[#allocation5 + $0x1e0] sm:$0x30] %v5861_v2  ;;  %v16260_v35 = vld [vmem:[#allocation5 + $0x1a4] ss:$8 sps:$4 sm:$0x33]   ;;  %v16272_v7 = vrot.slane %v13002_v16, %v13613_v59  ;;  %v7636_v38 = vcombine.low %v7564_v28, %v7564_v28 }
 0x486   : > { %v16265_v29 = vmul.f32 %v17035_v47, %v10636_v27  ;;  %v17037_v2 = vrot.slane %v16931_v11, %v15320_v22  ;;  %v8732_v62 = vcombine.high %v8731_v41, %v8731_v41  ;;  %v12979_v45 = vld [vmem:[#allocation5 + $0x170] ss:$8 sps:$4 sm:$0xcc]   ;;  %v12999_v27 = vld [vmem:[#allocation5 + $0x174] ss:$8 sps:$4 sm:$0x33]   ;;  %v6491_v47 = vrot.slane %v6483_v23, %v14476_v21 }
 0x487   : > { %17036 = vst [vmem:[#allocation40_spill] sm:$0xff] %v16272_v7  ;;  %v8438_v9 = vadd.f32 %v8430_v34, %v8240_v44  ;;  %v12925_v1 = vld [vmem:[#allocation5 + $0x1d0] ss:$8 sps:$4 sm:$0x33]   ;;  %v16279_v14 = vrot.slane %v12944_v0, %v13613_v59  ;;  %v7643_v11 = vrot.slane %v7636_v38, %v13613_v59  ;;  %v10275_v34 = vcombine.high %v10274_v48, %v10274_v48 }
 0x488   : > { %v8620_v36 = vmul.f32 %v17037_v2, %v8534_v19  ;;  %v16281_v8 = vld [vmem:[#allocation5 + $0x170] ss:$8 sps:$4 sm:$0x33]   ;;  %v12929_v41 = vld [vmem:[#allocation5 + $0x1d0] ss:$8 sps:$4 sm:$0xcc]   ;;  %v17038_v23 = vrot.slane %v16070_v50, %v14476_v21  ;;  %v6499_v12 = vmul.f32 %v6491_v47, %v17002_v39  ;;  %v8922_v16 = vrot.slane %v12925_v1, %v13613_v59 }
 0x489   : > { %12465 = vst.sshfl [vmem:[#allocation5 + $0x1f8] sm:$0xc0 pattern:$0x76325410] %v7636_v38  ;;  %v7644_v57 = vcombine.low %v7643_v11, %v7643_v11  ;;  %v17040_v38 = vrot.slane %v16938_v60, %v15320_v22  ;;  %v17041_v1 = vrot.slane %v16939_v18, %v15320_v22  ;;  %v9887_v60 = vcombine.high %v16279_v14, %v16279_v14 }
 0x48a   : > { %v7992_v28 = vld [vmem:[#allocation5 + $0x1e8] sm:$0xff]  ;;  %v8628_v19 = vadd.f32 %v8620_v36, %v8438_v9  ;;  %v16291_v0 = vmul.f32 %v17038_v23, %v10838_v5  ;;  %v13003_v49 = vld [vmem:[#allocation5 + $0x174] ss:$8 sps:$4 sm:$0xcc]   ;;  %v9119_v9 = vrot.slane %v12929_v41, %v13613_v59  ;;  %v6570_v39 = vrot.slane %v6499_v12, %v13613_v59 }
 0x48b   : > { %v8000_v2 = vadd.f32 %v7992_v28, %v16212_v6  ;;  %v8818_v48 = vmul.f32 %v17040_v38, %v8732_v62  ;;  %v12980_v36 = vld [vmem:[#allocation5 + $0x1b0] ss:$8 sps:$4 sm:$0xcc]   ;;  %v16305_v6 = vpop.permute.xlu1 %9909  ;;  %v9008_v47 = vmul.f32 %v17041_v1, %v8922_v16  ;;  %v12937_v28 = vld [vmem:[#allocation5 + $0x1d4] ss:$8 sps:$4 sm:$0xcc]   ;;  %v16313_v62 = vrot.slane %v12979_v45, %v13613_v59 }
 0x48c   : > { %17039 = vst [vmem:[#allocation41_spill] sm:$0xff] %v16291_v0  ;;  %12417 = vst.sshfl [vmem:[#allocation5 + $0x1f0] sm:$0x3 pattern:$0x76325410] %v6499_v12  ;;  %v7991_v41 = vld [vmem:[#allocation5 + $0x1e0] sm:$0xff]  ;;  %v17042_v12 = vrot.slane %v15993_v53, %v15317_v43  ;;  %v10846_v18 = vrot.slane %v12999_v27, %v13613_v59  ;;  %v6571_v14 = vcombine.high %v6570_v39, %v6570_v39 }
 0x48d   : > { %8008 = vst [vmem:[#allocation5 + $0x1e8] sm:$0xff] %v8000_v2  ;;  %v13000_v11 = vld [vmem:[#allocation5 + $0x1b4] ss:$8 sps:$4 sm:$0x33]   ;;  %7675 = vst [vmem:[#allocation5 + $0x1f0] sm:$0xc0] %v7644_v57  ;;  %v8826_v23 = vadd.f32 %v8818_v48, %v8628_v19  ;;  %v9120_v2 = vcombine.high %v9119_v9, %v9119_v9  ;;  %v7999_v1 = vadd.f32 %v7991_v41, %v16193_v42 }
 0x48e   : > { %v12933_v38 = vld [vmem:[#allocation5 + $0x1d4] ss:$8 sps:$4 sm:$0x33]   ;;  %v16318_v44 = vmul.f32 %v17042_v12, %v10275_v34  ;;  %v9945_v45 = vrot.slane %v16305_v6, %v14476_v21  ;;  %v13004_v19 = vld [vmem:[#allocation5 + $0x1b4] ss:$8 sps:$4 sm:$0xcc]   ;;  %v17043_v34 = vrot.slane %v16932_v20, %v15320_v22  ;;  %v9952_v27 = vrot.slane %v16305_v6, %v15314_v13 }
 0x48f   : > { %v7977_v16 = vld [vmem:[#allocation4 + $0x1f8] sm:$0xff]  ;;  %v9016_v9 = vadd.f32 %v9008_v47, %v8826_v23  ;;  %8007 = vst [vmem:[#allocation5 + $0x1e0] sm:$0xff] %v7999_v1  ;;  %6603 = vst [vmem:[#allocation5 + $0x1f8] sm:$0x3] %v6571_v14  ;;  %v9507_v42 = vrot.slane %v12937_v28, %v13613_v59  ;;  %v9959_v39 = vrot.slane %v16305_v6, %v15317_v43  ;;  %v16341_v20 = vpop.permute.xlu1 %10099  ;;  %v7976_v14 = vld [vmem:[#allocation4 + $0x1f0] sm:$0xff] }
 0x490   : > { %v7985_v48 = vmul.f32 %v7977_v16, %v16045_v61  ;;  %v9206_v12 = vmul.f32 %v17043_v34, %v9120_v2  ;;  %v16338_v61 = vrot.slane %v13003_v49, %v13613_v59  ;;  %v9310_v47 = vrot.slane %v12933_v38, %v13613_v59  ;;  %v16343_v23 = vld [vmem:[#allocation5 + $0x1b0] ss:$8 sps:$4 sm:$0x33]  }
 0x491   : > { %v16346_v2 = vrot.slane %v12980_v36, %v13613_v59  ;;  %v10854_v28 = vrot.slane %v13000_v11, %v13613_v59  ;;  %v17044_v16 = vrot.slane %v16070_v50, %v15314_v13  ;;  %v17046_v49 = vcombine.high %v16128_v31, %v16128_v31 }
 0x492   : > { %v10135_v38 = vrot.slane %v16341_v20, %v14476_v21  ;;  %v10142_v41 = vrot.slane %v16341_v20, %v15314_v13  ;;  %v16362_v36 = vrot.slane %v13004_v19, %v13613_v59  ;;  %v7984_v11 = vmul.f32 %v7976_v14, %v16072_v30 }
 0x493   : > { %v16352_v1 = vmul.f32 %v17044_v16, %v10846_v18  ;;  %v9979_v34 = vmul.f32 %v9945_v45, %v17046_v49  ;;  %v9214_v57 = vadd.f32 %v9206_v12, %v9016_v9  ;;  %v17047_v18 = vcombine.high %v16142_v55, %v16142_v55 }
 0x494   : > { %v10149_v31 = vrot.slane %v16341_v20, %v15317_v43  ;;  %v7993_v45 = vld [vmem:[#allocation5 + $0x1f0] sm:$0xff]  ;;  %v9508_v49 = vcombine.high %v9507_v42, %v9507_v42  ;;  %v9981_v5 = vmul.f32 %v9959_v39, %v9887_v60  ;;  %v17048_v7 = vrot.slane %v16118_v25, %v13613_v59  ;;  %v10295_v42 = vpop.permute.xlu1 %10294 }
 0x495   : > { %17045 = vst [vmem:[#allocation42_spill] sm:$0xff] %v16352_v1  ;;  %v9980_v16 = vmul.f32 %v9952_v27, %v17047_v18  ;;  %v11042_v19 = vcombine.high %v16338_v61, %v16338_v61  ;;  %v8001_v0 = vadd.f32 %v7993_v45, %v7984_v11  ;;  %v17049_v30 = vrot.slane %v16943_v63, %v15320_v22 }
 0x496   : > { %v10169_v1 = vmul.f32 %v10135_v38, %v17048_v7  ;;  %v17050_v55 = vrot.slane %v16130_v40, %v13613_v59  ;;  %v10466_v27 = vrot.slane %v16343_v23, %v13613_v59  ;;  %v9987_v60 = vadd.f32 %v9979_v34, %v15794_v58  ;;  %v12945_v45 = vld [vmem:[#allocation5 + $0x1e0] ss:$8 sps:$4 sm:$0xcc]  }
 0x497   : > { %v9396_v9 = vmul.f32 %v17049_v30, %v9310_v47  ;;  %v10663_v25 = vcombine.high %v16346_v2, %v16346_v2  ;;  %v17051_v7 = vrot.slane %v16070_v50, %v15317_v43  ;;  %v11051_v63 = vcombine.high %v16362_v36, %v16362_v36  ;;  %v7994_v47 = vld [vmem:[#allocation5 + $0x1f8] sm:$0xff]  ;;  %8009 = vst [vmem:[#allocation5 + $0x1f0] sm:$0xff] %v8001_v0 }
 0x498   : > { %v10170_v12 = vmul.f32 %v10142_v41, %v17050_v55  ;;  %v12941_v41 = vld [vmem:[#allocation5 + $0x1e0] ss:$8 sps:$4 sm:$0x33]   ;;  %v9988_v14 = vadd.f32 %v9980_v16, %v15893_v24  ;;  %v17052_v58 = vrot.slane %v16260_v35, %v13613_v59  ;;  %v10305_v38 = vrot.slane %v10295_v42, %v14476_v21 }
 0x499   : > { %v16389_v39 = vmul.f32 %v17051_v7, %v10854_v28  ;;  %v9404_v40 = vadd.f32 %v9396_v9, %v9214_v57  ;;  %v8002_v11 = vadd.f32 %v7994_v47, %v7985_v48  ;;  %v17053_v28 = vrot.slane %v16948_v17, %v15320_v22  ;;  %v12949_v57 = vld [vmem:[#allocation5 + $0x1e4] ss:$8 sps:$4 sm:$0x33]  }
 0x49a   : > { %v10171_v34 = vmul.f32 %v10149_v31, %v17052_v58  ;;  %v9989_v30 = vadd.f32 %v9981_v5, %v16009_v51  ;;  %v10177_v55 = vadd.f32 %v10169_v1, %v9987_v60  ;;  %v9698_v0 = vrot.slane %v12941_v41, %v13613_v59  ;;  %v12972_v5 = vld [vmem:[#allocation5 + $0x1e4] ss:$8 sps:$4 sm:$0xcc]   ;;  %v17054_v31 = vld [vmem:[#allocation48_spill] sm:$0xff]  ;;  %v10485_v41 = vpop.permute.xlu1 %10484 }
 0x49b   : > { %v9594_v18 = vmul.f32 %v17053_v28, %v9508_v49  ;;  %v10178_v9 = vadd.f32 %v10170_v12, %v9988_v14  ;;  %v10312_v24 = vrot.slane %v10295_v42, %v15314_v13  ;;  %v10319_v35 = vrot.slane %v10295_v42, %v15317_v43  ;;  %8010 = vst [vmem:[#allocation5 + $0x1f8] sm:$0xff] %v8002_v11 }
 0x49c   : > { %v9895_v16 = vrot.slane %v12945_v45, %v13613_v59  ;;  %v9966_v48 = vrot.slane %v16305_v6, %v15320_v22  ;;  %v10156_v17 = vrot.slane %v16341_v20, %v15320_v22  ;;  %v10326_v51 = vrot.slane %v10295_v42, %v15320_v22 }
 0x49d   : > { %v9602_v1 = vadd.f32 %v9594_v18, %v9404_v40  ;;  %v17055_v49 = vrot.slane %v17054_v31, %v15320_v22  ;;  %v10179_v60 = vadd.f32 %v10171_v34, %v9989_v30  ;;  %v17056_v7 = vcombine.high %v16053_v46, %v16053_v46 }
 0x49e   : > { %v9896_v14 = vcombine.high %v9895_v16, %v9895_v16  ;;  %v10086_v6 = vrot.slane %v12949_v57, %v13613_v59  ;;  %v10495_v58 = vrot.slane %v10485_v41, %v14476_v21  ;;  %v10375_v20 = vadd.f32 %v16226_v26, %v10177_v55  ;;  %v10488_v57 = vpop.permute.xlu1 %10487 }
 0x49f   : > { %v9784_v12 = vmul.f32 %v17055_v49, %v9698_v0  ;;  %v10363_v47 = vmul.f32 %v10305_v38, %v17056_v7  ;;  %v17057_v40 = vcombine.high %v16148_v56, %v16148_v56  ;;  %v17058_v34 = vcombine.high %v16159_v54, %v16159_v54  ;;  %v17064_v7 = vld [vmem:[#allocation18_spill] sm:$0xff] }
 0x4a0   : > { %v10376_v46 = vadd.f32 %v16231_v15, %v10178_v9  ;;  %v9982_v38 = vmul.f32 %v9966_v48, %v9896_v14  ;;  %v17059_v18 = vcombine.high %v16165_v52, %v16165_v52  ;;  %v10502_v30 = vrot.slane %v10485_v41, %v15314_v13  ;;  %v17061_v48 = vld [vmem:[#allocation14_spill] sm:$0xff] }
 0x4a1   : > { %v9792_v42 = vadd.f32 %v9784_v12, %v9602_v1  ;;  %v10364_v11 = vmul.f32 %v10312_v24, %v17057_v40  ;;  %v10365_v28 = vmul.f32 %v10319_v35, %v17058_v34  ;;  %v10283_v26 = vrot.slane %v12972_v5, %v13613_v59 }
 0x4a2   : > { %v10366_v45 = vmul.f32 %v10326_v51, %v17059_v18  ;;  %v10371_v55 = vadd.f32 %v10363_v47, %v16029_v33  ;;  %v10509_v56 = vrot.slane %v10485_v41, %v15317_v43  ;;  %v10516_v0 = vrot.slane %v10485_v41, %v15320_v22  ;;  %v12976_v5 = vld [vmem:[#allocation5 + $0x1f0] ss:$8 sps:$4 sm:$0x33]  }
 0x4a3   : > { %v10377_v54 = vadd.f32 %v16318_v44, %v10179_v60  ;;  %v9990_v24 = vadd.f32 %v9982_v38, %v9792_v42  ;;  %v10172_v15 = vmul.f32 %v10156_v17, %v10086_v6  ;;  %v17060_v9 = vrot.slane %v16096_v4, %v13613_v59  ;;  %v17062_v44 = vld [vmem:[#allocation24_spill] sm:$0xff]  ;;  %v10686_v38 = vpop.permute.xlu1 %10685 }
 0x4a4   : > { %v10284_v35 = vcombine.high %v10283_v26, %v10283_v26  ;;  %v10372_v16 = vadd.f32 %v10364_v11, %v16041_v10  ;;  %v10373_v51 = vadd.f32 %v10365_v28, %v17061_v48  ;;  %v10523_v33 = vrot.slane %v10488_v57, %v14476_v21  ;;  %v12981_v60 = vld [vmem:[#allocation5 + $0x1f0] ss:$8 sps:$4 sm:$0xcc]  }
 0x4a5   : > { %v10553_v52 = vmul.f32 %v10495_v58, %v17060_v9  ;;  %v10530_v1 = vrot.slane %v10488_v57, %v15314_v13  ;;  %v10180_v31 = vadd.f32 %v10172_v15, %v9990_v24  ;;  %v10374_v49 = vadd.f32 %v10366_v45, %v16218_v3  ;;  %v17066_v41 = vld [vmem:[#allocation20_spill] sm:$0xff] }
 0x4a6   : > { %v17063_v17 = vrot.slane %v17062_v44, %v13613_v59  ;;  %v10537_v4 = vrot.slane %v10488_v57, %v15317_v43  ;;  %v17065_v10 = vrot.slane %v17064_v7, %v13613_v59  ;;  %v17067_v14 = vrot.slane %v17066_v41, %v13613_v59  ;;  %v13001_v24 = vld [vmem:[#allocation5 + $0x1f4] ss:$8 sps:$4 sm:$0x33]  }
 0x4a7   : > { %v10474_v58 = vrot.slane %v12976_v5, %v13613_v59  ;;  %v10544_v42 = vrot.slane %v10488_v57, %v15320_v22  ;;  %v10561_v3 = vadd.f32 %v10553_v52, %v10371_v55  ;;  %v17068_v40 = vrot.slane %v15993_v53, %v15320_v22 }
 0x4a8   : > { %v10554_v12 = vmul.f32 %v10502_v30, %v17063_v17  ;;  %v10555_v47 = vmul.f32 %v10509_v56, %v17065_v10  ;;  %v10556_v6 = vmul.f32 %v10516_v0, %v17067_v14  ;;  %v17069_v34 = vrot.slane %v16176_v37, %v13613_v59  ;;  %v10873_v17 = vpop.permute.xlu1 %10872  ;;  %v17076_v14 = vld [vmem:[#allocation17_spill] sm:$0xff] }
 0x4a9   : > { %v10370_v11 = vmul.f32 %v17068_v40, %v10284_v35  ;;  %v10671_v18 = vrot.slane %v12981_v60, %v13613_v59  ;;  %v17070_v45 = vrot.slane %v16281_v8, %v13613_v59  ;;  %v10559_v26 = vmul.f32 %v10537_v4, %v10466_v27  ;;  %v17071_v8 = vld [vmem:[#allocation21_spill] sm:$0xff] }
 0x4aa   : > { %v10557_v28 = vmul.f32 %v10523_v33, %v17069_v34  ;;  %v10560_v55 = vmul.f32 %v10544_v42, %v10474_v58  ;;  %v10721_v56 = vrot.slane %v10686_v38, %v14476_v21  ;;  %v10728_v57 = vrot.slane %v10686_v38, %v15314_v13  ;;  %v17078_v42 = vld [vmem:[#allocation16_spill] sm:$0xff]  ;;  %v17079_v34 = vld [vmem:[#allocation22_spill] sm:$0xff] }
 0x4ab   : > { %v10558_v30 = vmul.f32 %v10530_v1, %v17070_v45  ;;  %v10378_v53 = vadd.f32 %v10370_v11, %v10180_v31  ;;  %v10672_v0 = vcombine.high %v10671_v18, %v10671_v18  ;;  %v10735_v37 = vrot.slane %v10686_v38, %v15317_v43  ;;  %v17081_v45 = vld [vmem:[#allocation25_spill] sm:$0xff] }
 0x4ac   : > { %v10562_v15 = vadd.f32 %v10554_v12, %v10372_v16  ;;  %v10563_v9 = vadd.f32 %v10555_v47, %v10373_v51  ;;  %v10742_v52 = vrot.slane %v10686_v38, %v15320_v22  ;;  %v17072_v35 = vcombine.high %v17071_v8, %v17071_v8  ;;  %v13005_v12 = vld [vmem:[#allocation5 + $0x1f4] ss:$8 sps:$4 sm:$0xcc]  }
 0x4ad   : > { %v10565_v23 = vadd.f32 %v10557_v28, %v10375_v20  ;;  %v10568_v27 = vadd.f32 %v10560_v55, %v10378_v53  ;;  %v17073_v5 = vcombine.high %v16313_v62, %v16313_v62  ;;  %v10757_v1 = vmul.f32 %v10735_v37, %v10663_v25 }
 0x4ae   : > { %v10755_v48 = vmul.f32 %v10721_v56, %v17072_v35  ;;  %v10564_v31 = vadd.f32 %v10556_v6, %v10374_v49  ;;  %v10566_v44 = vadd.f32 %v10558_v30, %v10376_v46  ;;  %v10567_v16 = vadd.f32 %v10559_v26, %v10377_v54  ;;  %v17074_v49 = vld [vmem:[#allocation19_spill] sm:$0xff]  ;;  %v11071_v56 = vpop.permute.xlu1 %11070 }
 0x4af   : > { %v10756_v33 = vmul.f32 %v10728_v57, %v17073_v5  ;;  %v10758_v51 = vmul.f32 %v10742_v52, %v10672_v0  ;;  %v10883_v60 = vrot.slane %v10873_v17, %v14476_v21  ;;  %v10890_v20 = vrot.slane %v10873_v17, %v15314_v13  ;;  %v17075_v54 = vld [vmem:[#allocation15_spill] sm:$0xff] }
 0x4b0   : > { %v10763_v4 = vadd.f32 %v10755_v48, %v10565_v23  ;;  %v10862_v7 = vrot.slane %v13001_v24, %v13613_v59  ;;  %v10765_v62 = vadd.f32 %v10757_v1, %v10567_v16  ;;  %v10897_v47 = vrot.slane %v10873_v17, %v15317_v43 }
 0x4b1   : > { %v10764_v10 = vadd.f32 %v10756_v33, %v10566_v44  ;;  %v10904_v2 = vrot.slane %v10873_v17, %v15320_v22  ;;  %v10766_v25 = vadd.f32 %v10758_v51, %v10568_v27  ;;  %v10759_v46 = vadd.f32 %v17074_v49, %v10561_v3  ;;  %v17087_v27 = vld [vmem:[#allocation23_spill] sm:$0xff]  ;;  %v17089_v33 = vld [vmem:[#allocation26_spill] sm:$0xff] }
 0x4b2   : > { %v10760_v41 = vadd.f32 %v17075_v54, %v10562_v15  ;;  %v17077_v6 = vrot.slane %v17076_v14, %v13613_v59  ;;  %v10761_v40 = vadd.f32 %v17078_v42, %v10563_v9  ;;  %v10762_v11 = vadd.f32 %v16265_v29, %v10564_v31  ;;  %v17085_v29 = vld [vmem:[#allocation41_spill] sm:$0xff]  ;;  %v17086_v15 = vld [vmem:[#allocation42_spill] sm:$0xff]  ;;  %v17097_v42 = vld [vmem:[#allocation40_spill] sm:$0xff] }
 0x4b3   : > { %v17080_v28 = vrot.slane %v17079_v34, %v13613_v59  ;;  %v11059_v18 = vrot.slane %v13005_v12, %v13613_v59  ;;  %v17082_v30 = vrot.slane %v17081_v45, %v13613_v59  ;;  %v17083_v26 = vrot.slane %v16239_v32, %v13613_v59  ;;  %v17091_v17 = vld [vmem:[#allocation38_spill] sm:$0xff] }
 0x4b4   : > { %v10941_v58 = vmul.f32 %v10883_v60, %v17077_v6  ;;  %v17084_v53 = vrot.slane %v16070_v50, %v15320_v22  ;;  %v10953_v57 = vadd.f32 %v17085_v29, %v10763_v4  ;;  %v11081_v37 = vrot.slane %v11071_v56, %v14476_v21  ;;  %v17093_v4 = vld [vmem:[#allocation39_spill] sm:$0xff]  ;;  %v17102_v29 = vld [vmem:[#allocation29_spill] sm:$0xff] }
 0x4b5   : > { %v10942_v38 = vmul.f32 %v10890_v20, %v17080_v28  ;;  %v10943_v3 = vmul.f32 %v10897_v47, %v17082_v30  ;;  %v10944_v55 = vmul.f32 %v10904_v2, %v17083_v26  ;;  %v11088_v24 = vrot.slane %v11071_v56, %v15314_v13  ;;  %v17099_v28 = vld [vmem:[#allocation34_spill] sm:$0xff]  ;;  %v17101_v26 = vld [vmem:[#allocation28_spill] sm:$0xff] }
 0x4b6   : > { %v10948_v0 = vmul.f32 %v17084_v53, %v10862_v7  ;;  %v10954_v9 = vadd.f32 %v17086_v15, %v10764_v10  ;;  %v10955_v52 = vadd.f32 %v16389_v39, %v10765_v62  ;;  %v10949_v8 = vadd.f32 %v10941_v58, %v10759_v46  ;;  %v11074_v7 = vpop.permute.xlu1 %11073 }
 0x4b7   : > { %v11095_v35 = vrot.slane %v11071_v56, %v15317_v43  ;;  %v11102_v32 = vrot.slane %v11071_v56, %v15320_v22  ;;  %v10950_v23 = vadd.f32 %v10942_v38, %v10760_v41  ;;  %v17088_v50 = vcombine.high %v17087_v27, %v17087_v27  ;;  %v17095_v41 = vld [vmem:[#allocation33_spill] sm:$0xff] }
 0x4b8   : > { %v10956_v48 = vadd.f32 %v10948_v0, %v10766_v25  ;;  %v17090_v1 = vcombine.high %v17089_v33, %v17089_v33  ;;  %v11060_v44 = vcombine.high %v11059_v18, %v11059_v18  ;;  %v10951_v16 = vadd.f32 %v10943_v3, %v10761_v40 }
 0x4b9   : > { %v11139_v5 = vmul.f32 %v11081_v37, %v17088_v50  ;;  %v10952_v51 = vadd.f32 %v10944_v55, %v10762_v11  ;;  %v17092_v39 = vcombine.high %v17091_v17, %v17091_v17  ;;  %v17094_v60 = vcombine.high %v17093_v4, %v17093_v4 }
 0x4ba   : > { %v11140_v31 = vmul.f32 %v11088_v24, %v17090_v1  ;;  %v11109_v47 = vrot.slane %v11074_v7, %v14476_v21  ;;  %v11116_v2 = vrot.slane %v11074_v7, %v15314_v13  ;;  %v11123_v46 = vrot.slane %v11074_v7, %v15317_v43 }
 0x4bb   : > { %v11141_v12 = vmul.f32 %v11095_v35, %v17092_v39  ;;  %v11142_v20 = vmul.f32 %v11102_v32, %v17094_v60  ;;  %v11147_v10 = vadd.f32 %v11139_v5, %v10949_v8  ;;  %v11130_v54 = vrot.slane %v11074_v7, %v15320_v22  ;;  %v13354_v7 = vld [vmem:[#allocation2] sm:$0x3] }
 0x4bc   : > { %v11148_v62 = vadd.f32 %v11140_v31, %v10950_v23  ;;  %v17096_v6 = vcombine.high %v17095_v41, %v17095_v41  ;;  %v17098_v40 = vcombine.high %v17097_v42, %v17097_v42  ;;  %v11144_v34 = vmul.f32 %v11116_v2, %v11042_v19  ;;  %v13358_v42 = vld [vmem:[#allocation2 + $0x6] sm:$0x3] }
 0x4bd   : > { %v11149_v25 = vadd.f32 %v11141_v12, %v10951_v16  ;;  %v11150_v49 = vadd.f32 %v11142_v20, %v10952_v51  ;;  %v11231_v14 = vmul.f32 %v17095_v41, %v11147_v10  ;;  %v17100_v18 = vcombine.high %v17099_v28, %v17099_v28 }
 0x4be   : > { %v11232_v58 = vmul.f32 %v17096_v6, %v11148_v62  ;;  %v11143_v11 = vmul.f32 %v11109_v47, %v17098_v40  ;;  %v11145_v30 = vmul.f32 %v11123_v46, %v11051_v63  ;;  %v11146_v3 = vmul.f32 %v11130_v54, %v11060_v44  ;;  %v13356_v46 = vld [vmem:[#allocation2 + $0x4] sm:$0x3]  ;;  %v13357_v6 = vld [vmem:[#allocation2 + $0x8] sm:$0x3] }
 0x4bf   : > { %v11233_v38 = vmul.f32 %v17099_v28, %v11149_v25  ;;  %v11234_v45 = vmul.f32 %v17100_v18, %v11150_v49  ;;  %v11221_v55 = vcombine.high %v17101_v26, %v17101_v26  ;;  %v11152_v53 = vadd.f32 %v11144_v34, %v10954_v9  ;;  %v13355_v25 = vld [vmem:[#allocation2 + $0x2] sm:$0x3]  ;;  %v13359_v34 = vld [vmem:[#allocation2 + $0xc] sm:$0x3] }
 0x4c0   : > { %v11151_v56 = vadd.f32 %v11143_v11, %v10953_v57  ;;  %v11247_v0 = vcombine.low %v11231_v14, %v11232_v58  ;;  %v11222_v61 = vcombine.high %v17102_v29, %v17102_v29  ;;  %v11153_v19 = vadd.f32 %v11145_v30, %v10955_v52 }
 0x4c1   : > { %v11154_v37 = vadd.f32 %v11146_v3, %v10956_v48  ;;  %v11248_v24 = vcombine.low %v11233_v38, %v11234_v45  ;;  %v11236_v8 = vmul.f32 %v11221_v55, %v11152_v53  ;;  %v13360_v38 = vld [vmem:[#allocation2 + $0xa] sm:$0x3]  ;;  %v13361_v45 = vld [vmem:[#allocation2 + $0xe] sm:$0x3] }
 0x4c2   : > { %v11235_v15 = vmul.f32 %v17101_v26, %v11151_v56  ;;  %v11255_v35 = vrot.slane %v11247_v0, %v13613_v59  ;;  %v11237_v36 = vmul.f32 %v17102_v29, %v11153_v19 }
 0x4c3   : > { %v11238_v63 = vmul.f32 %v11222_v61, %v11154_v37  ;;  %v11262_v32 = vrot.slane %v11248_v24, %v13613_v59 }
 0x4c4   : > { %v11265_v23 = vcombine.low %v11235_v15, %v11236_v8 }
 0x4c5   : > { %v11264_v57 = vcombine.high %v11255_v35, %v11262_v32  ;;  %v11266_v9 = vcombine.low %v11237_v36, %v11238_v63  ;;  %v11263_v27 = vcombine.low %v11255_v35, %v11262_v32 }
 0x4c6   : > { %v11273_v50 = vrot.slane %v11265_v23, %v13613_v59 }
 0x4c7   : > { %v11280_v52 = vrot.slane %v11266_v9, %v13613_v59 }
 0x4c9   : > { %v11282_v48 = vcombine.high %v11273_v50, %v11280_v52  ;;  %v11281_v5 = vcombine.low %v11273_v50, %v11280_v52 }
 0x4cb   : > { %v11288_v33 = vpack.c.bf16 %v11282_v48, %v11264_v57  ;;  %v11287_v1 = vpack.c.bf16 %v11281_v5, %v11263_v27 }
 0x4cd   : > { %11449 = vmatprep.mubr.bf16.mxu1 %v11288_v33 }
 0x4ce   : > { %11450 = vmatmul.mubr.bf16.vlgmr.msra.gmra.mrb[8].mxu1 %v11287_v1 }
 0x5a1   : > { %v12537_v31 = vpop.f32.mrb[8].mxu1 }
 0x5a2   : > { %v12538_v44 = vpop.f32.mrb[9].mxu1 }
 0x5a3   : > { %v12539_v16 = vadd.f32 %v12538_v44, %v12537_v31  ;;  %v12540_v51 = vpop.f32.mrb[10].mxu1 }
 0x5a4   : > { %v12541_v17 = vpop.f32.mrb[11].mxu1 }
 0x5a5   : > { %v11460_v39 = vcombine.high %v12539_v16, %v12539_v16  ;;  %v11467_v12 = vrot.slane %v12539_v16, %v13613_v59  ;;  %v12542_v4 = vadd.f32 %v12541_v17, %v12540_v51 }
 0x5a7   : > { %v11474_v60 = vrot.slane %v11460_v39, %v13613_v59  ;;  %v11475_v20 = vcombine.high %v11467_v12, %v11467_v12  ;;  %v11502_v10 = vadd.f32 %v13354_v7, %v11467_v12  ;;  %v11477_v62 = vcombine.high %v12542_v4, %v12542_v4 }
 0x5a8   : > { %v11484_v47 = vrot.slane %v12542_v4, %v13613_v59 }
 0x5a9   : > { %v11476_v2 = vcombine.high %v11474_v60, %v11474_v60  ;;  %v11503_v49 = vadd.f32 %v13355_v25, %v11475_v20  ;;  %v11504_v54 = vadd.f32 %v13356_v46, %v11474_v60  ;;  %11510 = vst [vmem:[#allocation2] sm:$0x3] %v11502_v10  ;;  %v11491_v41 = vrot.slane %v11477_v62, %v13613_v59  ;;  %11521 = sbr.rel (%p12486_p6) target bundleno = 1797 (0x705), region = 72 }
 0x5aa   : > { %v11492_v14 = vcombine.high %v11484_v47, %v11484_v47  ;;  %v11506_v58 = vadd.f32 %v13357_v6, %v11484_v47 }
 0x5ab   : > { %v11505_v40 = vadd.f32 %v13358_v42, %v11476_v2  ;;  %11511 = vst [vmem:[#allocation2 + $0x2] sm:$0x3] %v11503_v49  ;;  %11512 = vst [vmem:[#allocation2 + $0x4] sm:$0x3] %v11504_v54  ;;  %v11493_v11 = vcombine.high %v11491_v41, %v11491_v41  ;;  %v11508_v28 = vadd.f32 %v13359_v34, %v11491_v41 }
 0x5ac   : > { %v11507_v18 = vadd.f32 %v13360_v38, %v11492_v14  ;;  %11514 = vst [vmem:[#allocation2 + $0x8] sm:$0x3] %v11506_v58  ;;  %v11530_v3 = vcombine.low (!%p12486_p6), %v11502_v10, %v11503_v49 }
 0x5ad   : > { %11513 = vst [vmem:[#allocation2 + $0x6] sm:$0x3] %v11505_v40  ;;  %v11509_v30 = vadd.f32 %v13361_v45, %v11493_v11  ;;  %11516 = vst [vmem:[#allocation2 + $0xc] sm:$0x3] %v11508_v28  ;;  %v11531_v26 = vcombine.low (!%p12486_p6), %v11504_v54, %v11505_v40 }
 0x5ae   : > { %11515 = vst [vmem:[#allocation2 + $0xa] sm:$0x3] %v11507_v18  ;;  %v11547_v55 = vcombine.low (!%p12486_p6), %v11506_v58, %v11507_v18  ;;  %v11538_v53 = vrot.slane (!%p12486_p6), %v11530_v3, %v13613_v59 }
 0x5af   : > { %11517 = vst [vmem:[#allocation2 + $0xe] sm:$0x3] %v11509_v30  ;;  %v11548_v56 = vcombine.low (!%p12486_p6), %v11508_v28, %v11509_v30  ;;  %v11545_v0 = vrot.slane (!%p12486_p6), %v11531_v26, %v13613_v59  ;;  %v13461_v26 = vmov (!%p12486_p6), 1934713408  }
 0x5b0   : > { %v11555_v29 = vrot.slane %v11547_v55, %v13613_v59  ;;  %v11855_v55 = vunpack.c.l.s4 %v13461_v26 }
 0x5b1   : > { %v11562_v61 = vrot.slane %v11548_v56, %v13613_v59  ;;  %v11546_v19 = vcombine.low %v11538_v53, %v11545_v0 }
 0x5b3   : > { %11566 = vadd.xlane.f32.xlu0 %v11546_v19  ;;  %v11563_v37 = vcombine.low %v11555_v29, %v11562_v61  ;;  %v11856_v19 = vunpack.c.0.s8 %v11855_v55 }
 0x5b7   : > { %11568 = vadd.xlane.f32.xlu0 %v11563_v37 }
 0x640   : > { %v11567_v24 = vpop.xlane.xlu0 %11566 }
 0x641   : > { %v11571_v15 = vmul.f32 0.0078125, %v11567_v24 }
 0x643   : > { %v11581_v8 = vrot.slane %v11571_v15, %v14476_v21  ;;  %v11588_v35 = vrot.slane %v11571_v15, %v15314_v13  ;;  %v11595_v36 = vrot.slane %v11571_v15, %v15317_v43  ;;  %v11602_v63 = vrot.slane %v11571_v15, %v15320_v22 }
 0x644   : > { %v11569_v32 = vpop.xlane.xlu0 %11568 }
 0x645   : > { %v11572_v23 = vmul.f32 0.0078125, %v11569_v32  ;;  %v11639_v57 = vsub.f32 %v11502_v10, %v11581_v8  ;;  %v11640_v9 = vsub.f32 %v11503_v49, %v11588_v35  ;;  %v11641_v27 = vsub.f32 %v11504_v54, %v11595_v36 }
 0x646   : > { %v11642_v50 = vsub.f32 %v11505_v40, %v11602_v63  ;;  %v12487_v40 = vld [vmem:[%s16667_s9] ss:$0 sm:$0xff] }
 0x647   : > { %v11609_v52 = vrot.slane %v11572_v23, %v14476_v21  ;;  %v11616_v48 = vrot.slane %v11572_v23, %v15314_v13  ;;  %v11623_v5 = vrot.slane %v11572_v23, %v15317_v43  ;;  %v11630_v33 = vrot.slane %v11572_v23, %v15320_v22 }
 0x648   : > { %v11647_v1 = vmul.f32 %v11639_v57, %v11639_v57  ;;  %v11648_v31 = vmul.f32 %v11640_v9, %v11640_v9  ;;  %v11649_v44 = vmul.f32 %v11641_v27, %v11641_v27  ;;  %v11650_v16 = vmul.f32 %v11642_v50, %v11642_v50 }
 0x649   : > { %v16574_v51 = vsub.f32 %v11506_v58, %v11609_v52  ;;  %v16576_v17 = vsub.f32 %v11507_v18, %v11616_v48  ;;  %v16578_v39 = vsub.f32 %v11508_v28, %v11623_v5  ;;  %v16580_v12 = vsub.f32 %v11509_v30, %v11630_v33  ;;  %v12488_v28 = vld [vmem:[%s16668_s10] ss:$0 sm:$0xff]  ;;  %v17103_v5 = vld [vmem:[#allocation12_spill] sm:$0xff] }
 0x64a   : > { %v11663_v4 = vcombine.low %v11647_v1, %v11648_v31  ;;  %v11664_v60 = vcombine.low %v11649_v44, %v11650_v16  ;;  %v11789_v38 = vcombine.high %v12487_v40, %v12487_v40  ;;  %v11824_v45 = vcombine.high %v12488_v28, %v12488_v28 }
 0x64b   : > { %v11651_v20 = vmul.f32 %v16574_v51, %v16574_v51  ;;  %v11652_v7 = vmul.f32 %v16576_v17, %v16576_v17  ;;  %v11653_v10 = vmul.f32 %v16578_v39, %v16578_v39  ;;  %v11654_v62 = vmul.f32 %v16580_v12, %v16580_v12 }
 0x64c   : > { %v11671_v47 = vrot.slane %v11663_v4, %v13613_v59  ;;  %v11678_v2 = vrot.slane %v11664_v60, %v13613_v59  ;;  %v11796_v30 = vrot.slane %v12487_v40, %v13613_v59  ;;  %v11803_v3 = vrot.slane %v11789_v38, %v13613_v59 }
 0x64d   : > { %v11680_v25 = vcombine.low %v11651_v20, %v11652_v7  ;;  %v11681_v49 = vcombine.low %v11653_v10, %v11654_v62  ;;  %v11831_v56 = vrot.slane %v12488_v28, %v13613_v59  ;;  %v11838_v53 = vrot.slane %v11824_v45, %v13613_v59 }
 0x64e   : > { %v11679_v46 = vcombine.low %v11671_v47, %v11678_v2  ;;  %v11804_v29 = vcombine.high %v11796_v30, %v11796_v30  ;;  %v11805_v61 = vcombine.high %v11803_v3, %v11803_v3  ;;  %v11859_v33 = vsub.s32 %v11856_v19, %v17103_v5 }
 0x64f   : > { %v11688_v54 = vrot.slane %v11680_v25, %v13613_v59  ;;  %v11695_v41 = vrot.slane %v11681_v49, %v13613_v59  ;;  %v11839_v35 = vcombine.high %v11831_v56, %v11831_v56  ;;  %v11840_v36 = vcombine.high %v11838_v53, %v11838_v53 }
 0x650   : > { %11699 = vadd.xlane.f32.xlu1 %v11679_v46 }
 0x651   : > { %v11696_v14 = vcombine.low %v11688_v54, %v11695_v41 }
 0x654   : > { %11701 = vadd.xlane.f32.xlu1 %v11696_v14 }
 0x6dd   : > { %v11700_v6 = vpop.xlane.xlu1 %11699 }
 0x6de   : > { %v11703_v58 = vmul.f32 0.0078125, %v11700_v6 }
 0x6e0   : > { %v11705_v42 = vadd.f32 1e-05, %v11703_v58 }
 0x6e1   : > { %v11702_v11 = vpop.xlane.xlu1 %11701 }
 0x6e2   : > { %13362 = vrsqrt.f32 %v11705_v42  ;;  %v11704_v34 = vmul.f32 0.0078125, %v11702_v11 }
 0x6e4   : > { %v11706_v18 = vadd.f32 1e-05, %v11704_v34 }
 0x6e6   : > { %13364 = vrsqrt.f32 %v11706_v18 }
 0x6ec   : > { %v13363_v0 = vpop.eup %13362 }
 0x6ed   : > { %v11717_v37 = vrot.slane %v13363_v0, %v14476_v21  ;;  %v11724_v24 = vrot.slane %v13363_v0, %v15314_v13  ;;  %v11731_v15 = vrot.slane %v13363_v0, %v15317_v43  ;;  %v11738_v8 = vrot.slane %v13363_v0, %v15320_v22 }
 0x6ef   : > { %v11775_v63 = vmul.f32 %v11717_v37, %v11639_v57  ;;  %v11776_v32 = vmul.f32 %v11724_v24, %v11640_v9  ;;  %v11777_v23 = vmul.f32 %v11731_v15, %v11641_v27  ;;  %v11778_v52 = vmul.f32 %v11738_v8, %v11642_v50 }
 0x6f0   : > { %v13365_v48 = vpop.eup %13364 }
 0x6f1   : > { %v11810_v1 = vmul.f32 %v11796_v30, %v11775_v63  ;;  %v11811_v31 = vmul.f32 %v11804_v29, %v11776_v32  ;;  %v11812_v44 = vmul.f32 %v11803_v3, %v11777_v23  ;;  %v11813_v16 = vmul.f32 %v11805_v61, %v11778_v52 }
 0x6f2   : > { %v11745_v4 = vrot.slane %v13365_v48, %v14476_v21  ;;  %v11752_v60 = vrot.slane %v13365_v48, %v15314_v13  ;;  %v11759_v20 = vrot.slane %v13365_v48, %v15317_v43  ;;  %v11766_v7 = vrot.slane %v13365_v48, %v15320_v22 }
 0x6f3   : > { %v11845_v10 = vadd.f32 %v11831_v56, %v11810_v1  ;;  %v11846_v57 = vadd.f32 %v11839_v35, %v11811_v31  ;;  %v11847_v9 = vadd.f32 %v11838_v53, %v11812_v44  ;;  %v11848_v27 = vadd.f32 %v11840_v36, %v11813_v16 }
 0x6f4   : > { %v11779_v50 = vmul.f32 %v11745_v4, %v16574_v51  ;;  %v11780_v62 = vmul.f32 %v11752_v60, %v16576_v17  ;;  %v11781_v47 = vmul.f32 %v11759_v20, %v16578_v39  ;;  %v11782_v2 = vmul.f32 %v11766_v7, %v16580_v12 }
 0x6f5   : > { %v11853_v25 = vcombine.low %v11845_v10, %v11846_v57  ;;  %v11862_v21 = vcombine.low %v11847_v9, %v11848_v27 }
 0x6f6   : > { %v11814_v49 = vmul.f32 %v11796_v30, %v11779_v50  ;;  %v11815_v13 = vmul.f32 %v11804_v29, %v11780_v62  ;;  %v11816_v46 = vmul.f32 %v11803_v3, %v11781_v47  ;;  %v11817_v43 = vmul.f32 %v11805_v61, %v11782_v2 }
 0x6f7   : > { %v11860_v54 = vrot.slane %v11853_v25, %v11859_v33  ;;  %v11869_v22 = vrot.slane %v11862_v21, %v11859_v33 }
 0x6f8   : > { %v11849_v41 = vadd.f32 %v11831_v56, %v11814_v49  ;;  %v11850_v14 = vadd.f32 %v11839_v35, %v11815_v13  ;;  %v11851_v6 = vadd.f32 %v11838_v53, %v11816_v46  ;;  %v11852_v58 = vadd.f32 %v11840_v36, %v11817_v43 }
 0x6f9   : > { %v11897_v40 = vcombine.low %v11860_v54, %v11869_v22  ;;  %v12489_v17 = vcombine.high %v11860_v54, %v11869_v22 }
 0x6fa   : > { %v11871_v42 = vcombine.low %v11849_v41, %v11850_v14  ;;  %v11880_v51 = vcombine.low %v11851_v6, %v11852_v58 }
 0x6fb   : > { %v11905_v28 = vrot.slane %v11897_v40, %v13613_v59  ;;  %v11922_v38 = vrot.slane %v12489_v17, %v13613_v59 }
 0x6fc   : > { %v11878_v11 = vrot.slane %v11871_v42, %v11859_v33  ;;  %v11887_v39 = vrot.slane %v11880_v51, %v11859_v33 }
 0x6fe   : > { %v11898_v34 = vcombine.low %v11878_v11, %v11887_v39  ;;  %v12490_v12 = vcombine.high %v11878_v11, %v11887_v39 }
 0x700   : > { %v11912_v18 = vrot.slane %v11898_v34, %v13613_v59  ;;  %v11929_v45 = vrot.slane %v12490_v12, %v13613_v59 }
 0x702   : > { %v11913_v30 = vcombine.low %v11905_v28, %v11912_v18  ;;  %v11930_v3 = vcombine.low %v11922_v38, %v11929_v45 }
 0x704   : > { %11933 = vst [vmem:[#allocation6] sm:$0xff] %v11913_v30  ;;  %11934 = vst [vmem:[#allocation6 + $0x8] sm:$0xff] %v11930_v3 }
 0x705 PF: > { %s17104_s26 = sld [smem:[#allocation10_spill]]  ;;  %s13462_s29 = smov [#allocation6]  }
 0x706   : > { %s11944_s14 = sshll.u32 %s13462_s29, 4  ;;  %s11945_s14 = int_to_ptr.vmem [resolvable:$true] %s11944_s14 }
 0x707   : > { %s13366_s15 = scalar_lea.vmem %s11945_s14, 256  ;;  %p13373_p11 = scmp.lt.s32.totalorder %s11945_s14, %s11945_s14 }
 0x708   : > { %p13367_p8 = scmp.ne.s32.totalorder %s11945_s14, %s13366_s15  ;;  %p13374_p12 = scmp.lt.s32.totalorder %s13366_s15, %s13366_s15 }
 0x70a   : > { %p13375_p13 = por %p13374_p12, %p13373_p11 }
 0x70b   : > { %s17105_s28 = sadd.s32 4294967295, %s17104_s26  }
 0x70c   : > { %p16623_p7 = scmp.eq.s32.totalorder %s17105_s28, 1 }
 0x70e   : > { %p13368_p9 = pnand %p13367_p8, %p16623_p7 }
 0x710   : > { %p13369_p10 = pneg %p13368_p9 }
 0x712   : > { %p13376_p0 = pnand %p13375_p13, %p13369_p10 }
 0x714   : > { %13379 = shalt.err (!%p13376_p0)
}
 0x715   : > { %s17107_s13 = sld [smem:[#allocation57_spill]] }
 0x71b   : > { %s13380_s1 = scalar_lea.hbm %s17107_s13, 256 }
 0x71c   : > { %p13381_p1 = scmp.ne.s32.totalorder %s17107_s13, %s13380_s1  ;;  %p13386_p4 = scmp.lt.u32.totalorder %s13380_s1, %s17107_s13 }
 0x71e   : > { %p13382_p2 = pnand %p13381_p1, %p16623_p7 }
 0x720   : > { %p13383_p3 = pneg %p13382_p2 }
 0x722   : > { %p13388_p5 = pnand %p13386_p4, %p13383_p3 }
 0x724   : > { %13391 = shalt.err (!%p13388_p5)
}
 0x725   : > { %s13463_s22 = smov 128   ;;  %s13464_s27 = smov 8  }
 0x726   : > { %12545 = dma.vmem_to_hbm [thread:$0]  (%p16623_p7), %s11945_s14, 256, %s17107_s13, [#allocation7], %s13463_s22, %s13463_s22, %s13464_s27  }
 0x727   : > { %13405 = dma.done.wait (%p16623_p7), [#allocation7], 256  }
 0x728   : > { %13407 = vsyncadd (%p16623_p7), [#allocation7], 4294967040 }
 0x729 PF: > { %s17108_s17 = sld [smem:[#allocation10_spill]]  ;;  %s17110_s18 = sld [smem:[#allocation11_spill]] }
 0x72f   : > { %s22_s19 = sadd.s32 1, %s17108_s17   ;;  %s17109_s17 = sld [smem:[#allocation9_spill]] }
 0x730   : > { %p19_p6 = scmp.ge.s32.totalorder %s22_s19, 4  }
 0x732   :  { %21 = sbr.rel (!%p19_p6) target bundleno = 6 (0x6), region = 141 }
 0x739   :  { %11960 = vsyncpa [#allocation7], 1 }
 0x73a   :  { %11962 = vsyncpa [#allocation7 + $0x1], 1 }

</bundles_post_ra>
